<compile_context>
chip_gen: v7x
topology: tpu7x:2x2x1
jax: 0.10.0
libtpu: 0.0.40
codegen_flags: <defaults>
</compile_context>

<pallas_src>
import functools

import jax
import jax.numpy as jnp
from jax.experimental import pallas as pl
from jax.experimental.pallas import tpu as pltpu

EMB = 64
HID = 128


# ------------------------------------------------------------------ kernel

def _gru_gates(gi, gh, h, bhn):
    # gi: (B,3H) input-path preactivation; r/z biases (b_ih+b_hh) already folded
    #     in, n-gate carries only b_ih.
    # gh: (B,3H) = h @ W_hh.T (no bias).  bhn: (1,H) = b_hh n-gate.
    r = jax.nn.sigmoid(gi[:, :HID] + gh[:, :HID])
    z = jax.nn.sigmoid(gi[:, HID:2 * HID] + gh[:, HID:2 * HID])
    n = jnp.tanh(gi[:, 2 * HID:] + r * (gh[:, 2 * HID:] + bhn))
    return (1.0 - z) * n + z * h


def seq2seq_kernel(src_ref, tgt_ref,                      # (S*B,64), (T*B,64)
                   enc_wih_ref, enc_b_ref,                # (64,768), (1,768)
                   enc_whf_ref, enc_whb_ref,              # (128,384) each
                   enc_bhnf_ref, enc_bhnb_ref,            # (1,128) each
                   attn_wh_ref, attn_we_ref, attn_b_ref,  # (1,128),(1,256),(1,1)
                   dec_wx_ref, dec_wc_ref,                # (64,384), (256,384)
                   dec_whh_ref, dec_b_ref, dec_bhn_ref,   # (128,384),(1,384),(1,128)
                   fcw_ref, fcb_ref,                      # (128,Vp), (1,Vp)
                   out_ref,                               # (T*B, Vp)
                   gi_enc_scr, encf_scr, encb_scr, gi_dec_scr, hdec_scr,
                   *, S, T, B):
    G = 3 * HID

    # ---- hoisted input-side matmuls (off the recurrent critical path) ----
    gi_enc_scr[...] = (jnp.dot(src_ref[...], enc_wih_ref[...],
                               preferred_element_type=jnp.float32)
                       + enc_b_ref[...])
    gi_dec_scr[...] = (jnp.dot(tgt_ref[...], dec_wx_ref[...],
                               preferred_element_type=jnp.float32)
                       + dec_b_ref[...])

    # ---- hoisted weight / bias loads (reused every step) ----
    whf = enc_whf_ref[...]
    whb = enc_whb_ref[...]
    bhnf = enc_bhnf_ref[...]
    bhnb = enc_bhnb_ref[...]

    # ---- bidirectional encoder GRU, fully unrolled (S static & small) ----
    hf = jnp.zeros((B, HID), jnp.float32)
    hb = jnp.zeros((B, HID), jnp.float32)
    for t in range(S):
        # forward direction
        ghf = jnp.dot(hf, whf, preferred_element_type=jnp.float32)
        hf = _gru_gates(gi_enc_scr[t * B:(t + 1) * B, :G], ghf, hf, bhnf)
        encf_scr[t] = hf
        # backward direction (reversed time index)
        s = S - 1 - t
        ghb = jnp.dot(hb, whb, preferred_element_type=jnp.float32)
        hb = _gru_gates(gi_enc_scr[s * B:(s + 1) * B, G:], ghb, hb, bhnb)
        encb_scr[s] = hb

    # ---- attention precompute (encoder part of score is step-invariant) ----
    enc = jnp.concatenate([encf_scr[...], encb_scr[...]], axis=2)   # (S,B,256)
    we = attn_we_ref[...]
    score_e = jnp.sum(enc * we[None, :, :], axis=2, keepdims=True)  # (S,B,1)
    wh = attn_wh_ref[...]
    ab = attn_b_ref[...]
    wc = dec_wc_ref[...]
    whh = dec_whh_ref[...]
    bhn = dec_bhn_ref[...]

    # ---- decoder GRU + attention, fully unrolled ----
    h = jnp.zeros((B, HID), jnp.float32)
    for t in range(T):
        h_score = jnp.sum(h * wh, axis=1, keepdims=True)            # (B,1)
        scores = score_e + h_score[None, :, :] + ab                  # (S,B,1)
        w = jax.nn.softmax(scores, axis=0)                           # over src pos
        context = jnp.sum(w * enc, axis=0)                           # (B,256)

        gi = (gi_dec_scr[t * B:(t + 1) * B, :]
              + jnp.dot(context, wc, preferred_element_type=jnp.float32))
        gh = jnp.dot(h, whh, preferred_element_type=jnp.float32)
        h = _gru_gates(gi, gh, h, bhn)
        hdec_scr[t * B:(t + 1) * B, :] = h

    # ---- final FC: one (T*B,128)@(128,Vp) matmul, lane-dense output ----
    out_ref[...] = (jnp.dot(hdec_scr[...], fcw_ref[...],
                            preferred_element_type=jnp.float32)
                    + fcb_ref[...])


# ------------------------------------------------------------------ wrapper

def attention_seq2seq_forward(params, src_ids, tgt_ids):
    emb = params['embed']
    # TODO(synk): embedding gather kept in plain JAX (table lookup is glue here).
    src_emb = emb[src_ids].astype(jnp.float32)          # (Br, S, 64)
    tgt_emb = emb[tgt_ids[:, :-1]].astype(jnp.float32)  # (Br, T, 64)
    Br, S, _ = src_emb.shape
    T = tgt_emb.shape[1]
    V = params['fc_w'].shape[0]

    # pad batch to the f32 sublane count and vocab to a lane-dense 128 multiple
    B = max(8, ((Br + 7) // 8) * 8)
    Vp = ((V + 127) // 128) * 128
    G = 3 * HID

    src_p = jnp.pad(src_emb, ((0, B - Br), (0, 0), (0, 0)))
    tgt_p = jnp.pad(tgt_emb, ((0, B - Br), (0, 0), (0, 0)))
    src_flat = jnp.swapaxes(src_p, 0, 1).reshape(S * B, EMB)   # time-major, flat
    tgt_flat = jnp.swapaxes(tgt_p, 0, 1).reshape(T * B, EMB)

    def fold(wih, whh, bih, bhh):
        # transpose for (In,3H)/(H,3H) matmuls; fold b_ih+b_hh for r/z gates.
        bias = jnp.concatenate([bih[:2 * HID] + bhh[:2 * HID], bih[2 * HID:]])
        return wih.T, whh.T, bias[None, :], bhh[2 * HID:][None, :]

    wif_t, whf_t, bf, bhnf = fold(params['enc_wih_f'], params['enc_whh_f'],
                                  params['enc_bih_f'], params['enc_bhh_f'])
    wib_t, whb_t, bb, bhnb = fold(params['enc_wih_b'], params['enc_whh_b'],
                                  params['enc_bih_b'], params['enc_bhh_b'])
    enc_wih = jnp.concatenate([wif_t, wib_t], axis=1)          # (64, 768)
    enc_b = jnp.concatenate([bf, bb], axis=1)                  # (1, 768)

    dwih_t, dwhh_t, db, dbhn = fold(params['dec_wih'], params['dec_whh'],
                                    params['dec_bih'], params['dec_bhh'])
    dec_wx = dwih_t[:EMB, :]                                   # (64, 384)
    dec_wc = dwih_t[EMB:, :]                                   # (256, 384)

    attn_w = params['attn_w']
    attn_wh = attn_w[:, :HID]                                  # (1, 128)
    attn_we = attn_w[:, HID:]                                  # (1, 256)
    attn_b = params['attn_b'].reshape(1, 1)

    # pad FC to a 128-lane-dense output slab; slice back after the kernel
    fcw = jnp.zeros((HID, Vp), jnp.float32).at[:, :V].set(params['fc_w'].T)
    fcb = jnp.zeros((1, Vp), jnp.float32).at[:, :V].set(params['fc_b'][None, :])

    vmem = pl.BlockSpec(memory_space=pltpu.MemorySpace.VMEM)

    out_flat = pl.pallas_call(
        functools.partial(seq2seq_kernel, S=S, T=T, B=B),
        out_shape=jax.ShapeDtypeStruct((T * B, Vp), jnp.float32),
        in_specs=[vmem] * 18,
        out_specs=vmem,
        scratch_shapes=[
            pltpu.VMEM((S * B, 2 * G), jnp.float32),   # gi_enc (fwd|bwd)
            pltpu.VMEM((S, B, HID), jnp.float32),      # encoder fwd outputs
            pltpu.VMEM((S, B, HID), jnp.float32),      # encoder bwd outputs
            pltpu.VMEM((T * B, G), jnp.float32),       # gi_dec (tgt part)
            pltpu.VMEM((T * B, HID), jnp.float32),     # decoder hidden states
        ],
    )(src_flat, tgt_flat,
      enc_wih, enc_b, whf_t, whb_t, bhnf, bhnb,
      attn_wh, attn_we, attn_b,
      dec_wx, dec_wc, dwhh_t, db, dbhn,
      fcw, fcb)

    out = out_flat.reshape(T, B, Vp).transpose(1, 0, 2)        # (B, T, Vp)
    return out[:Br, :, :V]                                     # (Br, T, V)


# ------------------------------------------------------------------ reference

def _gru_cell_ref(x, h, wih, whh, bih, bhh):
    gi = x @ wih.T + bih
    gh = h @ whh.T + bhh
    r = jax.nn.sigmoid(gi[:, :HID] + gh[:, :HID])
    z = jax.nn.sigmoid(gi[:, HID:2 * HID] + gh[:, HID:2 * HID])
    n = jnp.tanh(gi[:, 2 * HID:] + r * gh[:, 2 * HID:])
    return (1.0 - z) * n + z * h


def reference_forward(params, src_ids, tgt_ids):
    emb = params['embed']
    src_emb = emb[src_ids].astype(jnp.float32)
    tgt_emb = emb[tgt_ids[:, :-1]].astype(jnp.float32)
    B, S, _ = src_emb.shape
    T = tgt_emb.shape[1]

    def gru_seq(x_seq, wih, whh, bih, bhh):
        h = jnp.zeros((B, HID), jnp.float32)
        outs = []
        for t in range(x_seq.shape[1]):
            h = _gru_cell_ref(x_seq[:, t], h, wih, whh, bih, bhh)
            outs.append(h)
        return jnp.stack(outs, axis=1)

    enc_f = gru_seq(src_emb, params['enc_wih_f'], params['enc_whh_f'],
                    params['enc_bih_f'], params['enc_bhh_f'])
    enc_b = gru_seq(src_emb[:, ::-1], params['enc_wih_b'], params['enc_whh_b'],
                    params['enc_bih_b'], params['enc_bhh_b'])[:, ::-1]
    enc_out = jnp.concatenate([enc_f, enc_b], axis=-1)        # (B, S, 256)

    h = jnp.zeros((B, HID), jnp.float32)
    outs = []
    for t in range(T):
        rep_h = jnp.broadcast_to(h[:, None, :], (B, S, HID))
        cat = jnp.concatenate([rep_h, enc_out], axis=2)       # (B, S, 384)
        scores = (cat @ params['attn_w'].T)[:, :, 0] + params['attn_b'][0]
        w = jax.nn.softmax(scores, axis=1)
        context = jnp.einsum('bs,bsk->bk', w, enc_out)
        x = jnp.concatenate([tgt_emb[:, t], context], axis=1)
        h = _gru_cell_ref(x, h, params['dec_wih'], params['dec_whh'],
                          params['dec_bih'], params['dec_bhh'])
        outs.append(h @ params['fc_w'].T + params['fc_b'])
    return jnp.stack(outs, axis=1)


# ------------------------------------------------------------------ params

def init_params(key, vocab_size):
    ks = jax.random.split(key, 17)

    def rnd(k, shape, scale=0.1):
        return scale * jax.random.normal(k, shape, dtype=jnp.float32)

    return dict(
        embed=rnd(ks[0], (vocab_size, EMB), 0.5),
        enc_wih_f=rnd(ks[1], (3 * HID, EMB)),
        enc_whh_f=rnd(ks[2], (3 * HID, HID)),
        enc_bih_f=rnd(ks[3], (3 * HID,)),
        enc_bhh_f=rnd(ks[4], (3 * HID,)),
        enc_wih_b=rnd(ks[5], (3 * HID, EMB)),
        enc_whh_b=rnd(ks[6], (3 * HID, HID)),
        enc_bih_b=rnd(ks[7], (3 * HID,)),
        enc_bhh_b=rnd(ks[8], (3 * HID,)),
        dec_wih=rnd(ks[9], (3 * HID, EMB + 2 * HID)),
        dec_whh=rnd(ks[10], (3 * HID, HID)),
        dec_bih=rnd(ks[11], (3 * HID,)),
        dec_bhh=rnd(ks[12], (3 * HID,)),
        attn_w=rnd(ks[13], (1, HID + 2 * HID)),
        attn_b=rnd(ks[14], (1,)),
        fc_w=rnd(ks[15], (vocab_size, HID)),
        fc_b=rnd(ks[16], (vocab_size,)),
    )


# ------------------------------------------------------------------ main

if __name__ == "__main__":
    key = jax.random.PRNGKey(0)
    pkey, skey, tkey = jax.random.split(key, 3)

    VOCAB = 70        # synthetic char vocab (dataset vocab is ~same scale)
    B_REAL = 2        # batch
    S_SRC = 8         # source sequence length (incl. <sos>/<eos>)
    T_TGT = 9         # target sequence length; decoder runs T_TGT-1 = 8 steps

    params = init_params(pkey, VOCAB)
    src_ids = jax.random.randint(skey, (B_REAL, S_SRC), 0, VOCAB)
    tgt_ids = jax.random.randint(tkey, (B_REAL, T_TGT), 0, VOCAB)

    out = attention_seq2seq_forward(params, src_ids, tgt_ids)
    out = jax.block_until_ready(out)

    assert out.shape == (B_REAL, T_TGT - 1, VOCAB), out.shape

    ref = reference_forward(params, src_ids, tgt_ids)
    max_err = float(jnp.max(jnp.abs(out - ref)))
    assert max_err < 2e-3, f"max abs error {max_err}"

    print("KERNEL_OK")
</pallas_src>

<mosaic_0001>
module attributes {stable_mosaic.version = 11 : i64} {
  func.func @seq2seq_kernel(%arg0: memref<64x64xf32, #tpu.memory_space<vmem>>, %arg1: memref<64x64xf32, #tpu.memory_space<vmem>>, %arg2: memref<64x768xf32, #tpu.memory_space<vmem>>, %arg3: memref<1x768xf32, #tpu.memory_space<vmem>>, %arg4: memref<128x384xf32, #tpu.memory_space<vmem>>, %arg5: memref<128x384xf32, #tpu.memory_space<vmem>>, %arg6: memref<1x128xf32, #tpu.memory_space<vmem>>, %arg7: memref<1x128xf32, #tpu.memory_space<vmem>>, %arg8: memref<1x128xf32, #tpu.memory_space<vmem>>, %arg9: memref<1x256xf32, #tpu.memory_space<vmem>>, %arg10: memref<1x1xf32, #tpu.memory_space<vmem>>, %arg11: memref<64x384xf32, #tpu.memory_space<vmem>>, %arg12: memref<256x384xf32, #tpu.memory_space<vmem>>, %arg13: memref<128x384xf32, #tpu.memory_space<vmem>>, %arg14: memref<1x384xf32, #tpu.memory_space<vmem>>, %arg15: memref<1x128xf32, #tpu.memory_space<vmem>>, %arg16: memref<128x128xf32, #tpu.memory_space<vmem>>, %arg17: memref<1x128xf32, #tpu.memory_space<vmem>>, %arg18: memref<64x128xf32, #tpu.memory_space<vmem>>, %arg19: memref<64x768xf32, #tpu.memory_space<vmem>>, %arg20: memref<8x8x128xf32, #tpu.memory_space<vmem>>, %arg21: memref<8x8x128xf32, #tpu.memory_space<vmem>>, %arg22: memref<64x384xf32, #tpu.memory_space<vmem>>, %arg23: memref<64x128xf32, #tpu.memory_space<vmem>>) attributes {dimension_semantics = [], scalar_prefetch = 0 : i64, scratch_operands = 5 : i64, tpu.core_type = #tpu.core_type<tc>} {
    %c0 = arith.constant 0 : index
    %c0_0 = arith.constant 0 : index
    %0 = vector.load %arg0[%c0, %c0_0] : memref<64x64xf32, #tpu.memory_space<vmem>>, vector<64x64xf32>
    %c0_1 = arith.constant 0 : index
    %c0_2 = arith.constant 0 : index
    %1 = vector.load %arg2[%c0_1, %c0_2] : memref<64x768xf32, #tpu.memory_space<vmem>>, vector<64x768xf32>
    %cst = arith.constant dense<0.000000e+00> : vector<64x768xf32>
    %2 = tpu.matmul %0, %1, %cst {dimension_numbers = #tpu.dot_dimension_numbers<[1], [0], [0], [1], [0, 0, 1, 1], [], []>} : vector<64x64xf32>, vector<64x768xf32>, vector<64x768xf32> -> vector<64x768xf32>
    %c0_3 = arith.constant 0 : index
    %c0_4 = arith.constant 0 : index
    %3 = vector.load %arg3[%c0_3, %c0_4] : memref<1x768xf32, #tpu.memory_space<vmem>>, vector<1x768xf32>
    %4 = vector.broadcast %3 : vector<1x768xf32> to vector<64x768xf32>
    %5 = arith.addf %2, %4 : vector<64x768xf32>
    %c0_5 = arith.constant 0 : index
    %c0_6 = arith.constant 0 : index
    %6 = vector.load %arg19[%c0_5, %c0_6] : memref<64x768xf32, #tpu.memory_space<vmem>>, vector<64x768xf32>
    tpu.vector_store %arg19[%c0_5, %c0_6], %5 {strides = array<i32>} : memref<64x768xf32, #tpu.memory_space<vmem>>, vector<64x768xf32>,
    %c0_7 = arith.constant 0 : index
    %c0_8 = arith.constant 0 : index
    %7 = vector.load %arg1[%c0_7, %c0_8] : memref<64x64xf32, #tpu.memory_space<vmem>>, vector<64x64xf32>
    %c0_9 = arith.constant 0 : index
    %c0_10 = arith.constant 0 : index
    %8 = vector.load %arg11[%c0_9, %c0_10] : memref<64x384xf32, #tpu.memory_space<vmem>>, vector<64x384xf32>
    %cst_11 = arith.constant dense<0.000000e+00> : vector<64x384xf32>
    %9 = tpu.matmul %7, %8, %cst_11 {dimension_numbers = #tpu.dot_dimension_numbers<[1], [0], [0], [1], [0, 0, 1, 1], [], []>} : vector<64x64xf32>, vector<64x384xf32>, vector<64x384xf32> -> vector<64x384xf32>
    %c0_12 = arith.constant 0 : index
    %c0_13 = arith.constant 0 : index
    %10 = vector.load %arg14[%c0_12, %c0_13] : memref<1x384xf32, #tpu.memory_space<vmem>>, vector<1x384xf32>
    %11 = vector.broadcast %10 : vector<1x384xf32> to vector<64x384xf32>
    %12 = arith.addf %9, %11 : vector<64x384xf32>
    %c0_14 = arith.constant 0 : index
    %c0_15 = arith.constant 0 : index
    %13 = vector.load %arg22[%c0_14, %c0_15] : memref<64x384xf32, #tpu.memory_space<vmem>>, vector<64x384xf32>
    tpu.vector_store %arg22[%c0_14, %c0_15], %12 {strides = array<i32>} : memref<64x384xf32, #tpu.memory_space<vmem>>, vector<64x384xf32>,
    %c0_16 = arith.constant 0 : index
    %c0_17 = arith.constant 0 : index
    %14 = vector.load %arg4[%c0_16, %c0_17] : memref<128x384xf32, #tpu.memory_space<vmem>>, vector<128x384xf32>
    %c0_18 = arith.constant 0 : index
    %c0_19 = arith.constant 0 : index
    %15 = vector.load %arg5[%c0_18, %c0_19] : memref<128x384xf32, #tpu.memory_space<vmem>>, vector<128x384xf32>
    %c0_20 = arith.constant 0 : index
    %c0_21 = arith.constant 0 : index
    %16 = vector.load %arg6[%c0_20, %c0_21] : memref<1x128xf32, #tpu.memory_space<vmem>>, vector<1x128xf32>
    %c0_22 = arith.constant 0 : index
    %c0_23 = arith.constant 0 : index
    %17 = vector.load %arg7[%c0_22, %c0_23] : memref<1x128xf32, #tpu.memory_space<vmem>>, vector<1x128xf32>
    %cst_24 = arith.constant 0.000000e+00 : f32
    %18 = vector.broadcast %cst_24 : f32 to vector<8x128xf32>
    %cst_25 = arith.constant 0.000000e+00 : f32
    %19 = vector.broadcast %cst_25 : f32 to vector<8x128xf32>
    %cst_26 = arith.constant dense<0.000000e+00> : vector<8x384xf32>
    %20 = tpu.matmul %18, %14, %cst_26 {dimension_numbers = #tpu.dot_dimension_numbers<[1], [0], [0], [1], [0, 0, 1, 1], [], []>} : vector<8x128xf32>, vector<128x384xf32>, vector<8x384xf32> -> vector<8x384xf32>
    %c0_27 = arith.constant 0 : index
    %c0_28 = arith.constant 0 : index
    %21 = vector.load %arg19[%c0_27, %c0_28] : memref<64x768xf32, #tpu.memory_space<vmem>>, vector<8x384xf32>
    %22 = vector.extract_strided_slice %21 {offsets = [0, 0], sizes = [8, 128], strides = [1, 1]} : vector<8x384xf32> to vector<8x128xf32>
    %23 = vector.extract_strided_slice %20 {offsets = [0, 0], sizes = [8, 128], strides = [1, 1]} : vector<8x384xf32> to vector<8x128xf32>
    %24 = arith.addf %22, %23 : vector<8x128xf32>
    %25 = arith.negf %24 : vector<8x128xf32>
    %26 = math.exp %25 : vector<8x128xf32>
    %cst_29 = arith.constant 1.000000e+00 : f32
    %27 = vector.broadcast %cst_29 : f32 to vector<8x128xf32>
    %28 = arith.addf %27, %26 : vector<8x128xf32>
    %29 = arith.divf %27, %28 : vector<8x128xf32>
    %30 = vector.extract_strided_slice %21 {offsets = [0, 128], sizes = [8, 128], strides = [1, 1]} : vector<8x384xf32> to vector<8x128xf32>
    %31 = vector.extract_strided_slice %20 {offsets = [0, 128], sizes = [8, 128], strides = [1, 1]} : vector<8x384xf32> to vector<8x128xf32>
    %32 = arith.addf %30, %31 : vector<8x128xf32>
    %33 = arith.negf %32 : vector<8x128xf32>
    %34 = math.exp %33 : vector<8x128xf32>
    %cst_30 = arith.constant 1.000000e+00 : f32
    %35 = vector.broadcast %cst_30 : f32 to vector<8x128xf32>
    %36 = arith.addf %35, %34 : vector<8x128xf32>
    %37 = arith.divf %35, %36 : vector<8x128xf32>
    %38 = vector.extract_strided_slice %21 {offsets = [0, 256], sizes = [8, 128], strides = [1, 1]} : vector<8x384xf32> to vector<8x128xf32>
    %39 = vector.extract_strided_slice %20 {offsets = [0, 256], sizes = [8, 128], strides = [1, 1]} : vector<8x384xf32> to vector<8x128xf32>
    %40 = vector.broadcast %16 : vector<1x128xf32> to vector<8x128xf32>
    %41 = arith.addf %39, %40 : vector<8x128xf32>
    %42 = arith.mulf %29, %41 : vector<8x128xf32>
    %43 = arith.addf %38, %42 : vector<8x128xf32>
    %44 = math.tanh %43 : vector<8x128xf32>
    %cst_31 = arith.constant 1.000000e+00 : f32
    %45 = vector.broadcast %cst_31 : f32 to vector<8x128xf32>
    %46 = arith.subf %45, %37 : vector<8x128xf32>
    %47 = arith.mulf %46, %44 : vector<8x128xf32>
    %48 = arith.mulf %37, %18 : vector<8x128xf32>
    %49 = arith.addf %47, %48 : vector<8x128xf32>
    %c0_32 = arith.constant 0 : index
    %c0_33 = arith.constant 0 : index
    %c0_34 = arith.constant 0 : index
    %50 = vector.load %arg20[%c0_32, %c0_33, %c0_34] : memref<8x8x128xf32, #tpu.memory_space<vmem>>, vector<1x8x128xf32>
    %51 = vector.shape_cast %50 : vector<1x8x128xf32> to vector<8x128xf32>
    %52 = vector.shape_cast %49 : vector<8x128xf32> to vector<1x8x128xf32>
    tpu.vector_store %arg20[%c0_32, %c0_33, %c0_34], %52 {strides = array<i32>} : memref<8x8x128xf32, #tpu.memory_space<vmem>>, vector<1x8x128xf32>,
    %cst_35 = arith.constant dense<0.000000e+00> : vector<8x384xf32>
    %53 = tpu.matmul %19, %15, %cst_35 {dimension_numbers = #tpu.dot_dimension_numbers<[1], [0], [0], [1], [0, 0, 1, 1], [], []>} : vector<8x128xf32>, vector<128x384xf32>, vector<8x384xf32> -> vector<8x384xf32>
    %c56 = arith.constant 56 : index
    %c384 = arith.constant 384 : index
    %54 = vector.load %arg19[%c56, %c384] : memref<64x768xf32, #tpu.memory_space<vmem>>, vector<8x384xf32>
    %55 = vector.extract_strided_slice %54 {offsets = [0, 0], sizes = [8, 128], strides = [1, 1]} : vector<8x384xf32> to vector<8x128xf32>
    %56 = vector.extract_strided_slice %53 {offsets = [0, 0], sizes = [8, 128], strides = [1, 1]} : vector<8x384xf32> to vector<8x128xf32>
    %57 = arith.addf %55, %56 : vector<8x128xf32>
    %58 = arith.negf %57 : vector<8x128xf32>
    %59 = math.exp %58 : vector<8x128xf32>
    %cst_36 = arith.constant 1.000000e+00 : f32
    %60 = vector.broadcast %cst_36 : f32 to vector<8x128xf32>
    %61 = arith.addf %60, %59 : vector<8x128xf32>
    %62 = arith.divf %60, %61 : vector<8x128xf32>
    %63 = vector.extract_strided_slice %54 {offsets = [0, 128], sizes = [8, 128], strides = [1, 1]} : vector<8x384xf32> to vector<8x128xf32>
    %64 = vector.extract_strided_slice %53 {offsets = [0, 128], sizes = [8, 128], strides = [1, 1]} : vector<8x384xf32> to vector<8x128xf32>
    %65 = arith.addf %63, %64 : vector<8x128xf32>
    %66 = arith.negf %65 : vector<8x128xf32>
    %67 = math.exp %66 : vector<8x128xf32>
    %cst_37 = arith.constant 1.000000e+00 : f32
    %68 = vector.broadcast %cst_37 : f32 to vector<8x128xf32>
    %69 = arith.addf %68, %67 : vector<8x128xf32>
    %70 = arith.divf %68, %69 : vector<8x128xf32>
    %71 = vector.extract_strided_slice %54 {offsets = [0, 256], sizes = [8, 128], strides = [1, 1]} : vector<8x384xf32> to vector<8x128xf32>
    %72 = vector.extract_strided_slice %53 {offsets = [0, 256], sizes = [8, 128], strides = [1, 1]} : vector<8x384xf32> to vector<8x128xf32>
    %73 = vector.broadcast %17 : vector<1x128xf32> to vector<8x128xf32>
    %74 = arith.addf %72, %73 : vector<8x128xf32>
    %75 = arith.mulf %62, %74 : vector<8x128xf32>
    %76 = arith.addf %71, %75 : vector<8x128xf32>
    %77 = math.tanh %76 : vector<8x128xf32>
    %cst_38 = arith.constant 1.000000e+00 : f32
    %78 = vector.broadcast %cst_38 : f32 to vector<8x128xf32>
    %79 = arith.subf %78, %70 : vector<8x128xf32>
    %80 = arith.mulf %79, %77 : vector<8x128xf32>
    %81 = arith.mulf %70, %19 : vector<8x128xf32>
    %82 = arith.addf %80, %81 : vector<8x128xf32>
    %c7 = arith.constant 7 : index
    %c0_39 = arith.constant 0 : index
    %c0_40 = arith.constant 0 : index
    %83 = vector.load %arg21[%c7, %c0_39, %c0_40] : memref<8x8x128xf32, #tpu.memory_space<vmem>>, vector<1x8x128xf32>
    %84 = vector.shape_cast %83 : vector<1x8x128xf32> to vector<8x128xf32>
    %85 = vector.shape_cast %82 : vector<8x128xf32> to vector<1x8x128xf32>
    tpu.vector_store %arg21[%c7, %c0_39, %c0_40], %85 {strides = array<i32>} : memref<8x8x128xf32, #tpu.memory_space<vmem>>, vector<1x8x128xf32>,
    %cst_41 = arith.constant dense<0.000000e+00> : vector<8x384xf32>
    %86 = tpu.matmul %49, %14, %cst_41 {dimension_numbers = #tpu.dot_dimension_numbers<[1], [0], [0], [1], [0, 0, 1, 1], [], []>} : vector<8x128xf32>, vector<128x384xf32>, vector<8x384xf32> -> vector<8x384xf32>
    %c8 = arith.constant 8 : index
    %c0_42 = arith.constant 0 : index
    %87 = vector.load %arg19[%c8, %c0_42] : memref<64x768xf32, #tpu.memory_space<vmem>>, vector<8x384xf32>
    %88 = vector.extract_strided_slice %87 {offsets = [0, 0], sizes = [8, 128], strides = [1, 1]} : vector<8x384xf32> to vector<8x128xf32>
    %89 = vector.extract_strided_slice %86 {offsets = [0, 0], sizes = [8, 128], strides = [1, 1]} : vector<8x384xf32> to vector<8x128xf32>
    %90 = arith.addf %88, %89 : vector<8x128xf32>
    %91 = arith.negf %90 : vector<8x128xf32>
    %92 = math.exp %91 : vector<8x128xf32>
    %cst_43 = arith.constant 1.000000e+00 : f32
    %93 = vector.broadcast %cst_43 : f32 to vector<8x128xf32>
    %94 = arith.addf %93, %92 : vector<8x128xf32>
    %95 = arith.divf %93, %94 : vector<8x128xf32>
    %96 = vector.extract_strided_slice %87 {offsets = [0, 128], sizes = [8, 128], strides = [1, 1]} : vector<8x384xf32> to vector<8x128xf32>
    %97 = vector.extract_strided_slice %86 {offsets = [0, 128], sizes = [8, 128], strides = [1, 1]} : vector<8x384xf32> to vector<8x128xf32>
    %98 = arith.addf %96, %97 : vector<8x128xf32>
    %99 = arith.negf %98 : vector<8x128xf32>
    %100 = math.exp %99 : vector<8x128xf32>
    %cst_44 = arith.constant 1.000000e+00 : f32
    %101 = vector.broadcast %cst_44 : f32 to vector<8x128xf32>
    %102 = arith.addf %101, %100 : vector<8x128xf32>
    %103 = arith.divf %101, %102 : vector<8x128xf32>
    %104 = vector.extract_strided_slice %87 {offsets = [0, 256], sizes = [8, 128], strides = [1, 1]} : vector<8x384xf32> to vector<8x128xf32>
    %105 = vector.extract_strided_slice %86 {offsets = [0, 256], sizes = [8, 128], strides = [1, 1]} : vector<8x384xf32> to vector<8x128xf32>
    %106 = vector.broadcast %16 : vector<1x128xf32> to vector<8x128xf32>
    %107 = arith.addf %105, %106 : vector<8x128xf32>
    %108 = arith.mulf %95, %107 : vector<8x128xf32>
    %109 = arith.addf %104, %108 : vector<8x128xf32>
    %110 = math.tanh %109 : vector<8x128xf32>
    %cst_45 = arith.constant 1.000000e+00 : f32
    %111 = vector.broadcast %cst_45 : f32 to vector<8x128xf32>
    %112 = arith.subf %111, %103 : vector<8x128xf32>
    %113 = arith.mulf %112, %110 : vector<8x128xf32>
    %114 = arith.mulf %103, %49 : vector<8x128xf32>
    %115 = arith.addf %113, %114 : vector<8x128xf32>
    %c1 = arith.constant 1 : index
    %c0_46 = arith.constant 0 : index
    %c0_47 = arith.constant 0 : index
    %116 = vector.load %arg20[%c1, %c0_46, %c0_47] : memref<8x8x128xf32, #tpu.memory_space<vmem>>, vector<1x8x128xf32>
    %117 = vector.shape_cast %116 : vector<1x8x128xf32> to vector<8x128xf32>
    %118 = vector.shape_cast %115 : vector<8x128xf32> to vector<1x8x128xf32>
    tpu.vector_store %arg20[%c1, %c0_46, %c0_47], %118 {strides = array<i32>} : memref<8x8x128xf32, #tpu.memory_space<vmem>>, vector<1x8x128xf32>,
    %cst_48 = arith.constant dense<0.000000e+00> : vector<8x384xf32>
    %119 = tpu.matmul %82, %15, %cst_48 {dimension_numbers = #tpu.dot_dimension_numbers<[1], [0], [0], [1], [0, 0, 1, 1], [], []>} : vector<8x128xf32>, vector<128x384xf32>, vector<8x384xf32> -> vector<8x384xf32>
    %c48 = arith.constant 48 : index
    %c384_49 = arith.constant 384 : index
    %120 = vector.load %arg19[%c48, %c384_49] : memref<64x768xf32, #tpu.memory_space<vmem>>, vector<8x384xf32>
    %121 = vector.extract_strided_slice %120 {offsets = [0, 0], sizes = [8, 128], strides = [1, 1]} : vector<8x384xf32> to vector<8x128xf32>
    %122 = vector.extract_strided_slice %119 {offsets = [0, 0], sizes = [8, 128], strides = [1, 1]} : vector<8x384xf32> to vector<8x128xf32>
    %123 = arith.addf %121, %122 : vector<8x128xf32>
    %124 = arith.negf %123 : vector<8x128xf32>
    %125 = math.exp %124 : vector<8x128xf32>
    %cst_50 = arith.constant 1.000000e+00 : f32
    %126 = vector.broadcast %cst_50 : f32 to vector<8x128xf32>
    %127 = arith.addf %126, %125 : vector<8x128xf32>
    %128 = arith.divf %126, %127 : vector<8x128xf32>
    %129 = vector.extract_strided_slice %120 {offsets = [0, 128], sizes = [8, 128], strides = [1, 1]} : vector<8x384xf32> to vector<8x128xf32>
    %130 = vector.extract_strided_slice %119 {offsets = [0, 128], sizes = [8, 128], strides = [1, 1]} : vector<8x384xf32> to vector<8x128xf32>
    %131 = arith.addf %129, %130 : vector<8x128xf32>
    %132 = arith.negf %131 : vector<8x128xf32>
    %133 = math.exp %132 : vector<8x128xf32>
    %cst_51 = arith.constant 1.000000e+00 : f32
    %134 = vector.broadcast %cst_51 : f32 to vector<8x128xf32>
    %135 = arith.addf %134, %133 : vector<8x128xf32>
    %136 = arith.divf %134, %135 : vector<8x128xf32>
    %137 = vector.extract_strided_slice %120 {offsets = [0, 256], sizes = [8, 128], strides = [1, 1]} : vector<8x384xf32> to vector<8x128xf32>
    %138 = vector.extract_strided_slice %119 {offsets = [0, 256], sizes = [8, 128], strides = [1, 1]} : vector<8x384xf32> to vector<8x128xf32>
    %139 = vector.broadcast %17 : vector<1x128xf32> to vector<8x128xf32>
    %140 = arith.addf %138, %139 : vector<8x128xf32>
    %141 = arith.mulf %128, %140 : vector<8x128xf32>
    %142 = arith.addf %137, %141 : vector<8x128xf32>
    %143 = math.tanh %142 : vector<8x128xf32>
    %cst_52 = arith.constant 1.000000e+00 : f32
    %144 = vector.broadcast %cst_52 : f32 to vector<8x128xf32>
    %145 = arith.subf %144, %136 : vector<8x128xf32>
    %146 = arith.mulf %145, %143 : vector<8x128xf32>
    %147 = arith.mulf %136, %82 : vector<8x128xf32>
    %148 = arith.addf %146, %147 : vector<8x128xf32>
    %c6 = arith.constant 6 : index
    %c0_53 = arith.constant 0 : index
    %c0_54 = arith.constant 0 : index
    %149 = vector.load %arg21[%c6, %c0_53, %c0_54] : memref<8x8x128xf32, #tpu.memory_space<vmem>>, vector<1x8x128xf32>
    %150 = vector.shape_cast %149 : vector<1x8x128xf32> to vector<8x128xf32>
    %151 = vector.shape_cast %148 : vector<8x128xf32> to vector<1x8x128xf32>
    tpu.vector_store %arg21[%c6, %c0_53, %c0_54], %151 {strides = array<i32>} : memref<8x8x128xf32, #tpu.memory_space<vmem>>, vector<1x8x128xf32>,
    %cst_55 = arith.constant dense<0.000000e+00> : vector<8x384xf32>
    %152 = tpu.matmul %115, %14, %cst_55 {dimension_numbers = #tpu.dot_dimension_numbers<[1], [0], [0], [1], [0, 0, 1, 1], [], []>} : vector<8x128xf32>, vector<128x384xf32>, vector<8x384xf32> -> vector<8x384xf32>
    %c16 = arith.constant 16 : index
    %c0_56 = arith.constant 0 : index
    %153 = vector.load %arg19[%c16, %c0_56] : memref<64x768xf32, #tpu.memory_space<vmem>>, vector<8x384xf32>
    %154 = vector.extract_strided_slice %153 {offsets = [0, 0], sizes = [8, 128], strides = [1, 1]} : vector<8x384xf32> to vector<8x128xf32>
    %155 = vector.extract_strided_slice %152 {offsets = [0, 0], sizes = [8, 128], strides = [1, 1]} : vector<8x384xf32> to vector<8x128xf32>
    %156 = arith.addf %154, %155 : vector<8x128xf32>
    %157 = arith.negf %156 : vector<8x128xf32>
    %158 = math.exp %157 : vector<8x128xf32>
    %cst_57 = arith.constant 1.000000e+00 : f32
    %159 = vector.broadcast %cst_57 : f32 to vector<8x128xf32>
    %160 = arith.addf %159, %158 : vector<8x128xf32>
    %161 = arith.divf %159, %160 : vector<8x128xf32>
    %162 = vector.extract_strided_slice %153 {offsets = [0, 128], sizes = [8, 128], strides = [1, 1]} : vector<8x384xf32> to vector<8x128xf32>
    %163 = vector.extract_strided_slice %152 {offsets = [0, 128], sizes = [8, 128], strides = [1, 1]} : vector<8x384xf32> to vector<8x128xf32>
    %164 = arith.addf %162, %163 : vector<8x128xf32>
    %165 = arith.negf %164 : vector<8x128xf32>
    %166 = math.exp %165 : vector<8x128xf32>
    %cst_58 = arith.constant 1.000000e+00 : f32
    %167 = vector.broadcast %cst_58 : f32 to vector<8x128xf32>
    %168 = arith.addf %167, %166 : vector<8x128xf32>
    %169 = arith.divf %167, %168 : vector<8x128xf32>
    %170 = vector.extract_strided_slice %153 {offsets = [0, 256], sizes = [8, 128], strides = [1, 1]} : vector<8x384xf32> to vector<8x128xf32>
    %171 = vector.extract_strided_slice %152 {offsets = [0, 256], sizes = [8, 128], strides = [1, 1]} : vector<8x384xf32> to vector<8x128xf32>
    %172 = vector.broadcast %16 : vector<1x128xf32> to vector<8x128xf32>
    %173 = arith.addf %171, %172 : vector<8x128xf32>
    %174 = arith.mulf %161, %173 : vector<8x128xf32>
    %175 = arith.addf %170, %174 : vector<8x128xf32>
    %176 = math.tanh %175 : vector<8x128xf32>
    %cst_59 = arith.constant 1.000000e+00 : f32
    %177 = vector.broadcast %cst_59 : f32 to vector<8x128xf32>
    %178 = arith.subf %177, %169 : vector<8x128xf32>
    %179 = arith.mulf %178, %176 : vector<8x128xf32>
    %180 = arith.mulf %169, %115 : vector<8x128xf32>
    %181 = arith.addf %179, %180 : vector<8x128xf32>
    %c2 = arith.constant 2 : index
    %c0_60 = arith.constant 0 : index
    %c0_61 = arith.constant 0 : index
    %182 = vector.load %arg20[%c2, %c0_60, %c0_61] : memref<8x8x128xf32, #tpu.memory_space<vmem>>, vector<1x8x128xf32>
    %183 = vector.shape_cast %182 : vector<1x8x128xf32> to vector<8x128xf32>
    %184 = vector.shape_cast %181 : vector<8x128xf32> to vector<1x8x128xf32>
    tpu.vector_store %arg20[%c2, %c0_60, %c0_61], %184 {strides = array<i32>} : memref<8x8x128xf32, #tpu.memory_space<vmem>>, vector<1x8x128xf32>,
    %cst_62 = arith.constant dense<0.000000e+00> : vector<8x384xf32>
    %185 = tpu.matmul %148, %15, %cst_62 {dimension_numbers = #tpu.dot_dimension_numbers<[1], [0], [0], [1], [0, 0, 1, 1], [], []>} : vector<8x128xf32>, vector<128x384xf32>, vector<8x384xf32> -> vector<8x384xf32>
    %c40 = arith.constant 40 : index
    %c384_63 = arith.constant 384 : index
    %186 = vector.load %arg19[%c40, %c384_63] : memref<64x768xf32, #tpu.memory_space<vmem>>, vector<8x384xf32>
    %187 = vector.extract_strided_slice %186 {offsets = [0, 0], sizes = [8, 128], strides = [1, 1]} : vector<8x384xf32> to vector<8x128xf32>
    %188 = vector.extract_strided_slice %185 {offsets = [0, 0], sizes = [8, 128], strides = [1, 1]} : vector<8x384xf32> to vector<8x128xf32>
    %189 = arith.addf %187, %188 : vector<8x128xf32>
    %190 = arith.negf %189 : vector<8x128xf32>
    %191 = math.exp %190 : vector<8x128xf32>
    %cst_64 = arith.constant 1.000000e+00 : f32
    %192 = vector.broadcast %cst_64 : f32 to vector<8x128xf32>
    %193 = arith.addf %192, %191 : vector<8x128xf32>
    %194 = arith.divf %192, %193 : vector<8x128xf32>
    %195 = vector.extract_strided_slice %186 {offsets = [0, 128], sizes = [8, 128], strides = [1, 1]} : vector<8x384xf32> to vector<8x128xf32>
    %196 = vector.extract_strided_slice %185 {offsets = [0, 128], sizes = [8, 128], strides = [1, 1]} : vector<8x384xf32> to vector<8x128xf32>
    %197 = arith.addf %195, %196 : vector<8x128xf32>
    %198 = arith.negf %197 : vector<8x128xf32>
    %199 = math.exp %198 : vector<8x128xf32>
    %cst_65 = arith.constant 1.000000e+00 : f32
    %200 = vector.broadcast %cst_65 : f32 to vector<8x128xf32>
    %201 = arith.addf %200, %199 : vector<8x128xf32>
    %202 = arith.divf %200, %201 : vector<8x128xf32>
    %203 = vector.extract_strided_slice %186 {offsets = [0, 256], sizes = [8, 128], strides = [1, 1]} : vector<8x384xf32> to vector<8x128xf32>
    %204 = vector.extract_strided_slice %185 {offsets = [0, 256], sizes = [8, 128], strides = [1, 1]} : vector<8x384xf32> to vector<8x128xf32>
    %205 = vector.broadcast %17 : vector<1x128xf32> to vector<8x128xf32>
    %206 = arith.addf %204, %205 : vector<8x128xf32>
    %207 = arith.mulf %194, %206 : vector<8x128xf32>
    %208 = arith.addf %203, %207 : vector<8x128xf32>
    %209 = math.tanh %208 : vector<8x128xf32>
    %cst_66 = arith.constant 1.000000e+00 : f32
    %210 = vector.broadcast %cst_66 : f32 to vector<8x128xf32>
    %211 = arith.subf %210, %202 : vector<8x128xf32>
    %212 = arith.mulf %211, %209 : vector<8x128xf32>
    %213 = arith.mulf %202, %148 : vector<8x128xf32>
    %214 = arith.addf %212, %213 : vector<8x128xf32>
    %c5 = arith.constant 5 : index
    %c0_67 = arith.constant 0 : index
    %c0_68 = arith.constant 0 : index
    %215 = vector.load %arg21[%c5, %c0_67, %c0_68] : memref<8x8x128xf32, #tpu.memory_space<vmem>>, vector<1x8x128xf32>
    %216 = vector.shape_cast %215 : vector<1x8x128xf32> to vector<8x128xf32>
    %217 = vector.shape_cast %214 : vector<8x128xf32> to vector<1x8x128xf32>
    tpu.vector_store %arg21[%c5, %c0_67, %c0_68], %217 {strides = array<i32>} : memref<8x8x128xf32, #tpu.memory_space<vmem>>, vector<1x8x128xf32>,
    %cst_69 = arith.constant dense<0.000000e+00> : vector<8x384xf32>
    %218 = tpu.matmul %181, %14, %cst_69 {dimension_numbers = #tpu.dot_dimension_numbers<[1], [0], [0], [1], [0, 0, 1, 1], [], []>} : vector<8x128xf32>, vector<128x384xf32>, vector<8x384xf32> -> vector<8x384xf32>
    %c24 = arith.constant 24 : index
    %c0_70 = arith.constant 0 : index
    %219 = vector.load %arg19[%c24, %c0_70] : memref<64x768xf32, #tpu.memory_space<vmem>>, vector<8x384xf32>
    %220 = vector.extract_strided_slice %219 {offsets = [0, 0], sizes = [8, 128], strides = [1, 1]} : vector<8x384xf32> to vector<8x128xf32>
    %221 = vector.extract_strided_slice %218 {offsets = [0, 0], sizes = [8, 128], strides = [1, 1]} : vector<8x384xf32> to vector<8x128xf32>
    %222 = arith.addf %220, %221 : vector<8x128xf32>
    %223 = arith.negf %222 : vector<8x128xf32>
    %224 = math.exp %223 : vector<8x128xf32>
    %cst_71 = arith.constant 1.000000e+00 : f32
    %225 = vector.broadcast %cst_71 : f32 to vector<8x128xf32>
    %226 = arith.addf %225, %224 : vector<8x128xf32>
    %227 = arith.divf %225, %226 : vector<8x128xf32>
    %228 = vector.extract_strided_slice %219 {offsets = [0, 128], sizes = [8, 128], strides = [1, 1]} : vector<8x384xf32> to vector<8x128xf32>
    %229 = vector.extract_strided_slice %218 {offsets = [0, 128], sizes = [8, 128], strides = [1, 1]} : vector<8x384xf32> to vector<8x128xf32>
    %230 = arith.addf %228, %229 : vector<8x128xf32>
    %231 = arith.negf %230 : vector<8x128xf32>
    %232 = math.exp %231 : vector<8x128xf32>
    %cst_72 = arith.constant 1.000000e+00 : f32
    %233 = vector.broadcast %cst_72 : f32 to vector<8x128xf32>
    %234 = arith.addf %233, %232 : vector<8x128xf32>
    %235 = arith.divf %233, %234 : vector<8x128xf32>
    %236 = vector.extract_strided_slice %219 {offsets = [0, 256], sizes = [8, 128], strides = [1, 1]} : vector<8x384xf32> to vector<8x128xf32>
    %237 = vector.extract_strided_slice %218 {offsets = [0, 256], sizes = [8, 128], strides = [1, 1]} : vector<8x384xf32> to vector<8x128xf32>
    %238 = vector.broadcast %16 : vector<1x128xf32> to vector<8x128xf32>
    %239 = arith.addf %237, %238 : vector<8x128xf32>
    %240 = arith.mulf %227, %239 : vector<8x128xf32>
    %241 = arith.addf %236, %240 : vector<8x128xf32>
    %242 = math.tanh %241 : vector<8x128xf32>
    %cst_73 = arith.constant 1.000000e+00 : f32
    %243 = vector.broadcast %cst_73 : f32 to vector<8x128xf32>
    %244 = arith.subf %243, %235 : vector<8x128xf32>
    %245 = arith.mulf %244, %242 : vector<8x128xf32>
    %246 = arith.mulf %235, %181 : vector<8x128xf32>
    %247 = arith.addf %245, %246 : vector<8x128xf32>
    %c3 = arith.constant 3 : index
    %c0_74 = arith.constant 0 : index
    %c0_75 = arith.constant 0 : index
    %248 = vector.load %arg20[%c3, %c0_74, %c0_75] : memref<8x8x128xf32, #tpu.memory_space<vmem>>, vector<1x8x128xf32>
    %249 = vector.shape_cast %248 : vector<1x8x128xf32> to vector<8x128xf32>
    %250 = vector.shape_cast %247 : vector<8x128xf32> to vector<1x8x128xf32>
    tpu.vector_store %arg20[%c3, %c0_74, %c0_75], %250 {strides = array<i32>} : memref<8x8x128xf32, #tpu.memory_space<vmem>>, vector<1x8x128xf32>,
    %cst_76 = arith.constant dense<0.000000e+00> : vector<8x384xf32>
    %251 = tpu.matmul %214, %15, %cst_76 {dimension_numbers = #tpu.dot_dimension_numbers<[1], [0], [0], [1], [0, 0, 1, 1], [], []>} : vector<8x128xf32>, vector<128x384xf32>, vector<8x384xf32> -> vector<8x384xf32>
    %c32 = arith.constant 32 : index
    %c384_77 = arith.constant 384 : index
    %252 = vector.load %arg19[%c32, %c384_77] : memref<64x768xf32, #tpu.memory_space<vmem>>, vector<8x384xf32>
    %253 = vector.extract_strided_slice %252 {offsets = [0, 0], sizes = [8, 128], strides = [1, 1]} : vector<8x384xf32> to vector<8x128xf32>
    %254 = vector.extract_strided_slice %251 {offsets = [0, 0], sizes = [8, 128], strides = [1, 1]} : vector<8x384xf32> to vector<8x128xf32>
    %255 = arith.addf %253, %254 : vector<8x128xf32>
    %256 = arith.negf %255 : vector<8x128xf32>
    %257 = math.exp %256 : vector<8x128xf32>
    %cst_78 = arith.constant 1.000000e+00 : f32
    %258 = vector.broadcast %cst_78 : f32 to vector<8x128xf32>
    %259 = arith.addf %258, %257 : vector<8x128xf32>
    %260 = arith.divf %258, %259 : vector<8x128xf32>
    %261 = vector.extract_strided_slice %252 {offsets = [0, 128], sizes = [8, 128], strides = [1, 1]} : vector<8x384xf32> to vector<8x128xf32>
    %262 = vector.extract_strided_slice %251 {offsets = [0, 128], sizes = [8, 128], strides = [1, 1]} : vector<8x384xf32> to vector<8x128xf32>
    %263 = arith.addf %261, %262 : vector<8x128xf32>
    %264 = arith.negf %263 : vector<8x128xf32>
    %265 = math.exp %264 : vector<8x128xf32>
    %cst_79 = arith.constant 1.000000e+00 : f32
    %266 = vector.broadcast %cst_79 : f32 to vector<8x128xf32>
    %267 = arith.addf %266, %265 : vector<8x128xf32>
    %268 = arith.divf %266, %267 : vector<8x128xf32>
    %269 = vector.extract_strided_slice %252 {offsets = [0, 256], sizes = [8, 128], strides = [1, 1]} : vector<8x384xf32> to vector<8x128xf32>
    %270 = vector.extract_strided_slice %251 {offsets = [0, 256], sizes = [8, 128], strides = [1, 1]} : vector<8x384xf32> to vector<8x128xf32>
    %271 = vector.broadcast %17 : vector<1x128xf32> to vector<8x128xf32>
    %272 = arith.addf %270, %271 : vector<8x128xf32>
    %273 = arith.mulf %260, %272 : vector<8x128xf32>
    %274 = arith.addf %269, %273 : vector<8x128xf32>
    %275 = math.tanh %274 : vector<8x128xf32>
    %cst_80 = arith.constant 1.000000e+00 : f32
    %276 = vector.broadcast %cst_80 : f32 to vector<8x128xf32>
    %277 = arith.subf %276, %268 : vector<8x128xf32>
    %278 = arith.mulf %277, %275 : vector<8x128xf32>
    %279 = arith.mulf %268, %214 : vector<8x128xf32>
    %280 = arith.addf %278, %279 : vector<8x128xf32>
    %c4 = arith.constant 4 : index
    %c0_81 = arith.constant 0 : index
    %c0_82 = arith.constant 0 : index
    %281 = vector.load %arg21[%c4, %c0_81, %c0_82] : memref<8x8x128xf32, #tpu.memory_space<vmem>>, vector<1x8x128xf32>
    %282 = vector.shape_cast %281 : vector<1x8x128xf32> to vector<8x128xf32>
    %283 = vector.shape_cast %280 : vector<8x128xf32> to vector<1x8x128xf32>
    tpu.vector_store %arg21[%c4, %c0_81, %c0_82], %283 {strides = array<i32>} : memref<8x8x128xf32, #tpu.memory_space<vmem>>, vector<1x8x128xf32>,
    %cst_83 = arith.constant dense<0.000000e+00> : vector<8x384xf32>
    %284 = tpu.matmul %247, %14, %cst_83 {dimension_numbers = #tpu.dot_dimension_numbers<[1], [0], [0], [1], [0, 0, 1, 1], [], []>} : vector<8x128xf32>, vector<128x384xf32>, vector<8x384xf32> -> vector<8x384xf32>
    %c32_84 = arith.constant 32 : index
    %c0_85 = arith.constant 0 : index
    %285 = vector.load %arg19[%c32_84, %c0_85] : memref<64x768xf32, #tpu.memory_space<vmem>>, vector<8x384xf32>
    %286 = vector.extract_strided_slice %285 {offsets = [0, 0], sizes = [8, 128], strides = [1, 1]} : vector<8x384xf32> to vector<8x128xf32>
    %287 = vector.extract_strided_slice %284 {offsets = [0, 0], sizes = [8, 128], strides = [1, 1]} : vector<8x384xf32> to vector<8x128xf32>
    %288 = arith.addf %286, %287 : vector<8x128xf32>
    %289 = arith.negf %288 : vector<8x128xf32>
    %290 = math.exp %289 : vector<8x128xf32>
    %cst_86 = arith.constant 1.000000e+00 : f32
    %291 = vector.broadcast %cst_86 : f32 to vector<8x128xf32>
    %292 = arith.addf %291, %290 : vector<8x128xf32>
    %293 = arith.divf %291, %292 : vector<8x128xf32>
    %294 = vector.extract_strided_slice %285 {offsets = [0, 128], sizes = [8, 128], strides = [1, 1]} : vector<8x384xf32> to vector<8x128xf32>
    %295 = vector.extract_strided_slice %284 {offsets = [0, 128], sizes = [8, 128], strides = [1, 1]} : vector<8x384xf32> to vector<8x128xf32>
    %296 = arith.addf %294, %295 : vector<8x128xf32>
    %297 = arith.negf %296 : vector<8x128xf32>
    %298 = math.exp %297 : vector<8x128xf32>
    %cst_87 = arith.constant 1.000000e+00 : f32
    %299 = vector.broadcast %cst_87 : f32 to vector<8x128xf32>
    %300 = arith.addf %299, %298 : vector<8x128xf32>
    %301 = arith.divf %299, %300 : vector<8x128xf32>
    %302 = vector.extract_strided_slice %285 {offsets = [0, 256], sizes = [8, 128], strides = [1, 1]} : vector<8x384xf32> to vector<8x128xf32>
    %303 = vector.extract_strided_slice %284 {offsets = [0, 256], sizes = [8, 128], strides = [1, 1]} : vector<8x384xf32> to vector<8x128xf32>
    %304 = vector.broadcast %16 : vector<1x128xf32> to vector<8x128xf32>
    %305 = arith.addf %303, %304 : vector<8x128xf32>
    %306 = arith.mulf %293, %305 : vector<8x128xf32>
    %307 = arith.addf %302, %306 : vector<8x128xf32>
    %308 = math.tanh %307 : vector<8x128xf32>
    %cst_88 = arith.constant 1.000000e+00 : f32
    %309 = vector.broadcast %cst_88 : f32 to vector<8x128xf32>
    %310 = arith.subf %309, %301 : vector<8x128xf32>
    %311 = arith.mulf %310, %308 : vector<8x128xf32>
    %312 = arith.mulf %301, %247 : vector<8x128xf32>
    %313 = arith.addf %311, %312 : vector<8x128xf32>
    %c4_89 = arith.constant 4 : index
    %c0_90 = arith.constant 0 : index
    %c0_91 = arith.constant 0 : index
    %314 = vector.load %arg20[%c4_89, %c0_90, %c0_91] : memref<8x8x128xf32, #tpu.memory_space<vmem>>, vector<1x8x128xf32>
    %315 = vector.shape_cast %314 : vector<1x8x128xf32> to vector<8x128xf32>
    %316 = vector.shape_cast %313 : vector<8x128xf32> to vector<1x8x128xf32>
    tpu.vector_store %arg20[%c4_89, %c0_90, %c0_91], %316 {strides = array<i32>} : memref<8x8x128xf32, #tpu.memory_space<vmem>>, vector<1x8x128xf32>,
    %cst_92 = arith.constant dense<0.000000e+00> : vector<8x384xf32>
    %317 = tpu.matmul %280, %15, %cst_92 {dimension_numbers = #tpu.dot_dimension_numbers<[1], [0], [0], [1], [0, 0, 1, 1], [], []>} : vector<8x128xf32>, vector<128x384xf32>, vector<8x384xf32> -> vector<8x384xf32>
    %c24_93 = arith.constant 24 : index
    %c384_94 = arith.constant 384 : index
    %318 = vector.load %arg19[%c24_93, %c384_94] : memref<64x768xf32, #tpu.memory_space<vmem>>, vector<8x384xf32>
    %319 = vector.extract_strided_slice %318 {offsets = [0, 0], sizes = [8, 128], strides = [1, 1]} : vector<8x384xf32> to vector<8x128xf32>
    %320 = vector.extract_strided_slice %317 {offsets = [0, 0], sizes = [8, 128], strides = [1, 1]} : vector<8x384xf32> to vector<8x128xf32>
    %321 = arith.addf %319, %320 : vector<8x128xf32>
    %322 = arith.negf %321 : vector<8x128xf32>
    %323 = math.exp %322 : vector<8x128xf32>
    %cst_95 = arith.constant 1.000000e+00 : f32
    %324 = vector.broadcast %cst_95 : f32 to vector<8x128xf32>
    %325 = arith.addf %324, %323 : vector<8x128xf32>
    %326 = arith.divf %324, %325 : vector<8x128xf32>
    %327 = vector.extract_strided_slice %318 {offsets = [0, 128], sizes = [8, 128], strides = [1, 1]} : vector<8x384xf32> to vector<8x128xf32>
    %328 = vector.extract_strided_slice %317 {offsets = [0, 128], sizes = [8, 128], strides = [1, 1]} : vector<8x384xf32> to vector<8x128xf32>
    %329 = arith.addf %327, %328 : vector<8x128xf32>
    %330 = arith.negf %329 : vector<8x128xf32>
    %331 = math.exp %330 : vector<8x128xf32>
    %cst_96 = arith.constant 1.000000e+00 : f32
    %332 = vector.broadcast %cst_96 : f32 to vector<8x128xf32>
    %333 = arith.addf %332, %331 : vector<8x128xf32>
    %334 = arith.divf %332, %333 : vector<8x128xf32>
    %335 = vector.extract_strided_slice %318 {offsets = [0, 256], sizes = [8, 128], strides = [1, 1]} : vector<8x384xf32> to vector<8x128xf32>
    %336 = vector.extract_strided_slice %317 {offsets = [0, 256], sizes = [8, 128], strides = [1, 1]} : vector<8x384xf32> to vector<8x128xf32>
    %337 = vector.broadcast %17 : vector<1x128xf32> to vector<8x128xf32>
    %338 = arith.addf %336, %337 : vector<8x128xf32>
    %339 = arith.mulf %326, %338 : vector<8x128xf32>
    %340 = arith.addf %335, %339 : vector<8x128xf32>
    %341 = math.tanh %340 : vector<8x128xf32>
    %cst_97 = arith.constant 1.000000e+00 : f32
    %342 = vector.broadcast %cst_97 : f32 to vector<8x128xf32>
    %343 = arith.subf %342, %334 : vector<8x128xf32>
    %344 = arith.mulf %343, %341 : vector<8x128xf32>
    %345 = arith.mulf %334, %280 : vector<8x128xf32>
    %346 = arith.addf %344, %345 : vector<8x128xf32>
    %c3_98 = arith.constant 3 : index
    %c0_99 = arith.constant 0 : index
    %c0_100 = arith.constant 0 : index
    %347 = vector.load %arg21[%c3_98, %c0_99, %c0_100] : memref<8x8x128xf32, #tpu.memory_space<vmem>>, vector<1x8x128xf32>
    %348 = vector.shape_cast %347 : vector<1x8x128xf32> to vector<8x128xf32>
    %349 = vector.shape_cast %346 : vector<8x128xf32> to vector<1x8x128xf32>
    tpu.vector_store %arg21[%c3_98, %c0_99, %c0_100], %349 {strides = array<i32>} : memref<8x8x128xf32, #tpu.memory_space<vmem>>, vector<1x8x128xf32>,
    %cst_101 = arith.constant dense<0.000000e+00> : vector<8x384xf32>
    %350 = tpu.matmul %313, %14, %cst_101 {dimension_numbers = #tpu.dot_dimension_numbers<[1], [0], [0], [1], [0, 0, 1, 1], [], []>} : vector<8x128xf32>, vector<128x384xf32>, vector<8x384xf32> -> vector<8x384xf32>
    %c40_102 = arith.constant 40 : index
    %c0_103 = arith.constant 0 : index
    %351 = vector.load %arg19[%c40_102, %c0_103] : memref<64x768xf32, #tpu.memory_space<vmem>>, vector<8x384xf32>
    %352 = vector.extract_strided_slice %351 {offsets = [0, 0], sizes = [8, 128], strides = [1, 1]} : vector<8x384xf32> to vector<8x128xf32>
    %353 = vector.extract_strided_slice %350 {offsets = [0, 0], sizes = [8, 128], strides = [1, 1]} : vector<8x384xf32> to vector<8x128xf32>
    %354 = arith.addf %352, %353 : vector<8x128xf32>
    %355 = arith.negf %354 : vector<8x128xf32>
    %356 = math.exp %355 : vector<8x128xf32>
    %cst_104 = arith.constant 1.000000e+00 : f32
    %357 = vector.broadcast %cst_104 : f32 to vector<8x128xf32>
    %358 = arith.addf %357, %356 : vector<8x128xf32>
    %359 = arith.divf %357, %358 : vector<8x128xf32>
    %360 = vector.extract_strided_slice %351 {offsets = [0, 128], sizes = [8, 128], strides = [1, 1]} : vector<8x384xf32> to vector<8x128xf32>
    %361 = vector.extract_strided_slice %350 {offsets = [0, 128], sizes = [8, 128], strides = [1, 1]} : vector<8x384xf32> to vector<8x128xf32>
    %362 = arith.addf %360, %361 : vector<8x128xf32>
    %363 = arith.negf %362 : vector<8x128xf32>
    %364 = math.exp %363 : vector<8x128xf32>
    %cst_105 = arith.constant 1.000000e+00 : f32
    %365 = vector.broadcast %cst_105 : f32 to vector<8x128xf32>
    %366 = arith.addf %365, %364 : vector<8x128xf32>
    %367 = arith.divf %365, %366 : vector<8x128xf32>
    %368 = vector.extract_strided_slice %351 {offsets = [0, 256], sizes = [8, 128], strides = [1, 1]} : vector<8x384xf32> to vector<8x128xf32>
    %369 = vector.extract_strided_slice %350 {offsets = [0, 256], sizes = [8, 128], strides = [1, 1]} : vector<8x384xf32> to vector<8x128xf32>
    %370 = vector.broadcast %16 : vector<1x128xf32> to vector<8x128xf32>
    %371 = arith.addf %369, %370 : vector<8x128xf32>
    %372 = arith.mulf %359, %371 : vector<8x128xf32>
    %373 = arith.addf %368, %372 : vector<8x128xf32>
    %374 = math.tanh %373 : vector<8x128xf32>
    %cst_106 = arith.constant 1.000000e+00 : f32
    %375 = vector.broadcast %cst_106 : f32 to vector<8x128xf32>
    %376 = arith.subf %375, %367 : vector<8x128xf32>
    %377 = arith.mulf %376, %374 : vector<8x128xf32>
    %378 = arith.mulf %367, %313 : vector<8x128xf32>
    %379 = arith.addf %377, %378 : vector<8x128xf32>
    %c5_107 = arith.constant 5 : index
    %c0_108 = arith.constant 0 : index
    %c0_109 = arith.constant 0 : index
    %380 = vector.load %arg20[%c5_107, %c0_108, %c0_109] : memref<8x8x128xf32, #tpu.memory_space<vmem>>, vector<1x8x128xf32>
    %381 = vector.shape_cast %380 : vector<1x8x128xf32> to vector<8x128xf32>
    %382 = vector.shape_cast %379 : vector<8x128xf32> to vector<1x8x128xf32>
    tpu.vector_store %arg20[%c5_107, %c0_108, %c0_109], %382 {strides = array<i32>} : memref<8x8x128xf32, #tpu.memory_space<vmem>>, vector<1x8x128xf32>,
    %cst_110 = arith.constant dense<0.000000e+00> : vector<8x384xf32>
    %383 = tpu.matmul %346, %15, %cst_110 {dimension_numbers = #tpu.dot_dimension_numbers<[1], [0], [0], [1], [0, 0, 1, 1], [], []>} : vector<8x128xf32>, vector<128x384xf32>, vector<8x384xf32> -> vector<8x384xf32>
    %c16_111 = arith.constant 16 : index
    %c384_112 = arith.constant 384 : index
    %384 = vector.load %arg19[%c16_111, %c384_112] : memref<64x768xf32, #tpu.memory_space<vmem>>, vector<8x384xf32>
    %385 = vector.extract_strided_slice %384 {offsets = [0, 0], sizes = [8, 128], strides = [1, 1]} : vector<8x384xf32> to vector<8x128xf32>
    %386 = vector.extract_strided_slice %383 {offsets = [0, 0], sizes = [8, 128], strides = [1, 1]} : vector<8x384xf32> to vector<8x128xf32>
    %387 = arith.addf %385, %386 : vector<8x128xf32>
    %388 = arith.negf %387 : vector<8x128xf32>
    %389 = math.exp %388 : vector<8x128xf32>
    %cst_113 = arith.constant 1.000000e+00 : f32
    %390 = vector.broadcast %cst_113 : f32 to vector<8x128xf32>
    %391 = arith.addf %390, %389 : vector<8x128xf32>
    %392 = arith.divf %390, %391 : vector<8x128xf32>
    %393 = vector.extract_strided_slice %384 {offsets = [0, 128], sizes = [8, 128], strides = [1, 1]} : vector<8x384xf32> to vector<8x128xf32>
    %394 = vector.extract_strided_slice %383 {offsets = [0, 128], sizes = [8, 128], strides = [1, 1]} : vector<8x384xf32> to vector<8x128xf32>
    %395 = arith.addf %393, %394 : vector<8x128xf32>
    %396 = arith.negf %395 : vector<8x128xf32>
    %397 = math.exp %396 : vector<8x128xf32>
    %cst_114 = arith.constant 1.000000e+00 : f32
    %398 = vector.broadcast %cst_114 : f32 to vector<8x128xf32>
    %399 = arith.addf %398, %397 : vector<8x128xf32>
    %400 = arith.divf %398, %399 : vector<8x128xf32>
    %401 = vector.extract_strided_slice %384 {offsets = [0, 256], sizes = [8, 128], strides = [1, 1]} : vector<8x384xf32> to vector<8x128xf32>
    %402 = vector.extract_strided_slice %383 {offsets = [0, 256], sizes = [8, 128], strides = [1, 1]} : vector<8x384xf32> to vector<8x128xf32>
    %403 = vector.broadcast %17 : vector<1x128xf32> to vector<8x128xf32>
    %404 = arith.addf %402, %403 : vector<8x128xf32>
    %405 = arith.mulf %392, %404 : vector<8x128xf32>
    %406 = arith.addf %401, %405 : vector<8x128xf32>
    %407 = math.tanh %406 : vector<8x128xf32>
    %cst_115 = arith.constant 1.000000e+00 : f32
    %408 = vector.broadcast %cst_115 : f32 to vector<8x128xf32>
    %409 = arith.subf %408, %400 : vector<8x128xf32>
    %410 = arith.mulf %409, %407 : vector<8x128xf32>
    %411 = arith.mulf %400, %346 : vector<8x128xf32>
    %412 = arith.addf %410, %411 : vector<8x128xf32>
    %c2_116 = arith.constant 2 : index
    %c0_117 = arith.constant 0 : index
    %c0_118 = arith.constant 0 : index
    %413 = vector.load %arg21[%c2_116, %c0_117, %c0_118] : memref<8x8x128xf32, #tpu.memory_space<vmem>>, vector<1x8x128xf32>
    %414 = vector.shape_cast %413 : vector<1x8x128xf32> to vector<8x128xf32>
    %415 = vector.shape_cast %412 : vector<8x128xf32> to vector<1x8x128xf32>
    tpu.vector_store %arg21[%c2_116, %c0_117, %c0_118], %415 {strides = array<i32>} : memref<8x8x128xf32, #tpu.memory_space<vmem>>, vector<1x8x128xf32>,
    %cst_119 = arith.constant dense<0.000000e+00> : vector<8x384xf32>
    %416 = tpu.matmul %379, %14, %cst_119 {dimension_numbers = #tpu.dot_dimension_numbers<[1], [0], [0], [1], [0, 0, 1, 1], [], []>} : vector<8x128xf32>, vector<128x384xf32>, vector<8x384xf32> -> vector<8x384xf32>
    %c48_120 = arith.constant 48 : index
    %c0_121 = arith.constant 0 : index
    %417 = vector.load %arg19[%c48_120, %c0_121] : memref<64x768xf32, #tpu.memory_space<vmem>>, vector<8x384xf32>
    %418 = vector.extract_strided_slice %417 {offsets = [0, 0], sizes = [8, 128], strides = [1, 1]} : vector<8x384xf32> to vector<8x128xf32>
    %419 = vector.extract_strided_slice %416 {offsets = [0, 0], sizes = [8, 128], strides = [1, 1]} : vector<8x384xf32> to vector<8x128xf32>
    %420 = arith.addf %418, %419 : vector<8x128xf32>
    %421 = arith.negf %420 : vector<8x128xf32>
    %422 = math.exp %421 : vector<8x128xf32>
    %cst_122 = arith.constant 1.000000e+00 : f32
    %423 = vector.broadcast %cst_122 : f32 to vector<8x128xf32>
    %424 = arith.addf %423, %422 : vector<8x128xf32>
    %425 = arith.divf %423, %424 : vector<8x128xf32>
    %426 = vector.extract_strided_slice %417 {offsets = [0, 128], sizes = [8, 128], strides = [1, 1]} : vector<8x384xf32> to vector<8x128xf32>
    %427 = vector.extract_strided_slice %416 {offsets = [0, 128], sizes = [8, 128], strides = [1, 1]} : vector<8x384xf32> to vector<8x128xf32>
    %428 = arith.addf %426, %427 : vector<8x128xf32>
    %429 = arith.negf %428 : vector<8x128xf32>
    %430 = math.exp %429 : vector<8x128xf32>
    %cst_123 = arith.constant 1.000000e+00 : f32
    %431 = vector.broadcast %cst_123 : f32 to vector<8x128xf32>
    %432 = arith.addf %431, %430 : vector<8x128xf32>
    %433 = arith.divf %431, %432 : vector<8x128xf32>
    %434 = vector.extract_strided_slice %417 {offsets = [0, 256], sizes = [8, 128], strides = [1, 1]} : vector<8x384xf32> to vector<8x128xf32>
    %435 = vector.extract_strided_slice %416 {offsets = [0, 256], sizes = [8, 128], strides = [1, 1]} : vector<8x384xf32> to vector<8x128xf32>
    %436 = vector.broadcast %16 : vector<1x128xf32> to vector<8x128xf32>
    %437 = arith.addf %435, %436 : vector<8x128xf32>
    %438 = arith.mulf %425, %437 : vector<8x128xf32>
    %439 = arith.addf %434, %438 : vector<8x128xf32>
    %440 = math.tanh %439 : vector<8x128xf32>
    %cst_124 = arith.constant 1.000000e+00 : f32
    %441 = vector.broadcast %cst_124 : f32 to vector<8x128xf32>
    %442 = arith.subf %441, %433 : vector<8x128xf32>
    %443 = arith.mulf %442, %440 : vector<8x128xf32>
    %444 = arith.mulf %433, %379 : vector<8x128xf32>
    %445 = arith.addf %443, %444 : vector<8x128xf32>
    %c6_125 = arith.constant 6 : index
    %c0_126 = arith.constant 0 : index
    %c0_127 = arith.constant 0 : index
    %446 = vector.load %arg20[%c6_125, %c0_126, %c0_127] : memref<8x8x128xf32, #tpu.memory_space<vmem>>, vector<1x8x128xf32>
    %447 = vector.shape_cast %446 : vector<1x8x128xf32> to vector<8x128xf32>
    %448 = vector.shape_cast %445 : vector<8x128xf32> to vector<1x8x128xf32>
    tpu.vector_store %arg20[%c6_125, %c0_126, %c0_127], %448 {strides = array<i32>} : memref<8x8x128xf32, #tpu.memory_space<vmem>>, vector<1x8x128xf32>,
    %cst_128 = arith.constant dense<0.000000e+00> : vector<8x384xf32>
    %449 = tpu.matmul %412, %15, %cst_128 {dimension_numbers = #tpu.dot_dimension_numbers<[1], [0], [0], [1], [0, 0, 1, 1], [], []>} : vector<8x128xf32>, vector<128x384xf32>, vector<8x384xf32> -> vector<8x384xf32>
    %c8_129 = arith.constant 8 : index
    %c384_130 = arith.constant 384 : index
    %450 = vector.load %arg19[%c8_129, %c384_130] : memref<64x768xf32, #tpu.memory_space<vmem>>, vector<8x384xf32>
    %451 = vector.extract_strided_slice %450 {offsets = [0, 0], sizes = [8, 128], strides = [1, 1]} : vector<8x384xf32> to vector<8x128xf32>
    %452 = vector.extract_strided_slice %449 {offsets = [0, 0], sizes = [8, 128], strides = [1, 1]} : vector<8x384xf32> to vector<8x128xf32>
    %453 = arith.addf %451, %452 : vector<8x128xf32>
    %454 = arith.negf %453 : vector<8x128xf32>
    %455 = math.exp %454 : vector<8x128xf32>
    %cst_131 = arith.constant 1.000000e+00 : f32
    %456 = vector.broadcast %cst_131 : f32 to vector<8x128xf32>
    %457 = arith.addf %456, %455 : vector<8x128xf32>
    %458 = arith.divf %456, %457 : vector<8x128xf32>
    %459 = vector.extract_strided_slice %450 {offsets = [0, 128], sizes = [8, 128], strides = [1, 1]} : vector<8x384xf32> to vector<8x128xf32>
    %460 = vector.extract_strided_slice %449 {offsets = [0, 128], sizes = [8, 128], strides = [1, 1]} : vector<8x384xf32> to vector<8x128xf32>
    %461 = arith.addf %459, %460 : vector<8x128xf32>
    %462 = arith.negf %461 : vector<8x128xf32>
    %463 = math.exp %462 : vector<8x128xf32>
    %cst_132 = arith.constant 1.000000e+00 : f32
    %464 = vector.broadcast %cst_132 : f32 to vector<8x128xf32>
    %465 = arith.addf %464, %463 : vector<8x128xf32>
    %466 = arith.divf %464, %465 : vector<8x128xf32>
    %467 = vector.extract_strided_slice %450 {offsets = [0, 256], sizes = [8, 128], strides = [1, 1]} : vector<8x384xf32> to vector<8x128xf32>
    %468 = vector.extract_strided_slice %449 {offsets = [0, 256], sizes = [8, 128], strides = [1, 1]} : vector<8x384xf32> to vector<8x128xf32>
    %469 = vector.broadcast %17 : vector<1x128xf32> to vector<8x128xf32>
    %470 = arith.addf %468, %469 : vector<8x128xf32>
    %471 = arith.mulf %458, %470 : vector<8x128xf32>
    %472 = arith.addf %467, %471 : vector<8x128xf32>
    %473 = math.tanh %472 : vector<8x128xf32>
    %cst_133 = arith.constant 1.000000e+00 : f32
    %474 = vector.broadcast %cst_133 : f32 to vector<8x128xf32>
    %475 = arith.subf %474, %466 : vector<8x128xf32>
    %476 = arith.mulf %475, %473 : vector<8x128xf32>
    %477 = arith.mulf %466, %412 : vector<8x128xf32>
    %478 = arith.addf %476, %477 : vector<8x128xf32>
    %c1_134 = arith.constant 1 : index
    %c0_135 = arith.constant 0 : index
    %c0_136 = arith.constant 0 : index
    %479 = vector.load %arg21[%c1_134, %c0_135, %c0_136] : memref<8x8x128xf32, #tpu.memory_space<vmem>>, vector<1x8x128xf32>
    %480 = vector.shape_cast %479 : vector<1x8x128xf32> to vector<8x128xf32>
    %481 = vector.shape_cast %478 : vector<8x128xf32> to vector<1x8x128xf32>
    tpu.vector_store %arg21[%c1_134, %c0_135, %c0_136], %481 {strides = array<i32>} : memref<8x8x128xf32, #tpu.memory_space<vmem>>, vector<1x8x128xf32>,
    %cst_137 = arith.constant dense<0.000000e+00> : vector<8x384xf32>
    %482 = tpu.matmul %445, %14, %cst_137 {dimension_numbers = #tpu.dot_dimension_numbers<[1], [0], [0], [1], [0, 0, 1, 1], [], []>} : vector<8x128xf32>, vector<128x384xf32>, vector<8x384xf32> -> vector<8x384xf32>
    %c56_138 = arith.constant 56 : index
    %c0_139 = arith.constant 0 : index
    %483 = vector.load %arg19[%c56_138, %c0_139] : memref<64x768xf32, #tpu.memory_space<vmem>>, vector<8x384xf32>
    %484 = vector.extract_strided_slice %483 {offsets = [0, 0], sizes = [8, 128], strides = [1, 1]} : vector<8x384xf32> to vector<8x128xf32>
    %485 = vector.extract_strided_slice %482 {offsets = [0, 0], sizes = [8, 128], strides = [1, 1]} : vector<8x384xf32> to vector<8x128xf32>
    %486 = arith.addf %484, %485 : vector<8x128xf32>
    %487 = arith.negf %486 : vector<8x128xf32>
    %488 = math.exp %487 : vector<8x128xf32>
    %cst_140 = arith.constant 1.000000e+00 : f32
    %489 = vector.broadcast %cst_140 : f32 to vector<8x128xf32>
    %490 = arith.addf %489, %488 : vector<8x128xf32>
    %491 = arith.divf %489, %490 : vector<8x128xf32>
    %492 = vector.extract_strided_slice %483 {offsets = [0, 128], sizes = [8, 128], strides = [1, 1]} : vector<8x384xf32> to vector<8x128xf32>
    %493 = vector.extract_strided_slice %482 {offsets = [0, 128], sizes = [8, 128], strides = [1, 1]} : vector<8x384xf32> to vector<8x128xf32>
    %494 = arith.addf %492, %493 : vector<8x128xf32>
    %495 = arith.negf %494 : vector<8x128xf32>
    %496 = math.exp %495 : vector<8x128xf32>
    %cst_141 = arith.constant 1.000000e+00 : f32
    %497 = vector.broadcast %cst_141 : f32 to vector<8x128xf32>
    %498 = arith.addf %497, %496 : vector<8x128xf32>
    %499 = arith.divf %497, %498 : vector<8x128xf32>
    %500 = vector.extract_strided_slice %483 {offsets = [0, 256], sizes = [8, 128], strides = [1, 1]} : vector<8x384xf32> to vector<8x128xf32>
    %501 = vector.extract_strided_slice %482 {offsets = [0, 256], sizes = [8, 128], strides = [1, 1]} : vector<8x384xf32> to vector<8x128xf32>
    %502 = vector.broadcast %16 : vector<1x128xf32> to vector<8x128xf32>
    %503 = arith.addf %501, %502 : vector<8x128xf32>
    %504 = arith.mulf %491, %503 : vector<8x128xf32>
    %505 = arith.addf %500, %504 : vector<8x128xf32>
    %506 = math.tanh %505 : vector<8x128xf32>
    %cst_142 = arith.constant 1.000000e+00 : f32
    %507 = vector.broadcast %cst_142 : f32 to vector<8x128xf32>
    %508 = arith.subf %507, %499 : vector<8x128xf32>
    %509 = arith.mulf %508, %506 : vector<8x128xf32>
    %510 = arith.mulf %499, %445 : vector<8x128xf32>
    %511 = arith.addf %509, %510 : vector<8x128xf32>
    %c7_143 = arith.constant 7 : index
    %c0_144 = arith.constant 0 : index
    %c0_145 = arith.constant 0 : index
    %512 = vector.load %arg20[%c7_143, %c0_144, %c0_145] : memref<8x8x128xf32, #tpu.memory_space<vmem>>, vector<1x8x128xf32>
    %513 = vector.shape_cast %512 : vector<1x8x128xf32> to vector<8x128xf32>
    %514 = vector.shape_cast %511 : vector<8x128xf32> to vector<1x8x128xf32>
    tpu.vector_store %arg20[%c7_143, %c0_144, %c0_145], %514 {strides = array<i32>} : memref<8x8x128xf32, #tpu.memory_space<vmem>>, vector<1x8x128xf32>,
    %cst_146 = arith.constant dense<0.000000e+00> : vector<8x384xf32>
    %515 = tpu.matmul %478, %15, %cst_146 {dimension_numbers = #tpu.dot_dimension_numbers<[1], [0], [0], [1], [0, 0, 1, 1], [], []>} : vector<8x128xf32>, vector<128x384xf32>, vector<8x384xf32> -> vector<8x384xf32>
    %c0_147 = arith.constant 0 : index
    %c384_148 = arith.constant 384 : index
    %516 = vector.load %arg19[%c0_147, %c384_148] : memref<64x768xf32, #tpu.memory_space<vmem>>, vector<8x384xf32>
    %517 = vector.extract_strided_slice %516 {offsets = [0, 0], sizes = [8, 128], strides = [1, 1]} : vector<8x384xf32> to vector<8x128xf32>
    %518 = vector.extract_strided_slice %515 {offsets = [0, 0], sizes = [8, 128], strides = [1, 1]} : vector<8x384xf32> to vector<8x128xf32>
    %519 = arith.addf %517, %518 : vector<8x128xf32>
    %520 = arith.negf %519 : vector<8x128xf32>
    %521 = math.exp %520 : vector<8x128xf32>
    %cst_149 = arith.constant 1.000000e+00 : f32
    %522 = vector.broadcast %cst_149 : f32 to vector<8x128xf32>
    %523 = arith.addf %522, %521 : vector<8x128xf32>
    %524 = arith.divf %522, %523 : vector<8x128xf32>
    %525 = vector.extract_strided_slice %516 {offsets = [0, 128], sizes = [8, 128], strides = [1, 1]} : vector<8x384xf32> to vector<8x128xf32>
    %526 = vector.extract_strided_slice %515 {offsets = [0, 128], sizes = [8, 128], strides = [1, 1]} : vector<8x384xf32> to vector<8x128xf32>
    %527 = arith.addf %525, %526 : vector<8x128xf32>
    %528 = arith.negf %527 : vector<8x128xf32>
    %529 = math.exp %528 : vector<8x128xf32>
    %cst_150 = arith.constant 1.000000e+00 : f32
    %530 = vector.broadcast %cst_150 : f32 to vector<8x128xf32>
    %531 = arith.addf %530, %529 : vector<8x128xf32>
    %532 = arith.divf %530, %531 : vector<8x128xf32>
    %533 = vector.extract_strided_slice %516 {offsets = [0, 256], sizes = [8, 128], strides = [1, 1]} : vector<8x384xf32> to vector<8x128xf32>
    %534 = vector.extract_strided_slice %515 {offsets = [0, 256], sizes = [8, 128], strides = [1, 1]} : vector<8x384xf32> to vector<8x128xf32>
    %535 = vector.broadcast %17 : vector<1x128xf32> to vector<8x128xf32>
    %536 = arith.addf %534, %535 : vector<8x128xf32>
    %537 = arith.mulf %524, %536 : vector<8x128xf32>
    %538 = arith.addf %533, %537 : vector<8x128xf32>
    %539 = math.tanh %538 : vector<8x128xf32>
    %cst_151 = arith.constant 1.000000e+00 : f32
    %540 = vector.broadcast %cst_151 : f32 to vector<8x128xf32>
    %541 = arith.subf %540, %532 : vector<8x128xf32>
    %542 = arith.mulf %541, %539 : vector<8x128xf32>
    %543 = arith.mulf %532, %478 : vector<8x128xf32>
    %544 = arith.addf %542, %543 : vector<8x128xf32>
    %c0_152 = arith.constant 0 : index
    %c0_153 = arith.constant 0 : index
    %c0_154 = arith.constant 0 : index
    %545 = vector.load %arg21[%c0_152, %c0_153, %c0_154] : memref<8x8x128xf32, #tpu.memory_space<vmem>>, vector<1x8x128xf32>
    %546 = vector.shape_cast %545 : vector<1x8x128xf32> to vector<8x128xf32>
    %547 = vector.shape_cast %544 : vector<8x128xf32> to vector<1x8x128xf32>
    tpu.vector_store %arg21[%c0_152, %c0_153, %c0_154], %547 {strides = array<i32>} : memref<8x8x128xf32, #tpu.memory_space<vmem>>, vector<1x8x128xf32>,
    %c0_155 = arith.constant 0 : index
    %c0_156 = arith.constant 0 : index
    %c0_157 = arith.constant 0 : index
    %548 = vector.load %arg20[%c0_155, %c0_156, %c0_157] : memref<8x8x128xf32, #tpu.memory_space<vmem>>, vector<8x8x128xf32>
    %c0_158 = arith.constant 0 : index
    %c0_159 = arith.constant 0 : index
    %c0_160 = arith.constant 0 : index
    %549 = vector.load %arg21[%c0_158, %c0_159, %c0_160] : memref<8x8x128xf32, #tpu.memory_space<vmem>>, vector<8x8x128xf32>
    %550 = tpu.concatenate %548, %549 in 2 : vector<8x8x128xf32>, vector<8x8x128xf32> -> vector<8x8x256xf32>
    %c0_161 = arith.constant 0 : index
    %c0_162 = arith.constant 0 : index
    %551 = vector.load %arg9[%c0_161, %c0_162] : memref<1x256xf32, #tpu.memory_space<vmem>>, vector<1x256xf32>
    %552 = vector.shape_cast %551 : vector<1x256xf32> to vector<1x1x256xf32>
    %553 = vector.broadcast %552 : vector<1x1x256xf32> to vector<8x8x256xf32>
    %554 = arith.mulf %550, %553 : vector<8x8x256xf32>
    %cst_163 = arith.constant dense<0.000000e+00> : vector<8x8xf32>
    %555 = vector.multi_reduction <add>, %554, %cst_163 [2] : vector<8x8x256xf32> to vector<8x8xf32>
    %556 = vector.shape_cast %555 : vector<8x8xf32> to vector<8x8x1xf32>
    %c0_164 = arith.constant 0 : index
    %c0_165 = arith.constant 0 : index
    %557 = vector.load %arg8[%c0_164, %c0_165] : memref<1x128xf32, #tpu.memory_space<vmem>>, vector<1x128xf32>
    %c0_166 = arith.constant 0 : index
    %c0_167 = arith.constant 0 : index
    %558 = vector.load %arg10[%c0_166, %c0_167] : memref<1x1xf32, #tpu.memory_space<vmem>>, vector<1x1xf32>
    %c0_168 = arith.constant 0 : index
    %c0_169 = arith.constant 0 : index
    %559 = vector.load %arg12[%c0_168, %c0_169] : memref<256x384xf32, #tpu.memory_space<vmem>>, vector<256x384xf32>
    %c0_170 = arith.constant 0 : index
    %c0_171 = arith.constant 0 : index
    %560 = vector.load %arg13[%c0_170, %c0_171] : memref<128x384xf32, #tpu.memory_space<vmem>>, vector<128x384xf32>
    %c0_172 = arith.constant 0 : index
    %c0_173 = arith.constant 0 : index
    %561 = vector.load %arg15[%c0_172, %c0_173] : memref<1x128xf32, #tpu.memory_space<vmem>>, vector<1x128xf32>
    %cst_174 = arith.constant 0.000000e+00 : f32
    %562 = vector.broadcast %cst_174 : f32 to vector<8x128xf32>
    %563 = vector.broadcast %557 : vector<1x128xf32> to vector<8x128xf32>
    %564 = arith.mulf %562, %563 : vector<8x128xf32>
    %cst_175 = arith.constant dense<0.000000e+00> : vector<8xf32>
    %565 = vector.multi_reduction <add>, %564, %cst_175 [1] : vector<8x128xf32> to vector<8xf32>
    %566 = vector.shape_cast %565 : vector<8xf32> to vector<8x1xf32>
    %567 = vector.shape_cast %566 : vector<8x1xf32> to vector<1x8x1xf32>
    %568 = vector.broadcast %567 : vector<1x8x1xf32> to vector<8x8x1xf32>
    %569 = arith.addf %556, %568 : vector<8x8x1xf32>
    %570 = vector.shape_cast %558 : vector<1x1xf32> to vector<1x1x1xf32>
    %571 = vector.broadcast %570 : vector<1x1x1xf32> to vector<8x8x1xf32>
    %572 = arith.addf %569, %571 : vector<8x8x1xf32>
    %cst_176 = arith.constant dense<0xFF800000> : vector<8x1xf32>
    %573 = vector.multi_reduction <maximumf>, %572, %cst_176 [0] : vector<8x8x1xf32> to vector<8x1xf32>
    %cst_177 = arith.constant 0xFF800000 : f32
    %574 = vector.broadcast %cst_177 : f32 to vector<8x1xf32>
    %575 = arith.maximumf %574, %573 : vector<8x1xf32>
    %576 = vector.shape_cast %575 : vector<8x1xf32> to vector<1x8x1xf32>
    %577 = vector.broadcast %576 : vector<1x8x1xf32> to vector<8x8x1xf32>
    %578 = arith.subf %572, %577 : vector<8x8x1xf32>
    %579 = math.exp %578 : vector<8x8x1xf32>
    %cst_178 = arith.constant dense<0.000000e+00> : vector<8x1xf32>
    %580 = vector.multi_reduction <add>, %579, %cst_178 [0] : vector<8x8x1xf32> to vector<8x1xf32>
    %581 = vector.shape_cast %580 : vector<8x1xf32> to vector<1x8x1xf32>
    %582 = vector.broadcast %581 : vector<1x8x1xf32> to vector<8x8x1xf32>
    %583 = arith.divf %579, %582 : vector<8x8x1xf32>
    %584 = vector.broadcast %583 : vector<8x8x1xf32> to vector<8x8x256xf32>
    %585 = arith.mulf %584, %550 : vector<8x8x256xf32>
    %cst_179 = arith.constant dense<0.000000e+00> : vector<8x256xf32>
    %586 = vector.multi_reduction <add>, %585, %cst_179 [0] : vector<8x8x256xf32> to vector<8x256xf32>
    %c0_180 = arith.constant 0 : index
    %c0_181 = arith.constant 0 : index
    %587 = vector.load %arg22[%c0_180, %c0_181] : memref<64x384xf32, #tpu.memory_space<vmem>>, vector<8x384xf32>
    %cst_182 = arith.constant dense<0.000000e+00> : vector<8x384xf32>
    %588 = tpu.matmul %586, %559, %cst_182 {dimension_numbers = #tpu.dot_dimension_numbers<[1], [0], [0], [1], [0, 0, 1, 1], [], []>} : vector<8x256xf32>, vector<256x384xf32>, vector<8x384xf32> -> vector<8x384xf32>
    %589 = arith.addf %587, %588 : vector<8x384xf32>
    %cst_183 = arith.constant dense<0.000000e+00> : vector<8x384xf32>
    %590 = tpu.matmul %562, %560, %cst_183 {dimension_numbers = #tpu.dot_dimension_numbers<[1], [0], [0], [1], [0, 0, 1, 1], [], []>} : vector<8x128xf32>, vector<128x384xf32>, vector<8x384xf32> -> vector<8x384xf32>
    %591 = vector.extract_strided_slice %589 {offsets = [0, 0], sizes = [8, 128], strides = [1, 1]} : vector<8x384xf32> to vector<8x128xf32>
    %592 = vector.extract_strided_slice %590 {offsets = [0, 0], sizes = [8, 128], strides = [1, 1]} : vector<8x384xf32> to vector<8x128xf32>
    %593 = arith.addf %591, %592 : vector<8x128xf32>
    %594 = arith.negf %593 : vector<8x128xf32>
    %595 = math.exp %594 : vector<8x128xf32>
    %cst_184 = arith.constant 1.000000e+00 : f32
    %596 = vector.broadcast %cst_184 : f32 to vector<8x128xf32>
    %597 = arith.addf %596, %595 : vector<8x128xf32>
    %598 = arith.divf %596, %597 : vector<8x128xf32>
    %599 = vector.extract_strided_slice %589 {offsets = [0, 128], sizes = [8, 128], strides = [1, 1]} : vector<8x384xf32> to vector<8x128xf32>
    %600 = vector.extract_strided_slice %590 {offsets = [0, 128], sizes = [8, 128], strides = [1, 1]} : vector<8x384xf32> to vector<8x128xf32>
    %601 = arith.addf %599, %600 : vector<8x128xf32>
    %602 = arith.negf %601 : vector<8x128xf32>
    %603 = math.exp %602 : vector<8x128xf32>
    %cst_185 = arith.constant 1.000000e+00 : f32
    %604 = vector.broadcast %cst_185 : f32 to vector<8x128xf32>
    %605 = arith.addf %604, %603 : vector<8x128xf32>
    %606 = arith.divf %604, %605 : vector<8x128xf32>
    %607 = vector.extract_strided_slice %589 {offsets = [0, 256], sizes = [8, 128], strides = [1, 1]} : vector<8x384xf32> to vector<8x128xf32>
    %608 = vector.extract_strided_slice %590 {offsets = [0, 256], sizes = [8, 128], strides = [1, 1]} : vector<8x384xf32> to vector<8x128xf32>
    %609 = vector.broadcast %561 : vector<1x128xf32> to vector<8x128xf32>
    %610 = arith.addf %608, %609 : vector<8x128xf32>
    %611 = arith.mulf %598, %610 : vector<8x128xf32>
    %612 = arith.addf %607, %611 : vector<8x128xf32>
    %613 = math.tanh %612 : vector<8x128xf32>
    %cst_186 = arith.constant 1.000000e+00 : f32
    %614 = vector.broadcast %cst_186 : f32 to vector<8x128xf32>
    %615 = arith.subf %614, %606 : vector<8x128xf32>
    %616 = arith.mulf %615, %613 : vector<8x128xf32>
    %617 = arith.mulf %606, %562 : vector<8x128xf32>
    %618 = arith.addf %616, %617 : vector<8x128xf32>
    %c0_187 = arith.constant 0 : index
    %c0_188 = arith.constant 0 : index
    %619 = vector.load %arg23[%c0_187, %c0_188] : memref<64x128xf32, #tpu.memory_space<vmem>>, vector<8x128xf32>
    tpu.vector_store %arg23[%c0_187, %c0_188], %618 {strides = array<i32>} : memref<64x128xf32, #tpu.memory_space<vmem>>, vector<8x128xf32>,
    %620 = vector.broadcast %557 : vector<1x128xf32> to vector<8x128xf32>
    %621 = arith.mulf %618, %620 : vector<8x128xf32>
    %cst_189 = arith.constant dense<0.000000e+00> : vector<8xf32>
    %622 = vector.multi_reduction <add>, %621, %cst_189 [1] : vector<8x128xf32> to vector<8xf32>
    %623 = vector.shape_cast %622 : vector<8xf32> to vector<8x1xf32>
    %624 = vector.shape_cast %623 : vector<8x1xf32> to vector<1x8x1xf32>
    %625 = vector.broadcast %624 : vector<1x8x1xf32> to vector<8x8x1xf32>
    %626 = arith.addf %556, %625 : vector<8x8x1xf32>
    %627 = vector.shape_cast %558 : vector<1x1xf32> to vector<1x1x1xf32>
    %628 = vector.broadcast %627 : vector<1x1x1xf32> to vector<8x8x1xf32>
    %629 = arith.addf %626, %628 : vector<8x8x1xf32>
    %cst_190 = arith.constant dense<0xFF800000> : vector<8x1xf32>
    %630 = vector.multi_reduction <maximumf>, %629, %cst_190 [0] : vector<8x8x1xf32> to vector<8x1xf32>
    %cst_191 = arith.constant 0xFF800000 : f32
    %631 = vector.broadcast %cst_191 : f32 to vector<8x1xf32>
    %632 = arith.maximumf %631, %630 : vector<8x1xf32>
    %633 = vector.shape_cast %632 : vector<8x1xf32> to vector<1x8x1xf32>
    %634 = vector.broadcast %633 : vector<1x8x1xf32> to vector<8x8x1xf32>
    %635 = arith.subf %629, %634 : vector<8x8x1xf32>
    %636 = math.exp %635 : vector<8x8x1xf32>
    %cst_192 = arith.constant dense<0.000000e+00> : vector<8x1xf32>
    %637 = vector.multi_reduction <add>, %636, %cst_192 [0] : vector<8x8x1xf32> to vector<8x1xf32>
    %638 = vector.shape_cast %637 : vector<8x1xf32> to vector<1x8x1xf32>
    %639 = vector.broadcast %638 : vector<1x8x1xf32> to vector<8x8x1xf32>
    %640 = arith.divf %636, %639 : vector<8x8x1xf32>
    %641 = vector.broadcast %640 : vector<8x8x1xf32> to vector<8x8x256xf32>
    %642 = arith.mulf %641, %550 : vector<8x8x256xf32>
    %cst_193 = arith.constant dense<0.000000e+00> : vector<8x256xf32>
    %643 = vector.multi_reduction <add>, %642, %cst_193 [0] : vector<8x8x256xf32> to vector<8x256xf32>
    %c8_194 = arith.constant 8 : index
    %c0_195 = arith.constant 0 : index
    %644 = vector.load %arg22[%c8_194, %c0_195] : memref<64x384xf32, #tpu.memory_space<vmem>>, vector<8x384xf32>
    %cst_196 = arith.constant dense<0.000000e+00> : vector<8x384xf32>
    %645 = tpu.matmul %643, %559, %cst_196 {dimension_numbers = #tpu.dot_dimension_numbers<[1], [0], [0], [1], [0, 0, 1, 1], [], []>} : vector<8x256xf32>, vector<256x384xf32>, vector<8x384xf32> -> vector<8x384xf32>
    %646 = arith.addf %644, %645 : vector<8x384xf32>
    %cst_197 = arith.constant dense<0.000000e+00> : vector<8x384xf32>
    %647 = tpu.matmul %618, %560, %cst_197 {dimension_numbers = #tpu.dot_dimension_numbers<[1], [0], [0], [1], [0, 0, 1, 1], [], []>} : vector<8x128xf32>, vector<128x384xf32>, vector<8x384xf32> -> vector<8x384xf32>
    %648 = vector.extract_strided_slice %646 {offsets = [0, 0], sizes = [8, 128], strides = [1, 1]} : vector<8x384xf32> to vector<8x128xf32>
    %649 = vector.extract_strided_slice %647 {offsets = [0, 0], sizes = [8, 128], strides = [1, 1]} : vector<8x384xf32> to vector<8x128xf32>
    %650 = arith.addf %648, %649 : vector<8x128xf32>
    %651 = arith.negf %650 : vector<8x128xf32>
    %652 = math.exp %651 : vector<8x128xf32>
    %cst_198 = arith.constant 1.000000e+00 : f32
    %653 = vector.broadcast %cst_198 : f32 to vector<8x128xf32>
    %654 = arith.addf %653, %652 : vector<8x128xf32>
    %655 = arith.divf %653, %654 : vector<8x128xf32>
    %656 = vector.extract_strided_slice %646 {offsets = [0, 128], sizes = [8, 128], strides = [1, 1]} : vector<8x384xf32> to vector<8x128xf32>
    %657 = vector.extract_strided_slice %647 {offsets = [0, 128], sizes = [8, 128], strides = [1, 1]} : vector<8x384xf32> to vector<8x128xf32>
    %658 = arith.addf %656, %657 : vector<8x128xf32>
    %659 = arith.negf %658 : vector<8x128xf32>
    %660 = math.exp %659 : vector<8x128xf32>
    %cst_199 = arith.constant 1.000000e+00 : f32
    %661 = vector.broadcast %cst_199 : f32 to vector<8x128xf32>
    %662 = arith.addf %661, %660 : vector<8x128xf32>
    %663 = arith.divf %661, %662 : vector<8x128xf32>
    %664 = vector.extract_strided_slice %646 {offsets = [0, 256], sizes = [8, 128], strides = [1, 1]} : vector<8x384xf32> to vector<8x128xf32>
    %665 = vector.extract_strided_slice %647 {offsets = [0, 256], sizes = [8, 128], strides = [1, 1]} : vector<8x384xf32> to vector<8x128xf32>
    %666 = vector.broadcast %561 : vector<1x128xf32> to vector<8x128xf32>
    %667 = arith.addf %665, %666 : vector<8x128xf32>
    %668 = arith.mulf %655, %667 : vector<8x128xf32>
    %669 = arith.addf %664, %668 : vector<8x128xf32>
    %670 = math.tanh %669 : vector<8x128xf32>
    %cst_200 = arith.constant 1.000000e+00 : f32
    %671 = vector.broadcast %cst_200 : f32 to vector<8x128xf32>
    %672 = arith.subf %671, %663 : vector<8x128xf32>
    %673 = arith.mulf %672, %670 : vector<8x128xf32>
    %674 = arith.mulf %663, %618 : vector<8x128xf32>
    %675 = arith.addf %673, %674 : vector<8x128xf32>
    %c8_201 = arith.constant 8 : index
    %c0_202 = arith.constant 0 : index
    %676 = vector.load %arg23[%c8_201, %c0_202] : memref<64x128xf32, #tpu.memory_space<vmem>>, vector<8x128xf32>
    tpu.vector_store %arg23[%c8_201, %c0_202], %675 {strides = array<i32>} : memref<64x128xf32, #tpu.memory_space<vmem>>, vector<8x128xf32>,
    %677 = vector.broadcast %557 : vector<1x128xf32> to vector<8x128xf32>
    %678 = arith.mulf %675, %677 : vector<8x128xf32>
    %cst_203 = arith.constant dense<0.000000e+00> : vector<8xf32>
    %679 = vector.multi_reduction <add>, %678, %cst_203 [1] : vector<8x128xf32> to vector<8xf32>
    %680 = vector.shape_cast %679 : vector<8xf32> to vector<8x1xf32>
    %681 = vector.shape_cast %680 : vector<8x1xf32> to vector<1x8x1xf32>
    %682 = vector.broadcast %681 : vector<1x8x1xf32> to vector<8x8x1xf32>
    %683 = arith.addf %556, %682 : vector<8x8x1xf32>
    %684 = vector.shape_cast %558 : vector<1x1xf32> to vector<1x1x1xf32>
    %685 = vector.broadcast %684 : vector<1x1x1xf32> to vector<8x8x1xf32>
    %686 = arith.addf %683, %685 : vector<8x8x1xf32>
    %cst_204 = arith.constant dense<0xFF800000> : vector<8x1xf32>
    %687 = vector.multi_reduction <maximumf>, %686, %cst_204 [0] : vector<8x8x1xf32> to vector<8x1xf32>
    %cst_205 = arith.constant 0xFF800000 : f32
    %688 = vector.broadcast %cst_205 : f32 to vector<8x1xf32>
    %689 = arith.maximumf %688, %687 : vector<8x1xf32>
    %690 = vector.shape_cast %689 : vector<8x1xf32> to vector<1x8x1xf32>
    %691 = vector.broadcast %690 : vector<1x8x1xf32> to vector<8x8x1xf32>
    %692 = arith.subf %686, %691 : vector<8x8x1xf32>
    %693 = math.exp %692 : vector<8x8x1xf32>
    %cst_206 = arith.constant dense<0.000000e+00> : vector<8x1xf32>
    %694 = vector.multi_reduction <add>, %693, %cst_206 [0] : vector<8x8x1xf32> to vector<8x1xf32>
    %695 = vector.shape_cast %694 : vector<8x1xf32> to vector<1x8x1xf32>
    %696 = vector.broadcast %695 : vector<1x8x1xf32> to vector<8x8x1xf32>
    %697 = arith.divf %693, %696 : vector<8x8x1xf32>
    %698 = vector.broadcast %697 : vector<8x8x1xf32> to vector<8x8x256xf32>
    %699 = arith.mulf %698, %550 : vector<8x8x256xf32>
    %cst_207 = arith.constant dense<0.000000e+00> : vector<8x256xf32>
    %700 = vector.multi_reduction <add>, %699, %cst_207 [0] : vector<8x8x256xf32> to vector<8x256xf32>
    %c16_208 = arith.constant 16 : index
    %c0_209 = arith.constant 0 : index
    %701 = vector.load %arg22[%c16_208, %c0_209] : memref<64x384xf32, #tpu.memory_space<vmem>>, vector<8x384xf32>
    %cst_210 = arith.constant dense<0.000000e+00> : vector<8x384xf32>
    %702 = tpu.matmul %700, %559, %cst_210 {dimension_numbers = #tpu.dot_dimension_numbers<[1], [0], [0], [1], [0, 0, 1, 1], [], []>} : vector<8x256xf32>, vector<256x384xf32>, vector<8x384xf32> -> vector<8x384xf32>
    %703 = arith.addf %701, %702 : vector<8x384xf32>
    %cst_211 = arith.constant dense<0.000000e+00> : vector<8x384xf32>
    %704 = tpu.matmul %675, %560, %cst_211 {dimension_numbers = #tpu.dot_dimension_numbers<[1], [0], [0], [1], [0, 0, 1, 1], [], []>} : vector<8x128xf32>, vector<128x384xf32>, vector<8x384xf32> -> vector<8x384xf32>
    %705 = vector.extract_strided_slice %703 {offsets = [0, 0], sizes = [8, 128], strides = [1, 1]} : vector<8x384xf32> to vector<8x128xf32>
    %706 = vector.extract_strided_slice %704 {offsets = [0, 0], sizes = [8, 128], strides = [1, 1]} : vector<8x384xf32> to vector<8x128xf32>
    %707 = arith.addf %705, %706 : vector<8x128xf32>
    %708 = arith.negf %707 : vector<8x128xf32>
    %709 = math.exp %708 : vector<8x128xf32>
    %cst_212 = arith.constant 1.000000e+00 : f32
    %710 = vector.broadcast %cst_212 : f32 to vector<8x128xf32>
    %711 = arith.addf %710, %709 : vector<8x128xf32>
    %712 = arith.divf %710, %711 : vector<8x128xf32>
    %713 = vector.extract_strided_slice %703 {offsets = [0, 128], sizes = [8, 128], strides = [1, 1]} : vector<8x384xf32> to vector<8x128xf32>
    %714 = vector.extract_strided_slice %704 {offsets = [0, 128], sizes = [8, 128], strides = [1, 1]} : vector<8x384xf32> to vector<8x128xf32>
    %715 = arith.addf %713, %714 : vector<8x128xf32>
    %716 = arith.negf %715 : vector<8x128xf32>
    %717 = math.exp %716 : vector<8x128xf32>
    %cst_213 = arith.constant 1.000000e+00 : f32
    %718 = vector.broadcast %cst_213 : f32 to vector<8x128xf32>
    %719 = arith.addf %718, %717 : vector<8x128xf32>
    %720 = arith.divf %718, %719 : vector<8x128xf32>
    %721 = vector.extract_strided_slice %703 {offsets = [0, 256], sizes = [8, 128], strides = [1, 1]} : vector<8x384xf32> to vector<8x128xf32>
    %722 = vector.extract_strided_slice %704 {offsets = [0, 256], sizes = [8, 128], strides = [1, 1]} : vector<8x384xf32> to vector<8x128xf32>
    %723 = vector.broadcast %561 : vector<1x128xf32> to vector<8x128xf32>
    %724 = arith.addf %722, %723 : vector<8x128xf32>
    %725 = arith.mulf %712, %724 : vector<8x128xf32>
    %726 = arith.addf %721, %725 : vector<8x128xf32>
    %727 = math.tanh %726 : vector<8x128xf32>
    %cst_214 = arith.constant 1.000000e+00 : f32
    %728 = vector.broadcast %cst_214 : f32 to vector<8x128xf32>
    %729 = arith.subf %728, %720 : vector<8x128xf32>
    %730 = arith.mulf %729, %727 : vector<8x128xf32>
    %731 = arith.mulf %720, %675 : vector<8x128xf32>
    %732 = arith.addf %730, %731 : vector<8x128xf32>
    %c16_215 = arith.constant 16 : index
    %c0_216 = arith.constant 0 : index
    %733 = vector.load %arg23[%c16_215, %c0_216] : memref<64x128xf32, #tpu.memory_space<vmem>>, vector<8x128xf32>
    tpu.vector_store %arg23[%c16_215, %c0_216], %732 {strides = array<i32>} : memref<64x128xf32, #tpu.memory_space<vmem>>, vector<8x128xf32>,
    %734 = vector.broadcast %557 : vector<1x128xf32> to vector<8x128xf32>
    %735 = arith.mulf %732, %734 : vector<8x128xf32>
    %cst_217 = arith.constant dense<0.000000e+00> : vector<8xf32>
    %736 = vector.multi_reduction <add>, %735, %cst_217 [1] : vector<8x128xf32> to vector<8xf32>
    %737 = vector.shape_cast %736 : vector<8xf32> to vector<8x1xf32>
    %738 = vector.shape_cast %737 : vector<8x1xf32> to vector<1x8x1xf32>
    %739 = vector.broadcast %738 : vector<1x8x1xf32> to vector<8x8x1xf32>
    %740 = arith.addf %556, %739 : vector<8x8x1xf32>
    %741 = vector.shape_cast %558 : vector<1x1xf32> to vector<1x1x1xf32>
    %742 = vector.broadcast %741 : vector<1x1x1xf32> to vector<8x8x1xf32>
    %743 = arith.addf %740, %742 : vector<8x8x1xf32>
    %cst_218 = arith.constant dense<0xFF800000> : vector<8x1xf32>
    %744 = vector.multi_reduction <maximumf>, %743, %cst_218 [0] : vector<8x8x1xf32> to vector<8x1xf32>
    %cst_219 = arith.constant 0xFF800000 : f32
    %745 = vector.broadcast %cst_219 : f32 to vector<8x1xf32>
    %746 = arith.maximumf %745, %744 : vector<8x1xf32>
    %747 = vector.shape_cast %746 : vector<8x1xf32> to vector<1x8x1xf32>
    %748 = vector.broadcast %747 : vector<1x8x1xf32> to vector<8x8x1xf32>
    %749 = arith.subf %743, %748 : vector<8x8x1xf32>
    %750 = math.exp %749 : vector<8x8x1xf32>
    %cst_220 = arith.constant dense<0.000000e+00> : vector<8x1xf32>
    %751 = vector.multi_reduction <add>, %750, %cst_220 [0] : vector<8x8x1xf32> to vector<8x1xf32>
    %752 = vector.shape_cast %751 : vector<8x1xf32> to vector<1x8x1xf32>
    %753 = vector.broadcast %752 : vector<1x8x1xf32> to vector<8x8x1xf32>
    %754 = arith.divf %750, %753 : vector<8x8x1xf32>
    %755 = vector.broadcast %754 : vector<8x8x1xf32> to vector<8x8x256xf32>
    %756 = arith.mulf %755, %550 : vector<8x8x256xf32>
    %cst_221 = arith.constant dense<0.000000e+00> : vector<8x256xf32>
    %757 = vector.multi_reduction <add>, %756, %cst_221 [0] : vector<8x8x256xf32> to vector<8x256xf32>
    %c24_222 = arith.constant 24 : index
    %c0_223 = arith.constant 0 : index
    %758 = vector.load %arg22[%c24_222, %c0_223] : memref<64x384xf32, #tpu.memory_space<vmem>>, vector<8x384xf32>
    %cst_224 = arith.constant dense<0.000000e+00> : vector<8x384xf32>
    %759 = tpu.matmul %757, %559, %cst_224 {dimension_numbers = #tpu.dot_dimension_numbers<[1], [0], [0], [1], [0, 0, 1, 1], [], []>} : vector<8x256xf32>, vector<256x384xf32>, vector<8x384xf32> -> vector<8x384xf32>
    %760 = arith.addf %758, %759 : vector<8x384xf32>
    %cst_225 = arith.constant dense<0.000000e+00> : vector<8x384xf32>
    %761 = tpu.matmul %732, %560, %cst_225 {dimension_numbers = #tpu.dot_dimension_numbers<[1], [0], [0], [1], [0, 0, 1, 1], [], []>} : vector<8x128xf32>, vector<128x384xf32>, vector<8x384xf32> -> vector<8x384xf32>
    %762 = vector.extract_strided_slice %760 {offsets = [0, 0], sizes = [8, 128], strides = [1, 1]} : vector<8x384xf32> to vector<8x128xf32>
    %763 = vector.extract_strided_slice %761 {offsets = [0, 0], sizes = [8, 128], strides = [1, 1]} : vector<8x384xf32> to vector<8x128xf32>
    %764 = arith.addf %762, %763 : vector<8x128xf32>
    %765 = arith.negf %764 : vector<8x128xf32>
    %766 = math.exp %765 : vector<8x128xf32>
    %cst_226 = arith.constant 1.000000e+00 : f32
    %767 = vector.broadcast %cst_226 : f32 to vector<8x128xf32>
    %768 = arith.addf %767, %766 : vector<8x128xf32>
    %769 = arith.divf %767, %768 : vector<8x128xf32>
    %770 = vector.extract_strided_slice %760 {offsets = [0, 128], sizes = [8, 128], strides = [1, 1]} : vector<8x384xf32> to vector<8x128xf32>
    %771 = vector.extract_strided_slice %761 {offsets = [0, 128], sizes = [8, 128], strides = [1, 1]} : vector<8x384xf32> to vector<8x128xf32>
    %772 = arith.addf %770, %771 : vector<8x128xf32>
    %773 = arith.negf %772 : vector<8x128xf32>
    %774 = math.exp %773 : vector<8x128xf32>
    %cst_227 = arith.constant 1.000000e+00 : f32
    %775 = vector.broadcast %cst_227 : f32 to vector<8x128xf32>
    %776 = arith.addf %775, %774 : vector<8x128xf32>
    %777 = arith.divf %775, %776 : vector<8x128xf32>
    %778 = vector.extract_strided_slice %760 {offsets = [0, 256], sizes = [8, 128], strides = [1, 1]} : vector<8x384xf32> to vector<8x128xf32>
    %779 = vector.extract_strided_slice %761 {offsets = [0, 256], sizes = [8, 128], strides = [1, 1]} : vector<8x384xf32> to vector<8x128xf32>
    %780 = vector.broadcast %561 : vector<1x128xf32> to vector<8x128xf32>
    %781 = arith.addf %779, %780 : vector<8x128xf32>
    %782 = arith.mulf %769, %781 : vector<8x128xf32>
    %783 = arith.addf %778, %782 : vector<8x128xf32>
    %784 = math.tanh %783 : vector<8x128xf32>
    %cst_228 = arith.constant 1.000000e+00 : f32
    %785 = vector.broadcast %cst_228 : f32 to vector<8x128xf32>
    %786 = arith.subf %785, %777 : vector<8x128xf32>
    %787 = arith.mulf %786, %784 : vector<8x128xf32>
    %788 = arith.mulf %777, %732 : vector<8x128xf32>
    %789 = arith.addf %787, %788 : vector<8x128xf32>
    %c24_229 = arith.constant 24 : index
    %c0_230 = arith.constant 0 : index
    %790 = vector.load %arg23[%c24_229, %c0_230] : memref<64x128xf32, #tpu.memory_space<vmem>>, vector<8x128xf32>
    tpu.vector_store %arg23[%c24_229, %c0_230], %789 {strides = array<i32>} : memref<64x128xf32, #tpu.memory_space<vmem>>, vector<8x128xf32>,
    %791 = vector.broadcast %557 : vector<1x128xf32> to vector<8x128xf32>
    %792 = arith.mulf %789, %791 : vector<8x128xf32>
    %cst_231 = arith.constant dense<0.000000e+00> : vector<8xf32>
    %793 = vector.multi_reduction <add>, %792, %cst_231 [1] : vector<8x128xf32> to vector<8xf32>
    %794 = vector.shape_cast %793 : vector<8xf32> to vector<8x1xf32>
    %795 = vector.shape_cast %794 : vector<8x1xf32> to vector<1x8x1xf32>
    %796 = vector.broadcast %795 : vector<1x8x1xf32> to vector<8x8x1xf32>
    %797 = arith.addf %556, %796 : vector<8x8x1xf32>
    %798 = vector.shape_cast %558 : vector<1x1xf32> to vector<1x1x1xf32>
    %799 = vector.broadcast %798 : vector<1x1x1xf32> to vector<8x8x1xf32>
    %800 = arith.addf %797, %799 : vector<8x8x1xf32>
    %cst_232 = arith.constant dense<0xFF800000> : vector<8x1xf32>
    %801 = vector.multi_reduction <maximumf>, %800, %cst_232 [0] : vector<8x8x1xf32> to vector<8x1xf32>
    %cst_233 = arith.constant 0xFF800000 : f32
    %802 = vector.broadcast %cst_233 : f32 to vector<8x1xf32>
    %803 = arith.maximumf %802, %801 : vector<8x1xf32>
    %804 = vector.shape_cast %803 : vector<8x1xf32> to vector<1x8x1xf32>
    %805 = vector.broadcast %804 : vector<1x8x1xf32> to vector<8x8x1xf32>
    %806 = arith.subf %800, %805 : vector<8x8x1xf32>
    %807 = math.exp %806 : vector<8x8x1xf32>
    %cst_234 = arith.constant dense<0.000000e+00> : vector<8x1xf32>
    %808 = vector.multi_reduction <add>, %807, %cst_234 [0] : vector<8x8x1xf32> to vector<8x1xf32>
    %809 = vector.shape_cast %808 : vector<8x1xf32> to vector<1x8x1xf32>
    %810 = vector.broadcast %809 : vector<1x8x1xf32> to vector<8x8x1xf32>
    %811 = arith.divf %807, %810 : vector<8x8x1xf32>
    %812 = vector.broadcast %811 : vector<8x8x1xf32> to vector<8x8x256xf32>
    %813 = arith.mulf %812, %550 : vector<8x8x256xf32>
    %cst_235 = arith.constant dense<0.000000e+00> : vector<8x256xf32>
    %814 = vector.multi_reduction <add>, %813, %cst_235 [0] : vector<8x8x256xf32> to vector<8x256xf32>
    %c32_236 = arith.constant 32 : index
    %c0_237 = arith.constant 0 : index
    %815 = vector.load %arg22[%c32_236, %c0_237] : memref<64x384xf32, #tpu.memory_space<vmem>>, vector<8x384xf32>
    %cst_238 = arith.constant dense<0.000000e+00> : vector<8x384xf32>
    %816 = tpu.matmul %814, %559, %cst_238 {dimension_numbers = #tpu.dot_dimension_numbers<[1], [0], [0], [1], [0, 0, 1, 1], [], []>} : vector<8x256xf32>, vector<256x384xf32>, vector<8x384xf32> -> vector<8x384xf32>
    %817 = arith.addf %815, %816 : vector<8x384xf32>
    %cst_239 = arith.constant dense<0.000000e+00> : vector<8x384xf32>
    %818 = tpu.matmul %789, %560, %cst_239 {dimension_numbers = #tpu.dot_dimension_numbers<[1], [0], [0], [1], [0, 0, 1, 1], [], []>} : vector<8x128xf32>, vector<128x384xf32>, vector<8x384xf32> -> vector<8x384xf32>
    %819 = vector.extract_strided_slice %817 {offsets = [0, 0], sizes = [8, 128], strides = [1, 1]} : vector<8x384xf32> to vector<8x128xf32>
    %820 = vector.extract_strided_slice %818 {offsets = [0, 0], sizes = [8, 128], strides = [1, 1]} : vector<8x384xf32> to vector<8x128xf32>
    %821 = arith.addf %819, %820 : vector<8x128xf32>
    %822 = arith.negf %821 : vector<8x128xf32>
    %823 = math.exp %822 : vector<8x128xf32>
    %cst_240 = arith.constant 1.000000e+00 : f32
    %824 = vector.broadcast %cst_240 : f32 to vector<8x128xf32>
    %825 = arith.addf %824, %823 : vector<8x128xf32>
    %826 = arith.divf %824, %825 : vector<8x128xf32>
    %827 = vector.extract_strided_slice %817 {offsets = [0, 128], sizes = [8, 128], strides = [1, 1]} : vector<8x384xf32> to vector<8x128xf32>
    %828 = vector.extract_strided_slice %818 {offsets = [0, 128], sizes = [8, 128], strides = [1, 1]} : vector<8x384xf32> to vector<8x128xf32>
    %829 = arith.addf %827, %828 : vector<8x128xf32>
    %830 = arith.negf %829 : vector<8x128xf32>
    %831 = math.exp %830 : vector<8x128xf32>
    %cst_241 = arith.constant 1.000000e+00 : f32
    %832 = vector.broadcast %cst_241 : f32 to vector<8x128xf32>
    %833 = arith.addf %832, %831 : vector<8x128xf32>
    %834 = arith.divf %832, %833 : vector<8x128xf32>
    %835 = vector.extract_strided_slice %817 {offsets = [0, 256], sizes = [8, 128], strides = [1, 1]} : vector<8x384xf32> to vector<8x128xf32>
    %836 = vector.extract_strided_slice %818 {offsets = [0, 256], sizes = [8, 128], strides = [1, 1]} : vector<8x384xf32> to vector<8x128xf32>
    %837 = vector.broadcast %561 : vector<1x128xf32> to vector<8x128xf32>
    %838 = arith.addf %836, %837 : vector<8x128xf32>
    %839 = arith.mulf %826, %838 : vector<8x128xf32>
    %840 = arith.addf %835, %839 : vector<8x128xf32>
    %841 = math.tanh %840 : vector<8x128xf32>
    %cst_242 = arith.constant 1.000000e+00 : f32
    %842 = vector.broadcast %cst_242 : f32 to vector<8x128xf32>
    %843 = arith.subf %842, %834 : vector<8x128xf32>
    %844 = arith.mulf %843, %841 : vector<8x128xf32>
    %845 = arith.mulf %834, %789 : vector<8x128xf32>
    %846 = arith.addf %844, %845 : vector<8x128xf32>
    %c32_243 = arith.constant 32 : index
    %c0_244 = arith.constant 0 : index
    %847 = vector.load %arg23[%c32_243, %c0_244] : memref<64x128xf32, #tpu.memory_space<vmem>>, vector<8x128xf32>
    tpu.vector_store %arg23[%c32_243, %c0_244], %846 {strides = array<i32>} : memref<64x128xf32, #tpu.memory_space<vmem>>, vector<8x128xf32>,
    %848 = vector.broadcast %557 : vector<1x128xf32> to vector<8x128xf32>
    %849 = arith.mulf %846, %848 : vector<8x128xf32>
    %cst_245 = arith.constant dense<0.000000e+00> : vector<8xf32>
    %850 = vector.multi_reduction <add>, %849, %cst_245 [1] : vector<8x128xf32> to vector<8xf32>
    %851 = vector.shape_cast %850 : vector<8xf32> to vector<8x1xf32>
    %852 = vector.shape_cast %851 : vector<8x1xf32> to vector<1x8x1xf32>
    %853 = vector.broadcast %852 : vector<1x8x1xf32> to vector<8x8x1xf32>
    %854 = arith.addf %556, %853 : vector<8x8x1xf32>
    %855 = vector.shape_cast %558 : vector<1x1xf32> to vector<1x1x1xf32>
    %856 = vector.broadcast %855 : vector<1x1x1xf32> to vector<8x8x1xf32>
    %857 = arith.addf %854, %856 : vector<8x8x1xf32>
    %cst_246 = arith.constant dense<0xFF800000> : vector<8x1xf32>
    %858 = vector.multi_reduction <maximumf>, %857, %cst_246 [0] : vector<8x8x1xf32> to vector<8x1xf32>
    %cst_247 = arith.constant 0xFF800000 : f32
    %859 = vector.broadcast %cst_247 : f32 to vector<8x1xf32>
    %860 = arith.maximumf %859, %858 : vector<8x1xf32>
    %861 = vector.shape_cast %860 : vector<8x1xf32> to vector<1x8x1xf32>
    %862 = vector.broadcast %861 : vector<1x8x1xf32> to vector<8x8x1xf32>
    %863 = arith.subf %857, %862 : vector<8x8x1xf32>
    %864 = math.exp %863 : vector<8x8x1xf32>
    %cst_248 = arith.constant dense<0.000000e+00> : vector<8x1xf32>
    %865 = vector.multi_reduction <add>, %864, %cst_248 [0] : vector<8x8x1xf32> to vector<8x1xf32>
    %866 = vector.shape_cast %865 : vector<8x1xf32> to vector<1x8x1xf32>
    %867 = vector.broadcast %866 : vector<1x8x1xf32> to vector<8x8x1xf32>
    %868 = arith.divf %864, %867 : vector<8x8x1xf32>
    %869 = vector.broadcast %868 : vector<8x8x1xf32> to vector<8x8x256xf32>
    %870 = arith.mulf %869, %550 : vector<8x8x256xf32>
    %cst_249 = arith.constant dense<0.000000e+00> : vector<8x256xf32>
    %871 = vector.multi_reduction <add>, %870, %cst_249 [0] : vector<8x8x256xf32> to vector<8x256xf32>
    %c40_250 = arith.constant 40 : index
    %c0_251 = arith.constant 0 : index
    %872 = vector.load %arg22[%c40_250, %c0_251] : memref<64x384xf32, #tpu.memory_space<vmem>>, vector<8x384xf32>
    %cst_252 = arith.constant dense<0.000000e+00> : vector<8x384xf32>
    %873 = tpu.matmul %871, %559, %cst_252 {dimension_numbers = #tpu.dot_dimension_numbers<[1], [0], [0], [1], [0, 0, 1, 1], [], []>} : vector<8x256xf32>, vector<256x384xf32>, vector<8x384xf32> -> vector<8x384xf32>
    %874 = arith.addf %872, %873 : vector<8x384xf32>
    %cst_253 = arith.constant dense<0.000000e+00> : vector<8x384xf32>
    %875 = tpu.matmul %846, %560, %cst_253 {dimension_numbers = #tpu.dot_dimension_numbers<[1], [0], [0], [1], [0, 0, 1, 1], [], []>} : vector<8x128xf32>, vector<128x384xf32>, vector<8x384xf32> -> vector<8x384xf32>
    %876 = vector.extract_strided_slice %874 {offsets = [0, 0], sizes = [8, 128], strides = [1, 1]} : vector<8x384xf32> to vector<8x128xf32>
    %877 = vector.extract_strided_slice %875 {offsets = [0, 0], sizes = [8, 128], strides = [1, 1]} : vector<8x384xf32> to vector<8x128xf32>
    %878 = arith.addf %876, %877 : vector<8x128xf32>
    %879 = arith.negf %878 : vector<8x128xf32>
    %880 = math.exp %879 : vector<8x128xf32>
    %cst_254 = arith.constant 1.000000e+00 : f32
    %881 = vector.broadcast %cst_254 : f32 to vector<8x128xf32>
    %882 = arith.addf %881, %880 : vector<8x128xf32>
    %883 = arith.divf %881, %882 : vector<8x128xf32>
    %884 = vector.extract_strided_slice %874 {offsets = [0, 128], sizes = [8, 128], strides = [1, 1]} : vector<8x384xf32> to vector<8x128xf32>
    %885 = vector.extract_strided_slice %875 {offsets = [0, 128], sizes = [8, 128], strides = [1, 1]} : vector<8x384xf32> to vector<8x128xf32>
    %886 = arith.addf %884, %885 : vector<8x128xf32>
    %887 = arith.negf %886 : vector<8x128xf32>
    %888 = math.exp %887 : vector<8x128xf32>
    %cst_255 = arith.constant 1.000000e+00 : f32
    %889 = vector.broadcast %cst_255 : f32 to vector<8x128xf32>
    %890 = arith.addf %889, %888 : vector<8x128xf32>
    %891 = arith.divf %889, %890 : vector<8x128xf32>
    %892 = vector.extract_strided_slice %874 {offsets = [0, 256], sizes = [8, 128], strides = [1, 1]} : vector<8x384xf32> to vector<8x128xf32>
    %893 = vector.extract_strided_slice %875 {offsets = [0, 256], sizes = [8, 128], strides = [1, 1]} : vector<8x384xf32> to vector<8x128xf32>
    %894 = vector.broadcast %561 : vector<1x128xf32> to vector<8x128xf32>
    %895 = arith.addf %893, %894 : vector<8x128xf32>
    %896 = arith.mulf %883, %895 : vector<8x128xf32>
    %897 = arith.addf %892, %896 : vector<8x128xf32>
    %898 = math.tanh %897 : vector<8x128xf32>
    %cst_256 = arith.constant 1.000000e+00 : f32
    %899 = vector.broadcast %cst_256 : f32 to vector<8x128xf32>
    %900 = arith.subf %899, %891 : vector<8x128xf32>
    %901 = arith.mulf %900, %898 : vector<8x128xf32>
    %902 = arith.mulf %891, %846 : vector<8x128xf32>
    %903 = arith.addf %901, %902 : vector<8x128xf32>
    %c40_257 = arith.constant 40 : index
    %c0_258 = arith.constant 0 : index
    %904 = vector.load %arg23[%c40_257, %c0_258] : memref<64x128xf32, #tpu.memory_space<vmem>>, vector<8x128xf32>
    tpu.vector_store %arg23[%c40_257, %c0_258], %903 {strides = array<i32>} : memref<64x128xf32, #tpu.memory_space<vmem>>, vector<8x128xf32>,
    %905 = vector.broadcast %557 : vector<1x128xf32> to vector<8x128xf32>
    %906 = arith.mulf %903, %905 : vector<8x128xf32>
    %cst_259 = arith.constant dense<0.000000e+00> : vector<8xf32>
    %907 = vector.multi_reduction <add>, %906, %cst_259 [1] : vector<8x128xf32> to vector<8xf32>
    %908 = vector.shape_cast %907 : vector<8xf32> to vector<8x1xf32>
    %909 = vector.shape_cast %908 : vector<8x1xf32> to vector<1x8x1xf32>
    %910 = vector.broadcast %909 : vector<1x8x1xf32> to vector<8x8x1xf32>
    %911 = arith.addf %556, %910 : vector<8x8x1xf32>
    %912 = vector.shape_cast %558 : vector<1x1xf32> to vector<1x1x1xf32>
    %913 = vector.broadcast %912 : vector<1x1x1xf32> to vector<8x8x1xf32>
    %914 = arith.addf %911, %913 : vector<8x8x1xf32>
    %cst_260 = arith.constant dense<0xFF800000> : vector<8x1xf32>
    %915 = vector.multi_reduction <maximumf>, %914, %cst_260 [0] : vector<8x8x1xf32> to vector<8x1xf32>
    %cst_261 = arith.constant 0xFF800000 : f32
    %916 = vector.broadcast %cst_261 : f32 to vector<8x1xf32>
    %917 = arith.maximumf %916, %915 : vector<8x1xf32>
    %918 = vector.shape_cast %917 : vector<8x1xf32> to vector<1x8x1xf32>
    %919 = vector.broadcast %918 : vector<1x8x1xf32> to vector<8x8x1xf32>
    %920 = arith.subf %914, %919 : vector<8x8x1xf32>
    %921 = math.exp %920 : vector<8x8x1xf32>
    %cst_262 = arith.constant dense<0.000000e+00> : vector<8x1xf32>
    %922 = vector.multi_reduction <add>, %921, %cst_262 [0] : vector<8x8x1xf32> to vector<8x1xf32>
    %923 = vector.shape_cast %922 : vector<8x1xf32> to vector<1x8x1xf32>
    %924 = vector.broadcast %923 : vector<1x8x1xf32> to vector<8x8x1xf32>
    %925 = arith.divf %921, %924 : vector<8x8x1xf32>
    %926 = vector.broadcast %925 : vector<8x8x1xf32> to vector<8x8x256xf32>
    %927 = arith.mulf %926, %550 : vector<8x8x256xf32>
    %cst_263 = arith.constant dense<0.000000e+00> : vector<8x256xf32>
    %928 = vector.multi_reduction <add>, %927, %cst_263 [0] : vector<8x8x256xf32> to vector<8x256xf32>
    %c48_264 = arith.constant 48 : index
    %c0_265 = arith.constant 0 : index
    %929 = vector.load %arg22[%c48_264, %c0_265] : memref<64x384xf32, #tpu.memory_space<vmem>>, vector<8x384xf32>
    %cst_266 = arith.constant dense<0.000000e+00> : vector<8x384xf32>
    %930 = tpu.matmul %928, %559, %cst_266 {dimension_numbers = #tpu.dot_dimension_numbers<[1], [0], [0], [1], [0, 0, 1, 1], [], []>} : vector<8x256xf32>, vector<256x384xf32>, vector<8x384xf32> -> vector<8x384xf32>
    %931 = arith.addf %929, %930 : vector<8x384xf32>
    %cst_267 = arith.constant dense<0.000000e+00> : vector<8x384xf32>
    %932 = tpu.matmul %903, %560, %cst_267 {dimension_numbers = #tpu.dot_dimension_numbers<[1], [0], [0], [1], [0, 0, 1, 1], [], []>} : vector<8x128xf32>, vector<128x384xf32>, vector<8x384xf32> -> vector<8x384xf32>
    %933 = vector.extract_strided_slice %931 {offsets = [0, 0], sizes = [8, 128], strides = [1, 1]} : vector<8x384xf32> to vector<8x128xf32>
    %934 = vector.extract_strided_slice %932 {offsets = [0, 0], sizes = [8, 128], strides = [1, 1]} : vector<8x384xf32> to vector<8x128xf32>
    %935 = arith.addf %933, %934 : vector<8x128xf32>
    %936 = arith.negf %935 : vector<8x128xf32>
    %937 = math.exp %936 : vector<8x128xf32>
    %cst_268 = arith.constant 1.000000e+00 : f32
    %938 = vector.broadcast %cst_268 : f32 to vector<8x128xf32>
    %939 = arith.addf %938, %937 : vector<8x128xf32>
    %940 = arith.divf %938, %939 : vector<8x128xf32>
    %941 = vector.extract_strided_slice %931 {offsets = [0, 128], sizes = [8, 128], strides = [1, 1]} : vector<8x384xf32> to vector<8x128xf32>
    %942 = vector.extract_strided_slice %932 {offsets = [0, 128], sizes = [8, 128], strides = [1, 1]} : vector<8x384xf32> to vector<8x128xf32>
    %943 = arith.addf %941, %942 : vector<8x128xf32>
    %944 = arith.negf %943 : vector<8x128xf32>
    %945 = math.exp %944 : vector<8x128xf32>
    %cst_269 = arith.constant 1.000000e+00 : f32
    %946 = vector.broadcast %cst_269 : f32 to vector<8x128xf32>
    %947 = arith.addf %946, %945 : vector<8x128xf32>
    %948 = arith.divf %946, %947 : vector<8x128xf32>
    %949 = vector.extract_strided_slice %931 {offsets = [0, 256], sizes = [8, 128], strides = [1, 1]} : vector<8x384xf32> to vector<8x128xf32>
    %950 = vector.extract_strided_slice %932 {offsets = [0, 256], sizes = [8, 128], strides = [1, 1]} : vector<8x384xf32> to vector<8x128xf32>
    %951 = vector.broadcast %561 : vector<1x128xf32> to vector<8x128xf32>
    %952 = arith.addf %950, %951 : vector<8x128xf32>
    %953 = arith.mulf %940, %952 : vector<8x128xf32>
    %954 = arith.addf %949, %953 : vector<8x128xf32>
    %955 = math.tanh %954 : vector<8x128xf32>
    %cst_270 = arith.constant 1.000000e+00 : f32
    %956 = vector.broadcast %cst_270 : f32 to vector<8x128xf32>
    %957 = arith.subf %956, %948 : vector<8x128xf32>
    %958 = arith.mulf %957, %955 : vector<8x128xf32>
    %959 = arith.mulf %948, %903 : vector<8x128xf32>
    %960 = arith.addf %958, %959 : vector<8x128xf32>
    %c48_271 = arith.constant 48 : index
    %c0_272 = arith.constant 0 : index
    %961 = vector.load %arg23[%c48_271, %c0_272] : memref<64x128xf32, #tpu.memory_space<vmem>>, vector<8x128xf32>
    tpu.vector_store %arg23[%c48_271, %c0_272], %960 {strides = array<i32>} : memref<64x128xf32, #tpu.memory_space<vmem>>, vector<8x128xf32>,
    %962 = vector.broadcast %557 : vector<1x128xf32> to vector<8x128xf32>
    %963 = arith.mulf %960, %962 : vector<8x128xf32>
    %cst_273 = arith.constant dense<0.000000e+00> : vector<8xf32>
    %964 = vector.multi_reduction <add>, %963, %cst_273 [1] : vector<8x128xf32> to vector<8xf32>
    %965 = vector.shape_cast %964 : vector<8xf32> to vector<8x1xf32>
    %966 = vector.shape_cast %965 : vector<8x1xf32> to vector<1x8x1xf32>
    %967 = vector.broadcast %966 : vector<1x8x1xf32> to vector<8x8x1xf32>
    %968 = arith.addf %556, %967 : vector<8x8x1xf32>
    %969 = vector.shape_cast %558 : vector<1x1xf32> to vector<1x1x1xf32>
    %970 = vector.broadcast %969 : vector<1x1x1xf32> to vector<8x8x1xf32>
    %971 = arith.addf %968, %970 : vector<8x8x1xf32>
    %cst_274 = arith.constant dense<0xFF800000> : vector<8x1xf32>
    %972 = vector.multi_reduction <maximumf>, %971, %cst_274 [0] : vector<8x8x1xf32> to vector<8x1xf32>
    %cst_275 = arith.constant 0xFF800000 : f32
    %973 = vector.broadcast %cst_275 : f32 to vector<8x1xf32>
    %974 = arith.maximumf %973, %972 : vector<8x1xf32>
    %975 = vector.shape_cast %974 : vector<8x1xf32> to vector<1x8x1xf32>
    %976 = vector.broadcast %975 : vector<1x8x1xf32> to vector<8x8x1xf32>
    %977 = arith.subf %971, %976 : vector<8x8x1xf32>
    %978 = math.exp %977 : vector<8x8x1xf32>
    %cst_276 = arith.constant dense<0.000000e+00> : vector<8x1xf32>
    %979 = vector.multi_reduction <add>, %978, %cst_276 [0] : vector<8x8x1xf32> to vector<8x1xf32>
    %980 = vector.shape_cast %979 : vector<8x1xf32> to vector<1x8x1xf32>
    %981 = vector.broadcast %980 : vector<1x8x1xf32> to vector<8x8x1xf32>
    %982 = arith.divf %978, %981 : vector<8x8x1xf32>
    %983 = vector.broadcast %982 : vector<8x8x1xf32> to vector<8x8x256xf32>
    %984 = arith.mulf %983, %550 : vector<8x8x256xf32>
    %cst_277 = arith.constant dense<0.000000e+00> : vector<8x256xf32>
    %985 = vector.multi_reduction <add>, %984, %cst_277 [0] : vector<8x8x256xf32> to vector<8x256xf32>
    %c56_278 = arith.constant 56 : index
    %c0_279 = arith.constant 0 : index
    %986 = vector.load %arg22[%c56_278, %c0_279] : memref<64x384xf32, #tpu.memory_space<vmem>>, vector<8x384xf32>
    %cst_280 = arith.constant dense<0.000000e+00> : vector<8x384xf32>
    %987 = tpu.matmul %985, %559, %cst_280 {dimension_numbers = #tpu.dot_dimension_numbers<[1], [0], [0], [1], [0, 0, 1, 1], [], []>} : vector<8x256xf32>, vector<256x384xf32>, vector<8x384xf32> -> vector<8x384xf32>
    %988 = arith.addf %986, %987 : vector<8x384xf32>
    %cst_281 = arith.constant dense<0.000000e+00> : vector<8x384xf32>
    %989 = tpu.matmul %960, %560, %cst_281 {dimension_numbers = #tpu.dot_dimension_numbers<[1], [0], [0], [1], [0, 0, 1, 1], [], []>} : vector<8x128xf32>, vector<128x384xf32>, vector<8x384xf32> -> vector<8x384xf32>
    %990 = vector.extract_strided_slice %988 {offsets = [0, 0], sizes = [8, 128], strides = [1, 1]} : vector<8x384xf32> to vector<8x128xf32>
    %991 = vector.extract_strided_slice %989 {offsets = [0, 0], sizes = [8, 128], strides = [1, 1]} : vector<8x384xf32> to vector<8x128xf32>
    %992 = arith.addf %990, %991 : vector<8x128xf32>
    %993 = arith.negf %992 : vector<8x128xf32>
    %994 = math.exp %993 : vector<8x128xf32>
    %cst_282 = arith.constant 1.000000e+00 : f32
    %995 = vector.broadcast %cst_282 : f32 to vector<8x128xf32>
    %996 = arith.addf %995, %994 : vector<8x128xf32>
    %997 = arith.divf %995, %996 : vector<8x128xf32>
    %998 = vector.extract_strided_slice %988 {offsets = [0, 128], sizes = [8, 128], strides = [1, 1]} : vector<8x384xf32> to vector<8x128xf32>
    %999 = vector.extract_strided_slice %989 {offsets = [0, 128], sizes = [8, 128], strides = [1, 1]} : vector<8x384xf32> to vector<8x128xf32>
    %1000 = arith.addf %998, %999 : vector<8x128xf32>
    %1001 = arith.negf %1000 : vector<8x128xf32>
    %1002 = math.exp %1001 : vector<8x128xf32>
    %cst_283 = arith.constant 1.000000e+00 : f32
    %1003 = vector.broadcast %cst_283 : f32 to vector<8x128xf32>
    %1004 = arith.addf %1003, %1002 : vector<8x128xf32>
    %1005 = arith.divf %1003, %1004 : vector<8x128xf32>
    %1006 = vector.extract_strided_slice %988 {offsets = [0, 256], sizes = [8, 128], strides = [1, 1]} : vector<8x384xf32> to vector<8x128xf32>
    %1007 = vector.extract_strided_slice %989 {offsets = [0, 256], sizes = [8, 128], strides = [1, 1]} : vector<8x384xf32> to vector<8x128xf32>
    %1008 = vector.broadcast %561 : vector<1x128xf32> to vector<8x128xf32>
    %1009 = arith.addf %1007, %1008 : vector<8x128xf32>
    %1010 = arith.mulf %997, %1009 : vector<8x128xf32>
    %1011 = arith.addf %1006, %1010 : vector<8x128xf32>
    %1012 = math.tanh %1011 : vector<8x128xf32>
    %cst_284 = arith.constant 1.000000e+00 : f32
    %1013 = vector.broadcast %cst_284 : f32 to vector<8x128xf32>
    %1014 = arith.subf %1013, %1005 : vector<8x128xf32>
    %1015 = arith.mulf %1014, %1012 : vector<8x128xf32>
    %1016 = arith.mulf %1005, %960 : vector<8x128xf32>
    %1017 = arith.addf %1015, %1016 : vector<8x128xf32>
    %c56_285 = arith.constant 56 : index
    %c0_286 = arith.constant 0 : index
    %1018 = vector.load %arg23[%c56_285, %c0_286] : memref<64x128xf32, #tpu.memory_space<vmem>>, vector<8x128xf32>
    tpu.vector_store %arg23[%c56_285, %c0_286], %1017 {strides = array<i32>} : memref<64x128xf32, #tpu.memory_space<vmem>>, vector<8x128xf32>,
    %c0_287 = arith.constant 0 : index
    %c0_288 = arith.constant 0 : index
    %1019 = vector.load %arg23[%c0_287, %c0_288] : memref<64x128xf32, #tpu.memory_space<vmem>>, vector<64x128xf32>
    %c0_289 = arith.constant 0 : index
    %c0_290 = arith.constant 0 : index
    %1020 = vector.load %arg16[%c0_289, %c0_290] : memref<128x128xf32, #tpu.memory_space<vmem>>, vector<128x128xf32>
    %cst_291 = arith.constant dense<0.000000e+00> : vector<64x128xf32>
    %1021 = tpu.matmul %1019, %1020, %cst_291 {dimension_numbers = #tpu.dot_dimension_numbers<[1], [0], [0], [1], [0, 0, 1, 1], [], []>} : vector<64x128xf32>, vector<128x128xf32>, vector<64x128xf32> -> vector<64x128xf32>
    %c0_292 = arith.constant 0 : index
    %c0_293 = arith.constant 0 : index
    %1022 = vector.load %arg17[%c0_292, %c0_293] : memref<1x128xf32, #tpu.memory_space<vmem>>, vector<1x128xf32>
    %1023 = vector.broadcast %1022 : vector<1x128xf32> to vector<64x128xf32>
    %1024 = arith.addf %1021, %1023 : vector<64x128xf32>
    %c0_294 = arith.constant 0 : index
    %c0_295 = arith.constant 0 : index
    %1025 = vector.load %arg18[%c0_294, %c0_295] : memref<64x128xf32, #tpu.memory_space<vmem>>, vector<64x128xf32>
    tpu.vector_store %arg18[%c0_294, %c0_295], %1024 {strides = array<i32>} : memref<64x128xf32, #tpu.memory_space<vmem>>, vector<64x128xf32>,
    return
  }
}

</mosaic_0001>

<bundles_post_ra>
// kernel: tpu_custom_call.1
= control target key start
LH: loop header
LB: loop body
LE: loop exit
PB: predicated region body
PF: predicated region fallthrough
CT: control target
= control target key end

     0   :  { %s15413_s0 = inlined_call_operand.hbm [shape: f32[64,64], index: 0, kind: input, shape index: {}]   ;;  %s15414_s1 = inlined_call_operand.hbm [shape: f32[64,64], index: 1, kind: input, shape index: {}]   ;;  %s15415_s2 = inlined_call_operand.hbm [shape: f32[64,768], index: 2, kind: input, shape index: {}]   ;;  %s15416_s3 = inlined_call_operand.vmem [shape: f32[1,768], index: 3, kind: input, shape index: {}]   ;;  %s15417_s4 = inlined_call_operand.hbm [shape: f32[128,384], index: 4, kind: input, shape index: {}]   ;;  %s15418_s5 = inlined_call_operand.hbm [shape: f32[128,384], index: 5, kind: input, shape index: {}]   ;;  %s15419_s6 = inlined_call_operand.vmem [shape: f32[1,128], index: 6, kind: input, shape index: {}]   ;;  %s15420_s7 = inlined_call_operand.vmem [shape: f32[1,128], index: 7, kind: input, shape index: {}]   ;;  %s15421_s8 = inlined_call_operand.vmem [shape: f32[1,128], index: 8, kind: input, shape index: {}]   ;;  %s15422_s9 = inlined_call_operand.vmem [shape: f32[1,256], index: 9, kind: input, shape index: {}]   ;;  %s15423_s10 = inlined_call_operand.<no memory space> [shape: f32[1,1], index: 10, kind: input, shape index: {}]   ;;  %s15424_s11 = inlined_call_operand.hbm [shape: f32[64,384], index: 11, kind: input, shape index: {}]   ;;  %s15425_s12 = inlined_call_operand.hbm [shape: f32[256,384], index: 12, kind: input, shape index: {}]   ;;  %s15426_s13 = inlined_call_operand.hbm [shape: f32[128,384], index: 13, kind: input, shape index: {}]   ;;  %s15427_s14 = inlined_call_operand.vmem [shape: f32[1,384], index: 14, kind: input, shape index: {}]   ;;  %s15428_s15 = inlined_call_operand.vmem [shape: f32[1,128], index: 15, kind: input, shape index: {}]   ;;  %s15429_s16 = inlined_call_operand.hbm [shape: f32[128,128], index: 16, kind: input, shape index: {}]   ;;  %s15430_s17 = inlined_call_operand.vmem [shape: f32[1,128], index: 17, kind: input, shape index: {}]   ;;  %s15431_s18 = inlined_call_operand.hbm [shape: f32[64,128], index: 18, kind: output, shape index: {}]  }
   0x1   :  { %15684 = sst [smem:[#allocation115_spill]] %s15413_s0  ;;  %v23_v0 = vstv %s15423_s10 }
   0x2   :  { %15685 = sst [smem:[#allocation116_spill]] %s15414_s1  ;;  %24 = vst [vmem:[#allocation7] sm:$0x1] %v23_v0 }
   0x3   :  { %15686 = sst [smem:[#allocation117_spill]] %s15415_s2 }
   0x4   :  { %25 = vsyncpa [#allocation9], 0 }
   0x5   :  { %26 = vsyncpa [#allocation12], 0 }
   0x6   :  { %27 = vsyncpa [#allocation15], 0 }
   0x7   :  { %28 = vsyncpa [#allocation18], 0 }
   0x8   :  { %29 = vsyncpa [#allocation21], 0 }
   0x9   :  { %30 = vsyncpa [#allocation10], 0  ;;  %s12587_s29 = smov [#allocation11]   ;;  %s12588_s0 = smov [#allocation14]  }
   0xa   :  { %s48_s30 = sshll.u32 %s12587_s29, 4  ;;  %s74_s19 = sshll.u32 %s12588_s0, 4  ;;  %s49_s30 = int_to_ptr.vmem [resolvable:$true] %s48_s30  ;;  %s12705_s19 = int_to_ptr.vmem [resolvable:$true] %s74_s19 }
   0xb   :  { %s15687_s21 = sld [smem:[#allocation116_spill]] }
  0x11   :  { %s12355_s22 = scalar_lea.hbm %s15687_s21, 1024 }
  0x12   :  { %p12356_p0 = scmp.ne.s32.totalorder %s15687_s21, %s12355_s22  ;;  %p12359_p1 = scmp.lt.u32.totalorder %s12355_s22, %s15687_s21 }
  0x14   :  { %p12361_p2 = pnand %p12359_p1, %p12356_p0 }
  0x16   :  { %12364 = shalt.err (!%p12361_p2)
}
  0x17   :  { %s12365_s25 = scalar_lea.vmem %s49_s30, 1024  ;;  %p12370_p4 = scmp.lt.s32.totalorder %s49_s30, %s49_s30 }
  0x18   :  { %p12366_p3 = scmp.ne.s32.totalorder %s49_s30, %s12365_s25  ;;  %p12371_p5 = scmp.lt.s32.totalorder %s12365_s25, %s12365_s25 }
  0x1a   :  { %p12372_p6 = por %p12371_p5, %p12370_p4 }
  0x1c   :  { %p12373_p7 = pnand %p12372_p6, %p12366_p3 }
  0x1e   :  { %12376 = shalt.err (!%p12373_p7)
}
  0x1f   :  { %s15435_s26 = smov 128   ;;  %s15437_s27 = smov 8  }
  0x20   :  { %54 = dma.hbm_to_vmem [thread:$0]  %s15687_s21, 1024, %s49_s30, [#allocation12], %s15435_s26, %s15435_s26, %s15437_s27  }
  0x21   :  { %s12377_s20 = scalar_lea.hbm %s15417_s4, 6144 }
  0x22   :  { %p12378_p8 = scmp.ne.s32.totalorder %s15417_s4, %s12377_s20  ;;  %p12381_p9 = scmp.lt.u32.totalorder %s12377_s20, %s15417_s4 }
  0x24   :  { %p12383_p10 = pnand %p12381_p9, %p12378_p8 }
  0x26   :  { %12386 = shalt.err (!%p12383_p10)
}
  0x27   :  { %s12387_s24 = scalar_lea.vmem %s12705_s19, 6144  ;;  %p12392_p12 = scmp.lt.s32.totalorder %s12705_s19, %s12705_s19 }
  0x28   :  { %p12388_p11 = scmp.ne.s32.totalorder %s12705_s19, %s12387_s24  ;;  %p12393_p13 = scmp.lt.s32.totalorder %s12387_s24, %s12387_s24 }
  0x2a   :  { %p12394_p0 = por %p12393_p13, %p12392_p12 }
  0x2c   :  { %p12395_p1 = pnand %p12394_p0, %p12388_p11 }
  0x2e   :  { %12398 = shalt.err (!%p12395_p1)
}
  0x2f   :  { %s15439_s30 = smov 384   ;;  %s15441_s21 = smov 24  }
  0x30   :  { %80 = dma.hbm_to_vmem [thread:$0]  %s15417_s4, 6144, %s12705_s19, [#allocation15], %s15439_s30, %s15439_s30, %s15441_s21  }
  0x31   :  { %s12593_s29 = smov [#allocation17]   ;;  %s12594_s1 = smov [#allocation20]  }
  0x32   :  { %s108_s0 = sshll.u32 %s12593_s29, 4  ;;  %s132_s20 = sshll.u32 %s12594_s1, 4  ;;  %s109_s0 = int_to_ptr.vmem [resolvable:$true] %s108_s0  ;;  %s12742_s20 = int_to_ptr.vmem [resolvable:$true] %s132_s20 }
  0x33   :  { %s12399_s10 = scalar_lea.hbm %s15424_s11, 3072 }
  0x34   :  { %p12400_p2 = scmp.ne.s32.totalorder %s15424_s11, %s12399_s10  ;;  %p12403_p3 = scmp.lt.u32.totalorder %s12399_s10, %s15424_s11 }
  0x36   :  { %p12405_p4 = pnand %p12403_p3, %p12400_p2 }
  0x38   :  { %12408 = shalt.err (!%p12405_p4)
}
  0x39   :  { %s12409_s4 = scalar_lea.vmem %s109_s0, 3072  ;;  %p12414_p6 = scmp.lt.s32.totalorder %s109_s0, %s109_s0 }
  0x3a   :  { %p12410_p5 = scmp.ne.s32.totalorder %s109_s0, %s12409_s4  ;;  %p12415_p7 = scmp.lt.s32.totalorder %s12409_s4, %s12409_s4 }
  0x3c   :  { %p12416_p8 = por %p12415_p7, %p12414_p6 }
  0x3e   :  { %p12417_p9 = pnand %p12416_p8, %p12410_p5 }
  0x40   :  { %12420 = shalt.err (!%p12417_p9)
}
  0x41   :  { %114 = dma.hbm_to_vmem [thread:$0]  %s15424_s11, 3072, %s109_s0, [#allocation18], %s15439_s30, %s15439_s30, %s15441_s21  }
  0x42   :  { %s12421_s26 = scalar_lea.hbm %s15426_s13, 6144 }
  0x43   :  { %p12422_p10 = scmp.ne.s32.totalorder %s15426_s13, %s12421_s26  ;;  %p12425_p11 = scmp.lt.u32.totalorder %s12421_s26, %s15426_s13 }
  0x45   :  { %p12427_p12 = pnand %p12425_p11, %p12422_p10 }
  0x47   :  { %12430 = shalt.err (!%p12427_p12)
}
  0x48   :  { %s12431_s10 = scalar_lea.vmem %s12742_s20, 6144  ;;  %p12436_p0 = scmp.lt.s32.totalorder %s12742_s20, %s12742_s20 }
  0x49   :  { %p12432_p13 = scmp.ne.s32.totalorder %s12742_s20, %s12431_s10  ;;  %p12437_p1 = scmp.lt.s32.totalorder %s12431_s10, %s12431_s10 }
  0x4b   :  { %p12438_p2 = por %p12437_p1, %p12436_p0 }
  0x4d   :  { %p12439_p3 = pnand %p12438_p2, %p12432_p13 }
  0x4f   :  { %12442 = shalt.err (!%p12439_p3)
}
  0x50   :  { %138 = dma.hbm_to_vmem [thread:$0]  %s15426_s13, 6144, %s12742_s20, [#allocation21], %s15439_s30, %s15439_s30, %s15441_s21  }
  0x51   :  { %s12595_s23 = smov [#allocation8]   ;;  %s12596_s4 = smov [#allocation13]  }
  0x52   :  { %s36_s24 = sshll.u32 %s12595_s23, 4  ;;  %s60_s19 = sshll.u32 %s12596_s4, 4  ;;  %s37_s24 = int_to_ptr.vmem [resolvable:$true] %s36_s24  ;;  %s12779_s19 = int_to_ptr.vmem [resolvable:$true] %s60_s19 }
  0x53   :  { %s15688_s29 = sld [smem:[#allocation115_spill]] }
  0x59   :  { %s12443_s26 = scalar_lea.hbm %s15688_s29, 1024 }
  0x5a   :  { %p12444_p4 = scmp.ne.s32.totalorder %s15688_s29, %s12443_s26  ;;  %p12447_p5 = scmp.lt.u32.totalorder %s12443_s26, %s15688_s29 }
  0x5c   :  { %p12449_p6 = pnand %p12447_p5, %p12444_p4 }
  0x5e   :  { %12452 = shalt.err (!%p12449_p6)
}
  0x5f   :  { %s12453_s13 = scalar_lea.vmem %s37_s24, 1024  ;;  %p12458_p8 = scmp.lt.s32.totalorder %s37_s24, %s37_s24 }
  0x60   :  { %p12454_p7 = scmp.ne.s32.totalorder %s37_s24, %s12453_s13  ;;  %p12459_p9 = scmp.lt.s32.totalorder %s12453_s13, %s12453_s13 }
  0x62   :  { %p12460_p10 = por %p12459_p9, %p12458_p8 }
  0x64   :  { %p12461_p11 = pnand %p12460_p10, %p12454_p7 }
  0x66   :  { %12464 = shalt.err (!%p12461_p11)
}
  0x67   :  { %s15689_s20 = smov 8   ;;  %s15690_s10 = smov 128  }
  0x68   :  { %42 = dma.hbm_to_vmem [thread:$0]  %s15688_s29, 1024, %s37_s24, [#allocation9], %s15690_s10, %s15690_s10, %s15689_s20  }
  0x69   :  { %s15691_s25 = sld [smem:[#allocation117_spill]] }
  0x6f   :  { %s12465_s28 = scalar_lea.hbm %s15691_s25, 6144 }
  0x70   :  { %p12466_p12 = scmp.ne.s32.totalorder %s15691_s25, %s12465_s28  ;;  %p12469_p13 = scmp.lt.u32.totalorder %s12465_s28, %s15691_s25 }
  0x72   :  { %p12471_p0 = pnand %p12469_p13, %p12466_p12 }
  0x74   :  { %12474 = shalt.err (!%p12471_p0)
}
  0x75   :  { %s12475_s2 = scalar_lea.vmem %s12779_s19, 6144  ;;  %p12480_p2 = scmp.lt.s32.totalorder %s12779_s19, %s12779_s19 }
  0x76   :  { %p12476_p1 = scmp.ne.s32.totalorder %s12779_s19, %s12475_s2  ;;  %p12481_p3 = scmp.lt.s32.totalorder %s12475_s2, %s12475_s2 }
  0x78   :  { %p12482_p4 = por %p12481_p3, %p12480_p2 }
  0x7a   :  { %p12483_p5 = pnand %p12482_p4, %p12476_p1 }
  0x7c   :  { %12486 = shalt.err (!%p12483_p5)
}
  0x7d   :  { %s12597_s24 = smov 768   ;;  %s12598_s29 = smov 48  }
  0x7e   :  { %66 = dma.hbm_to_vmem [thread:$0]  %s15691_s25, 6144, %s12779_s19, [#allocation12], %s12597_s24, %s12597_s24, %s12598_s29  }
  0x7f   :  { %s12599_s0 = smov [#allocation16]   ;;  %s12600_s4 = smov [#allocation19]  }
  0x80   :  { %s86_s23 = sshll.u32 %s12599_s0, 4  ;;  %s120_s28 = sshll.u32 %s12600_s4, 4  ;;  %s87_s23 = int_to_ptr.vmem [resolvable:$true] %s86_s23  ;;  %s12813_s28 = int_to_ptr.vmem [resolvable:$true] %s120_s28 }
  0x81   :  { %s12487_s1 = scalar_lea.hbm %s15418_s5, 6144 }
  0x82   :  { %p12488_p6 = scmp.ne.s32.totalorder %s15418_s5, %s12487_s1  ;;  %p12491_p7 = scmp.lt.u32.totalorder %s12487_s1, %s15418_s5 }
  0x84   :  { %p12493_p8 = pnand %p12491_p7, %p12488_p6 }
  0x86   :  { %12496 = shalt.err (!%p12493_p8)
}
  0x87   :  { %s12497_s19 = scalar_lea.vmem %s87_s23, 6144  ;;  %p12502_p10 = scmp.lt.s32.totalorder %s87_s23, %s87_s23 }
  0x88   :  { %p12498_p9 = scmp.ne.s32.totalorder %s87_s23, %s12497_s19  ;;  %p12503_p11 = scmp.lt.s32.totalorder %s12497_s19, %s12497_s19 }
  0x8a   :  { %p12504_p12 = por %p12503_p11, %p12502_p10 }
  0x8c   :  { %p12505_p13 = pnand %p12504_p12, %p12498_p9 }
  0x8e   :  { %12508 = shalt.err (!%p12505_p13)
}
  0x8f   :  { %s15692_s25 = smov 24   ;;  %s15693_s24 = smov 384  }
  0x90   :  { %92 = dma.hbm_to_vmem [thread:$0]  %s15418_s5, 6144, %s87_s23, [#allocation15], %s15693_s24, %s15693_s24, %s15692_s25  }
  0x91   :  { %s12509_s30 = scalar_lea.hbm %s15425_s12, 12288 }
  0x92   :  { %p12510_p0 = scmp.ne.s32.totalorder %s15425_s12, %s12509_s30  ;;  %p12513_p1 = scmp.lt.u32.totalorder %s12509_s30, %s15425_s12 }
  0x94   :  { %p12515_p2 = pnand %p12513_p1, %p12510_p0 }
  0x96   :  { %12518 = shalt.err (!%p12515_p2)
}
  0x97   :  { %s12519_s1 = scalar_lea.vmem %s12813_s28, 12288  ;;  %p12524_p4 = scmp.lt.s32.totalorder %s12813_s28, %s12813_s28 }
  0x98   :  { %p12520_p3 = scmp.ne.s32.totalorder %s12813_s28, %s12519_s1  ;;  %p12525_p5 = scmp.lt.s32.totalorder %s12519_s1, %s12519_s1 }
  0x9a   :  { %p12526_p6 = por %p12525_p5, %p12524_p4 }
  0x9c   :  { %p12527_p7 = pnand %p12526_p6, %p12520_p3 }
  0x9e   :  { %12530 = shalt.err (!%p12527_p7)
}
  0x9f   :  { %126 = dma.hbm_to_vmem [thread:$0]  %s15425_s12, 12288, %s12813_s28, [#allocation18], %s15693_s24, %s15693_s24, %s15692_s25  }
  0xa0   :  { %s12601_s22 = smov [#allocation22]   ;;  %s12531_s13 = scalar_lea.hbm %s15429_s16, 2048 }
  0xa1   :  { %s148_s2 = sshll.u32 %s12601_s22, 4  ;;  %p12532_p8 = scmp.ne.s32.totalorder %s15429_s16, %s12531_s13  ;;  %s149_s2 = int_to_ptr.vmem [resolvable:$true] %s148_s2 }
  0xa2   :  { %p12535_p9 = scmp.lt.u32.totalorder %s12531_s13, %s15429_s16 }
  0xa4   :  { %p12537_p10 = pnand %p12535_p9, %p12532_p8 }
  0xa6   :  { %12540 = shalt.err (!%p12537_p10)
}
  0xa7   :  { %s12541_s4 = scalar_lea.vmem %s149_s2, 2048  ;;  %p12546_p12 = scmp.lt.s32.totalorder %s149_s2, %s149_s2 }
  0xa8   :  { %p12542_p11 = scmp.ne.s32.totalorder %s149_s2, %s12541_s4  ;;  %p12547_p13 = scmp.lt.s32.totalorder %s12541_s4, %s12541_s4 }
  0xaa   :  { %p12548_p0 = por %p12547_p13, %p12546_p12 }
  0xac   :  { %p12549_p1 = pnand %p12548_p0, %p12542_p11 }
  0xae   :  { %12552 = shalt.err (!%p12549_p1)
}
  0xaf   :  { %154 = dma.hbm_to_vmem [thread:$0]  %s15429_s16, 2048, %s149_s2, [#allocation21], %s15690_s10, %s15690_s10, %s15689_s20  }
  0xb0   :  { %12575 = dma.done.wait [#allocation9], 1024  }
  0xb1   :  { %12576 = vsyncadd [#allocation9], 4294966272 }
  0xb2   :  { %12577 = dma.done.wait [#allocation12], 7168  }
  0xb3   :  { %12578 = vsyncadd [#allocation12], 4294960128 }
  0xb4   :  { %12579 = dma.done.wait [#allocation15], 12288  }
  0xb5   :  { %12580 = vsyncadd [#allocation15], 4294955008 }
  0xb6   :  { %12581 = dma.done.wait [#allocation18], 15360  }
  0xb7   :  { %12582 = vsyncadd [#allocation18], 4294951936 }
  0xb8   :  { %12583 = dma.done.wait [#allocation21], 8192  }
  0xb9   :  { %12584 = vsyncadd [#allocation21], 4294959104  ;;  %v15443_v1 = vmov 0.0   ;;  %v193_v2 = vld [vmem:[#allocation13 + $0x8] sm:$0xff]  ;;  %v199_v3 = vld [vmem:[#allocation13 + $0x38] sm:$0xff]  ;;  %vm272_vm0 = vcmask 523264  }
  0xba   :  { %361 = vmatprep.mubr.f32.mxu0 %v15443_v1  ;;  %821 = vmatprep.mubr.f32.mxu1 %v15443_v1  ;;  %v693_v4 = vld [vmem:[#allocation17 + $0x8] sm:$0xff]  ;;  %v9632_v5 = vpack.c.bf16 %v199_v3, %v193_v2  ;;  %v696_v6 = vld [vmem:[#allocation17 + $0x20] sm:$0xff]  ;;  %v198_v8 = vld [vmem:[#allocation13 + $0x30] sm:$0xff]  ;;  %v15445_v63 = vmov 0.0|0.0   ;;  %vm12604_vm1 = vmmov 0   ;;  %vm4041_vm2 = vcmask 7168  }
  0xbb   :  { %v192_v7 = vld [vmem:[#allocation13] sm:$0xff]  ;;  %v9680_v9 = vpack.c.bf16 %v696_v6, %v693_v4  ;;  %v695_v12 = vld [vmem:[#allocation17 + $0x18] sm:$0xff]  ;;  %v205_v13 = vld [vmem:[#allocation13 + $0x68] sm:$0xff] }
  0xbc   :  { %v9634_v10 = vpack.c.bf16 %v198_v8, %v192_v7  ;;  %v692_v11 = vld [vmem:[#allocation17] sm:$0xff]  ;;  %9633 = vmatprep.subr.bf16.mxu0 %v9632_v5  ;;  %v211_v15 = vld [vmem:[#allocation13 + $0x98] sm:$0xff]  ;;  %v702_v17 = vld [vmem:[#allocation17 + $0x50] sm:$0xff] }
  0xbd   :  { %v9682_v14 = vpack.c.bf16 %v695_v12, %v692_v11  ;;  %v699_v16 = vld [vmem:[#allocation17 + $0x38] sm:$0xff]  ;;  %9681 = vmatprep.subr.bf16.mxu1 %v9680_v9  ;;  %v9636_v18 = vpack.c.bf16 %v211_v15, %v205_v13  ;;  %v204_v20 = vld [vmem:[#allocation13 + $0x60] sm:$0xff]  ;;  %v210_v21 = vld [vmem:[#allocation13 + $0x90] sm:$0xff] }
  0xbe   :  { %9635 = vmatpush1.bf16.msra.mxu0 %v9634_v10  ;;  %v9684_v19 = vpack.c.bf16 %v702_v17, %v699_v16  ;;  %v698_v22 = vld [vmem:[#allocation17 + $0x30] sm:$0xff]  ;;  %v9638_v23 = vpack.c.bf16 %v210_v21, %v204_v20  ;;  %v701_v24 = vld [vmem:[#allocation17 + $0x48] sm:$0xff]  ;;  %v223_v26 = vld [vmem:[#allocation13 + $0xf8] sm:$0xff] }
  0xbf   :  { %9683 = vmatpush1.bf16.msra.mxu1 %v9682_v14  ;;  %v217_v25 = vld [vmem:[#allocation13 + $0xc8] sm:$0xff]  ;;  %9637 = vmatprep.subr.bf16.mxu0 %v9636_v18  ;;  %v9686_v27 = vpack.c.bf16 %v701_v24, %v698_v22  ;;  %v708_v30 = vld [vmem:[#allocation17 + $0x80] sm:$0xff]  ;;  %v222_v33 = vld [vmem:[#allocation13 + $0xf0] sm:$0xff] }
  0xc0   :  { %9685 = vmatprep.subr.bf16.mxu1 %v9684_v19  ;;  %v9640_v28 = vpack.c.bf16 %v223_v26, %v217_v25  ;;  %v705_v29 = vld [vmem:[#allocation17 + $0x68] sm:$0xff]  ;;  %v216_v31 = vld [vmem:[#allocation13 + $0xc0] sm:$0xff]  ;;  %v707_v35 = vld [vmem:[#allocation17 + $0x78] sm:$0xff] }
  0xc1   :  { %v9688_v32 = vpack.c.bf16 %v708_v30, %v705_v29  ;;  %v704_v34 = vld [vmem:[#allocation17 + $0x60] sm:$0xff]  ;;  %v9642_v36 = vpack.c.bf16 %v222_v33, %v216_v31  ;;  %v229_v37 = vld [vmem:[#allocation13 + $0x128] sm:$0xff]  ;;  %v235_v38 = vld [vmem:[#allocation13 + $0x158] sm:$0xff] }
  0xc2   :  { %9639 = vmatpush1.bf16.msra.mxu0 %v9638_v23  ;;  %v711_v39 = vld [vmem:[#allocation17 + $0x98] sm:$0xff]  ;;  %v9690_v40 = vpack.c.bf16 %v707_v35, %v704_v34  ;;  %v9644_v41 = vpack.c.bf16 %v235_v38, %v229_v37  ;;  %v714_v42 = vld [vmem:[#allocation17 + $0xb0] sm:$0xff]  ;;  %v228_v43 = vld [vmem:[#allocation13 + $0x120] sm:$0xff] }
  0xc3   :  { %9687 = vmatpush1.bf16.msra.mxu1 %v9686_v27  ;;  %9641 = vmatprep.subr.bf16.mxu0 %v9640_v28  ;;  %v234_v44 = vld [vmem:[#allocation13 + $0x150] sm:$0xff]  ;;  %v9692_v45 = vpack.c.bf16 %v714_v42, %v711_v39  ;;  %v713_v47 = vld [vmem:[#allocation17 + $0xa8] sm:$0xff]  ;;  %v195_v48 = vld [vmem:[#allocation13 + $0x18] sm:$0xff] }
  0xc4   :  { %9689 = vmatprep.subr.bf16.mxu1 %v9688_v32  ;;  %v710_v46 = vld [vmem:[#allocation17 + $0x90] sm:$0xff]  ;;  %v201_v49 = vld [vmem:[#allocation13 + $0x48] sm:$0xff]  ;;  %v9646_v50 = vpack.c.bf16 %v234_v44, %v228_v43  ;;  %v200_v54 = vld [vmem:[#allocation13 + $0x40] sm:$0xff] }
  0xc5   :  { %v9694_v51 = vpack.c.bf16 %v713_v47, %v710_v46  ;;  %v9648_v52 = vpack.c.bf16 %v201_v49, %v195_v48  ;;  %v194_v53 = vld [vmem:[#allocation13 + $0x10] sm:$0xff]  ;;  %v1004_v56 = vld [vmem:[#allocation14 + $0x28] sm:$0xff]  ;;  %v12867_v57 = vld [vmem:[#allocation8] sm:$0xff] }
  0xc6   :  { %9643 = vmatpush1.bf16.msra.mxu0 %v9642_v36  ;;  %v1001_v55 = vld [vmem:[#allocation14 + $0x10] sm:$0xff]  ;;  %v9650_v58 = vpack.c.bf16 %v200_v54, %v194_v53  ;;  %v207_v59 = vld [vmem:[#allocation13 + $0x78] sm:$0xff]  ;;  %v213_v60 = vld [vmem:[#allocation13 + $0xa8] sm:$0xff] }
  0xc7   :  { %9691 = vmatpush1.bf16.msra.mxu1 %v9690_v40  ;;  %9645 = vmatprep.subr.bf16.mxu0 %v9644_v41  ;;  %v12869_v61 = vld [vmem:[#allocation11] sm:$0xff]  ;;  %v12871_v62 = vpack.c.bf16 %v1004_v56, %v1001_v55  ;;  %v1010_v2 = vld [vmem:[#allocation14 + $0x58] sm:$0xff]  ;;  %v9652_v3 = vpack.c.bf16 %v213_v60, %v207_v59  ;;  %v206_v4 = vld [vmem:[#allocation13 + $0x70] sm:$0xff] }
  0xc8   :  { %9693 = vmatprep.subr.bf16.mxu1 %v9692_v45  ;;  %v1007_v0 = vld [vmem:[#allocation14 + $0x40] sm:$0xff]  ;;  %v12878_v6 = vld [vmem:[#allocation8 + $0x8] sm:$0xff]  ;;  %v219_v7 = vld [vmem:[#allocation13 + $0xd8] sm:$0xff] }
  0xc9   :  { %v212_v5 = vld [vmem:[#allocation13 + $0xa0] sm:$0xff]  ;;  %v225_v8 = vld [vmem:[#allocation13 + $0x108] sm:$0xff]  ;;  %v12884_v10 = vpack.c.bf16 %v1010_v2, %v1007_v0  ;;  %v1013_v12 = vld [vmem:[#allocation14 + $0x70] sm:$0xff] }
  0xca   :  { %9647 = vmatpush1.bf16.msra.mxu0 %v9646_v50  ;;  %v12882_v9 = vld [vmem:[#allocation11 + $0x8] sm:$0xff]  ;;  %v9654_v11 = vpack.c.bf16 %v212_v5, %v206_v4  ;;  %v9656_v14 = vpack.c.bf16 %v225_v8, %v219_v7  ;;  %v218_v15 = vld [vmem:[#allocation13 + $0xd0] sm:$0xff]  ;;  %v224_v16 = vld [vmem:[#allocation13 + $0x100] sm:$0xff] }
  0xcb   :  { %9695 = vmatpush1.bf16.msra.mxu1 %v9694_v51  ;;  %9649 = vmatprep.subr.bf16.mxu0 %v9648_v52  ;;  %v1016_v13 = vld [vmem:[#allocation14 + $0x88] sm:$0xff]  ;;  %v12893_v17 = vld [vmem:[#allocation8 + $0x10] sm:$0xff]  ;;  %v231_v18 = vld [vmem:[#allocation13 + $0x138] sm:$0xff]  ;;  %v9658_v24 = vpack.c.bf16 %v224_v16, %v218_v15 }
  0xcc   :  { %9744 = vmatprep.subr.bf16.mxu1 %v15445_v63  ;;  %v237_v19 = vld [vmem:[#allocation13 + $0x168] sm:$0xff]  ;;  %v12897_v20 = vld [vmem:[#allocation11 + $0x10] sm:$0xff]  ;;  %v12899_v21 = vpack.c.bf16 %v1016_v13, %v1013_v12  ;;  %v1019_v22 = vld [vmem:[#allocation14 + $0xa0] sm:$0xff] }
  0xcd   :  { %7898 = vmatmul.mubr.msk.f32.vlgmr.msra.gmra.mrb[0].mxu0 %vm272_vm0, %v12867_v57  ;;  %v1022_v23 = vld [vmem:[#allocation14 + $0xb8] sm:$0xff]  ;;  %v9660_v25 = vpack.c.bf16 %v237_v19, %v231_v18  ;;  %v230_v26 = vld [vmem:[#allocation13 + $0x130] sm:$0xff]  ;;  %v236_v27 = vld [vmem:[#allocation13 + $0x160] sm:$0xff] }
  0xce   :  { %9651 = vmatpush1.bf16.msra.mxu0 %v9650_v58  ;;  %7922 = vmatmul.mubr.msk.f32.vlgmr.msra.gmra.mrb[0].mxu1 %vm272_vm0, %v12869_v61  ;;  %v12907_v28 = vld [vmem:[#allocation8 + $0x18] sm:$0xff]  ;;  %v197_v29 = vld [vmem:[#allocation13 + $0x28] sm:$0xff]  ;;  %v12913_v32 = vpack.c.bf16 %v1022_v23, %v1019_v22  ;;  %v1025_v33 = vld [vmem:[#allocation14 + $0xd0] sm:$0xff]  ;;  %v9662_v35 = vpack.c.bf16 %v236_v27, %v230_v26 }
  0xcf   :  { %9746 = vmatpush3.bf16.msra.mxu1 %v12871_v62  ;;  %367 = vmatprep.mubr.f32.mxu0 %v15443_v1  ;;  %v203_v30 = vld [vmem:[#allocation13 + $0x58] sm:$0xff]  ;;  %v1028_v34 = vld [vmem:[#allocation14 + $0xe8] sm:$0xff]  ;;  %v12921_v37 = vld [vmem:[#allocation8 + $0x20] sm:$0xff] }
  0xd0   :  { %827 = vmatprep.mubr.f32.mxu1 %v15443_v1  ;;  %9747 = vmatprep.subr.bf16.mxu1 %v15445_v63  ;;  %v12911_v31 = vld [vmem:[#allocation11 + $0x18] sm:$0xff]  ;;  %v9664_v36 = vpack.c.bf16 %v203_v30, %v197_v29  ;;  %v12925_v38 = vld [vmem:[#allocation11 + $0x20] sm:$0xff]  ;;  %v12927_v39 = vpack.c.bf16 %v1028_v34, %v1025_v33  ;;  %v12935_v42 = vld [vmem:[#allocation8 + $0x28] sm:$0xff] }
  0xd1   :  { %7899 = vmatmul.mubr.msk.f32.gmra.mrb[2].mxu0 %vm272_vm0, %v12878_v6  ;;  %9653 = vmatprep.subr.bf16.mxu0 %v9652_v3  ;;  %v1031_v40 = vld [vmem:[#allocation14 + $0x100] sm:$0xff]  ;;  %v1034_v41 = vld [vmem:[#allocation14 + $0x118] sm:$0xff]  ;;  %v12939_v43 = vld [vmem:[#allocation11 + $0x28] sm:$0xff] }
  0xd2   :  { %7923 = vmatmul.mubr.msk.f32.gmra.mrb[2].mxu1 %vm272_vm0, %v12882_v9  ;;  %373 = vmatprep.mubr.f32.mxu0 %v15443_v1  ;;  %15694 = vst [vmem:[#allocation30_spill] sm:$0xff] %v12927_v39  ;;  %v12941_v44 = vpack.c.bf16 %v1034_v41, %v1031_v40  ;;  %v1037_v45 = vld [vmem:[#allocation14 + $0x130] sm:$0xff]  ;;  %v1040_v46 = vld [vmem:[#allocation14 + $0x148] sm:$0xff]  ;;  %v1043_v50 = vld [vmem:[#allocation14 + $0x160] sm:$0xff] }
  0xd3   :  { %9749 = vmatpush3.bf16.msra.mxu1 %v12884_v10  ;;  %833 = vmatprep.mubr.f32.mxu1 %v15443_v1  ;;  %v12949_v47 = vld [vmem:[#allocation8 + $0x30] sm:$0xff]  ;;  %v12955_v49 = vpack.c.bf16 %v1040_v46, %v1037_v45  ;;  %v1046_v51 = vld [vmem:[#allocation14 + $0x178] sm:$0xff]  ;;  %v1048_v52 = vld [vmem:[#allocation16 + $0x8] sm:$0xff] }
  0xd4   :  { %9750 = vmatprep.subr.bf16.mxu1 %v15445_v63  ;;  %9655 = vmatpush1.bf16.msra.mxu0 %v9654_v11  ;;  %15695 = vst [vmem:[#allocation31_spill] sm:$0xff] %v12941_v44  ;;  %v12953_v48 = vld [vmem:[#allocation11 + $0x30] sm:$0xff]  ;;  %v1051_v53 = vld [vmem:[#allocation16 + $0x20] sm:$0xff]  ;;  %v12963_v54 = vld [vmem:[#allocation8 + $0x38] sm:$0xff]  ;;  %v12969_v56 = vpack.c.bf16 %v1046_v51, %v1043_v50 }
  0xd5   :  { %7900 = vmatmul.mubr.msk.f32.gmra.mrb[4].mxu0 %vm272_vm0, %v12893_v17  ;;  %9657 = vmatprep.subr.bf16.mxu0 %v9656_v14  ;;  %15696 = vst [vmem:[#allocation32_spill] sm:$0xff] %v12955_v49  ;;  %v12967_v55 = vld [vmem:[#allocation11 + $0x38] sm:$0xff]  ;;  %v196_v58 = vld [vmem:[#allocation13 + $0x20] sm:$0xff]  ;;  %v202_v59 = vld [vmem:[#allocation13 + $0x50] sm:$0xff]  ;;  %v12972_v60 = vpack.c.bf16 %v1051_v53, %v1048_v52 }
  0xd6   :  { %7924 = vmatmul.mubr.msk.f32.gmra.mrb[4].mxu1 %vm272_vm0, %v12897_v20  ;;  %379 = vmatprep.mubr.f32.mxu0 %v15443_v1  ;;  %15697 = vst [vmem:[#allocation33_spill] sm:$0xff] %v12969_v56  ;;  %v1047_v0 = vld [vmem:[#allocation16] sm:$0xff]  ;;  %v1050_v2 = vld [vmem:[#allocation16 + $0x18] sm:$0xff]  ;;  %v1057_v4 = vld [vmem:[#allocation16 + $0x50] sm:$0xff]  ;;  %v9666_v8 = vpack.c.bf16 %v202_v59, %v196_v58 }
  0xd7   :  { %9752 = vmatpush3.bf16.msra.mxu1 %v12899_v21  ;;  %839 = vmatprep.mubr.f32.mxu1 %v15443_v1  ;;  %15698 = vst [vmem:[#allocation34_spill] sm:$0xff] %v12972_v60  ;;  %v1054_v3 = vld [vmem:[#allocation16 + $0x38] sm:$0xff]  ;;  %v209_v5 = vld [vmem:[#allocation13 + $0x88] sm:$0xff]  ;;  %v12982_v11 = vpack.c.bf16 %v1050_v2, %v1047_v0  ;;  %v1053_v12 = vld [vmem:[#allocation16 + $0x30] sm:$0xff] }
  0xd8   :  { %9753 = vmatprep.subr.bf16.mxu1 %v15445_v63  ;;  %9659 = vmatpush1.bf16.msra.mxu0 %v9658_v24  ;;  %v215_v7 = vld [vmem:[#allocation13 + $0xb8] sm:$0xff]  ;;  %v208_v13 = vld [vmem:[#allocation13 + $0x80] sm:$0xff]  ;;  %v214_v14 = vld [vmem:[#allocation13 + $0xb0] sm:$0xff]  ;;  %v12985_v15 = vpack.c.bf16 %v1057_v4, %v1054_v3 }
  0xd9   :  { %7901 = vmatmul.mubr.msk.f32.gmra.mrb[6].mxu0 %vm272_vm0, %v12907_v28  ;;  %9661 = vmatprep.subr.bf16.mxu0 %v9660_v25  ;;  %v1056_v16 = vld [vmem:[#allocation16 + $0x48] sm:$0xff]  ;;  %v9668_v18 = vpack.c.bf16 %v215_v7, %v209_v5  ;;  %v227_v22 = vld [vmem:[#allocation13 + $0x118] sm:$0xff]  ;;  %v1063_v24 = vld [vmem:[#allocation16 + $0x80] sm:$0xff]  ;;  %v9670_v25 = vpack.c.bf16 %v214_v14, %v208_v13 }
  0xda   :  { %7925 = vmatmul.mubr.msk.f32.gmra.mrb[6].mxu1 %vm272_vm0, %v12911_v31  ;;  %385 = vmatprep.mubr.f32.mxu0 %v15443_v1  ;;  %v221_v19 = vld [vmem:[#allocation13 + $0xe8] sm:$0xff]  ;;  %v12992_v26 = vpack.c.bf16 %v1056_v16, %v1053_v12  ;;  %v1059_v27 = vld [vmem:[#allocation16 + $0x60] sm:$0xff]  ;;  %v226_v33 = vld [vmem:[#allocation13 + $0x110] sm:$0xff] }
  0xdb   :  { %9755 = vmatpush3.bf16.msra.mxu1 %v12913_v32  ;;  %845 = vmatprep.mubr.f32.mxu1 %v15443_v1  ;;  %v1060_v23 = vld [vmem:[#allocation16 + $0x68] sm:$0xff]  ;;  %v9672_v29 = vpack.c.bf16 %v227_v22, %v221_v19  ;;  %v220_v30 = vld [vmem:[#allocation13 + $0xe0] sm:$0xff]  ;;  %v239_v40 = vld [vmem:[#allocation13 + $0x178] sm:$0xff] }
  0xdc   :  { %9756 = vmatprep.subr.bf16.mxu1 %v15445_v63  ;;  %9663 = vmatpush1.bf16.msra.mxu0 %v9662_v35  ;;  %v12995_v34 = vpack.c.bf16 %v1063_v24, %v1060_v23  ;;  %v1062_v35 = vld [vmem:[#allocation16 + $0x78] sm:$0xff]  ;;  %v1069_v45 = vld [vmem:[#allocation16 + $0xb0] sm:$0xff]  ;;  %v9674_v46 = vpack.c.bf16 %v226_v33, %v220_v30  ;;  %v232_v53 = vld [vmem:[#allocation13 + $0x140] sm:$0xff] }
  0xdd   :  { %7902 = vmatmul.mubr.msk.f32.gmra.mrb[8].mxu0 %vm272_vm0, %v12921_v37  ;;  %9665 = vmatprep.subr.bf16.mxu0 %v9664_v36  ;;  %v233_v36 = vld [vmem:[#allocation13 + $0x148] sm:$0xff]  ;;  %v1066_v41 = vld [vmem:[#allocation16 + $0x98] sm:$0xff]  ;;  %v13002_v50 = vpack.c.bf16 %v1062_v35, %v1059_v27  ;;  %v1065_v51 = vld [vmem:[#allocation16 + $0x90] sm:$0xff] }
  0xde   :  { %7926 = vmatmul.mubr.msk.f32.gmra.mrb[8].mxu1 %vm272_vm0, %v12925_v38  ;;  %391 = vmatprep.mubr.f32.mxu0 %v15443_v1  ;;  %v9676_v52 = vpack.c.bf16 %v239_v40, %v233_v36  ;;  %v238_v58 = vld [vmem:[#allocation13 + $0x170] sm:$0xff]  ;;  %v13005_v59 = vpack.c.bf16 %v1069_v45, %v1066_v41  ;;  %v1068_v0 = vld [vmem:[#allocation16 + $0xa8] sm:$0xff]  ;;  %v1075_v5 = vld [vmem:[#allocation16 + $0xe0] sm:$0xff] }
  0xdf   :  { %9758 = vmatpush3.bf16.msra.mxu1 %v12927_v39  ;;  %851 = vmatprep.mubr.f32.mxu1 %v15443_v1  ;;  %v694_v2 = vld [vmem:[#allocation17 + $0x10] sm:$0xff]  ;;  %v697_v3 = vld [vmem:[#allocation17 + $0x28] sm:$0xff]  ;;  %v9678_v7 = vpack.c.bf16 %v238_v58, %v232_v53  ;;  %v1071_v14 = vld [vmem:[#allocation16 + $0xc0] sm:$0xff] }
  0xe0   :  { %9759 = vmatprep.subr.bf16.mxu1 %v15445_v63  ;;  %v1072_v4 = vld [vmem:[#allocation16 + $0xc8] sm:$0xff]  ;;  %v9696_v12 = vpack.c.bf16 %v697_v3, %v694_v2  ;;  %v1074_v16 = vld [vmem:[#allocation16 + $0xd8] sm:$0xff]  ;;  %v1081_v19 = vld [vmem:[#allocation16 + $0x110] sm:$0xff] }
  0xe1   :  { %7903 = vmatmul.mubr.msk.f32.gmra.mrb[10].mxu0 %vm272_vm0, %v12935_v42  ;;  %v13014_v13 = vpack.c.bf16 %v1075_v5, %v1072_v4  ;;  %v13020_v22 = vpack.c.bf16 %v1074_v16, %v1071_v14  ;;  %v1077_v24 = vld [vmem:[#allocation16 + $0xf0] sm:$0xff]  ;;  %v1084_v27 = vld [vmem:[#allocation16 + $0x128] sm:$0xff]  ;;  %v1083_v35 = vld [vmem:[#allocation16 + $0x120] sm:$0xff] }
  0xe2   :  { %7927 = vmatmul.mubr.msk.f32.gmra.mrb[10].mxu1 %vm272_vm0, %v12939_v43  ;;  %397 = vmatprep.mubr.f32.mxu0 %v15443_v1  ;;  %v1086_v36 = vld [vmem:[#allocation16 + $0x138] sm:$0xff]  ;;  %v1093_v41 = vld [vmem:[#allocation16 + $0x170] sm:$0xff]  ;;  %v700_v58 = vld [vmem:[#allocation17 + $0x40] sm:$0xff] }
  0xe3   :  { %9761 = vmatpush3.bf16.msra.mxu1 %v12941_v44  ;;  %857 = vmatprep.mubr.f32.mxu1 %v15443_v1  ;;  %v1090_v40 = vld [vmem:[#allocation16 + $0x158] sm:$0xff]  ;;  %v13038_v45 = vpack.c.bf16 %v1086_v36, %v1083_v35  ;;  %v706_v3 = vld [vmem:[#allocation17 + $0x70] sm:$0xff]  ;;  %v709_v4 = vld [vmem:[#allocation17 + $0x88] sm:$0xff] }
  0xe4   :  { %9762 = vmatprep.subr.bf16.mxu1 %v15445_v63  ;;  %v9704_v5 = vpack.c.bf16 %v709_v4, %v706_v3  ;;  %v715_v14 = vld [vmem:[#allocation17 + $0xb8] sm:$0xff]  ;;  %v1003_v16 = vld [vmem:[#allocation14 + $0x20] sm:$0xff]  ;;  %v1033_v4 = vld [vmem:[#allocation14 + $0x110] sm:$0xff] }
  0xe5   :  { %7904 = vmatmul.mubr.msk.f32.gmra.mrb[12].mxu0 %vm272_vm0, %v12949_v47  ;;  %v1014_v35 = vld [vmem:[#allocation14 + $0x78] sm:$0xff] }
  0xe6   :  { %7928 = vmatmul.mubr.msk.f32.gmra.mrb[12].mxu1 %vm272_vm0, %v12953_v48  ;;  %403 = vmatprep.mubr.f32.mxu0 %v15443_v1  ;;  %v1018_v36 = vld [vmem:[#allocation14 + $0x98] sm:$0xff] }
  0xe7   :  { %9764 = vmatpush3.bf16.msra.mxu1 %v12955_v49  ;;  %863 = vmatprep.mubr.f32.mxu1 %v15443_v1  ;;  %v1030_v3 = vld [vmem:[#allocation14 + $0xf8] sm:$0xff] }
  0xe8   :  { %9765 = vmatprep.subr.bf16.mxu1 %v15445_v63 }
  0xe9   :  { %7905 = vmatmul.mubr.msk.f32.gmra.mrb[14].mxu0 %vm272_vm0, %v12963_v54 }
  0xea   :  { %7929 = vmatmul.mubr.msk.f32.gmra.mrb[14].mxu1 %vm272_vm0, %v12967_v55  ;;  %474 = vmatprep.mubr.f32.mxu0 %v15443_v1 }
  0xeb   :  { %9767 = vmatpush3.bf16.msra.mxu1 %v12969_v56  ;;  %8780 = vmatprep.mubr.msk.f32.mxu1 %vm12604_vm1, %v15443_v1 }
  0xec   :  { %9769 = vmatprep.subr.bf16.mxu1 %v12972_v60 }
  0xed   :  { %7906 = vmatmul.mubr.msk.f32.vlgmr.msra.gmra.mrb[16].mxu0 %vm272_vm0, %v12867_v57 }
  0xee   :  { %9667 = vmatpush1.bf16.msra.mxu0 %v9666_v8  ;;  %8781 = vmatmul.mubr.f32.vlgmr.msra.gmra.mrb[16].mxu1 %v15443_v1  ;;  %v13011_v8 = vpack.c.bf16 %v1068_v0, %v1065_v51  ;;  %v1089_v51 = vld [vmem:[#allocation16 + $0x150] sm:$0xff]  ;;  %v703_v0 = vld [vmem:[#allocation17 + $0x58] sm:$0xff] }
  0xef   :  { %9771 = vmatpush1.bf16.msra.mxu1 %v12982_v11  ;;  %480 = vmatprep.mubr.f32.mxu0 %v15443_v1  ;;  %v9700_v2 = vpack.c.bf16 %v703_v0, %v700_v58  ;;  %v1027_v58 = vld [vmem:[#allocation14 + $0xe0] sm:$0xff] }
  0xf0   :  { %9773 = vmatprep.subr.bf16.mxu1 %v12985_v15  ;;  %9669 = vmatprep.subr.bf16.mxu0 %v9668_v18  ;;  %v1078_v18 = vld [vmem:[#allocation16 + $0xf8] sm:$0xff]  ;;  %v1023_v0 = vld [vmem:[#allocation14 + $0xc0] sm:$0xff] }
  0xf1   :  { %7907 = vmatmul.mubr.msk.f32.gmra.mrb[18].mxu0 %vm272_vm0, %v12878_v6  ;;  %1334 = vmatprep.mubr.f32.mxu1 %v15443_v1  ;;  %v13023_v23 = vpack.c.bf16 %v1081_v19, %v1078_v18  ;;  %v1009_v18 = vld [vmem:[#allocation14 + $0x50] sm:$0xff] }
  0xf2   :  { %486 = vmatprep.mubr.f32.mxu0 %v15443_v1  ;;  %9671 = vmatpush1.bf16.msra.mxu0 %v9670_v25  ;;  %v1080_v25 = vld [vmem:[#allocation16 + $0x108] sm:$0xff]  ;;  %v1005_v19 = vld [vmem:[#allocation14 + $0x30] sm:$0xff] }
  0xf3   :  { %9775 = vmatpush1.bf16.msra.mxu1 %v12992_v26  ;;  %9673 = vmatprep.subr.bf16.mxu0 %v9672_v29  ;;  %v1087_v29 = vld [vmem:[#allocation16 + $0x140] sm:$0xff]  ;;  %v13029_v30 = vpack.c.bf16 %v1080_v25, %v1077_v24  ;;  %v1008_v24 = vld [vmem:[#allocation14 + $0x48] sm:$0xff] }
  0xf4   :  { %9777 = vmatprep.subr.bf16.mxu1 %v12995_v34  ;;  %v13032_v33 = vpack.c.bf16 %v1087_v29, %v1084_v27  ;;  %v1012_v25 = vld [vmem:[#allocation14 + $0x68] sm:$0xff]  ;;  %v1015_v27 = vld [vmem:[#allocation14 + $0x80] sm:$0xff] }
  0xf5   :  { %7908 = vmatmul.mubr.msk.f32.gmra.mrb[20].mxu0 %vm272_vm0, %v12893_v17  ;;  %v1011_v29 = vld [vmem:[#allocation14 + $0x60] sm:$0xff] }
  0xf6   :  { %492 = vmatprep.mubr.f32.mxu0 %v15443_v1  ;;  %9675 = vmatpush1.bf16.msra.mxu0 %v9674_v46  ;;  %v13041_v46 = vpack.c.bf16 %v1093_v41, %v1090_v40  ;;  %v1021_v40 = vld [vmem:[#allocation14 + $0xb0] sm:$0xff] }
  0xf7   :  { %9779 = vmatpush1.bf16.msra.mxu1 %v13002_v50  ;;  %9677 = vmatprep.subr.bf16.mxu0 %v9676_v52  ;;  %v1092_v52 = vld [vmem:[#allocation16 + $0x168] sm:$0xff]  ;;  %v1017_v41 = vld [vmem:[#allocation14 + $0x90] sm:$0xff] }
  0xf8   :  { %9781 = vmatprep.subr.bf16.mxu1 %v13005_v59  ;;  %v13047_v53 = vpack.c.bf16 %v1092_v52, %v1089_v51  ;;  %v1020_v51 = vld [vmem:[#allocation14 + $0xa8] sm:$0xff] }
  0xf9   :  { %7909 = vmatmul.mubr.msk.f32.gmra.mrb[22].mxu0 %vm272_vm0, %v12907_v28  ;;  %v1024_v52 = vld [vmem:[#allocation14 + $0xc8] sm:$0xff] }
  0xfa   :  { %498 = vmatprep.mubr.f32.mxu0 %v15443_v1  ;;  %9679 = vmatpush1.bf16.msra.mxu0 %v9678_v7  ;;  %v712_v7 = vld [vmem:[#allocation17 + $0xa0] sm:$0xff] }
  0xfb   :  { %9783 = vmatpush1.bf16.msra.mxu1 %v13011_v8  ;;  %9697 = vmatprep.subr.bf16.mxu0 %v9696_v12 }
  0xfc   :  { %9785 = vmatprep.subr.bf16.mxu1 %v13014_v13 }
  0xfd   :  { %7910 = vmatmul.mubr.msk.f32.gmra.mrb[24].mxu0 %vm272_vm0, %v12921_v37 }
  0xfe   :  { %504 = vmatprep.mubr.f32.mxu0 %v15443_v1 }
  0xff   :  { %9787 = vmatpush1.bf16.msra.mxu1 %v13020_v22 }
 0x100   :  { %9789 = vmatprep.subr.bf16.mxu1 %v13023_v23 }
 0x101   :  { %7911 = vmatmul.mubr.msk.f32.gmra.mrb[26].mxu0 %vm272_vm0, %v12935_v42 }
 0x102   :  { %510 = vmatprep.mubr.f32.mxu0 %v15443_v1 }
 0x103   :  { %9791 = vmatpush1.bf16.msra.mxu1 %v13029_v30 }
 0x104   :  { %9793 = vmatprep.subr.bf16.mxu1 %v13032_v33 }
 0x105   :  { %7912 = vmatmul.mubr.msk.f32.gmra.mrb[28].mxu0 %vm272_vm0, %v12949_v47 }
 0x106   :  { %516 = vmatprep.mubr.f32.mxu0 %v15443_v1 }
 0x107   :  { %9795 = vmatpush1.bf16.msra.mxu1 %v13038_v45 }
 0x108   :  { %9797 = vmatprep.subr.bf16.mxu1 %v13041_v46 }
 0x109   :  { %7913 = vmatmul.mubr.msk.f32.gmra.mrb[30].mxu0 %vm272_vm0, %v12963_v54 }
 0x10a   :  { %587 = vmatprep.mubr.f32.mxu0 %v15443_v1 }
 0x10b   :  { %9799 = vmatpush1.bf16.msra.mxu1 %v13047_v53 }
 0x10c   :  { %9856 = vmatprep.subr.bf16.mxu1 %v15445_v63 }
 0x10d   :  { %7914 = vmatmul.mubr.msk.f32.vlgmr.msra.gmra.mrb[32].mxu0 %vm272_vm0, %v12867_v57  ;;  %v9708_v57 = vpack.c.bf16 %v715_v14, %v712_v7  ;;  %v1032_v7 = vld [vmem:[#allocation14 + $0x108] sm:$0xff] }
 0x10e   :  { %1335 = vmatmul.mubr.f32.vlgmr.msra.gmra.mrb[18].mxu1 %v15443_v1  ;;  %9699 = vmatpush3.bf16.msra.mxu0 %v9696_v12  ;;  %v1000_v12 = vld [vmem:[#allocation14 + $0x8] sm:$0xff] }
 0x10f   :  { %593 = vmatprep.mubr.f32.mxu0 %v15443_v1  ;;  %9701 = vmatprep.subr.bf16.mxu0 %v9700_v2  ;;  %v1036_v14 = vld [vmem:[#allocation14 + $0x128] sm:$0xff] }
 0x110   :  { %9858 = vmatpush3.bf16.msra.mxu1 %v12871_v62  ;;  %8850 = vmatprep.mubr.msk.f32.mxu1 %vm12604_vm1, %v15443_v1 }
 0x111   :  { %7915 = vmatmul.mubr.msk.f32.gmra.mrb[34].mxu0 %vm272_vm0, %v12878_v6  ;;  %9859 = vmatprep.subr.bf16.mxu1 %v15445_v63  ;;  %v13071_v6 = vpack.c.bf16 %v1003_v16, %v1000_v12  ;;  %v1035_v16 = vld [vmem:[#allocation14 + $0x120] sm:$0xff] }
 0x112   :  { %599 = vmatprep.mubr.f32.mxu0 %v15443_v1  ;;  %9703 = vmatpush3.bf16.msra.mxu0 %v9700_v2  ;;  %v1026_v2 = vld [vmem:[#allocation14 + $0xd8] sm:$0xff] }
 0x113   :  { %9705 = vmatprep.subr.bf16.mxu0 %v9704_v5 }
 0x114   :  { %9861 = vmatpush3.bf16.msra.mxu1 %v12884_v10 }
 0x115   :  { %7916 = vmatmul.mubr.msk.f32.gmra.mrb[36].mxu0 %vm272_vm0, %v12893_v17  ;;  %9862 = vmatprep.subr.bf16.mxu1 %v15445_v63  ;;  %v999_v17 = vld [vmem:[#allocation14] sm:$0xff] }
 0x116   :  { %605 = vmatprep.mubr.f32.mxu0 %v15443_v1  ;;  %9707 = vmatpush3.bf16.msra.mxu0 %v9704_v5  ;;  %v1029_v5 = vld [vmem:[#allocation14 + $0xf0] sm:$0xff] }
 0x117   :  { %9709 = vmatprep.subr.bf16.mxu0 %v9708_v57  ;;  %v13146_v12 = vpack.c.bf16 %v1032_v7, %v1029_v5  ;;  %v1073_v5 = vld [vmem:[#allocation16 + $0xd0] sm:$0xff]  ;;  %v1076_v7 = vld [vmem:[#allocation16 + $0xe8] sm:$0xff] }
 0x118   :  { %9864 = vmatpush3.bf16.msra.mxu1 %v12899_v21 }
 0x119   :  { %7917 = vmatmul.mubr.msk.f32.gmra.mrb[38].mxu0 %vm272_vm0, %v12907_v28  ;;  %9865 = vmatprep.subr.bf16.mxu1 %v15445_v63  ;;  %v1002_v28 = vld [vmem:[#allocation14 + $0x18] sm:$0xff]  ;;  %15700 = vst [vmem:[#allocation36_spill] sm:$0xff] %v13146_v12 }
 0x11a   :  { %611 = vmatprep.mubr.f32.mxu0 %v15443_v1  ;;  %9711 = vmatpush3.bf16.msra.mxu0 %v9708_v57  ;;  %v1039_v57 = vld [vmem:[#allocation14 + $0x140] sm:$0xff] }
 0x11b   :  { %9713 = vmatprep.subr.bf16.mxu0 %v13071_v6 }
 0x11c   :  { %9867 = vmatpush3.bf16.msra.mxu1 %v12913_v32 }
 0x11d   :  { %7918 = vmatmul.mubr.msk.f32.gmra.mrb[40].mxu0 %vm272_vm0, %v12921_v37  ;;  %9868 = vmatprep.subr.bf16.mxu1 %v15445_v63  ;;  %v1006_v37 = vld [vmem:[#allocation14 + $0x38] sm:$0xff] }
 0x11e   :  { %617 = vmatprep.mubr.f32.mxu0 %v15443_v1 }
 0x120   :  { %9870 = vmatpush3.bf16.msra.mxu1 %v12927_v39 }
 0x121   :  { %7919 = vmatmul.mubr.msk.f32.gmra.mrb[42].mxu0 %vm272_vm0, %v12935_v42  ;;  %9871 = vmatprep.subr.bf16.mxu1 %v15445_v63  ;;  %v13100_v42 = vpack.c.bf16 %v1002_v28, %v999_v17  ;;  %v1038_v17 = vld [vmem:[#allocation14 + $0x138] sm:$0xff] }
 0x122   :  { %623 = vmatprep.mubr.f32.mxu0 %v15443_v1  ;;  %v1042_v28 = vld [vmem:[#allocation14 + $0x158] sm:$0xff] }
 0x124   :  { %9873 = vmatpush3.bf16.msra.mxu1 %v12941_v44 }
 0x125   :  { %7920 = vmatmul.mubr.msk.f32.gmra.mrb[44].mxu0 %vm272_vm0, %v12949_v47  ;;  %9874 = vmatprep.subr.bf16.mxu1 %v15445_v63  ;;  %v13102_v47 = vpack.c.bf16 %v1009_v18, %v1006_v37  ;;  %v1045_v37 = vld [vmem:[#allocation14 + $0x170] sm:$0xff]  ;;  %v13152_v18 = vpack.c.bf16 %v1038_v17, %v1035_v16  ;;  %v1082_v16 = vld [vmem:[#allocation16 + $0x118] sm:$0xff] }
 0x126   :  { %629 = vmatprep.mubr.f32.mxu0 %v15443_v1 }
 0x127   :  { %15702 = vst [vmem:[#allocation38_spill] sm:$0xff] %v13152_v18 }
 0x128   :  { %9876 = vmatpush3.bf16.msra.mxu1 %v12955_v49 }
 0x129   :  { %7921 = vmatmul.mubr.msk.f32.gmra.mrb[46].mxu0 %vm272_vm0, %v12963_v54  ;;  %9877 = vmatprep.subr.bf16.mxu1 %v15445_v63  ;;  %v13109_v54 = vpack.c.bf16 %v1008_v24, %v1005_v19  ;;  %v13155_v19 = vpack.c.bf16 %v1045_v37, %v1042_v28  ;;  %v1041_v24 = vld [vmem:[#allocation14 + $0x150] sm:$0xff]  ;;  %v1088_v37 = vld [vmem:[#allocation16 + $0x148] sm:$0xff] }
 0x12a   :  { %8736 = vmatprep.mubr.msk.f32.mxu0 %vm272_vm0, %v12869_v61  ;;  %v13114_v61 = vpack.c.bf16 %v1015_v27, %v1012_v25  ;;  %v1044_v25 = vld [vmem:[#allocation14 + $0x168] sm:$0xff]  ;;  %v1085_v28 = vld [vmem:[#allocation16 + $0x130] sm:$0xff] }
 0x12b   :  { %15703 = vst [vmem:[#allocation39_spill] sm:$0xff] %v13155_v19  ;;  %v13158_v27 = vpack.c.bf16 %v1044_v25, %v1041_v24  ;;  %v13189_v24 = vpack.c.bf16 %v1088_v37, %v1085_v28  ;;  %v1091_v25 = vld [vmem:[#allocation16 + $0x160] sm:$0xff] }
 0x12c   :  { %9879 = vmatpush3.bf16.msra.mxu1 %v12969_v56 }
 0x12d   :  { %8737 = vmatmul.mubr.msk.f32.vlgmr.msra.gmra.mrb[48].mxu0 %vm272_vm0, %v12882_v9  ;;  %9881 = vmatprep.subr.bf16.mxu1 %v12972_v60  ;;  %v13119_v9 = vpack.c.bf16 %v1014_v35, %v1011_v29  ;;  %15704 = vst [vmem:[#allocation40_spill] sm:$0xff] %v13158_v27  ;;  %v1049_v29 = vld [vmem:[#allocation16 + $0x10] sm:$0xff]  ;;  %v1052_v35 = vld [vmem:[#allocation16 + $0x28] sm:$0xff] }
 0x12e   :  { %9715 = vmatpush1.bf16.msra.mxu0 %v13100_v42  ;;  %8739 = vmatprep.mubr.msk.f32.mxu0 %vm272_vm0, %v12897_v20  ;;  %v13124_v20 = vpack.c.bf16 %v1021_v40, %v1018_v36  ;;  %v13162_v36 = vpack.c.bf16 %v1052_v35, %v1049_v29  ;;  %v1055_v40 = vld [vmem:[#allocation16 + $0x40] sm:$0xff]  ;;  %v1094_v29 = vld [vmem:[#allocation16 + $0x178] sm:$0xff] }
 0x12f   :  { %9717 = vmatprep.subr.bf16.mxu0 %v13102_v47  ;;  %v13193_v35 = vpack.c.bf16 %v1094_v29, %v1091_v25 }
 0x131   :  { %8740 = vmatmul.mubr.msk.f32.gmra.mrb[50].mxu0 %vm272_vm0, %v12911_v31  ;;  %v13129_v31 = vpack.c.bf16 %v1020_v51, %v1017_v41  ;;  %v1058_v41 = vld [vmem:[#allocation16 + $0x58] sm:$0xff] }
 0x132   :  { %9719 = vmatpush1.bf16.msra.mxu0 %v13109_v54  ;;  %8742 = vmatprep.mubr.msk.f32.mxu0 %vm272_vm0, %v12925_v38  ;;  %v13134_v38 = vpack.c.bf16 %v1027_v58, %v1024_v52  ;;  %v13167_v51 = vpack.c.bf16 %v1058_v41, %v1055_v40  ;;  %v1061_v52 = vld [vmem:[#allocation16 + $0x70] sm:$0xff]  ;;  %v1064_v58 = vld [vmem:[#allocation16 + $0x88] sm:$0xff] }
 0x133   :  { %9721 = vmatprep.subr.bf16.mxu0 %v13114_v61 }
 0x135   :  { %8743 = vmatmul.mubr.msk.f32.gmra.mrb[52].mxu0 %vm272_vm0, %v12939_v43  ;;  %v13139_v43 = vpack.c.bf16 %v1026_v2, %v1023_v0  ;;  %v13173_v0 = vpack.c.bf16 %v1064_v58, %v1061_v52  ;;  %v1067_v2 = vld [vmem:[#allocation16 + $0xa0] sm:$0xff]  ;;  %v242_v52 = vlaneseq }
 0x136   :  { %9723 = vmatpush1.bf16.msra.mxu0 %v13119_v9  ;;  %8745 = vmatprep.mubr.msk.f32.mxu0 %vm272_vm0, %v12953_v48  ;;  %v13143_v48 = vpack.c.bf16 %v1033_v4, %v1030_v3  ;;  %v1070_v3 = vld [vmem:[#allocation16 + $0xb8] sm:$0xff] }
 0x137   :  { %9725 = vmatprep.subr.bf16.mxu0 %v13124_v20  ;;  %v13177_v4 = vpack.c.bf16 %v1070_v3, %v1067_v2  ;;  %v13220_v58 = vshrl.u32 %v242_v52, 7  ;;  %v13226_v3 = vld [vmem:[%s15416_s3] sm:$0x3f] }
 0x138   :  { %15699 = vst [vmem:[#allocation35_spill] sm:$0xff] %v13143_v48 }
 0x139   :  { %8746 = vmatmul.mubr.msk.f32.gmra.mrb[54].mxu0 %vm272_vm0, %v12967_v55  ;;  %v13149_v55 = vpack.c.bf16 %v1039_v57, %v1036_v14  ;;  %v13181_v14 = vpack.c.bf16 %v1076_v7, %v1073_v5  ;;  %v1079_v57 = vld [vmem:[#allocation16 + $0x100] sm:$0xff]  ;;  %v256_v2 = vsub.s32 3, %v13220_v58  ;;  %v15449_v7 = vsub.s32 2, %v13220_v58 }
 0x13a   :  { %9727 = vmatpush1.bf16.msra.mxu0 %v13129_v31  ;;  %1161 = vmatprep.mubr.f32.mxu0 %v15443_v1  ;;  %v13185_v17 = vpack.c.bf16 %v1082_v16, %v1079_v57 }
 0x13b   :  { %9729 = vmatprep.subr.bf16.mxu0 %v13134_v38  ;;  %15701 = vst [vmem:[#allocation37_spill] sm:$0xff] %v13149_v55  ;;  %v257_v5 = vrot.slane %v13226_v3, %v256_v2  ;;  %v13239_v29 = vrot.slane %v13226_v3, %v15449_v7 }
 0x13e   :  { %9731 = vmatpush1.bf16.msra.mxu0 %v13139_v43 }
 0x13f   :  { %9733 = vmatprep.subr.bf16.mxu0 %v13143_v48 }
 0x142   :  { %9735 = vmatpush1.bf16.msra.mxu0 %v13146_v12 }
 0x143   :  { %9737 = vmatprep.subr.bf16.mxu0 %v13149_v55 }
 0x146   :  { %9739 = vmatpush1.bf16.msra.mxu0 %v13152_v18 }
 0x147   :  { %9741 = vmatprep.subr.bf16.mxu0 %v13155_v19 }
 0x14a   :  { %9743 = vmatpush1.bf16.msra.mxu0 %v13158_v27 }
 0x14b   :  { %9800 = vmatprep.subr.bf16.mxu0 %v15445_v63 }
 0x14d   :  { %1162 = vmatmul.mubr.f32.vlgmr.msra.gmra.mrb[0].mxu0 %v15443_v1 }
 0x14e   :  { %9802 = vmatpush3.bf16.msra.mxu0 %v13162_v36  ;;  %8815 = vmatprep.mubr.msk.f32.mxu0 %vm12604_vm1, %v15443_v1 }
 0x14f   :  { %9803 = vmatprep.subr.bf16.mxu0 %v15445_v63 }
 0x152   :  { %9805 = vmatpush3.bf16.msra.mxu0 %v13167_v51 }
 0x153   :  { %9806 = vmatprep.subr.bf16.mxu0 %v15445_v63 }
 0x156   :  { %9808 = vmatpush3.bf16.msra.mxu0 %v13173_v0 }
 0x157   :  { %9809 = vmatprep.subr.bf16.mxu0 %v15445_v63 }
 0x15a   :  { %9811 = vmatpush3.bf16.msra.mxu0 %v13177_v4 }
 0x15b   :  { %9812 = vmatprep.subr.bf16.mxu0 %v15445_v63 }
 0x15e   :  { %9814 = vmatpush3.bf16.msra.mxu0 %v13181_v14 }
 0x15f   :  { %9815 = vmatprep.subr.bf16.mxu0 %v15445_v63 }
 0x162   :  { %9817 = vmatpush3.bf16.msra.mxu0 %v13185_v17 }
 0x163   :  { %9818 = vmatprep.subr.bf16.mxu0 %v15445_v63 }
 0x166   :  { %9820 = vmatpush3.bf16.msra.mxu0 %v13189_v24 }
 0x167   :  { %9821 = vmatprep.subr.bf16.mxu0 %v15445_v63 }
 0x16a   :  { %9823 = vmatpush3.bf16.msra.mxu0 %v13193_v35 }
 0x16b   :  { %9825 = vmatprep.subr.bf16.mxu0 %v13071_v6 }
 0x16d   :  { %8816 = vmatmul.mubr.f32.vlgmr.msra.gmra.mrb[56].mxu0 %v15443_v1 }
 0x16e   :  { %9827 = vmatpush1.bf16.msra.mxu0 %v13100_v42  ;;  %1508 = vmatprep.mubr.f32.mxu0 %v15443_v1 }
 0x16f   :  { %9829 = vmatprep.subr.bf16.mxu0 %v13102_v47 }
 0x172   :  { %9831 = vmatpush1.bf16.msra.mxu0 %v13109_v54 }
 0x173   :  { %9833 = vmatprep.subr.bf16.mxu0 %v13114_v61 }
 0x176   :  { %9835 = vmatpush1.bf16.msra.mxu0 %v13119_v9 }
 0x177   :  { %9837 = vmatprep.subr.bf16.mxu0 %v13124_v20 }
 0x17a   :  { %9839 = vmatpush1.bf16.msra.mxu0 %v13129_v31 }
 0x17b   :  { %9841 = vmatprep.subr.bf16.mxu0 %v13134_v38 }
 0x17e   :  { %9843 = vmatpush1.bf16.msra.mxu0 %v13139_v43 }
 0x17f   :  { %9845 = vmatprep.subr.bf16.mxu0 %v13143_v48 }
 0x182   :  { %9847 = vmatpush1.bf16.msra.mxu0 %v13146_v12 }
 0x183   :  { %9849 = vmatprep.subr.bf16.mxu0 %v13149_v55 }
 0x186   :  { %9851 = vmatpush1.bf16.msra.mxu0 %v13152_v18 }
 0x187   :  { %9853 = vmatprep.subr.bf16.mxu0 %v13155_v19 }
 0x18a   :  { %9855 = vmatpush1.bf16.msra.mxu0 %v13158_v27 }
 0x18b   :  { %9912 = vmatprep.subr.bf16.mxu0 %v15445_v63 }
 0x1a1   :  { %v13216_v40 = vpop.f32.mrb[0].mxu1 }
 0x1a2   :  { %15705 = vst [vmem:[#allocation41_spill] sm:$0xff] %v13216_v40  ;;  %v13218_v41 = vpop.f32.mrb[1].mxu1 }
 0x1a3   :  { %15706 = vst [vmem:[#allocation42_spill] sm:$0xff] %v13218_v41 }
 0x1c0   :  { %v13230_v57 = vpop.f32.mrb[16].mxu0 }
 0x1c1   :  { %v478_v16 = vpop.f32.mrb[17].mxu0  ;;  %v13232_v28 = vpop.f32.mrb[16].mxu1 }
 0x1c2   :  { %v13234_v37 = vadd.f32 %v478_v16, %v257_v5  ;;  %v8782_v25 = vpop.f32.mrb[17].mxu1 }
 0x1c4   :  { %15707 = vst [vmem:[#allocation43_spill] sm:$0xff] %v13234_v37  ;;  %v482_v52 = vpop.f32.mrb[18].mxu0 }
 0x1c5   :  { %v13242_v1 = vadd.f32 %v482_v52, %v13239_v29  ;;  %v484_v2 = vpop.f32.mrb[19].mxu0 }
 0x1c6   :  { %v13244_v63 = vadd.f32 %v484_v2, %v257_v5 }
 0x1c7   :  { %15708 = vst [vmem:[#allocation44_spill] sm:$0xff] %v13242_v1 }
 0x1c8   :  { %15709 = vst [vmem:[#allocation45_spill] sm:$0xff] %v13244_v63  ;;  %v488_v41 = vpop.f32.mrb[20].mxu0 }
 0x1c9   :  { %v13247_v40 = vadd.f32 %v488_v41, %v13239_v29  ;;  %v490_v60 = vpop.f32.mrb[21].mxu0 }
 0x1ca   :  { %v13249_v16 = vadd.f32 %v490_v60, %v257_v5 }
 0x1cb   :  { %15710 = vst [vmem:[#allocation46_spill] sm:$0xff] %v13247_v40 }
 0x1cc   :  { %15711 = vst [vmem:[#allocation47_spill] sm:$0xff] %v13249_v16  ;;  %v494_v25 = vpop.f32.mrb[22].mxu0 }
 0x1cd   :  { %v13252_v37 = vadd.f32 %v494_v25, %v13239_v29  ;;  %v496_v7 = vpop.f32.mrb[23].mxu0 }
 0x1ce   :  { %v13254_v56 = vadd.f32 %v496_v7, %v257_v5 }
 0x1cf   :  { %15712 = vst [vmem:[#allocation48_spill] sm:$0xff] %v13252_v37 }
 0x1d0   :  { %15713 = vst [vmem:[#allocation49_spill] sm:$0xff] %v13254_v56  ;;  %v500_v27 = vpop.f32.mrb[24].mxu0  ;;  %v260_v56 = vsub.s32 4, %v13220_v58 }
 0x1d1   :  { %v13257_v52 = vadd.f32 %v500_v27, %v13239_v29  ;;  %v502_v2 = vpop.f32.mrb[25].mxu0  ;;  %v264_v27 = vsub.s32 5, %v13220_v58 }
 0x1d2   :  { %v13259_v63 = vadd.f32 %v502_v2, %v257_v5 }
 0x1d3   :  { %15714 = vst [vmem:[#allocation50_spill] sm:$0xff] %v13257_v52 }
 0x1d4   :  { %15715 = vst [vmem:[#allocation51_spill] sm:$0xff] %v13259_v63  ;;  %v506_v1 = vpop.f32.mrb[26].mxu0  ;;  %v13278_v63 = vrot.slane %v13226_v3, %v264_v27 }
 0x1d5   :  { %v13262_v41 = vadd.f32 %v506_v1, %v13239_v29  ;;  %v508_v60 = vpop.f32.mrb[27].mxu0 }
 0x1d6   :  { %v13264_v16 = vadd.f32 %v508_v60, %v257_v5 }
 0x1d7   :  { %15716 = vst [vmem:[#allocation52_spill] sm:$0xff] %v13262_v41  ;;  %v261_v41 = vrot.slane %v13226_v3, %v260_v56 }
 0x1d8   :  { %15717 = vst [vmem:[#allocation53_spill] sm:$0xff] %v13264_v16  ;;  %v512_v40 = vpop.f32.mrb[28].mxu0 }
 0x1d9   :  { %v13267_v25 = vadd.f32 %v512_v40, %v13239_v29  ;;  %v514_v7 = vpop.f32.mrb[29].mxu0 }
 0x1da   :  { %v13270_v37 = vadd.f32 %v514_v7, %v257_v5 }
 0x1db   :  { %15718 = vst [vmem:[#allocation54_spill] sm:$0xff] %v13267_v25 }
 0x1dc   :  { %15719 = vst [vmem:[#allocation55_spill] sm:$0xff] %v13270_v37  ;;  %v518_v2 = vpop.f32.mrb[30].mxu0 }
 0x1dd   :  { %v13274_v52 = vadd.f32 %v518_v2, %v13239_v29  ;;  %v520_v1 = vpop.f32.mrb[31].mxu0 }
 0x1de   :  { %v521_v60 = vadd.f32 %v520_v1, %v257_v5 }
 0x1df   :  { %15720 = vst [vmem:[#allocation56_spill] sm:$0xff] %v13274_v52 }
 0x1e0   :  { %v589_v40 = vpop.f32.mrb[32].mxu0 }
 0x1e1   :  { %v13280_v25 = vadd.f32 %v589_v40, %v261_v41  ;;  %v1336_v16 = vpop.f32.mrb[18].mxu1  ;;  %v591_v19 = vpop.f32.mrb[33].mxu0 }
 0x1e2   :  { %v1414_v7 = vadd.f32 %v1336_v16, %v521_v60  ;;  %v13283_v37 = vadd.f32 %v591_v19, %v13278_v63  ;;  %v1338_v49 = vpop.f32.mrb[19].mxu1 }
 0x1e3   :  { %15721 = vst [vmem:[#allocation57_spill] sm:$0xff] %v13280_v25 }
 0x1e4   :  { %15722 = vst [vmem:[#allocation58_spill] sm:$0xff] %v13283_v37  ;;  %v595_v18 = vpop.f32.mrb[34].mxu0 }
 0x1e5   :  { %v13285_v2 = vadd.f32 %v595_v18, %v261_v41  ;;  %v597_v52 = vpop.f32.mrb[35].mxu0 }
 0x1e6   :  { %v13288_v56 = vadd.f32 %v597_v52, %v13278_v63 }
 0x1e7   :  { %15723 = vst [vmem:[#allocation59_spill] sm:$0xff] %v13285_v2 }
 0x1e8   :  { %15724 = vst [vmem:[#allocation60_spill] sm:$0xff] %v13288_v56  ;;  %v601_v5 = vpop.f32.mrb[36].mxu0 }
 0x1e9   :  { %v13290_v27 = vadd.f32 %v601_v5, %v261_v41  ;;  %v603_v1 = vpop.f32.mrb[37].mxu0 }
 0x1ea   :  { %v13293_v40 = vadd.f32 %v603_v1, %v13278_v63 }
 0x1eb   :  { %15725 = vst [vmem:[#allocation61_spill] sm:$0xff] %v13290_v27 }
 0x1ec   :  { %15726 = vst [vmem:[#allocation62_spill] sm:$0xff] %v13293_v40  ;;  %v607_v25 = vpop.f32.mrb[38].mxu0 }
 0x1ed   :  { %v13295_v16 = vadd.f32 %v607_v25, %v261_v41  ;;  %v609_v19 = vpop.f32.mrb[39].mxu0 }
 0x1ee   :  { %v13298_v60 = vadd.f32 %v609_v19, %v13278_v63  ;;  %v716_v19 = vld [vmem:[%s15427_s14] sm:$0x7] }
 0x1ef   :  { %15727 = vst [vmem:[#allocation63_spill] sm:$0xff] %v13295_v16 }
 0x1f0   :  { %15728 = vst [vmem:[#allocation64_spill] sm:$0xff] %v13298_v60  ;;  %v613_v18 = vpop.f32.mrb[40].mxu0 }
 0x1f1   :  { %v13300_v37 = vadd.f32 %v613_v18, %v261_v41  ;;  %v615_v2 = vpop.f32.mrb[41].mxu0 }
 0x1f2   :  { %v13303_v52 = vadd.f32 %v615_v2, %v13278_v63 }
 0x1f3   :  { %15729 = vst [vmem:[#allocation65_spill] sm:$0xff] %v13300_v37 }
 0x1f4   :  { %15730 = vst [vmem:[#allocation66_spill] sm:$0xff] %v13303_v52  ;;  %v619_v5 = vpop.f32.mrb[42].mxu0 }
 0x1f5   :  { %v13305_v56 = vadd.f32 %v619_v5, %v261_v41  ;;  %v621_v27 = vpop.f32.mrb[43].mxu0  ;;  %v15735_v5 = vsub.s32 2, %v13220_v58 }
 0x1f6   :  { %v13308_v1 = vadd.f32 %v621_v27, %v13278_v63 }
 0x1f7   :  { %15731 = vst [vmem:[#allocation67_spill] sm:$0xff] %v13305_v56  ;;  %v13320_v37 = vrot.slane %v716_v19, %v15735_v5 }
 0x1f8   :  { %15732 = vst [vmem:[#allocation68_spill] sm:$0xff] %v13308_v1  ;;  %v625_v25 = vpop.f32.mrb[44].mxu0 }
 0x1f9   :  { %v13310_v40 = vadd.f32 %v625_v25, %v261_v41  ;;  %v627_v16 = vpop.f32.mrb[45].mxu0  ;;  %15736 = vst [vmem:[#allocation71_spill] sm:$0xff] %v13320_v37 }
 0x1fa   :  { %v13316_v18 = vadd.f32 %v627_v16, %v13278_v63 }
 0x1fb   :  { %15733 = vst [vmem:[#allocation69_spill] sm:$0xff] %v13310_v40 }
 0x1fc   :  { %15734 = vst [vmem:[#allocation70_spill] sm:$0xff] %v13316_v18  ;;  %v631_v2 = vpop.f32.mrb[46].mxu0 }
 0x1fd   :  { %v632_v60 = vadd.f32 %v631_v2, %v261_v41  ;;  %v633_v52 = vpop.f32.mrb[47].mxu0 }
 0x1ff   :  { %v1421_v27 = vadd.f32 %v1338_v49, %v632_v60 }
 0x200   :  { %v8738_v1 = vpop.f32.mrb[48].mxu0 }
 0x201   :  { %v13323_v25 = vadd.f32 %v8738_v1, %v13320_v37  ;;  %v13325_v56 = vpop.f32.mrb[49].mxu0 }
 0x202   :  { %15738 = vst [vmem:[#allocation73_spill] sm:$0xff] %v13325_v56 }
 0x203   :  { %15737 = vst [vmem:[#allocation72_spill] sm:$0xff] %v13323_v25  ;;  %v7942_v25 = vmul.f32 -1.442695, %v1421_v27 }
 0x204   :  { %v8741_v40 = vpop.f32.mrb[50].mxu0 }
 0x205   :  { %v13328_v55 = vadd.f32 %v8741_v40, %v13320_v37  ;;  %v946_v16 = vpop.f32.mrb[51].mxu0 }
 0x206   :  { %v13331_v18 = vadd.f32 %v946_v16, %v13320_v37 }
 0x207   :  { %15739 = vst [vmem:[#allocation74_spill] sm:$0xff] %v13328_v55  ;;  %v13346_v55 = vsub.s32 0, %v13220_v58 }
 0x208   :  { %15740 = vst [vmem:[#allocation75_spill] sm:$0xff] %v13331_v18  ;;  %v8744_v41 = vpop.f32.mrb[52].mxu0 }
 0x209   :  { %v13334_v2 = vadd.f32 %v8744_v41, %v13320_v37  ;;  %v956_v19 = vpop.f32.mrb[53].mxu0  ;;  %15745 = vst [vmem:[#allocation80_spill] sm:$0xff] %v13346_v55  ;;  %v13350_v16 = vrot.slane %v13226_v3, %v13346_v55  ;;  %v13353_v41 = vsub.s32 1, %v13220_v58 }
 0x20a   :  { %v13337_v49 = vadd.f32 %v956_v19, %v13320_v37 }
 0x20b   :  { %15741 = vst [vmem:[#allocation76_spill] sm:$0xff] %v13334_v2  ;;  %15746 = vst [vmem:[#allocation81_spill] sm:$0xff] %v13350_v16  ;;  %v13357_v2 = vrot.slane %v13226_v3, %v13353_v41 }
 0x20c   :  { %15742 = vst [vmem:[#allocation77_spill] sm:$0xff] %v13337_v49  ;;  %v8747_v60 = vpop.f32.mrb[54].mxu0  ;;  %15747 = vst [vmem:[#allocation82_spill] sm:$0xff] %v13353_v41 }
 0x20d   :  { %v13340_v1 = vadd.f32 %v8747_v60, %v13320_v37  ;;  %v966_v5 = vpop.f32.mrb[55].mxu0  ;;  %15748 = vst [vmem:[#allocation83_spill] sm:$0xff] %v13357_v2 }
 0x20e   :  { %v13343_v40 = vadd.f32 %v966_v5, %v13320_v37  ;;  %v7941_v5 = vmul.f32 -1.442695, %v1414_v7 }
 0x20f   :  { %15743 = vst [vmem:[#allocation78_spill] sm:$0xff] %v13340_v1 }
 0x210   :  { %15744 = vst [vmem:[#allocation79_spill] sm:$0xff] %v13343_v40 }
 0x220   :  { %v1163_v19 = vpop.f32.mrb[0].mxu0 }
 0x221   :  { %v11856_v60 = vadd.f32 %v1163_v19, %v13350_v16  ;;  %v1165_v1 = vpop.f32.mrb[1].mxu0  ;;  %v13364_v19 = vld [vmem:[%s15419_s6] ss:$0 sm:$0xff] }
 0x222   :  { %v11857_v49 = vadd.f32 %v1165_v1, %v13357_v2  ;;  %15749 = vst [vmem:[#allocation84_spill] sm:$0xff] %v13364_v19 }
 0x223   :  { %v7938_v40 = vmul.f32 -1.442695, %v11856_v60 }
 0x224   :  { %v7939_v18 = vmul.f32 -1.442695, %v11857_v49  ;;  %v1261_v49 = vadd.f32 %v13364_v19, %v13232_v28  ;;  %v634_v28 = vadd.f32 %v633_v52, %v13278_v63 }
 0x225   :  { %11958 = vpow2.f32 %v7938_v40 }
 0x226   :  { %11960 = vpow2.f32 %v7941_v5 }
 0x227   :  { %11962 = vpow2.f32 %v7939_v18 }
 0x228   :  { %11964 = vpow2.f32 %v7942_v25 }
 0x22f   :  { %v11959_v56 = vpop.eup %11958 }
 0x230   :  { %v1245_v58 = vadd.f32 1.0, %v11959_v56  ;;  %v11961_v37 = vpop.eup %11960  ;;  %v477_v56 = vadd.f32 %v13230_v57, %v13239_v29 }
 0x231   :  { %v1418_v55 = vadd.f32 1.0, %v11961_v37  ;;  %v11963_v3 = vpop.eup %11962  ;;  %v13373_v37 = vld [vmem:[%s15420_s7] ss:$0 sm:$0xff] }
 0x232   :  { %11966 = vrcp.f32 %v1245_v58  ;;  %v1252_v7 = vadd.f32 1.0, %v11963_v3  ;;  %v11965_v1 = vpop.eup %11964 }
 0x233   :  { %11968 = vrcp.f32 %v1418_v55  ;;  %v1425_v25 = vadd.f32 1.0, %v11965_v1 }
 0x234   :  { %11970 = vrcp.f32 %v1252_v7 }
 0x23c   :  { %v11967_v18 = vpop.eup %11966 }
 0x23d   :  { %v1262_v27 = vmul.f32 %v11967_v18, %v1261_v49  ;;  %v11969_v58 = vpop.eup %11968 }
 0x23e   :  { %v11971_v29 = vpop.eup %11970 }
 0x23f   :  { %v1263_v40 = vadd.f32 %v1262_v27, %v477_v56  ;;  %v1265_v7 = vsub.f32 1.0, %v11971_v29  ;;  %v1267_v41 = vmul.f32 0.0, %v11971_v29 }
 0x240   :  { %v1407_v60 = vpop.f32.mrb[56].mxu0 }
 0x241   :  { %11972 = vtanh.f32 %v1263_v40  ;;  %v1434_v55 = vadd.f32 %v13373_v37, %v1407_v60  ;;  %v8817_v5 = vpop.f32.mrb[57].mxu0  ;;  %v15752_v40 = vmov 0.0   ;;  %v15755_v60 = vld [vmem:[#allocation38_spill] sm:$0xff] }
 0x242   :  { %11974 = vrcp.f32 %v1425_v25  ;;  %v15751_v25 = vmov 0.0|0.0   ;;  %v15757_v5 = vld [vmem:[#allocation39_spill] sm:$0xff] }
 0x243   :  { %v1435_v3 = vmul.f32 %v11969_v58, %v1434_v55  ;;  %v15756_v55 = vld [vmem:[#allocation32_spill] sm:$0xff] }
 0x244   :  { %v15758_v58 = vld [vmem:[#allocation40_spill] sm:$0xff] }
 0x245   :  { %v1436_v57 = vadd.f32 %v1435_v3, %v634_v28  ;;  %v15759_v28 = vld [vmem:[#allocation33_spill] sm:$0xff]  ;;  %v15760_v3 = vld [vmem:[#allocation34_spill] sm:$0xff] }
 0x247   :  { %11976 = vtanh.f32 %v1436_v57 }
 0x24b   :  { %v11973_v49 = vpop.eup %11972 }
 0x24c   :  { %v1266_v18 = vmul.f32 %v11973_v49, %v1265_v7  ;;  %v11975_v19 = vpop.eup %11974 }
 0x24d   :  { %v1438_v56 = vsub.f32 1.0, %v11975_v19  ;;  %v1440_v63 = vmul.f32 0.0, %v11975_v19  ;;  %v15754_v19 = vld [vmem:[#allocation37_spill] sm:$0xff] }
 0x24e   :  { %v13377_v1 = vadd.f32 %v1267_v41, %v1266_v18 }
 0x250   :  { %15750 = vst [vmem:[#allocation85_spill] sm:$0xff] %v13377_v1  ;;  %1509 = vmatmul.mubr.f32.vlgmr.msra.gmra.mrb[2].mxu0 %v13377_v1  ;;  %8851 = vmatmul.mubr.f32.vlgmr.msra.gmra.mrb[20].mxu1 %v13377_v1 }
 0x251   :  { %v11977_v27 = vpop.eup %11976  ;;  %9883 = vmatpush1.bf16.msra.mxu1 %v12982_v11  ;;  %9914 = vmatpush3.bf16.msra.mxu0 %v13162_v36 }
 0x252   :  { %v1439_v52 = vmul.f32 %v11977_v27, %v1438_v56  ;;  %9885 = vmatprep.subr.bf16.mxu1 %v12985_v15  ;;  %9915 = vmatprep.subr.bf16.mxu0 %v15751_v25 }
 0x253   :  { %1676 = vmatprep.mubr.f32.mxu1 %v15752_v40  ;;  %8885 = vmatprep.mubr.msk.f32.mxu0 %vm12604_vm1, %v15752_v40 }
 0x254   :  { %v13388_v41 = vadd.f32 %v1440_v63, %v1439_v52 }
 0x255   :  { %9887 = vmatpush1.bf16.msra.mxu1 %v12992_v26  ;;  %9917 = vmatpush3.bf16.msra.mxu0 %v13167_v51 }
 0x256   :  { %15753 = vst [vmem:[#allocation86_spill] sm:$0xff] %v13388_v41  ;;  %9889 = vmatprep.subr.bf16.mxu1 %v12995_v34  ;;  %9918 = vmatprep.subr.bf16.mxu0 %v15751_v25 }
 0x259   :  { %9891 = vmatpush1.bf16.msra.mxu1 %v13002_v50  ;;  %9920 = vmatpush3.bf16.msra.mxu0 %v13173_v0 }
 0x25a   :  { %9893 = vmatprep.subr.bf16.mxu1 %v13005_v59  ;;  %9921 = vmatprep.subr.bf16.mxu0 %v15751_v25 }
 0x25d   :  { %9895 = vmatpush1.bf16.msra.mxu1 %v13011_v8  ;;  %9923 = vmatpush3.bf16.msra.mxu0 %v13177_v4 }
 0x25e   :  { %9897 = vmatprep.subr.bf16.mxu1 %v13014_v13  ;;  %9924 = vmatprep.subr.bf16.mxu0 %v15751_v25 }
 0x261   :  { %9899 = vmatpush1.bf16.msra.mxu1 %v13020_v22  ;;  %9926 = vmatpush3.bf16.msra.mxu0 %v13181_v14 }
 0x262   :  { %9901 = vmatprep.subr.bf16.mxu1 %v13023_v23  ;;  %9927 = vmatprep.subr.bf16.mxu0 %v15751_v25 }
 0x265   :  { %9903 = vmatpush1.bf16.msra.mxu1 %v13029_v30  ;;  %9929 = vmatpush3.bf16.msra.mxu0 %v13185_v17 }
 0x266   :  { %9905 = vmatprep.subr.bf16.mxu1 %v13032_v33  ;;  %9930 = vmatprep.subr.bf16.mxu0 %v15751_v25 }
 0x269   :  { %9907 = vmatpush1.bf16.msra.mxu1 %v13038_v45  ;;  %9932 = vmatpush3.bf16.msra.mxu0 %v13189_v24 }
 0x26a   :  { %9909 = vmatprep.subr.bf16.mxu1 %v13041_v46  ;;  %9933 = vmatprep.subr.bf16.mxu0 %v15751_v25 }
 0x26d   :  { %9911 = vmatpush1.bf16.msra.mxu1 %v13047_v53  ;;  %9935 = vmatpush3.bf16.msra.mxu0 %v13193_v35 }
 0x26e   :  { %9937 = vmatprep.subr.bf16.mxu0 %v13071_v6  ;;  %9968 = vmatprep.subr.bf16.mxu1 %v15751_v25 }
 0x270   :  { %1677 = vmatmul.mubr.f32.vlgmr.msra.gmra.mrb[22].mxu1 %v13388_v41  ;;  %8886 = vmatmul.mubr.f32.vlgmr.msra.gmra.mrb[58].mxu0 %v13388_v41 }
 0x271   :  { %9939 = vmatpush1.bf16.msra.mxu0 %v13100_v42  ;;  %9970 = vmatpush3.bf16.msra.mxu1 %v12871_v62 }
 0x272   :  { %9941 = vmatprep.subr.bf16.mxu0 %v13102_v47  ;;  %9971 = vmatprep.subr.bf16.mxu1 %v15751_v25 }
 0x273   :  { %1844 = vmatprep.mubr.f32.mxu0 %v15752_v40  ;;  %8920 = vmatprep.mubr.msk.f32.mxu1 %vm12604_vm1, %v15752_v40 }
 0x275   :  { %9943 = vmatpush1.bf16.msra.mxu0 %v13109_v54  ;;  %9973 = vmatpush3.bf16.msra.mxu1 %v12884_v10 }
 0x276   :  { %9945 = vmatprep.subr.bf16.mxu0 %v13114_v61  ;;  %9974 = vmatprep.subr.bf16.mxu1 %v15751_v25 }
 0x279   :  { %9947 = vmatpush1.bf16.msra.mxu0 %v13119_v9  ;;  %9976 = vmatpush3.bf16.msra.mxu1 %v12899_v21 }
 0x27a   :  { %9949 = vmatprep.subr.bf16.mxu0 %v13124_v20  ;;  %9977 = vmatprep.subr.bf16.mxu1 %v15751_v25 }
 0x27d   :  { %9951 = vmatpush1.bf16.msra.mxu0 %v13129_v31  ;;  %9979 = vmatpush3.bf16.msra.mxu1 %v12913_v32 }
 0x27e   :  { %9953 = vmatprep.subr.bf16.mxu0 %v13134_v38  ;;  %9980 = vmatprep.subr.bf16.mxu1 %v15751_v25 }
 0x281   :  { %9955 = vmatpush1.bf16.msra.mxu0 %v13139_v43  ;;  %9982 = vmatpush3.bf16.msra.mxu1 %v12927_v39 }
 0x282   :  { %9957 = vmatprep.subr.bf16.mxu0 %v13143_v48  ;;  %9983 = vmatprep.subr.bf16.mxu1 %v15751_v25 }
 0x285   :  { %9959 = vmatpush1.bf16.msra.mxu0 %v13146_v12  ;;  %9985 = vmatpush3.bf16.msra.mxu1 %v12941_v44  ;;  %v15762_v44 = vld [vmem:[#allocation44_spill] sm:$0xff] }
 0x286   :  { %9961 = vmatprep.subr.bf16.mxu0 %v15754_v19  ;;  %9986 = vmatprep.subr.bf16.mxu1 %v15751_v25 }
 0x289   :  { %9963 = vmatpush1.bf16.msra.mxu0 %v15755_v60  ;;  %9988 = vmatpush3.bf16.msra.mxu1 %v15756_v55 }
 0x28a   :  { %9965 = vmatprep.subr.bf16.mxu0 %v15757_v5  ;;  %9989 = vmatprep.subr.bf16.mxu1 %v15751_v25 }
 0x28d   :  { %9967 = vmatpush1.bf16.msra.mxu0 %v15758_v58  ;;  %9991 = vmatpush3.bf16.msra.mxu1 %v15759_v28 }
 0x28e   :  { %9993 = vmatprep.subr.bf16.mxu1 %v15760_v3  ;;  %10024 = vmatprep.subr.bf16.mxu0 %v15751_v25  ;;  %v15761_v3 = vld [vmem:[#allocation84_spill] sm:$0xff] }
 0x323   :  { %v1510_v57 = vpop.f32.mrb[2].mxu0  ;;  %v1581_v29 = vpop.f32.mrb[20].mxu1 }
 0x324   :  { %v11858_v7 = vadd.f32 %v1510_v57, %v13350_v16  ;;  %v1512_v49 = vpop.f32.mrb[3].mxu0  ;;  %v8852_v18 = vpop.f32.mrb[21].mxu1  ;;  %v1602_v55 = vadd.f32 %v15761_v3, %v1581_v29 }
 0x325   :  { %v11859_v27 = vadd.f32 %v1512_v49, %v13357_v2 }
 0x326   :  { %v7944_v56 = vmul.f32 -1.442695, %v11858_v7  ;;  %v15763_v7 = vld [vmem:[#allocation55_spill] sm:$0xff] }
 0x327   :  { %v7945_v63 = vmul.f32 -1.442695, %v11859_v27 }
 0x328   :  { %11978 = vpow2.f32 %v7944_v56 }
 0x329   :  { %11980 = vpow2.f32 %v7945_v63  ;;  %v15764_v63 = vld [vmem:[#allocation69_spill] sm:$0xff] }
 0x332   :  { %v11979_v52 = vpop.eup %11978 }
 0x333   :  { %v1592_v58 = vadd.f32 1.0, %v11979_v52  ;;  %v11981_v28 = vpop.eup %11980 }
 0x334   :  { %v1599_v5 = vadd.f32 1.0, %v11981_v28 }
 0x335   :  { %11982 = vrcp.f32 %v1592_v58 }
 0x336   :  { %11984 = vrcp.f32 %v1599_v5 }
 0x33f   :  { %v11983_v60 = vpop.eup %11982 }
 0x340   :  { %v1603_v19 = vmul.f32 %v11983_v60, %v1602_v55  ;;  %v11985_v58 = vpop.eup %11984 }
 0x341   :  { %v1606_v12 = vsub.f32 1.0, %v11985_v58  ;;  %v1608_v60 = vmul.f32 %v11985_v58, %v13377_v1  ;;  %v15768_v58 = vld [vmem:[#allocation36_spill] sm:$0xff] }
 0x342   :  { %v1604_v57 = vadd.f32 %v1603_v19, %v15762_v44 }
 0x343   :  { %v1678_v16 = vpop.f32.mrb[22].mxu1  ;;  %v1749_v18 = vpop.f32.mrb[58].mxu0 }
 0x344   :  { %11986 = vtanh.f32 %v1604_v57  ;;  %v1756_v49 = vadd.f32 %v1678_v16, %v15763_v7  ;;  %v1680_v56 = vpop.f32.mrb[23].mxu1  ;;  %v8887_v27 = vpop.f32.mrb[59].mxu0  ;;  %v1770_v16 = vadd.f32 %v13373_v37, %v1749_v18  ;;  %v15766_v57 = vld [vmem:[#allocation70_spill] sm:$0xff] }
 0x345   :  { %v1763_v2 = vadd.f32 %v1680_v56, %v15764_v63 }
 0x346   :  { %v7946_v52 = vmul.f32 -1.442695, %v1756_v49 }
 0x347   :  { %v7947_v28 = vmul.f32 -1.442695, %v1763_v2 }
 0x348   :  { %11988 = vpow2.f32 %v7946_v52 }
 0x349   :  { %11990 = vpow2.f32 %v7947_v28  ;;  %v15769_v28 = vld [vmem:[#allocation31_spill] sm:$0xff] }
 0x34e   :  { %v11987_v29 = vpop.eup %11986 }
 0x34f   :  { %v1607_v3 = vmul.f32 %v11987_v29, %v1606_v12  ;;  %v15770_v29 = vld [vmem:[#allocation37_spill] sm:$0xff] }
 0x351   :  { %v13462_v44 = vadd.f32 %v1608_v60, %v1607_v3  ;;  %v15771_v60 = vld [vmem:[#allocation38_spill] sm:$0xff] }
 0x352   :  { %v11989_v19 = vpop.eup %11988 }
 0x353   :  { %15765 = vst [vmem:[#allocation44_spill] sm:$0xff] %v13462_v44  ;;  %v1760_v55 = vadd.f32 1.0, %v11989_v19  ;;  %1845 = vmatmul.mubr.f32.vlgmr.msra.gmra.mrb[4].mxu0 %v13462_v44  ;;  %8921 = vmatmul.mubr.f32.vlgmr.msra.gmra.mrb[24].mxu1 %v13462_v44  ;;  %v11991_v12 = vpop.eup %11990  ;;  %v15772_v19 = vld [vmem:[#allocation32_spill] sm:$0xff] }
 0x354   :  { %9995 = vmatpush1.bf16.msra.mxu1 %v12982_v11  ;;  %10026 = vmatpush3.bf16.msra.mxu0 %v13162_v36  ;;  %v1767_v2 = vadd.f32 1.0, %v11991_v12  ;;  %v15774_v12 = vld [vmem:[#allocation40_spill] sm:$0xff] }
 0x355   :  { %11992 = vrcp.f32 %v1760_v55  ;;  %9997 = vmatprep.subr.bf16.mxu1 %v12985_v15  ;;  %10027 = vmatprep.subr.bf16.mxu0 %v15751_v25  ;;  %v15773_v55 = vld [vmem:[#allocation39_spill] sm:$0xff] }
 0x356   :  { %2012 = vmatprep.mubr.f32.mxu1 %v15752_v40  ;;  %8955 = vmatprep.mubr.msk.f32.mxu0 %vm12604_vm1, %v15752_v40  ;;  %11994 = vrcp.f32 %v1767_v2  ;;  %v15775_v2 = vld [vmem:[#allocation33_spill] sm:$0xff] }
 0x358   :  { %9999 = vmatpush1.bf16.msra.mxu1 %v12992_v26  ;;  %10029 = vmatpush3.bf16.msra.mxu0 %v13167_v51 }
 0x359   :  { %10001 = vmatprep.subr.bf16.mxu1 %v12995_v34  ;;  %10030 = vmatprep.subr.bf16.mxu0 %v15751_v25 }
 0x35c   :  { %10003 = vmatpush1.bf16.msra.mxu1 %v13002_v50  ;;  %10032 = vmatpush3.bf16.msra.mxu0 %v13173_v0 }
 0x35d   :  { %10005 = vmatprep.subr.bf16.mxu1 %v13005_v59  ;;  %10033 = vmatprep.subr.bf16.mxu0 %v15751_v25 }
 0x35f   :  { %v11993_v5 = vpop.eup %11992 }
 0x360   :  { %v1771_v3 = vmul.f32 %v11993_v5, %v1770_v16  ;;  %10007 = vmatpush1.bf16.msra.mxu1 %v13011_v8  ;;  %10035 = vmatpush3.bf16.msra.mxu0 %v13177_v4  ;;  %v11995_v18 = vpop.eup %11994  ;;  %v15776_v16 = vld [vmem:[#allocation34_spill] sm:$0xff] }
 0x361   :  { %10009 = vmatprep.subr.bf16.mxu1 %v13014_v13  ;;  %10036 = vmatprep.subr.bf16.mxu0 %v15751_v25  ;;  %v1774_v49 = vsub.f32 1.0, %v11995_v18  ;;  %v1776_v63 = vmul.f32 %v11995_v18, %v13388_v41 }
 0x362   :  { %v1772_v7 = vadd.f32 %v1771_v3, %v15766_v57  ;;  %v15777_v57 = vld [vmem:[#allocation81_spill] sm:$0xff] }
 0x364   :  { %11996 = vtanh.f32 %v1772_v7  ;;  %10011 = vmatpush1.bf16.msra.mxu1 %v13020_v22  ;;  %10038 = vmatpush3.bf16.msra.mxu0 %v13181_v14 }
 0x365   :  { %10013 = vmatprep.subr.bf16.mxu1 %v13023_v23  ;;  %10039 = vmatprep.subr.bf16.mxu0 %v15751_v25 }
 0x368   :  { %10015 = vmatpush1.bf16.msra.mxu1 %v13029_v30  ;;  %10041 = vmatpush3.bf16.msra.mxu0 %v13185_v17 }
 0x369   :  { %10017 = vmatprep.subr.bf16.mxu1 %v13032_v33  ;;  %10042 = vmatprep.subr.bf16.mxu0 %v15751_v25 }
 0x36c   :  { %10019 = vmatpush1.bf16.msra.mxu1 %v13038_v45  ;;  %10044 = vmatpush3.bf16.msra.mxu0 %v13189_v24 }
 0x36d   :  { %10021 = vmatprep.subr.bf16.mxu1 %v13041_v46  ;;  %10045 = vmatprep.subr.bf16.mxu0 %v15751_v25 }
 0x36e   :  { %v11997_v56 = vpop.eup %11996 }
 0x36f   :  { %v1775_v27 = vmul.f32 %v11997_v56, %v1774_v49 }
 0x370   :  { %10023 = vmatpush1.bf16.msra.mxu1 %v13047_v53  ;;  %10047 = vmatpush3.bf16.msra.mxu0 %v13193_v35 }
 0x371   :  { %v13502_v52 = vadd.f32 %v1776_v63, %v1775_v27  ;;  %10049 = vmatprep.subr.bf16.mxu0 %v13071_v6  ;;  %10080 = vmatprep.subr.bf16.mxu1 %v15751_v25  ;;  %v15778_v27 = vld [vmem:[#allocation83_spill] sm:$0xff] }
 0x373   :  { %15767 = vst [vmem:[#allocation55_spill] sm:$0xff] %v13502_v52  ;;  %2013 = vmatmul.mubr.f32.vlgmr.msra.gmra.mrb[26].mxu1 %v13502_v52  ;;  %8956 = vmatmul.mubr.f32.vlgmr.msra.gmra.mrb[60].mxu0 %v13502_v52 }
 0x374   :  { %10051 = vmatpush1.bf16.msra.mxu0 %v13100_v42  ;;  %10082 = vmatpush3.bf16.msra.mxu1 %v12871_v62 }
 0x375   :  { %10053 = vmatprep.subr.bf16.mxu0 %v13102_v47  ;;  %10083 = vmatprep.subr.bf16.mxu1 %v15751_v25 }
 0x376   :  { %2180 = vmatprep.mubr.f32.mxu0 %v15752_v40  ;;  %8990 = vmatprep.mubr.msk.f32.mxu1 %vm12604_vm1, %v15752_v40 }
 0x378   :  { %10055 = vmatpush1.bf16.msra.mxu0 %v13109_v54  ;;  %10085 = vmatpush3.bf16.msra.mxu1 %v12884_v10 }
 0x379   :  { %10057 = vmatprep.subr.bf16.mxu0 %v13114_v61  ;;  %10086 = vmatprep.subr.bf16.mxu1 %v15751_v25 }
 0x37c   :  { %10059 = vmatpush1.bf16.msra.mxu0 %v13119_v9  ;;  %10088 = vmatpush3.bf16.msra.mxu1 %v12899_v21 }
 0x37d   :  { %10061 = vmatprep.subr.bf16.mxu0 %v13124_v20  ;;  %10089 = vmatprep.subr.bf16.mxu1 %v15751_v25 }
 0x380   :  { %10063 = vmatpush1.bf16.msra.mxu0 %v13129_v31  ;;  %10091 = vmatpush3.bf16.msra.mxu1 %v12913_v32 }
 0x381   :  { %10065 = vmatprep.subr.bf16.mxu0 %v13134_v38  ;;  %10092 = vmatprep.subr.bf16.mxu1 %v15751_v25 }
 0x384   :  { %10067 = vmatpush1.bf16.msra.mxu0 %v13139_v43  ;;  %10094 = vmatpush3.bf16.msra.mxu1 %v12927_v39 }
 0x385   :  { %10069 = vmatprep.subr.bf16.mxu0 %v13143_v48  ;;  %10095 = vmatprep.subr.bf16.mxu1 %v15751_v25 }
 0x388   :  { %10071 = vmatpush1.bf16.msra.mxu0 %v15768_v58  ;;  %10097 = vmatpush3.bf16.msra.mxu1 %v15769_v28  ;;  %v15780_v28 = vld [vmem:[#allocation46_spill] sm:$0xff] }
 0x389   :  { %10073 = vmatprep.subr.bf16.mxu0 %v15770_v29  ;;  %10098 = vmatprep.subr.bf16.mxu1 %v15751_v25 }
 0x38c   :  { %10075 = vmatpush1.bf16.msra.mxu0 %v15771_v60  ;;  %10100 = vmatpush3.bf16.msra.mxu1 %v15772_v19 }
 0x38d   :  { %10077 = vmatprep.subr.bf16.mxu0 %v15773_v55  ;;  %10101 = vmatprep.subr.bf16.mxu1 %v15751_v25 }
 0x390   :  { %10079 = vmatpush1.bf16.msra.mxu0 %v15774_v12  ;;  %10103 = vmatpush3.bf16.msra.mxu1 %v15775_v2 }
 0x391   :  { %10105 = vmatprep.subr.bf16.mxu1 %v15776_v16  ;;  %10136 = vmatprep.subr.bf16.mxu0 %v15751_v25  ;;  %v15779_v16 = vld [vmem:[#allocation84_spill] sm:$0xff] }
 0x426   :  { %v1846_v5 = vpop.f32.mrb[4].mxu0  ;;  %v1917_v3 = vpop.f32.mrb[24].mxu1 }
 0x427   :  { %v11860_v7 = vadd.f32 %v1846_v5, %v15777_v57  ;;  %v1848_v18 = vpop.f32.mrb[5].mxu0  ;;  %v8922_v49 = vpop.f32.mrb[25].mxu1  ;;  %v1938_v19 = vadd.f32 %v15779_v16, %v1917_v3 }
 0x428   :  { %v11861_v63 = vadd.f32 %v1848_v18, %v15778_v27 }
 0x429   :  { %v7948_v56 = vmul.f32 -1.442695, %v11860_v7  ;;  %v15781_v7 = vld [vmem:[#allocation53_spill] sm:$0xff] }
 0x42a   :  { %v7949_v1 = vmul.f32 -1.442695, %v11861_v63 }
 0x42b   :  { %11998 = vpow2.f32 %v7948_v56 }
 0x42c   :  { %12000 = vpow2.f32 %v7949_v1  ;;  %v15782_v1 = vld [vmem:[#allocation67_spill] sm:$0xff] }
 0x435   :  { %v11999_v41 = vpop.eup %11998 }
 0x436   :  { %v1928_v12 = vadd.f32 1.0, %v11999_v41  ;;  %v12001_v2 = vpop.eup %12000 }
 0x437   :  { %v1935_v55 = vadd.f32 1.0, %v12001_v2 }
 0x438   :  { %12002 = vrcp.f32 %v1928_v12 }
 0x439   :  { %12004 = vrcp.f32 %v1935_v55 }
 0x442   :  { %v12003_v60 = vpop.eup %12002 }
 0x443   :  { %v1939_v29 = vmul.f32 %v12003_v60, %v1938_v19  ;;  %v12005_v12 = vpop.eup %12004 }
 0x444   :  { %v1942_v58 = vsub.f32 1.0, %v12005_v12  ;;  %v1944_v60 = vmul.f32 %v12005_v12, %v13462_v44  ;;  %v15786_v12 = vld [vmem:[#allocation36_spill] sm:$0xff] }
 0x445   :  { %v1940_v5 = vadd.f32 %v1939_v29, %v15780_v28 }
 0x446   :  { %v2014_v57 = vpop.f32.mrb[26].mxu1  ;;  %v2085_v49 = vpop.f32.mrb[60].mxu0 }
 0x447   :  { %12006 = vtanh.f32 %v1940_v5  ;;  %v2092_v18 = vadd.f32 %v2014_v57, %v15781_v7  ;;  %v2016_v56 = vpop.f32.mrb[27].mxu1  ;;  %v8957_v63 = vpop.f32.mrb[61].mxu0  ;;  %v15784_v5 = vld [vmem:[#allocation68_spill] sm:$0xff] }
 0x448   :  { %v2099_v27 = vadd.f32 %v2016_v56, %v15782_v1 }
 0x449   :  { %v7950_v41 = vmul.f32 -1.442695, %v2092_v18 }
 0x44a   :  { %v7951_v2 = vmul.f32 -1.442695, %v2099_v27 }
 0x44b   :  { %12008 = vpow2.f32 %v7950_v41 }
 0x44c   :  { %12010 = vpow2.f32 %v7951_v2  ;;  %v15787_v2 = vld [vmem:[#allocation31_spill] sm:$0xff] }
 0x451   :  { %v12007_v3 = vpop.eup %12006 }
 0x452   :  { %v1943_v16 = vmul.f32 %v12007_v3, %v1942_v58  ;;  %v15788_v3 = vld [vmem:[#allocation37_spill] sm:$0xff] }
 0x454   :  { %v13550_v28 = vadd.f32 %v1944_v60, %v1943_v16  ;;  %v2106_v16 = vadd.f32 %v13373_v37, %v2085_v49  ;;  %v15789_v60 = vld [vmem:[#allocation38_spill] sm:$0xff] }
 0x455   :  { %v12009_v29 = vpop.eup %12008 }
 0x456   :  { %15783 = vst [vmem:[#allocation69_spill] sm:$0xff] %v13550_v28  ;;  %v2096_v19 = vadd.f32 1.0, %v12009_v29  ;;  %2181 = vmatmul.mubr.f32.vlgmr.msra.gmra.mrb[6].mxu0 %v13550_v28  ;;  %8991 = vmatmul.mubr.f32.vlgmr.msra.gmra.mrb[28].mxu1 %v13550_v28  ;;  %v12011_v58 = vpop.eup %12010  ;;  %v15790_v29 = vld [vmem:[#allocation32_spill] sm:$0xff] }
 0x457   :  { %10107 = vmatpush1.bf16.msra.mxu1 %v12982_v11  ;;  %10138 = vmatpush3.bf16.msra.mxu0 %v13162_v36  ;;  %v2103_v55 = vadd.f32 1.0, %v12011_v58  ;;  %v15792_v58 = vld [vmem:[#allocation40_spill] sm:$0xff] }
 0x458   :  { %12012 = vrcp.f32 %v2096_v19  ;;  %10109 = vmatprep.subr.bf16.mxu1 %v12985_v15  ;;  %10139 = vmatprep.subr.bf16.mxu0 %v15751_v25  ;;  %v15791_v19 = vld [vmem:[#allocation39_spill] sm:$0xff] }
 0x459   :  { %2348 = vmatprep.mubr.f32.mxu1 %v15752_v40  ;;  %9025 = vmatprep.mubr.msk.f32.mxu0 %vm12604_vm1, %v15752_v40  ;;  %12014 = vrcp.f32 %v2103_v55  ;;  %v15793_v55 = vld [vmem:[#allocation33_spill] sm:$0xff] }
 0x45b   :  { %10111 = vmatpush1.bf16.msra.mxu1 %v12992_v26  ;;  %10141 = vmatpush3.bf16.msra.mxu0 %v13167_v51 }
 0x45c   :  { %10113 = vmatprep.subr.bf16.mxu1 %v12995_v34  ;;  %10142 = vmatprep.subr.bf16.mxu0 %v15751_v25 }
 0x45f   :  { %10115 = vmatpush1.bf16.msra.mxu1 %v13002_v50  ;;  %10144 = vmatpush3.bf16.msra.mxu0 %v13173_v0 }
 0x460   :  { %10117 = vmatprep.subr.bf16.mxu1 %v13005_v59  ;;  %10145 = vmatprep.subr.bf16.mxu0 %v15751_v25 }
 0x462   :  { %v12013_v57 = vpop.eup %12012 }
 0x463   :  { %v2107_v27 = vmul.f32 %v12013_v57, %v2106_v16  ;;  %10119 = vmatpush1.bf16.msra.mxu1 %v13011_v8  ;;  %10147 = vmatpush3.bf16.msra.mxu0 %v13177_v4  ;;  %v12015_v49 = vpop.eup %12014  ;;  %v15794_v16 = vld [vmem:[#allocation34_spill] sm:$0xff] }
 0x464   :  { %10121 = vmatprep.subr.bf16.mxu1 %v13014_v13  ;;  %10148 = vmatprep.subr.bf16.mxu0 %v15751_v25  ;;  %v2110_v18 = vsub.f32 1.0, %v12015_v49  ;;  %v2112_v1 = vmul.f32 %v12015_v49, %v13502_v52 }
 0x465   :  { %v2108_v7 = vadd.f32 %v2107_v27, %v15784_v5  ;;  %v15795_v5 = vld [vmem:[#allocation81_spill] sm:$0xff] }
 0x467   :  { %12016 = vtanh.f32 %v2108_v7  ;;  %10123 = vmatpush1.bf16.msra.mxu1 %v13020_v22  ;;  %10150 = vmatpush3.bf16.msra.mxu0 %v13181_v14 }
 0x468   :  { %10125 = vmatprep.subr.bf16.mxu1 %v13023_v23  ;;  %10151 = vmatprep.subr.bf16.mxu0 %v15751_v25 }
 0x46b   :  { %10127 = vmatpush1.bf16.msra.mxu1 %v13029_v30  ;;  %10153 = vmatpush3.bf16.msra.mxu0 %v13185_v17 }
 0x46c   :  { %10129 = vmatprep.subr.bf16.mxu1 %v13032_v33  ;;  %10154 = vmatprep.subr.bf16.mxu0 %v15751_v25 }
 0x46f   :  { %10131 = vmatpush1.bf16.msra.mxu1 %v13038_v45  ;;  %10156 = vmatpush3.bf16.msra.mxu0 %v13189_v24 }
 0x470   :  { %10133 = vmatprep.subr.bf16.mxu1 %v13041_v46  ;;  %10157 = vmatprep.subr.bf16.mxu0 %v15751_v25 }
 0x471   :  { %v12017_v56 = vpop.eup %12016 }
 0x472   :  { %v2111_v63 = vmul.f32 %v12017_v56, %v2110_v18 }
 0x473   :  { %10135 = vmatpush1.bf16.msra.mxu1 %v13047_v53  ;;  %10159 = vmatpush3.bf16.msra.mxu0 %v13193_v35 }
 0x474   :  { %v13590_v41 = vadd.f32 %v2112_v1, %v2111_v63  ;;  %10161 = vmatprep.subr.bf16.mxu0 %v13071_v6  ;;  %10192 = vmatprep.subr.bf16.mxu1 %v15751_v25  ;;  %v15796_v63 = vld [vmem:[#allocation83_spill] sm:$0xff] }
 0x476   :  { %15785 = vst [vmem:[#allocation70_spill] sm:$0xff] %v13590_v41  ;;  %2349 = vmatmul.mubr.f32.vlgmr.msra.gmra.mrb[30].mxu1 %v13590_v41  ;;  %9026 = vmatmul.mubr.f32.vlgmr.msra.gmra.mrb[62].mxu0 %v13590_v41 }
 0x477   :  { %10163 = vmatpush1.bf16.msra.mxu0 %v13100_v42  ;;  %10194 = vmatpush3.bf16.msra.mxu1 %v12871_v62 }
 0x478   :  { %10165 = vmatprep.subr.bf16.mxu0 %v13102_v47  ;;  %10195 = vmatprep.subr.bf16.mxu1 %v15751_v25 }
 0x479   :  { %2516 = vmatprep.mubr.f32.mxu0 %v15752_v40  ;;  %9060 = vmatprep.mubr.msk.f32.mxu1 %vm12604_vm1, %v15752_v40 }
 0x47b   :  { %10167 = vmatpush1.bf16.msra.mxu0 %v13109_v54  ;;  %10197 = vmatpush3.bf16.msra.mxu1 %v12884_v10 }
 0x47c   :  { %10169 = vmatprep.subr.bf16.mxu0 %v13114_v61  ;;  %10198 = vmatprep.subr.bf16.mxu1 %v15751_v25 }
 0x47f   :  { %10171 = vmatpush1.bf16.msra.mxu0 %v13119_v9  ;;  %10200 = vmatpush3.bf16.msra.mxu1 %v12899_v21 }
 0x480   :  { %10173 = vmatprep.subr.bf16.mxu0 %v13124_v20  ;;  %10201 = vmatprep.subr.bf16.mxu1 %v15751_v25 }
 0x483   :  { %10175 = vmatpush1.bf16.msra.mxu0 %v13129_v31  ;;  %10203 = vmatpush3.bf16.msra.mxu1 %v12913_v32 }
 0x484   :  { %10177 = vmatprep.subr.bf16.mxu0 %v13134_v38  ;;  %10204 = vmatprep.subr.bf16.mxu1 %v15751_v25 }
 0x487   :  { %10179 = vmatpush1.bf16.msra.mxu0 %v13139_v43  ;;  %10206 = vmatpush3.bf16.msra.mxu1 %v12927_v39 }
 0x488   :  { %10181 = vmatprep.subr.bf16.mxu0 %v13143_v48  ;;  %10207 = vmatprep.subr.bf16.mxu1 %v15751_v25 }
 0x48b   :  { %10183 = vmatpush1.bf16.msra.mxu0 %v15786_v12  ;;  %10209 = vmatpush3.bf16.msra.mxu1 %v15787_v2  ;;  %v15798_v2 = vld [vmem:[#allocation48_spill] sm:$0xff] }
 0x48c   :  { %10185 = vmatprep.subr.bf16.mxu0 %v15788_v3  ;;  %10210 = vmatprep.subr.bf16.mxu1 %v15751_v25 }
 0x48f   :  { %10187 = vmatpush1.bf16.msra.mxu0 %v15789_v60  ;;  %10212 = vmatpush3.bf16.msra.mxu1 %v15790_v29 }
 0x490   :  { %10189 = vmatprep.subr.bf16.mxu0 %v15791_v19  ;;  %10213 = vmatprep.subr.bf16.mxu1 %v15751_v25 }
 0x493   :  { %10191 = vmatpush1.bf16.msra.mxu0 %v15792_v58  ;;  %10215 = vmatpush3.bf16.msra.mxu1 %v15793_v55 }
 0x494   :  { %10217 = vmatprep.subr.bf16.mxu1 %v15794_v16  ;;  %10248 = vmatprep.subr.bf16.mxu0 %v15751_v25  ;;  %v15797_v16 = vld [vmem:[#allocation84_spill] sm:$0xff] }
 0x529   :  { %v2182_v57 = vpop.f32.mrb[6].mxu0  ;;  %v2253_v27 = vpop.f32.mrb[28].mxu1 }
 0x52a   :  { %v11862_v7 = vadd.f32 %v2182_v57, %v15795_v5  ;;  %v2184_v49 = vpop.f32.mrb[7].mxu0  ;;  %v8992_v18 = vpop.f32.mrb[29].mxu1  ;;  %v2274_v29 = vadd.f32 %v15797_v16, %v2253_v27 }
 0x52b   :  { %v11863_v1 = vadd.f32 %v2184_v49, %v15796_v63 }
 0x52c   :  { %v7952_v56 = vmul.f32 -1.442695, %v11862_v7  ;;  %v15799_v7 = vld [vmem:[#allocation51_spill] sm:$0xff] }
 0x52d   :  { %v7953_v44 = vmul.f32 -1.442695, %v11863_v1 }
 0x52e   :  { %12018 = vpow2.f32 %v7952_v56 }
 0x52f   :  { %12020 = vpow2.f32 %v7953_v44  ;;  %v15800_v44 = vld [vmem:[#allocation65_spill] sm:$0xff] }
 0x538   :  { %v12019_v52 = vpop.eup %12018 }
 0x539   :  { %v2264_v58 = vadd.f32 1.0, %v12019_v52  ;;  %v12021_v55 = vpop.eup %12020 }
 0x53a   :  { %v2271_v19 = vadd.f32 1.0, %v12021_v55 }
 0x53b   :  { %12022 = vrcp.f32 %v2264_v58 }
 0x53c   :  { %12024 = vrcp.f32 %v2271_v19 }
 0x545   :  { %v12023_v60 = vpop.eup %12022 }
 0x546   :  { %v2275_v3 = vmul.f32 %v12023_v60, %v2274_v29  ;;  %v12025_v58 = vpop.eup %12024 }
 0x547   :  { %v2278_v12 = vsub.f32 1.0, %v12025_v58  ;;  %v2280_v60 = vmul.f32 %v12025_v58, %v13550_v28  ;;  %v15805_v58 = vld [vmem:[#allocation31_spill] sm:$0xff] }
 0x548   :  { %v2276_v57 = vadd.f32 %v2275_v3, %v15798_v2 }
 0x549   :  { %v2350_v5 = vpop.f32.mrb[30].mxu1  ;;  %v2421_v18 = vpop.f32.mrb[62].mxu0 }
 0x54a   :  { %12026 = vtanh.f32 %v2276_v57  ;;  %v2428_v49 = vadd.f32 %v2350_v5, %v15799_v7  ;;  %v2352_v56 = vpop.f32.mrb[31].mxu1  ;;  %v9027_v1 = vpop.f32.mrb[63].mxu0  ;;  %v15802_v57 = vld [vmem:[#allocation66_spill] sm:$0xff] }
 0x54b   :  { %v2435_v63 = vadd.f32 %v2352_v56, %v15800_v44 }
 0x54c   :  { %v7954_v52 = vmul.f32 -1.442695, %v2428_v49 }
 0x54d   :  { %v7955_v55 = vmul.f32 -1.442695, %v2435_v63 }
 0x54e   :  { %12028 = vpow2.f32 %v7954_v52  ;;  %v15804_v52 = vld [vmem:[#allocation36_spill] sm:$0xff] }
 0x54f   :  { %12030 = vpow2.f32 %v7955_v55  ;;  %v15806_v55 = vld [vmem:[#allocation37_spill] sm:$0xff] }
 0x554   :  { %v12027_v27 = vpop.eup %12026 }
 0x555   :  { %v2279_v16 = vmul.f32 %v12027_v27, %v2278_v12  ;;  %v15807_v27 = vld [vmem:[#allocation38_spill] sm:$0xff] }
 0x557   :  { %v13638_v2 = vadd.f32 %v2280_v60, %v2279_v16  ;;  %v2442_v16 = vadd.f32 %v13373_v37, %v2421_v18  ;;  %v15808_v60 = vld [vmem:[#allocation32_spill] sm:$0xff] }
 0x558   :  { %v12029_v3 = vpop.eup %12028 }
 0x559   :  { %15801 = vst [vmem:[#allocation46_spill] sm:$0xff] %v13638_v2  ;;  %v2432_v29 = vadd.f32 1.0, %v12029_v3  ;;  %2517 = vmatmul.mubr.f32.vlgmr.msra.gmra.mrb[8].mxu0 %v13638_v2  ;;  %9061 = vmatmul.mubr.f32.vlgmr.msra.gmra.mrb[32].mxu1 %v13638_v2  ;;  %v12031_v12 = vpop.eup %12030  ;;  %v15809_v3 = vld [vmem:[#allocation39_spill] sm:$0xff] }
 0x55a   :  { %10219 = vmatpush1.bf16.msra.mxu1 %v12982_v11  ;;  %10250 = vmatpush3.bf16.msra.mxu0 %v13162_v36  ;;  %v2439_v19 = vadd.f32 1.0, %v12031_v12  ;;  %v15811_v12 = vld [vmem:[#allocation33_spill] sm:$0xff] }
 0x55b   :  { %12032 = vrcp.f32 %v2432_v29  ;;  %10221 = vmatprep.subr.bf16.mxu1 %v12985_v15  ;;  %10251 = vmatprep.subr.bf16.mxu0 %v15751_v25  ;;  %v15810_v29 = vld [vmem:[#allocation40_spill] sm:$0xff] }
 0x55c   :  { %2684 = vmatprep.mubr.f32.mxu1 %v15752_v40  ;;  %9095 = vmatprep.mubr.msk.f32.mxu0 %vm12604_vm1, %v15752_v40  ;;  %12034 = vrcp.f32 %v2439_v19  ;;  %v15812_v19 = vld [vmem:[#allocation34_spill] sm:$0xff] }
 0x55e   :  { %10223 = vmatpush1.bf16.msra.mxu1 %v12992_v26  ;;  %10253 = vmatpush3.bf16.msra.mxu0 %v13167_v51 }
 0x55f   :  { %10225 = vmatprep.subr.bf16.mxu1 %v12995_v34  ;;  %10254 = vmatprep.subr.bf16.mxu0 %v15751_v25 }
 0x562   :  { %10227 = vmatpush1.bf16.msra.mxu1 %v13002_v50  ;;  %10256 = vmatpush3.bf16.msra.mxu0 %v13173_v0 }
 0x563   :  { %10229 = vmatprep.subr.bf16.mxu1 %v13005_v59  ;;  %10257 = vmatprep.subr.bf16.mxu0 %v15751_v25 }
 0x565   :  { %v12033_v5 = vpop.eup %12032 }
 0x566   :  { %v2443_v63 = vmul.f32 %v12033_v5, %v2442_v16  ;;  %10231 = vmatpush1.bf16.msra.mxu1 %v13011_v8  ;;  %10259 = vmatpush3.bf16.msra.mxu0 %v13177_v4  ;;  %v12035_v37 = vpop.eup %12034 }
 0x567   :  { %10233 = vmatprep.subr.bf16.mxu1 %v13014_v13  ;;  %10260 = vmatprep.subr.bf16.mxu0 %v15751_v25  ;;  %v2446_v18 = vsub.f32 1.0, %v12035_v37  ;;  %v2448_v1 = vmul.f32 %v12035_v37, %v13590_v41 }
 0x568   :  { %v2444_v7 = vadd.f32 %v2443_v63, %v15802_v57  ;;  %v15813_v63 = vld [vmem:[#allocation81_spill] sm:$0xff] }
 0x56a   :  { %12036 = vtanh.f32 %v2444_v7  ;;  %10235 = vmatpush1.bf16.msra.mxu1 %v13020_v22  ;;  %10262 = vmatpush3.bf16.msra.mxu0 %v13181_v14 }
 0x56b   :  { %10237 = vmatprep.subr.bf16.mxu1 %v13023_v23  ;;  %10263 = vmatprep.subr.bf16.mxu0 %v15751_v25 }
 0x56e   :  { %10239 = vmatpush1.bf16.msra.mxu1 %v13029_v30  ;;  %10265 = vmatpush3.bf16.msra.mxu0 %v13185_v17 }
 0x56f   :  { %10241 = vmatprep.subr.bf16.mxu1 %v13032_v33  ;;  %10266 = vmatprep.subr.bf16.mxu0 %v15751_v25 }
 0x572   :  { %10243 = vmatpush1.bf16.msra.mxu1 %v13038_v45  ;;  %10268 = vmatpush3.bf16.msra.mxu0 %v13189_v24 }
 0x573   :  { %10245 = vmatprep.subr.bf16.mxu1 %v13041_v46  ;;  %10269 = vmatprep.subr.bf16.mxu0 %v15751_v25 }
 0x574   :  { %v12037_v49 = vpop.eup %12036 }
 0x575   :  { %v2447_v56 = vmul.f32 %v12037_v49, %v2446_v18  ;;  %v15814_v49 = vld [vmem:[#allocation83_spill] sm:$0xff] }
 0x576   :  { %10247 = vmatpush1.bf16.msra.mxu1 %v13047_v53  ;;  %10271 = vmatpush3.bf16.msra.mxu0 %v13193_v35 }
 0x577   :  { %v13678_v44 = vadd.f32 %v2448_v1, %v2447_v56  ;;  %10273 = vmatprep.subr.bf16.mxu0 %v13071_v6  ;;  %10304 = vmatprep.subr.bf16.mxu1 %v15751_v25 }
 0x579   :  { %15803 = vst [vmem:[#allocation53_spill] sm:$0xff] %v13678_v44  ;;  %2685 = vmatmul.mubr.f32.vlgmr.msra.gmra.mrb[34].mxu1 %v13678_v44  ;;  %9096 = vmatmul.mubr.f32.vlgmr.msra.gmra.mrb[64].mxu0 %v13678_v44 }
 0x57a   :  { %10275 = vmatpush1.bf16.msra.mxu0 %v13100_v42  ;;  %10306 = vmatpush3.bf16.msra.mxu1 %v12871_v62 }
 0x57b   :  { %10277 = vmatprep.subr.bf16.mxu0 %v13102_v47  ;;  %10307 = vmatprep.subr.bf16.mxu1 %v15751_v25 }
 0x57c   :  { %2852 = vmatprep.mubr.f32.mxu0 %v15752_v40  ;;  %9130 = vmatprep.mubr.msk.f32.mxu1 %vm12604_vm1, %v15752_v40 }
 0x57e   :  { %10279 = vmatpush1.bf16.msra.mxu0 %v13109_v54  ;;  %10309 = vmatpush3.bf16.msra.mxu1 %v12884_v10 }
 0x57f   :  { %10281 = vmatprep.subr.bf16.mxu0 %v13114_v61  ;;  %10310 = vmatprep.subr.bf16.mxu1 %v15751_v25 }
 0x582   :  { %10283 = vmatpush1.bf16.msra.mxu0 %v13119_v9  ;;  %10312 = vmatpush3.bf16.msra.mxu1 %v12899_v21 }
 0x583   :  { %10285 = vmatprep.subr.bf16.mxu0 %v13124_v20  ;;  %10313 = vmatprep.subr.bf16.mxu1 %v15751_v25 }
 0x586   :  { %10287 = vmatpush1.bf16.msra.mxu0 %v13129_v31  ;;  %10315 = vmatpush3.bf16.msra.mxu1 %v12913_v32 }
 0x587   :  { %10289 = vmatprep.subr.bf16.mxu0 %v13134_v38  ;;  %10316 = vmatprep.subr.bf16.mxu1 %v15751_v25 }
 0x58a   :  { %10291 = vmatpush1.bf16.msra.mxu0 %v13139_v43  ;;  %10318 = vmatpush3.bf16.msra.mxu1 %v12927_v39 }
 0x58b   :  { %10293 = vmatprep.subr.bf16.mxu0 %v13143_v48  ;;  %10319 = vmatprep.subr.bf16.mxu1 %v15751_v25 }
 0x58e   :  { %10295 = vmatpush1.bf16.msra.mxu0 %v15804_v52  ;;  %10321 = vmatpush3.bf16.msra.mxu1 %v15805_v58 }
 0x58f   :  { %10297 = vmatprep.subr.bf16.mxu0 %v15806_v55  ;;  %10322 = vmatprep.subr.bf16.mxu1 %v15751_v25  ;;  %v15816_v55 = vld [vmem:[#allocation50_spill] sm:$0xff] }
 0x592   :  { %10299 = vmatpush1.bf16.msra.mxu0 %v15807_v27  ;;  %10324 = vmatpush3.bf16.msra.mxu1 %v15808_v60 }
 0x593   :  { %10301 = vmatprep.subr.bf16.mxu0 %v15809_v3  ;;  %10325 = vmatprep.subr.bf16.mxu1 %v15751_v25 }
 0x596   :  { %10303 = vmatpush1.bf16.msra.mxu0 %v15810_v29  ;;  %10327 = vmatpush3.bf16.msra.mxu1 %v15811_v12 }
 0x597   :  { %10329 = vmatprep.subr.bf16.mxu1 %v15812_v19  ;;  %10360 = vmatprep.subr.bf16.mxu0 %v15751_v25  ;;  %v15815_v19 = vld [vmem:[#allocation84_spill] sm:$0xff] }
 0x62c   :  { %v2518_v16 = vpop.f32.mrb[8].mxu0  ;;  %v2589_v5 = vpop.f32.mrb[32].mxu1 }
 0x62d   :  { %v11864_v57 = vadd.f32 %v2518_v16, %v15813_v63  ;;  %v2520_v7 = vpop.f32.mrb[9].mxu0  ;;  %v9062_v37 = vpop.f32.mrb[33].mxu1  ;;  %v2610_v3 = vadd.f32 %v15815_v19, %v2589_v5 }
 0x62e   :  { %v11865_v56 = vadd.f32 %v2520_v7, %v15814_v49 }
 0x62f   :  { %v7956_v18 = vmul.f32 -1.442695, %v11864_v57  ;;  %v15817_v57 = vld [vmem:[#allocation49_spill] sm:$0xff] }
 0x630   :  { %v7957_v1 = vmul.f32 -1.442695, %v11865_v56 }
 0x631   :  { %12038 = vpow2.f32 %v7956_v18 }
 0x632   :  { %12040 = vpow2.f32 %v7957_v1  ;;  %v15818_v1 = vld [vmem:[#allocation63_spill] sm:$0xff] }
 0x63b   :  { %v12039_v28 = vpop.eup %12038 }
 0x63c   :  { %v2600_v41 = vadd.f32 1.0, %v12039_v28  ;;  %v12041_v12 = vpop.eup %12040 }
 0x63d   :  { %v2607_v29 = vadd.f32 1.0, %v12041_v12 }
 0x63e   :  { %12042 = vrcp.f32 %v2600_v41 }
 0x63f   :  { %12044 = vrcp.f32 %v2607_v29  ;;  %v15819_v29 = vld [vmem:[#allocation80_spill] sm:$0xff] }
 0x648   :  { %v12043_v60 = vpop.eup %12042 }
 0x649   :  { %v2611_v27 = vmul.f32 %v12043_v60, %v2610_v3  ;;  %v12045_v41 = vpop.eup %12044  ;;  %v3811_v60 = vld [vmem:[%s15422_s9] sm:$0x3] }
 0x64a   :  { %v2614_v58 = vsub.f32 1.0, %v12045_v41  ;;  %v13732_v5 = vrot.slane %v3811_v60, %v15819_v29 }
 0x64b   :  { %v2612_v16 = vadd.f32 %v2611_v27, %v15816_v55  ;;  %v2616_v27 = vmul.f32 %v12045_v41, %v13638_v2 }
 0x64c   :  { %v2686_v63 = vpop.f32.mrb[34].mxu1  ;;  %v2757_v37 = vpop.f32.mrb[64].mxu0 }
 0x64d   :  { %12046 = vtanh.f32 %v2612_v16  ;;  %v2764_v7 = vadd.f32 %v2686_v63, %v15817_v57  ;;  %v2688_v18 = vpop.f32.mrb[35].mxu1  ;;  %v9097_v56 = vpop.f32.mrb[65].mxu0  ;;  %v15820_v63 = vld [vmem:[#allocation82_spill] sm:$0xff] }
 0x64e   :  { %v2771_v49 = vadd.f32 %v2688_v18, %v15818_v1  ;;  %v13735_v16 = vrot.slane %v3811_v60, %v15820_v63  ;;  %v15821_v60 = vld [vmem:[#allocation64_spill] sm:$0xff] }
 0x64f   :  { %v7958_v28 = vmul.f32 -1.442695, %v2764_v7 }
 0x650   :  { %v7959_v12 = vmul.f32 -1.442695, %v2771_v49  ;;  %v3832_v7 = vmul.f32 %v13735_v16, %v13678_v44 }
 0x651   :  { %12048 = vpow2.f32 %v7958_v28  ;;  %v13761_v28 = vld [vmem:[%s15420_s7] ss:$0 sm:$0xff] }
 0x652   :  { %12050 = vpow2.f32 %v7959_v12  ;;  %v2778_v41 = vadd.f32 %v13761_v28, %v2757_v37 }
 0x657   :  { %v12047_v19 = vpop.eup %12046 }
 0x658   :  { %v2615_v55 = vmul.f32 %v12047_v19, %v2614_v58 }
 0x65a   :  { %v13729_v3 = vadd.f32 %v2616_v27, %v2615_v55 }
 0x65b   :  { %v12049_v57 = vpop.eup %12048 }
 0x65c   :  { %v2768_v49 = vadd.f32 1.0, %v12049_v57  ;;  %2853 = vmatmul.mubr.f32.vlgmr.msra.gmra.mrb[10].mxu0 %v13729_v3  ;;  %9131 = vmatmul.mubr.f32.vlgmr.msra.gmra.mrb[36].mxu1 %v13729_v3  ;;  %v3831_v58 = vmul.f32 %v13732_v5, %v13729_v3  ;;  %v12051_v56 = vpop.eup %12050 }
 0x65d   :  { %10331 = vmatpush1.bf16.msra.mxu1 %v12982_v11  ;;  %10362 = vmatpush3.bf16.msra.mxu0 %v13162_v36  ;;  %v2775_v1 = vadd.f32 1.0, %v12051_v56 }
 0x65e   :  { %12052 = vrcp.f32 %v2768_v49  ;;  %10333 = vmatprep.subr.bf16.mxu1 %v12985_v15  ;;  %10363 = vmatprep.subr.bf16.mxu0 %v15751_v25  ;;  %v3851_v18 = vadd.f32 %v3832_v7, %v3831_v58 }
 0x65f   :  { %3020 = vmatprep.mubr.f32.mxu1 %v15752_v40  ;;  %9165 = vmatprep.mubr.msk.f32.mxu0 %vm12604_vm1, %v15752_v40  ;;  %12054 = vrcp.f32 %v2775_v1 }
 0x660   :  { %3852 = vadd.xlane.f32.xlu0 %v3851_v18  ;;  %v3829_v18 = vmul.f32 %v13732_v5, %v13638_v2 }
 0x661   :  { %10335 = vmatpush1.bf16.msra.mxu1 %v12992_v26  ;;  %10365 = vmatpush3.bf16.msra.mxu0 %v13167_v51 }
 0x662   :  { %10337 = vmatprep.subr.bf16.mxu1 %v12995_v34  ;;  %10366 = vmatprep.subr.bf16.mxu0 %v15751_v25 }
 0x665   :  { %10339 = vmatpush1.bf16.msra.mxu1 %v13002_v50  ;;  %10368 = vmatpush3.bf16.msra.mxu0 %v13173_v0 }
 0x666   :  { %10341 = vmatprep.subr.bf16.mxu1 %v13005_v59  ;;  %10369 = vmatprep.subr.bf16.mxu0 %v15751_v25 }
 0x668   :  { %v12053_v12 = vpop.eup %12052 }
 0x669   :  { %v2779_v19 = vmul.f32 %v12053_v12, %v2778_v41  ;;  %10343 = vmatpush1.bf16.msra.mxu1 %v13011_v8  ;;  %10371 = vmatpush3.bf16.msra.mxu0 %v13177_v4  ;;  %v12055_v37 = vpop.eup %12054  ;;  %v15822_v41 = vld [vmem:[#allocation31_spill] sm:$0xff]  ;;  %v15823_v12 = vld [vmem:[#allocation37_spill] sm:$0xff] }
 0x66a   :  { %10345 = vmatprep.subr.bf16.mxu1 %v13014_v13  ;;  %10372 = vmatprep.subr.bf16.mxu0 %v15751_v25  ;;  %v2782_v27 = vsub.f32 1.0, %v12055_v37  ;;  %v2784_v58 = vmul.f32 %v12055_v37, %v13678_v44  ;;  %v15827_v37 = vld [vmem:[#allocation40_spill] sm:$0xff]  ;;  %v15831_v44 = vld [vmem:[#allocation83_spill] sm:$0xff] }
 0x66b   :  { %v2780_v55 = vadd.f32 %v2779_v19, %v15821_v60  ;;  %v15824_v19 = vld [vmem:[#allocation38_spill] sm:$0xff]  ;;  %v15825_v60 = vld [vmem:[#allocation32_spill] sm:$0xff] }
 0x66d   :  { %12056 = vtanh.f32 %v2780_v55  ;;  %10347 = vmatpush1.bf16.msra.mxu1 %v13020_v22  ;;  %10374 = vmatpush3.bf16.msra.mxu0 %v13181_v14  ;;  %v15826_v55 = vld [vmem:[#allocation39_spill] sm:$0xff] }
 0x66e   :  { %10349 = vmatprep.subr.bf16.mxu1 %v13023_v23  ;;  %10375 = vmatprep.subr.bf16.mxu0 %v15751_v25 }
 0x671   :  { %10351 = vmatpush1.bf16.msra.mxu1 %v13029_v30  ;;  %10377 = vmatpush3.bf16.msra.mxu0 %v13185_v17 }
 0x672   :  { %10353 = vmatprep.subr.bf16.mxu1 %v13032_v33  ;;  %10378 = vmatprep.subr.bf16.mxu0 %v15751_v25 }
 0x675   :  { %10355 = vmatpush1.bf16.msra.mxu1 %v13038_v45  ;;  %10380 = vmatpush3.bf16.msra.mxu0 %v13189_v24 }
 0x676   :  { %10357 = vmatprep.subr.bf16.mxu1 %v13041_v46  ;;  %10381 = vmatprep.subr.bf16.mxu0 %v15751_v25 }
 0x677   :  { %v12057_v57 = vpop.eup %12056 }
 0x678   :  { %v2783_v49 = vmul.f32 %v12057_v57, %v2782_v27  ;;  %v15828_v27 = vld [vmem:[#allocation33_spill] sm:$0xff]  ;;  %v15829_v57 = vld [vmem:[#allocation34_spill] sm:$0xff] }
 0x679   :  { %10359 = vmatpush1.bf16.msra.mxu1 %v13047_v53  ;;  %10383 = vmatpush3.bf16.msra.mxu0 %v13193_v35 }
 0x67a   :  { %v13784_v7 = vadd.f32 %v2784_v58, %v2783_v49  ;;  %10385 = vmatprep.subr.bf16.mxu0 %v13071_v6  ;;  %10416 = vmatprep.subr.bf16.mxu1 %v15751_v25 }
 0x67c   :  { %3021 = vmatmul.mubr.f32.vlgmr.msra.gmra.mrb[38].mxu1 %v13784_v7  ;;  %9166 = vmatmul.mubr.f32.vlgmr.msra.gmra.mrb[66].mxu0 %v13784_v7  ;;  %v3830_v56 = vmul.f32 %v13735_v16, %v13784_v7 }
 0x67d   :  { %10387 = vmatpush1.bf16.msra.mxu0 %v13100_v42  ;;  %10418 = vmatpush3.bf16.msra.mxu1 %v12871_v62 }
 0x67e   :  { %v3848_v1 = vadd.f32 %v3830_v56, %v3829_v18  ;;  %10389 = vmatprep.subr.bf16.mxu0 %v13102_v47  ;;  %10419 = vmatprep.subr.bf16.mxu1 %v15751_v25  ;;  %v15830_v18 = vld [vmem:[#allocation81_spill] sm:$0xff] }
 0x67f   :  { %3188 = vmatprep.mubr.f32.mxu0 %v15752_v40  ;;  %9200 = vmatprep.mubr.msk.f32.mxu1 %vm12604_vm1, %v15752_v40 }
 0x680   :  { %3849 = vadd.xlane.f32.xlu1 %v3848_v1 }
 0x681   :  { %10391 = vmatpush1.bf16.msra.mxu0 %v13109_v54  ;;  %10421 = vmatpush3.bf16.msra.mxu1 %v12884_v10 }
 0x682   :  { %10393 = vmatprep.subr.bf16.mxu0 %v13114_v61  ;;  %10422 = vmatprep.subr.bf16.mxu1 %v15751_v25 }
 0x685   :  { %10395 = vmatpush1.bf16.msra.mxu0 %v13119_v9  ;;  %10424 = vmatpush3.bf16.msra.mxu1 %v12899_v21 }
 0x686   :  { %10397 = vmatprep.subr.bf16.mxu0 %v13124_v20  ;;  %10425 = vmatprep.subr.bf16.mxu1 %v15751_v25 }
 0x689   :  { %10399 = vmatpush1.bf16.msra.mxu0 %v13129_v31  ;;  %10427 = vmatpush3.bf16.msra.mxu1 %v12913_v32 }
 0x68a   :  { %10401 = vmatprep.subr.bf16.mxu0 %v13134_v38  ;;  %10428 = vmatprep.subr.bf16.mxu1 %v15751_v25 }
 0x68d   :  { %10403 = vmatpush1.bf16.msra.mxu0 %v13139_v43  ;;  %10430 = vmatpush3.bf16.msra.mxu1 %v12927_v39 }
 0x68e   :  { %10405 = vmatprep.subr.bf16.mxu0 %v13143_v48  ;;  %10431 = vmatprep.subr.bf16.mxu1 %v15751_v25 }
 0x691   :  { %10407 = vmatpush1.bf16.msra.mxu0 %v15804_v52  ;;  %10433 = vmatpush3.bf16.msra.mxu1 %v15822_v41 }
 0x692   :  { %10409 = vmatprep.subr.bf16.mxu0 %v15823_v12  ;;  %10434 = vmatprep.subr.bf16.mxu1 %v15751_v25 }
 0x695   :  { %10411 = vmatpush1.bf16.msra.mxu0 %v15824_v19  ;;  %10436 = vmatpush3.bf16.msra.mxu1 %v15825_v60 }
 0x696   :  { %10413 = vmatprep.subr.bf16.mxu0 %v15826_v55  ;;  %10437 = vmatprep.subr.bf16.mxu1 %v15751_v25 }
 0x699   :  { %10415 = vmatpush1.bf16.msra.mxu0 %v15827_v37  ;;  %10439 = vmatpush3.bf16.msra.mxu1 %v15828_v27 }
 0x69a   :  { %10441 = vmatprep.subr.bf16.mxu1 %v15829_v57  ;;  %10472 = vmatprep.subr.bf16.mxu0 %v15751_v25  ;;  %v13834_v57 = vld [vmem:[%s15419_s6] ss:$0 sm:$0xff] }
 0x69b   :  { %15832 = vst [vmem:[#allocation67_spill] sm:$0xff] %v13834_v57 }
 0x72f   :  { %v2854_v49 = vpop.f32.mrb[10].mxu0  ;;  %v2925_v58 = vpop.f32.mrb[36].mxu1 }
 0x730   :  { %v11866_v56 = vadd.f32 %v2854_v49, %v15830_v18  ;;  %v2856_v1 = vpop.f32.mrb[11].mxu0  ;;  %v9132_v63 = vpop.f32.mrb[37].mxu1  ;;  %v2946_v49 = vadd.f32 %v13834_v57, %v2925_v58 }
 0x731   :  { %v11867_v2 = vadd.f32 %v2856_v1, %v15831_v44 }
 0x732   :  { %v7960_v29 = vmul.f32 -1.442695, %v11866_v56  ;;  %v15833_v56 = vld [vmem:[#allocation52_spill] sm:$0xff] }
 0x733   :  { %v7961_v55 = vmul.f32 -1.442695, %v11867_v2 }
 0x734   :  { %12058 = vpow2.f32 %v7960_v29 }
 0x735   :  { %12060 = vpow2.f32 %v7961_v55  ;;  %v15834_v55 = vld [vmem:[#allocation47_spill] sm:$0xff] }
 0x73e   :  { %v12059_v60 = vpop.eup %12058 }
 0x73f   :  { %v2936_v37 = vadd.f32 1.0, %v12059_v60  ;;  %v12061_v27 = vpop.eup %12060 }
 0x740   :  { %v2943_v19 = vadd.f32 1.0, %v12061_v27  ;;  %v15835_v27 = vld [vmem:[#allocation61_spill] sm:$0xff] }
 0x741   :  { %12062 = vrcp.f32 %v2936_v37 }
 0x742   :  { %12064 = vrcp.f32 %v2943_v19 }
 0x74b   :  { %v12063_v18 = vpop.eup %12062 }
 0x74c   :  { %v2947_v63 = vmul.f32 %v12063_v18, %v2946_v49  ;;  %v12065_v52 = vpop.eup %12064 }
 0x74d   :  { %v2950_v39 = vsub.f32 1.0, %v12065_v52  ;;  %v2952_v19 = vmul.f32 %v12065_v52, %v13729_v3 }
 0x74e   :  { %v2948_v1 = vadd.f32 %v2947_v63, %v15833_v56 }
 0x74f   :  { %v3022_v29 = vpop.f32.mrb[38].mxu1  ;;  %v3093_v2 = vpop.f32.mrb[66].mxu0 }
 0x750   :  { %12066 = vtanh.f32 %v2948_v1  ;;  %v3100_v60 = vadd.f32 %v3022_v29, %v15834_v55  ;;  %v3024_v37 = vpop.f32.mrb[39].mxu1  ;;  %v9167_v44 = vpop.f32.mrb[67].mxu0  ;;  %v15837_v29 = vld [vmem:[#allocation62_spill] sm:$0xff] }
 0x751   :  { %v3107_v12 = vadd.f32 %v3024_v37, %v15835_v27 }
 0x752   :  { %v7962_v41 = vmul.f32 -1.442695, %v3100_v60 }
 0x753   :  { %v7963_v48 = vmul.f32 -1.442695, %v3107_v12 }
 0x754   :  { %12068 = vpow2.f32 %v7962_v41  ;;  %v15836_v41 = vld [vmem:[#allocation70_spill] sm:$0xff] }
 0x755   :  { %12070 = vpow2.f32 %v7963_v48  ;;  %v3834_v12 = vmul.f32 %v13735_v16, %v15836_v41 }
 0x75a   :  { %v12067_v58 = vpop.eup %12066 }
 0x75b   :  { %v2951_v57 = vmul.f32 %v12067_v58, %v2950_v39 }
 0x75d   :  { %v13841_v18 = vadd.f32 %v2952_v19, %v2951_v57  ;;  %v3114_v57 = vadd.f32 %v13761_v28, %v3093_v2 }
 0x75e   :  { %v12069_v49 = vpop.eup %12068 }
 0x75f   :  { %v3104_v63 = vadd.f32 1.0, %v12069_v49  ;;  %3189 = vmatmul.mubr.f32.vlgmr.msra.gmra.mrb[12].mxu0 %v13841_v18  ;;  %9201 = vmatmul.mubr.f32.vlgmr.msra.gmra.mrb[40].mxu1 %v13841_v18  ;;  %v3833_v44 = vmul.f32 %v13732_v5, %v13841_v18  ;;  %v12071_v48 = vpop.eup %12070  ;;  %v15838_v49 = vld [vmem:[#allocation69_spill] sm:$0xff] }
 0x760   :  { %10443 = vmatpush1.bf16.msra.mxu1 %v12982_v11  ;;  %10474 = vmatpush3.bf16.msra.mxu0 %v13162_v36  ;;  %v3111_v52 = vadd.f32 1.0, %v12071_v48 }
 0x761   :  { %12072 = vrcp.f32 %v3104_v63  ;;  %10445 = vmatprep.subr.bf16.mxu1 %v12985_v15  ;;  %10475 = vmatprep.subr.bf16.mxu0 %v15751_v25  ;;  %v3854_v39 = vadd.f32 %v3834_v12, %v3833_v44  ;;  %v3827_v63 = vmul.f32 %v13732_v5, %v15838_v49 }
 0x762   :  { %3356 = vmatprep.mubr.f32.mxu1 %v15752_v40  ;;  %9235 = vmatprep.mubr.msk.f32.mxu0 %vm12604_vm1, %v15752_v40  ;;  %12074 = vrcp.f32 %v3111_v52 }
 0x763   :  { %3855 = vadd.xlane.f32.xlu1 %v3854_v39 }
 0x764   :  { %10447 = vmatpush1.bf16.msra.mxu1 %v12992_v26  ;;  %10477 = vmatpush3.bf16.msra.mxu0 %v13167_v51 }
 0x765   :  { %10449 = vmatprep.subr.bf16.mxu1 %v12995_v34  ;;  %10478 = vmatprep.subr.bf16.mxu0 %v15751_v25 }
 0x768   :  { %10451 = vmatpush1.bf16.msra.mxu1 %v13002_v50  ;;  %10480 = vmatpush3.bf16.msra.mxu0 %v13173_v0 }
 0x769   :  { %10453 = vmatprep.subr.bf16.mxu1 %v13005_v59  ;;  %10481 = vmatprep.subr.bf16.mxu0 %v15751_v25 }
 0x76b   :  { %v12073_v56 = vpop.eup %12072 }
 0x76c   :  { %v3115_v1 = vmul.f32 %v12073_v56, %v3114_v57  ;;  %10455 = vmatpush1.bf16.msra.mxu1 %v13011_v8  ;;  %10483 = vmatpush3.bf16.msra.mxu0 %v13177_v4  ;;  %v12075_v2 = vpop.eup %12074  ;;  %v15851_v56 = vld [vmem:[#allocation83_spill] sm:$0xff] }
 0x76d   :  { %10457 = vmatprep.subr.bf16.mxu1 %v13014_v13  ;;  %10484 = vmatprep.subr.bf16.mxu0 %v15751_v25  ;;  %v3118_v60 = vsub.f32 1.0, %v12075_v2  ;;  %v3120_v58 = vmul.f32 %v12075_v2, %v13784_v7 }
 0x76e   :  { %v3116_v55 = vadd.f32 %v3115_v1, %v15837_v29 }
 0x770   :  { %12076 = vtanh.f32 %v3116_v55  ;;  %10459 = vmatpush1.bf16.msra.mxu1 %v13020_v22  ;;  %10486 = vmatpush3.bf16.msra.mxu0 %v13181_v14 }
 0x771   :  { %10461 = vmatprep.subr.bf16.mxu1 %v13023_v23  ;;  %10487 = vmatprep.subr.bf16.mxu0 %v15751_v25 }
 0x774   :  { %10463 = vmatpush1.bf16.msra.mxu1 %v13029_v30  ;;  %10489 = vmatpush3.bf16.msra.mxu0 %v13185_v17 }
 0x775   :  { %10465 = vmatprep.subr.bf16.mxu1 %v13032_v33  ;;  %10490 = vmatprep.subr.bf16.mxu0 %v15751_v25 }
 0x778   :  { %10467 = vmatpush1.bf16.msra.mxu1 %v13038_v45  ;;  %10492 = vmatpush3.bf16.msra.mxu0 %v13189_v24 }
 0x779   :  { %10469 = vmatprep.subr.bf16.mxu1 %v13041_v46  ;;  %10493 = vmatprep.subr.bf16.mxu0 %v15751_v25 }
 0x77a   :  { %v12077_v37 = vpop.eup %12076 }
 0x77b   :  { %v3119_v27 = vmul.f32 %v12077_v37, %v3118_v60 }
 0x77c   :  { %10471 = vmatpush1.bf16.msra.mxu1 %v13047_v53  ;;  %10495 = vmatpush3.bf16.msra.mxu0 %v13193_v35 }
 0x77d   :  { %v13885_v19 = vadd.f32 %v3120_v58, %v3119_v27  ;;  %10497 = vmatprep.subr.bf16.mxu0 %v13071_v6  ;;  %10528 = vmatprep.subr.bf16.mxu1 %v15751_v25  ;;  %v15842_v6 = vld [vmem:[#allocation31_spill] sm:$0xff] }
 0x77e   :  { %v15852_v27 = vld [vmem:[#allocation67_spill] sm:$0xff] }
 0x77f   :  { %3357 = vmatmul.mubr.f32.vlgmr.msra.gmra.mrb[42].mxu1 %v13885_v19  ;;  %9236 = vmatmul.mubr.f32.vlgmr.msra.gmra.mrb[68].mxu0 %v13885_v19  ;;  %v3828_v44 = vmul.f32 %v13735_v16, %v13885_v19 }
 0x780   :  { %10499 = vmatpush1.bf16.msra.mxu0 %v13100_v42  ;;  %10530 = vmatpush3.bf16.msra.mxu1 %v12871_v62  ;;  %v15839_v62 = vld [vmem:[#allocation30_spill] sm:$0xff]  ;;  %v15843_v42 = vld [vmem:[#allocation37_spill] sm:$0xff] }
 0x781   :  { %v3845_v12 = vadd.f32 %v3828_v44, %v3827_v63  ;;  %10501 = vmatprep.subr.bf16.mxu0 %v13102_v47  ;;  %10531 = vmatprep.subr.bf16.mxu1 %v15751_v25  ;;  %v15845_v47 = vld [vmem:[#allocation32_spill] sm:$0xff] }
 0x782   :  { %3524 = vmatprep.mubr.f32.mxu0 %v15752_v40  ;;  %9270 = vmatprep.mubr.msk.f32.mxu1 %vm12604_vm1, %v15752_v40 }
 0x783   :  { %3846 = vadd.xlane.f32.xlu1 %v3845_v12  ;;  %v15853_v12 = vld [vmem:[#allocation54_spill] sm:$0xff] }
 0x784   :  { %10503 = vmatpush1.bf16.msra.mxu0 %v13109_v54  ;;  %10533 = vmatpush3.bf16.msra.mxu1 %v12884_v10  ;;  %v15840_v10 = vld [vmem:[#allocation35_spill] sm:$0xff] }
 0x785   :  { %10505 = vmatprep.subr.bf16.mxu0 %v13114_v61  ;;  %10534 = vmatprep.subr.bf16.mxu1 %v15751_v25  ;;  %v15846_v54 = vld [vmem:[#allocation39_spill] sm:$0xff]  ;;  %v15847_v61 = vld [vmem:[#allocation40_spill] sm:$0xff] }
 0x788   :  { %10507 = vmatpush1.bf16.msra.mxu0 %v13119_v9  ;;  %10536 = vmatpush3.bf16.msra.mxu1 %v12899_v21  ;;  %v15841_v21 = vld [vmem:[#allocation36_spill] sm:$0xff]  ;;  %v15848_v9 = vld [vmem:[#allocation33_spill] sm:$0xff] }
 0x789   :  { %10509 = vmatprep.subr.bf16.mxu0 %v13124_v20  ;;  %10537 = vmatprep.subr.bf16.mxu1 %v15751_v25  ;;  %v15849_v20 = vld [vmem:[#allocation34_spill] sm:$0xff] }
 0x78c   :  { %10511 = vmatpush1.bf16.msra.mxu0 %v13129_v31  ;;  %10539 = vmatpush3.bf16.msra.mxu1 %v12913_v32  ;;  %v15844_v32 = vld [vmem:[#allocation38_spill] sm:$0xff] }
 0x78d   :  { %10513 = vmatprep.subr.bf16.mxu0 %v13134_v38  ;;  %10540 = vmatprep.subr.bf16.mxu1 %v15751_v25 }
 0x790   :  { %10515 = vmatpush1.bf16.msra.mxu0 %v13139_v43  ;;  %10542 = vmatpush3.bf16.msra.mxu1 %v15839_v62  ;;  %v15850_v43 = vld [vmem:[#allocation81_spill] sm:$0xff] }
 0x791   :  { %10517 = vmatprep.subr.bf16.mxu0 %v15840_v10  ;;  %10543 = vmatprep.subr.bf16.mxu1 %v15751_v25 }
 0x794   :  { %10519 = vmatpush1.bf16.msra.mxu0 %v15841_v21  ;;  %10545 = vmatpush3.bf16.msra.mxu1 %v15842_v6  ;;  %v15854_v6 = vld [vmem:[#allocation45_spill] sm:$0xff] }
 0x795   :  { %10521 = vmatprep.subr.bf16.mxu0 %v15843_v42  ;;  %10546 = vmatprep.subr.bf16.mxu1 %v15751_v25 }
 0x798   :  { %10523 = vmatpush1.bf16.msra.mxu0 %v15844_v32  ;;  %10548 = vmatpush3.bf16.msra.mxu1 %v15845_v47 }
 0x799   :  { %10525 = vmatprep.subr.bf16.mxu0 %v15846_v54  ;;  %10549 = vmatprep.subr.bf16.mxu1 %v15751_v25  ;;  %v15855_v54 = vld [vmem:[#allocation59_spill] sm:$0xff] }
 0x79c   :  { %10527 = vmatpush1.bf16.msra.mxu0 %v15847_v61  ;;  %10551 = vmatpush3.bf16.msra.mxu1 %v15848_v9 }
 0x79d   :  { %10553 = vmatprep.subr.bf16.mxu1 %v15849_v20  ;;  %10584 = vmatprep.subr.bf16.mxu0 %v15751_v25 }
 0x832   :  { %v3190_v31 = vpop.f32.mrb[12].mxu0  ;;  %v3261_v38 = vpop.f32.mrb[40].mxu1 }
 0x833   :  { %v11868_v39 = vadd.f32 %v3190_v31, %v15850_v43  ;;  %v3192_v48 = vpop.f32.mrb[13].mxu0  ;;  %v9202_v52 = vpop.f32.mrb[41].mxu1  ;;  %v3282_v58 = vadd.f32 %v15852_v27, %v3261_v38 }
 0x834   :  { %v11869_v1 = vadd.f32 %v3192_v48, %v15851_v56 }
 0x835   :  { %v7964_v57 = vmul.f32 -1.442695, %v11868_v39 }
 0x836   :  { %v7965_v29 = vmul.f32 -1.442695, %v11869_v1 }
 0x837   :  { %12078 = vpow2.f32 %v7964_v57 }
 0x838   :  { %12080 = vpow2.f32 %v7965_v29 }
 0x841   :  { %v12079_v55 = vpop.eup %12078 }
 0x842   :  { %v3272_v2 = vadd.f32 1.0, %v12079_v55  ;;  %v12081_v60 = vpop.eup %12080 }
 0x843   :  { %v3279_v37 = vadd.f32 1.0, %v12081_v60 }
 0x844   :  { %12082 = vrcp.f32 %v3272_v2  ;;  %v15857_v2 = vld [vmem:[#allocation55_spill] sm:$0xff] }
 0x845   :  { %12084 = vrcp.f32 %v3279_v37  ;;  %v3836_v60 = vmul.f32 %v13735_v16, %v15857_v2 }
 0x84e   :  { %v12083_v63 = vpop.eup %12082 }
 0x84f   :  { %v3283_v44 = vmul.f32 %v12083_v63, %v3282_v58  ;;  %v12085_v20 = vpop.eup %12084 }
 0x850   :  { %v3286_v39 = vsub.f32 1.0, %v12085_v20  ;;  %v3288_v52 = vmul.f32 %v12085_v20, %v13841_v18 }
 0x851   :  { %v3284_v62 = vadd.f32 %v3283_v44, %v15853_v12 }
 0x852   :  { %v3358_v10 = vpop.f32.mrb[42].mxu1  ;;  %v3429_v21 = vpop.f32.mrb[68].mxu0 }
 0x853   :  { %12086 = vtanh.f32 %v3284_v62  ;;  %v3436_v42 = vadd.f32 %v3358_v10, %v15854_v6  ;;  %v3360_v32 = vpop.f32.mrb[43].mxu1  ;;  %v9237_v47 = vpop.f32.mrb[69].mxu0 }
 0x854   :  { %v3443_v61 = vadd.f32 %v3360_v32, %v15855_v54  ;;  %v15860_v32 = vld [vmem:[#allocation56_spill] sm:$0xff] }
 0x855   :  { %v7966_v9 = vmul.f32 -1.442695, %v3436_v42 }
 0x856   :  { %v7967_v31 = vmul.f32 -1.442695, %v3443_v61  ;;  %v15861_v61 = vld [vmem:[#allocation43_spill] sm:$0xff] }
 0x857   :  { %12088 = vpow2.f32 %v7966_v9 }
 0x858   :  { %12090 = vpow2.f32 %v7967_v31  ;;  %v15862_v31 = vld [vmem:[#allocation57_spill] sm:$0xff] }
 0x85d   :  { %v12087_v38 = vpop.eup %12086 }
 0x85e   :  { %v3287_v48 = vmul.f32 %v12087_v38, %v3286_v39 }
 0x860   :  { %v13937_v57 = vadd.f32 %v3288_v52, %v3287_v48 }
 0x861   :  { %v12089_v1 = vpop.eup %12088 }
 0x862   :  { %15856 = vst [vmem:[#allocation68_spill] sm:$0xff] %v13937_v57  ;;  %v3440_v29 = vadd.f32 1.0, %v12089_v1  ;;  %3525 = vmatmul.mubr.f32.vlgmr.msra.gmra.mrb[14].mxu0 %v13937_v57  ;;  %9271 = vmatmul.mubr.f32.vlgmr.msra.gmra.mrb[44].mxu1 %v13937_v57  ;;  %v3835_v55 = vmul.f32 %v13732_v5, %v13937_v57  ;;  %v12091_v58 = vpop.eup %12090 }
 0x863   :  { %10555 = vmatpush1.bf16.msra.mxu1 %v12982_v11  ;;  %10586 = vmatpush3.bf16.msra.mxu0 %v13162_v36  ;;  %v3447_v11 = vadd.f32 1.0, %v12091_v58 }
 0x864   :  { %12092 = vrcp.f32 %v3440_v29  ;;  %10557 = vmatprep.subr.bf16.mxu1 %v12985_v15  ;;  %10587 = vmatprep.subr.bf16.mxu0 %v15751_v25  ;;  %v3857_v37 = vadd.f32 %v3836_v60, %v3835_v55  ;;  %v3450_v15 = vadd.f32 %v13761_v28, %v3429_v21 }
 0x865   :  { %3692 = vmatprep.mubr.f32.mxu1 %v15752_v40  ;;  %9305 = vmatprep.mubr.msk.f32.mxu0 %vm12604_vm1, %v15752_v40  ;;  %12094 = vrcp.f32 %v3447_v11 }
 0x866   :  { %3858 = vadd.xlane.f32.xlu0 %v3857_v37 }
 0x867   :  { %10559 = vmatpush1.bf16.msra.mxu1 %v12992_v26  ;;  %10589 = vmatpush3.bf16.msra.mxu0 %v13167_v51 }
 0x868   :  { %10561 = vmatprep.subr.bf16.mxu1 %v12995_v34  ;;  %10590 = vmatprep.subr.bf16.mxu0 %v15751_v25  ;;  %v15858_v34 = vld [vmem:[#allocation60_spill] sm:$0xff] }
 0x86b   :  { %10563 = vmatpush1.bf16.msra.mxu1 %v13002_v50  ;;  %10592 = vmatpush3.bf16.msra.mxu0 %v13173_v0 }
 0x86c   :  { %10565 = vmatprep.subr.bf16.mxu1 %v13005_v59  ;;  %10593 = vmatprep.subr.bf16.mxu0 %v15751_v25 }
 0x86e   :  { %v12093_v36 = vpop.eup %12092 }
 0x86f   :  { %v3451_v26 = vmul.f32 %v12093_v36, %v3450_v15  ;;  %10567 = vmatpush1.bf16.msra.mxu1 %v13011_v8  ;;  %10595 = vmatpush3.bf16.msra.mxu0 %v13177_v4  ;;  %v12095_v59 = vpop.eup %12094  ;;  %v15864_v15 = vld [vmem:[#allocation86_spill] sm:$0xff] }
 0x870   :  { %10569 = vmatprep.subr.bf16.mxu1 %v13014_v13  ;;  %10596 = vmatprep.subr.bf16.mxu0 %v15751_v25  ;;  %v3454_v8 = vsub.f32 1.0, %v12095_v59  ;;  %v3838_v36 = vmul.f32 %v13735_v16, %v15864_v15 }
 0x871   :  { %v3452_v50 = vadd.f32 %v3451_v26, %v15858_v34 }
 0x873   :  { %12096 = vtanh.f32 %v3452_v50  ;;  %10571 = vmatpush1.bf16.msra.mxu1 %v13020_v22  ;;  %10598 = vmatpush3.bf16.msra.mxu0 %v13181_v14 }
 0x874   :  { %10573 = vmatprep.subr.bf16.mxu1 %v13023_v23  ;;  %10599 = vmatprep.subr.bf16.mxu0 %v15751_v25  ;;  %v3456_v23 = vmul.f32 %v12095_v59, %v13885_v19 }
 0x877   :  { %10575 = vmatpush1.bf16.msra.mxu1 %v13029_v30  ;;  %10601 = vmatpush3.bf16.msra.mxu0 %v13185_v17 }
 0x878   :  { %10577 = vmatprep.subr.bf16.mxu1 %v13032_v33  ;;  %10602 = vmatprep.subr.bf16.mxu0 %v15751_v25  ;;  %v15859_v33 = vld [vmem:[#allocation44_spill] sm:$0xff] }
 0x87b   :  { %10579 = vmatpush1.bf16.msra.mxu1 %v13038_v45  ;;  %10604 = vmatpush3.bf16.msra.mxu0 %v13189_v24  ;;  %v3825_v45 = vmul.f32 %v13732_v5, %v15859_v33 }
 0x87c   :  { %10581 = vmatprep.subr.bf16.mxu1 %v13041_v46  ;;  %10605 = vmatprep.subr.bf16.mxu0 %v15751_v25 }
 0x87d   :  { %v12097_v13 = vpop.eup %12096 }
 0x87e   :  { %v3455_v22 = vmul.f32 %v12097_v13, %v3454_v8 }
 0x87f   :  { %10583 = vmatpush1.bf16.msra.mxu1 %v13047_v53  ;;  %10607 = vmatpush3.bf16.msra.mxu0 %v13193_v35 }
 0x880   :  { %v13981_v30 = vadd.f32 %v3456_v23, %v3455_v22  ;;  %v15865_v22 = vld [vmem:[#allocation58_spill] sm:$0xff] }
 0x882   :  { %3693 = vmatmul.mubr.f32.vlgmr.msra.gmra.mrb[46].mxu1 %v13981_v30  ;;  %9306 = vmatmul.mubr.f32.vlgmr.msra.gmra.mrb[70].mxu0 %v13981_v30  ;;  %v3826_v46 = vmul.f32 %v13735_v16, %v13981_v30 }
 0x883   :  { %4386 = vmatprep.mubr.f32.mxu1 %v15752_v40 }
 0x884   :  { %v3842_v51 = vadd.f32 %v3826_v46, %v3825_v45 }
 0x886   :  { %3843 = vadd.xlane.f32.xlu0 %v3842_v51 }
 0x935   :  { %v3526_v0 = vpop.f32.mrb[14].mxu0  ;;  %v3597_v53 = vpop.f32.mrb[44].mxu1 }
 0x936   :  { %v11870_v4 = vadd.f32 %v3526_v0, %v15850_v43  ;;  %v3528_v14 = vpop.f32.mrb[15].mxu0  ;;  %v9272_v17 = vpop.f32.mrb[45].mxu1  ;;  %v3618_v21 = vadd.f32 %v15852_v27, %v3597_v53 }
 0x937   :  { %v11871_v35 = vadd.f32 %v3528_v14, %v15851_v56  ;;  %v15866_v14 = vld [vmem:[#allocation85_spill] sm:$0xff] }
 0x938   :  { %v7968_v24 = vmul.f32 -1.442695, %v11870_v4  ;;  %v3823_v17 = vmul.f32 %v13732_v5, %v15866_v14 }
 0x939   :  { %v7969_v63 = vmul.f32 -1.442695, %v11871_v35 }
 0x93a   :  { %12098 = vpow2.f32 %v7968_v24  ;;  %v7972_v24 = vld [vmem:[%s15421_s8] ss:$0 sm:$0xff] }
 0x93b   :  { %12100 = vpow2.f32 %v7969_v63  ;;  %v4016_v63 = vmul.f32 0.0, %v7972_v24  ;;  %v3908_v24 = vld [vmem:[#allocation19 + $0x158] sm:$0xff] }
 0x944   :  { %v12099_v44 = vpop.eup %12098 }
 0x945   :  { %v3608_v12 = vadd.f32 1.0, %v12099_v44  ;;  %v12101_v62 = vpop.eup %12100  ;;  %v12605_v44 = vmov 0  }
 0x946   :  { %v3615_v10 = vadd.f32 1.0, %v12101_v62  ;;  %11957 = vset.pattern.permute.xlu0 %v12605_v44  ;;  %11956 = vset.pattern.permute.xlu1 %v12605_v44  ;;  %v3869_v62 = vld [vmem:[#allocation19 + $0x20] sm:$0xff] }
 0x947   :  { %12102 = vrcp.f32 %v3608_v12  ;;  %v3866_v12 = vld [vmem:[#allocation19 + $0x8] sm:$0xff] }
 0x948   :  { %12104 = vrcp.f32 %v3615_v10  ;;  %v3865_v10 = vld [vmem:[#allocation19] sm:$0xff] }
 0x951   :  { %v12103_v6 = vpop.eup %12102 }
 0x952   :  { %v3619_v42 = vmul.f32 %v12103_v6, %v3618_v21  ;;  %v12105_v48 = vpop.eup %12104  ;;  %v14015_v21 = vpack.c.bf16 %v3869_v62, %v3866_v12  ;;  %v3872_v6 = vld [vmem:[#allocation19 + $0x38] sm:$0xff]  ;;  %v3907_v12 = vld [vmem:[#allocation19 + $0x150] sm:$0xff]  ;;  %v3910_v62 = vld [vmem:[#allocation19 + $0x168] sm:$0xff] }
 0x953   :  { %v3622_v1 = vsub.f32 1.0, %v12105_v48  ;;  %v3624_v55 = vmul.f32 %v12105_v48, %v13937_v57 }
 0x954   :  { %v3620_v43 = vadd.f32 %v3619_v42, %v15860_v32  ;;  %15867 = vst [vmem:[#allocation51_spill] sm:$0xff] %v14015_v21  ;;  %v3875_v42 = vld [vmem:[#allocation19 + $0x50] sm:$0xff]  ;;  %10609 = vmatprep.subr.bf16.mxu0 %v14015_v21 }
 0x955   :  { %v3694_v47 = vpop.f32.mrb[46].mxu1  ;;  %v3765_v54 = vpop.f32.mrb[70].mxu0  ;;  %v14019_v32 = vpack.c.bf16 %v3875_v42, %v3872_v6  ;;  %v14062_v6 = vpack.c.bf16 %v3910_v62, %v3907_v12 }
 0x956   :  { %12106 = vtanh.f32 %v3620_v43  ;;  %v3772_v56 = vadd.f32 %v3694_v47, %v15861_v61  ;;  %v3696_v9 = vpop.f32.mrb[47].mxu1  ;;  %v9307_v20 = vpop.f32.mrb[71].mxu0  ;;  %v3786_v59 = vadd.f32 %v13761_v28, %v3765_v54  ;;  %v3871_v43 = vld [vmem:[#allocation19 + $0x30] sm:$0xff]  ;;  %v3874_v47 = vld [vmem:[#allocation19 + $0x48] sm:$0xff]  ;;  %v3881_v61 = vld [vmem:[#allocation19 + $0x80] sm:$0xff] }
 0x957   :  { %v3779_v39 = vadd.f32 %v3696_v9, %v15862_v31  ;;  %15869 = vst [vmem:[#allocation66_spill] sm:$0xff] %v14019_v32  ;;  %v3878_v54 = vld [vmem:[#allocation19 + $0x68] sm:$0xff]  ;;  %v3877_v20 = vld [vmem:[#allocation19 + $0x60] sm:$0xff]  ;;  %v3880_v31 = vld [vmem:[#allocation19 + $0x78] sm:$0xff] }
 0x958   :  { %v7970_v38 = vmul.f32 -1.442695, %v3772_v56  ;;  %v14023_v56 = vpack.c.bf16 %v3874_v47, %v3871_v43  ;;  %v14026_v9 = vpack.c.bf16 %v3881_v61, %v3878_v54  ;;  %v14029_v48 = vpack.c.bf16 %v3880_v31, %v3877_v20  ;;  %15883 = vst [vmem:[#allocation36_spill] sm:$0xff] %v14062_v6  ;;  %v3913_v43 = vld [vmem:[#allocation19 + $0x180] sm:$0xff]  ;;  %v3916_v47 = vld [vmem:[#allocation19 + $0x198] sm:$0xff]  ;;  %v14067_v54 = vpop.xlane.xlu0 %3852  ;;  %v14075_v31 = vpop.xlane.xlu1 %3849 }
 0x959   :  { %v7971_v52 = vmul.f32 -1.442695, %v3779_v39  ;;  %v3884_v39 = vld [vmem:[#allocation19 + $0x98] sm:$0xff]  ;;  %15885 = vst [vmem:[#allocation37_spill] sm:$0xff] %v14067_v54  ;;  %v14070_v61 = vpack.c.bf16 %v3916_v47, %v3913_v43  ;;  %15888 = vst [vmem:[#allocation39_spill] sm:$0xff] %v14075_v31 }
 0x95a   :  { %12108 = vpow2.f32 %v7970_v38  ;;  %15870 = vst [vmem:[#allocation84_spill] sm:$0xff] %v14023_v56  ;;  %15871 = vst [vmem:[#allocation50_spill] sm:$0xff] %v14026_v9  ;;  %v3887_v38 = vld [vmem:[#allocation19 + $0xb0] sm:$0xff] }
 0x95b   :  { %12110 = vpow2.f32 %v7971_v52  ;;  %15872 = vst [vmem:[#allocation49_spill] sm:$0xff] %v14029_v48  ;;  %v14032_v52 = vpack.c.bf16 %v3887_v38, %v3884_v39  ;;  %15886 = vst [vmem:[#allocation38_spill] sm:$0xff] %v14070_v61 }
 0x95c   :  { %v14073_v20 = vpop.xlane.xlu0 %3858  ;;  %v14080_v38 = vpop.xlane.xlu1 %3855 }
 0x95d   :  { %15873 = vst [vmem:[#allocation63_spill] sm:$0xff] %v14032_v52  ;;  %15887 = vst [vmem:[#allocation32_spill] sm:$0xff] %v14073_v20 }
 0x95e   :  { %15890 = vst [vmem:[#allocation33_spill] sm:$0xff] %v14080_v38 }
 0x960   :  { %v12107_v27 = vpop.eup %12106  ;;  %v14078_v39 = vpop.xlane.xlu0 %3843 }
 0x961   :  { %v3623_v29 = vmul.f32 %v12107_v27, %v3622_v1  ;;  %v3883_v1 = vld [vmem:[#allocation19 + $0x90] sm:$0xff]  ;;  %v3886_v27 = vld [vmem:[#allocation19 + $0xa8] sm:$0xff]  ;;  %15889 = vst [vmem:[#allocation40_spill] sm:$0xff] %v14078_v39 }
 0x963   :  { %v13997_v60 = vadd.f32 %v3624_v55, %v3623_v29  ;;  %v3890_v29 = vld [vmem:[#allocation19 + $0xc8] sm:$0xff]  ;;  %v3893_v55 = vld [vmem:[#allocation19 + $0xe0] sm:$0xff] }
 0x964   :  { %v12109_v37 = vpop.eup %12108 }
 0x965   :  { %15863 = vst [vmem:[#allocation48_spill] sm:$0xff] %v13997_v60  ;;  %v3776_v58 = vadd.f32 1.0, %v12109_v37  ;;  %v3837_v11 = vmul.f32 %v13732_v5, %v13997_v60  ;;  %v12111_v34 = vpop.eup %12110  ;;  %v3868_v5 = vld [vmem:[#allocation19 + $0x18] sm:$0xff]  ;;  %v14035_v37 = vpack.c.bf16 %v3886_v27, %v3883_v1  ;;  %v14084_v27 = vpop.xlane.xlu1 %3846 }
 0x966   :  { %v3783_v50 = vadd.f32 1.0, %v12111_v34  ;;  %v3892_v34 = vld [vmem:[#allocation19 + $0xd8] sm:$0xff]  ;;  %15892 = vst [vmem:[#allocation81_spill] sm:$0xff] %v14084_v27 }
 0x967   :  { %12112 = vrcp.f32 %v3776_v58  ;;  %v3860_v26 = vadd.f32 %v3838_v36, %v3837_v11  ;;  %15874 = vst [vmem:[#allocation64_spill] sm:$0xff] %v14035_v37  ;;  %v3962_v58 = vld [vmem:[#allocation20 + $0x8] sm:$0xff]  ;;  %v3965_v11 = vld [vmem:[#allocation20 + $0x20] sm:$0xff]  ;;  %v14038_v36 = vpack.c.bf16 %v3893_v55, %v3890_v29  ;;  %v14086_v29 = vld [vmem:[#allocation7] ss:$0 sm:$0xff] }
 0x968   :  { %12114 = vrcp.f32 %v3783_v50  ;;  %v14040_v50 = vpack.c.bf16 %v3965_v11, %v3962_v58  ;;  %15893 = vst [vmem:[#allocation83_spill] sm:$0xff] %v14086_v29 }
 0x969   :  { %3861 = vadd.xlane.f32.xlu1 %v3860_v26  ;;  %15875 = vst [vmem:[#allocation52_spill] sm:$0xff] %v14038_v36  ;;  %v3889_v26 = vld [vmem:[#allocation19 + $0xc0] sm:$0xff] }
 0x96a   :  { %15876 = vst [vmem:[#allocation47_spill] sm:$0xff] %v14040_v50  ;;  %10705 = vmatprep.subr.bf16.mxu1 %v14040_v50 }
 0x971   :  { %v12113_v8 = vpop.eup %12112 }
 0x972   :  { %v3787_v13 = vmul.f32 %v12113_v8, %v3786_v59  ;;  %v12115_v45 = vpop.eup %12114  ;;  %v3896_v59 = vld [vmem:[#allocation19 + $0xf8] sm:$0xff]  ;;  %v3899_v8 = vld [vmem:[#allocation19 + $0x110] sm:$0xff] }
 0x973   :  { %v3790_v46 = vsub.f32 1.0, %v12115_v45  ;;  %v3792_v53 = vmul.f32 %v12115_v45, %v13981_v30  ;;  %v3898_v45 = vld [vmem:[#allocation19 + $0x108] sm:$0xff] }
 0x974   :  { %v3788_v23 = vadd.f32 %v3787_v13, %v15865_v22  ;;  %v14044_v13 = vpack.c.bf16 %v3892_v34, %v3889_v26  ;;  %v14047_v22 = vpack.c.bf16 %v3899_v8, %v3896_v59 }
 0x976   :  { %12116 = vtanh.f32 %v3788_v23  ;;  %15877 = vst [vmem:[#allocation61_spill] sm:$0xff] %v14044_v13  ;;  %15878 = vst [vmem:[#allocation70_spill] sm:$0xff] %v14047_v22  ;;  %v3895_v23 = vld [vmem:[#allocation19 + $0xf0] sm:$0xff] }
 0x980   :  { %v12117_v51 = vpop.eup %12116 }
 0x981   :  { %v3791_v0 = vmul.f32 %v12117_v51, %v3790_v46  ;;  %v3902_v46 = vld [vmem:[#allocation19 + $0x128] sm:$0xff]  ;;  %v3905_v51 = vld [vmem:[#allocation19 + $0x140] sm:$0xff] }
 0x983   :  { %v14006_v4 = vadd.f32 %v3792_v53, %v3791_v0  ;;  %v14050_v0 = vpack.c.bf16 %v3898_v45, %v3895_v23  ;;  %v14053_v53 = vpack.c.bf16 %v3905_v51, %v3902_v46 }
 0x985   :  { %v3824_v28 = vmul.f32 %v13735_v16, %v14006_v4  ;;  %v14017_v16 = vpack.c.bf16 %v3868_v5, %v3865_v10  ;;  %15879 = vst [vmem:[#allocation62_spill] sm:$0xff] %v14050_v0  ;;  %15880 = vst [vmem:[#allocation69_spill] sm:$0xff] %v14053_v53  ;;  %v3914_v10 = vld [vmem:[#allocation19 + $0x188] sm:$0xff]  ;;  %v3917_v5 = vld [vmem:[#allocation19 + $0x1a0] sm:$0xff] }
 0x986   :  { %v14065_v42 = vpack.c.bf16 %v3917_v5, %v3914_v10 }
 0x987   :  { %v3839_v35 = vadd.f32 %v3824_v28, %v3823_v17  ;;  %15868 = vst [vmem:[#allocation65_spill] sm:$0xff] %v14017_v16  ;;  %10611 = vmatpush1.bf16.msra.mxu0 %v14017_v16  ;;  %v3901_v17 = vld [vmem:[#allocation19 + $0x120] sm:$0xff]  ;;  %v3904_v28 = vld [vmem:[#allocation19 + $0x138] sm:$0xff] }
 0x988   :  { %10613 = vmatprep.subr.bf16.mxu0 %v14019_v32  ;;  %15884 = vst [vmem:[#allocation31_spill] sm:$0xff] %v14065_v42 }
 0x989   :  { %3840 = vadd.xlane.f32.xlu0 %v3839_v35  ;;  %v3911_v35 = vld [vmem:[#allocation19 + $0x170] sm:$0xff] }
 0x98a   :  { %v14059_v44 = vpack.c.bf16 %v3911_v35, %v3908_v24 }
 0x98b   :  { %10615 = vmatpush1.bf16.msra.mxu0 %v14023_v56 }
 0x98c   :  { %10617 = vmatprep.subr.bf16.mxu0 %v14026_v9  ;;  %15882 = vst [vmem:[#allocation35_spill] sm:$0xff] %v14059_v44 }
 0x98d   :  { %4017 = vadd.xlane.f32.xlu0 %v4016_v63  ;;  %v14056_v63 = vpack.c.bf16 %v3904_v28, %v3901_v17 }
 0x98f   :  { %10619 = vmatpush1.bf16.msra.mxu0 %v14029_v48  ;;  %15881 = vst [vmem:[#allocation30_spill] sm:$0xff] %v14056_v63 }
 0x990   :  { %10621 = vmatprep.subr.bf16.mxu0 %v14032_v52 }
 0x993   :  { %10623 = vmatpush1.bf16.msra.mxu0 %v14035_v37 }
 0x994   :  { %10625 = vmatprep.subr.bf16.mxu0 %v14038_v36 }
 0x997   :  { %10627 = vmatpush1.bf16.msra.mxu0 %v14044_v13 }
 0x998   :  { %10629 = vmatprep.subr.bf16.mxu0 %v14047_v22 }
 0x99b   :  { %10631 = vmatpush1.bf16.msra.mxu0 %v14050_v0 }
 0x99c   :  { %10633 = vmatprep.subr.bf16.mxu0 %v14053_v53 }
 0x99f   :  { %10635 = vmatpush1.bf16.msra.mxu0 %v14056_v63 }
 0x9a0   :  { %10637 = vmatprep.subr.bf16.mxu0 %v14059_v44 }
 0x9a3   :  { %10639 = vmatpush1.bf16.msra.mxu0 %v14062_v6 }
 0x9a4   :  { %10641 = vmatprep.subr.bf16.mxu0 %v14065_v42 }
 0x9a7   :  { %10643 = vmatpush1.bf16.msra.mxu0 %v14070_v61 }
 0x9f6   :  { %v14088_v58 = vpop.xlane.xlu1 %3861 }
 0x9f7   :  { %15894 = vst [vmem:[#allocation67_spill] sm:$0xff] %v14088_v58 }
 0xa16   :  { %v14082_v1 = vpop.xlane.xlu0 %3840 }
 0xa17   :  { %15891 = vst [vmem:[#allocation34_spill] sm:$0xff] %v14082_v1 }
 0xa1a   :  { %v4018_v55 = vpop.xlane.xlu0 %4017 }
 0xa1b   :  { %v4019_v11 = vadd.f32 %v4018_v55, %v14082_v1  ;;  %v4020_v26 = vadd.f32 %v4018_v55, %v14078_v39  ;;  %v4021_v34 = vadd.f32 %v4018_v55, %v14084_v27  ;;  %v4022_v59 = vadd.f32 %v4018_v55, %v14075_v31 }
 0xa1c   :  { %v4023_v8 = vadd.f32 %v4018_v55, %v14067_v54  ;;  %v4024_v23 = vadd.f32 %v4018_v55, %v14080_v38  ;;  %v4025_v45 = vadd.f32 %v4018_v55, %v14073_v20  ;;  %v4026_v46 = vadd.f32 %v4018_v55, %v14088_v58 }
 0xa1d   :  { %v4033_v51 = vadd.f32 %v14086_v29, %v4019_v11  ;;  %v4035_v17 = vadd.f32 %v14086_v29, %v4021_v34  ;;  %v4036_v28 = vadd.f32 %v14086_v29, %v4022_v59  ;;  %v4034_v24 = vadd.f32 %v14086_v29, %v4020_v26 }
 0xa1e   :  { %v4037_v35 = vadd.f32 %v14086_v29, %v4023_v8  ;;  %v4038_v12 = vadd.f32 %v14086_v29, %v4024_v23  ;;  %v4039_v62 = vadd.f32 %v14086_v29, %v4025_v45  ;;  %v4040_v10 = vadd.f32 %v14086_v29, %v4026_v46 }
 0xa1f   :  { %v4042_v5 = vsel %vm4041_vm2, %v4033_v51, -inf  ;;  %v4044_v43 = vsel %vm4041_vm2, %v4035_v17, -inf  ;;  %v4045_v47 = vsel %vm4041_vm2, %v4036_v28, -inf  ;;  %v4043_v55 = vsel %vm4041_vm2, %v4034_v24, -inf }
 0xa20   :  { %v4046_v11 = vsel %vm4041_vm2, %v4037_v35, -inf  ;;  %v4050_v26 = vsel %vm4041_vm2, %v4039_v62, -inf  ;;  %v4052_v34 = vsel %vm4041_vm2, %v4040_v10, -inf  ;;  %v4048_v59 = vsel %vm4041_vm2, %v4038_v12, -inf }
 0xa21   :  { %v4047_v8 = vmax.f32 %v4042_v5, %v4046_v11  ;;  %v4051_v23 = vmax.f32 %v4044_v43, %v4050_v26  ;;  %v4053_v45 = vmax.f32 %v4045_v47, %v4052_v34  ;;  %v4049_v46 = vmax.f32 %v4043_v55, %v4048_v59 }
 0xa23   :  { %v4055_v29 = vmax.f32 %v4051_v23, %v4053_v45  ;;  %v4054_v58 = vmax.f32 %v4047_v8, %v4049_v46  ;;  %v3920_v45 = vld [vmem:[#allocation19 + $0x1b8] sm:$0xff]  ;;  %v3923_v46 = vld [vmem:[#allocation19 + $0x1d0] sm:$0xff] }
 0xa25   :  { %v4056_v20 = vmax.f32 %v4054_v58, %v4055_v29 }
 0xa27   :  { %v4057_v38 = vsub.f32 %v4033_v51, %v4056_v20  ;;  %v4058_v54 = vsub.f32 %v4034_v24, %v4056_v20  ;;  %v4059_v31 = vsub.f32 %v4035_v17, %v4056_v20  ;;  %v4060_v27 = vsub.f32 %v4036_v28, %v4056_v20 }
 0xa28   :  { %v4061_v39 = vsub.f32 %v4037_v35, %v4056_v20  ;;  %v4062_v60 = vsub.f32 %v4038_v12, %v4056_v20  ;;  %v4063_v57 = vsub.f32 %v4039_v62, %v4056_v20  ;;  %v4064_v43 = vsub.f32 %v4040_v10, %v4056_v20 }
 0xa29   :  { %v4065_v1 = vmul.f32 1.442695, %v4057_v38  ;;  %v4067_v25 = vmul.f32 1.442695, %v4058_v54  ;;  %v4069_v15 = vmul.f32 1.442695, %v4059_v31 }
 0xa2a   :  { %v4071_v2 = vmul.f32 1.442695, %v4060_v27  ;;  %v4073_v5 = vmul.f32 1.442695, %v4061_v39  ;;  %v4075_v47 = vmul.f32 1.442695, %v4062_v60 }
 0xa2b   :  { %12118 = vpow2.f32 %v4065_v1  ;;  %v4077_v29 = vmul.f32 1.442695, %v4063_v57  ;;  %v4079_v58 = vmul.f32 1.442695, %v4064_v43  ;;  %v14136_v43 = vpack.c.bf16 %v3923_v46, %v3920_v45  ;;  %v3976_v46 = vld [vmem:[#allocation20 + $0x78] sm:$0xff] }
 0xa2c   :  { %12120 = vpow2.f32 %v4067_v25 }
 0xa2d   :  { %12122 = vpow2.f32 %v4069_v15  ;;  %15895 = vst [vmem:[#allocation54_spill] sm:$0xff] %v14136_v43  ;;  %10645 = vmatprep.subr.bf16.mxu0 %v14136_v43 }
 0xa2e   :  { %12124 = vpow2.f32 %v4071_v2 }
 0xa2f   :  { %12126 = vpow2.f32 %v4073_v5  ;;  %v3961_v5 = vld [vmem:[#allocation20] sm:$0xff] }
 0xa30   :  { %12128 = vpow2.f32 %v4075_v47  ;;  %v3964_v47 = vld [vmem:[#allocation20 + $0x18] sm:$0xff] }
 0xa31   :  { %12130 = vpow2.f32 %v4077_v29  ;;  %v3919_v29 = vld [vmem:[#allocation19 + $0x1b0] sm:$0xff] }
 0xa32   :  { %12132 = vpow2.f32 %v4079_v58  ;;  %v3922_v58 = vld [vmem:[#allocation19 + $0x1c8] sm:$0xff] }
 0xa35   :  { %v12119_v51 = vpop.eup %12118 }
 0xa36   :  { %v12121_v17 = vpop.eup %12120  ;;  %v4081_v54 = vsel %vm4041_vm2, %v12119_v51, 0.0 }
 0xa37   :  { %v12123_v31 = vpop.eup %12122  ;;  %v4082_v38 = vsel %vm4041_vm2, %v12121_v17, 0.0 }
 0xa38   :  { %v12125_v1 = vpop.eup %12124  ;;  %v4083_v25 = vadd.f32 %v4082_v38, %v4081_v54  ;;  %v4084_v15 = vsel %vm4041_vm2, %v12123_v31, 0.0  ;;  %v14138_v54 = vpack.c.bf16 %v3964_v47, %v3961_v5  ;;  %v14140_v38 = vpack.c.bf16 %v3922_v58, %v3919_v29  ;;  %v3931_v5 = vld [vmem:[#allocation19 + $0x210] sm:$0xff]  ;;  %v3934_v47 = vld [vmem:[#allocation19 + $0x228] sm:$0xff] }
 0xa39   :  { %v12127_v20 = vpop.eup %12126  ;;  %v4086_v60 = vsel %vm4041_vm2, %v12125_v1, 0.0  ;;  %v14166_v58 = vpack.c.bf16 %v3934_v47, %v3931_v5  ;;  %v3947_v5 = vld [vmem:[#allocation19 + $0x290] sm:$0xff]  ;;  %v3985_v47 = vld [vmem:[#allocation20 + $0xc0] sm:$0xff] }
 0xa3a   :  { %v4085_v2 = vadd.f32 %v4084_v15, %v4083_v25  ;;  %v14118_v57 = vpop.eup %12128  ;;  %v4088_v27 = vsel %vm4041_vm2, %v12127_v20, 0.0  ;;  %15896 = vst [vmem:[#allocation45_spill] sm:$0xff] %v14140_v38  ;;  %v3971_v25 = vld [vmem:[#allocation20 + $0x50] sm:$0xff]  ;;  %10707 = vmatpush1.bf16.msra.mxu1 %v14138_v54  ;;  %10647 = vmatpush1.bf16.msra.mxu0 %v14140_v38  ;;  %v3926_v15 = vld [vmem:[#allocation19 + $0x1e8] sm:$0xff] }
 0xa3b   :  { %v14121_v28 = vpop.eup %12130  ;;  %v4090_v35 = vsel %vm4041_vm2, %v14118_v57, 0.0  ;;  %15900 = vst [vmem:[#allocation56_spill] sm:$0xff] %v14166_v58 }
 0xa3c   :  { %v4087_v39 = vadd.f32 %v4086_v60, %v4085_v2  ;;  %v14125_v12 = vpop.eup %12132  ;;  %v4092_v10 = vsel %vm4041_vm2, %v14121_v28, 0.0  ;;  %v3929_v2 = vld [vmem:[#allocation19 + $0x200] sm:$0xff]  ;;  %v3967_v60 = vld [vmem:[#allocation20 + $0x30] sm:$0xff] }
 0xa3d   :  { %v4094_v11 = vsel %vm4041_vm2, %v14125_v12, 0.0 }
 0xa3e   :  { %v4089_v24 = vadd.f32 %v4088_v27, %v4087_v39  ;;  %v14149_v39 = vpack.c.bf16 %v3929_v2, %v3926_v15  ;;  %v3970_v27 = vld [vmem:[#allocation20 + $0x48] sm:$0xff]  ;;  %v3941_v2 = vld [vmem:[#allocation19 + $0x260] sm:$0xff] }
 0xa3f   :  { %v3938_v15 = vld [vmem:[#allocation19 + $0x248] sm:$0xff] }
 0xa40   :  { %v4091_v62 = vadd.f32 %v4090_v35, %v4089_v24  ;;  %15897 = vst [vmem:[#allocation59_spill] sm:$0xff] %v14149_v39  ;;  %v3925_v24 = vld [vmem:[#allocation19 + $0x1e0] sm:$0xff]  ;;  %v3928_v35 = vld [vmem:[#allocation19 + $0x1f8] sm:$0xff]  ;;  %10649 = vmatprep.subr.bf16.mxu0 %v14149_v39 }
 0xa42   :  { %v4093_v55 = vadd.f32 %v4092_v10, %v4091_v62  ;;  %v14151_v62 = vpack.c.bf16 %v3970_v27, %v3967_v60  ;;  %v14153_v10 = vpack.c.bf16 %v3928_v35, %v3925_v24  ;;  %v3979_v60 = vld [vmem:[#allocation20 + $0x90] sm:$0xff]  ;;  %v14176_v27 = vpack.c.bf16 %v3941_v2, %v3938_v15  ;;  %v3982_v24 = vld [vmem:[#allocation20 + $0xa8] sm:$0xff]  ;;  %v3937_v35 = vld [vmem:[#allocation19 + $0x240] sm:$0xff] }
 0xa43   :  { %v3946_v15 = vld [vmem:[#allocation19 + $0x288] sm:$0xff] }
 0xa44   :  { %v4095_v26 = vadd.f32 %v4094_v11, %v4093_v55  ;;  %15898 = vst [vmem:[#allocation60_spill] sm:$0xff] %v14153_v10  ;;  %v3977_v55 = vld [vmem:[#allocation20 + $0x80] sm:$0xff]  ;;  %10651 = vmatpush1.bf16.msra.mxu0 %v14153_v10  ;;  %15902 = vst [vmem:[#allocation57_spill] sm:$0xff] %v14176_v27 }
 0xa46   :  { %12134 = vrcp.f32 %v4095_v26 }
 0xa50   :  { %v14131_v34 = vpop.eup %12134 }
 0xa51   :  { %v4098_v59 = vmul.f32 %v14131_v34, %v12121_v17  ;;  %v4097_v8 = vmul.f32 %v14131_v34, %v12119_v51  ;;  %v4099_v23 = vmul.f32 %v14131_v34, %v12123_v31  ;;  %v3968_v17 = vld [vmem:[#allocation20 + $0x38] sm:$0xff]  ;;  %v4100_v31 = vmul.f32 %v14131_v34, %v12125_v1  ;;  %v3974_v1 = vld [vmem:[#allocation20 + $0x68] sm:$0xff] }
 0xa52   :  { %v14143_v51 = vpack.c.bf16 %v3971_v25, %v3968_v17  ;;  %v14156_v11 = vpack.c.bf16 %v3977_v55, %v3974_v1  ;;  %v4101_v26 = vmul.f32 %v14131_v34, %v12127_v20  ;;  %v3980_v20 = vld [vmem:[#allocation20 + $0x98] sm:$0xff]  ;;  %v3983_v17 = vld [vmem:[#allocation20 + $0xb0] sm:$0xff]  ;;  %v14178_v55 = vpack.c.bf16 %v3982_v24, %v3979_v60 }
 0xa53   :  { %4112 = vperm.xlu0 %11957, %v4098_v59   ;;  %4107 = vperm.xlu1 %11956, %v4097_v8   ;;  %v3932_v59 = vld [vmem:[#allocation19 + $0x218] sm:$0xff]  ;;  %v3935_v8 = vld [vmem:[#allocation19 + $0x230] sm:$0xff]  ;;  %v14169_v25 = vpack.c.bf16 %v3983_v17, %v3980_v20 }
 0xa54   :  { %10709 = vmatprep.subr.bf16.mxu1 %v14143_v51  ;;  %v14162_v45 = vpack.c.bf16 %v3935_v8, %v3932_v59  ;;  %v3940_v1 = vld [vmem:[#allocation19 + $0x258] sm:$0xff]  ;;  %15903 = vst [vmem:[#allocation58_spill] sm:$0xff] %v14178_v55  ;;  %v3989_v59 = vld [vmem:[#allocation20 + $0xe0] sm:$0xff]  ;;  %v3995_v24 = vld [vmem:[#allocation20 + $0x110] sm:$0xff] }
 0xa55   :  { %10711 = vmatpush1.bf16.msra.mxu1 %v14151_v62  ;;  %15901 = vst [vmem:[#allocation43_spill] sm:$0xff] %v14169_v25  ;;  %v3988_v17 = vld [vmem:[#allocation20 + $0xd8] sm:$0xff] }
 0xa56   :  { %10713 = vmatprep.subr.bf16.mxu1 %v14156_v11  ;;  %15899 = vst [vmem:[#allocation44_spill] sm:$0xff] %v14162_v45  ;;  %10653 = vmatprep.subr.bf16.mxu0 %v14162_v45  ;;  %v14192_v2 = vpack.c.bf16 %v3988_v17, %v3985_v47  ;;  %v3949_v47 = vld [vmem:[#allocation19 + $0x2a0] sm:$0xff]  ;;  %v3952_v17 = vld [vmem:[#allocation19 + $0x2b8] sm:$0xff] }
 0xa57   :  { %4117 = vperm.xlu1 %11956, %v4099_v23   ;;  %v3973_v23 = vld [vmem:[#allocation20 + $0x60] sm:$0xff]  ;;  %10655 = vmatpush1.bf16.msra.mxu0 %v14166_v58 }
 0xa58   :  { %v14164_v29 = vpack.c.bf16 %v3976_v46, %v3973_v23  ;;  %10657 = vmatprep.subr.bf16.mxu0 %v14176_v27  ;;  %v4103_v23 = vmul.f32 %v14131_v34, %v14121_v28  ;;  %v3944_v46 = vld [vmem:[#allocation19 + $0x278] sm:$0xff]  ;;  %15907 = vst [vmem:[#allocation89_spill] sm:$0xff] %v14192_v2 }
 0xa59   :  { %v14190_v20 = vpack.c.bf16 %v3947_v5, %v3944_v46  ;;  %v3992_v28 = vld [vmem:[#allocation20 + $0xf8] sm:$0xff]  ;;  %v3994_v5 = vld [vmem:[#allocation20 + $0x108] sm:$0xff] }
 0xa5a   :  { %10715 = vmatpush1.bf16.msra.mxu1 %v14164_v29 }
 0xa5b   :  { %4122 = vperm.xlu1 %11956, %v4100_v31   ;;  %v4102_v31 = vmul.f32 %v14131_v34, %v14118_v57  ;;  %10717 = vmatprep.subr.bf16.mxu1 %v14169_v25  ;;  %v3986_v57 = vld [vmem:[#allocation20 + $0xc8] sm:$0xff]  ;;  %15906 = vst [vmem:[#allocation88_spill] sm:$0xff] %v14190_v20 }
 0xa5c   :  { %v14183_v8 = vpack.c.bf16 %v3989_v59, %v3986_v57  ;;  %v3950_v57 = vld [vmem:[#allocation19 + $0x2a8] sm:$0xff]  ;;  %v3953_v59 = vld [vmem:[#allocation19 + $0x2c0] sm:$0xff] }
 0xa5d   :  { %v14204_v46 = vpack.c.bf16 %v3953_v59, %v3950_v57  ;;  %v3959_v57 = vld [vmem:[#allocation19 + $0x2f0] sm:$0xff]  ;;  %v3997_v59 = vld [vmem:[#allocation20 + $0x120] sm:$0xff]  ;;  %v4006_v25 = vld [vmem:[#allocation20 + $0x168] sm:$0xff] }
 0xa5e   :  { %15905 = vst [vmem:[#allocation87_spill] sm:$0xff] %v14183_v8  ;;  %10719 = vmatpush1.bf16.msra.mxu1 %v14178_v55  ;;  %v4003_v55 = vld [vmem:[#allocation20 + $0x150] sm:$0xff] }
 0xa5f   :  { %4127 = vperm.xlu1 %11956, %v4101_v26   ;;  %v14180_v26 = vpack.c.bf16 %v3940_v1, %v3937_v35  ;;  %10721 = vmatprep.subr.bf16.mxu1 %v14183_v8  ;;  %v14197_v35 = vpack.c.bf16 %v3995_v24, %v3992_v28  ;;  %v4104_v1 = vmul.f32 %v14131_v34, %v14125_v12  ;;  %v3998_v12 = vld [vmem:[#allocation20 + $0x128] sm:$0xff]  ;;  %v4001_v34 = vld [vmem:[#allocation20 + $0x140] sm:$0xff]  ;;  %v3956_v24 = vld [vmem:[#allocation19 + $0x2d8] sm:$0xff] }
 0xa60   :  { %15910 = vst [vmem:[#allocation92_spill] sm:$0xff] %v14204_v46  ;;  %v14211_v28 = vpack.c.bf16 %v4001_v34, %v3998_v12  ;;  %v4004_v12 = vld [vmem:[#allocation20 + $0x158] sm:$0xff]  ;;  %v4007_v34 = vld [vmem:[#allocation20 + $0x170] sm:$0xff]  ;;  %v3918_v8 = vld [vmem:[#allocation19 + $0x1a8] sm:$0xff] }
 0xa61   :  { %15904 = vst [vmem:[#allocation85_spill] sm:$0xff] %v14180_v26  ;;  %10659 = vmatpush1.bf16.msra.mxu0 %v14180_v26  ;;  %15909 = vst [vmem:[#allocation91_spill] sm:$0xff] %v14197_v35 }
 0xa62   :  { %10661 = vmatprep.subr.bf16.mxu0 %v14190_v20  ;;  %10723 = vmatpush1.bf16.msra.mxu1 %v14192_v2  ;;  %15913 = vst [vmem:[#allocation95_spill] sm:$0xff] %v14211_v28  ;;  %v3915_v2 = vld [vmem:[#allocation19 + $0x190] sm:$0xff] }
 0xa63   :  { %4132 = vperm.xlu1 %11956, %v4102_v31   ;;  %v3943_v31 = vld [vmem:[#allocation19 + $0x270] sm:$0xff]  ;;  %10725 = vmatprep.subr.bf16.mxu1 %v14197_v35 }
 0xa64   :  { %v14194_v60 = vpack.c.bf16 %v3946_v15, %v3943_v31  ;;  %v14208_v15 = vpack.c.bf16 %v3952_v17, %v3949_v47  ;;  %v3958_v47 = vld [vmem:[#allocation19 + $0x2e8] sm:$0xff] }
 0xa66   :  { %15908 = vst [vmem:[#allocation90_spill] sm:$0xff] %v14194_v60  ;;  %10663 = vmatpush1.bf16.msra.mxu0 %v14194_v60  ;;  %15912 = vst [vmem:[#allocation94_spill] sm:$0xff] %v14208_v15 }
 0xa67   :  { %4137 = vperm.xlu1 %11956, %v4103_v23   ;;  %v3991_v23 = vld [vmem:[#allocation20 + $0xf0] sm:$0xff]  ;;  %10665 = vmatprep.subr.bf16.mxu0 %v14204_v46 }
 0xa68   :  { %v14206_v31 = vpack.c.bf16 %v3994_v5, %v3991_v23  ;;  %v4000_v23 = vld [vmem:[#allocation20 + $0x138] sm:$0xff]  ;;  %v3955_v5 = vld [vmem:[#allocation19 + $0x2d0] sm:$0xff] }
 0xa69   :  { %v14218_v17 = vpack.c.bf16 %v4000_v23, %v3997_v59  ;;  %v14220_v35 = vpack.c.bf16 %v3958_v47, %v3955_v5 }
 0xa6a   :  { %15911 = vst [vmem:[#allocation93_spill] sm:$0xff] %v14206_v31  ;;  %10727 = vmatpush1.bf16.msra.mxu1 %v14206_v31  ;;  %10667 = vmatpush1.bf16.msra.mxu0 %v14208_v15  ;;  %v14223_v31 = vpack.c.bf16 %v4007_v34, %v4004_v12 }
 0xa6b   :  { %4142 = vperm.xlu1 %11956, %v4104_v1   ;;  %10729 = vmatprep.subr.bf16.mxu1 %v14211_v28  ;;  %v14216_v1 = vpack.c.bf16 %v3959_v57, %v3956_v24  ;;  %15915 = vst [vmem:[#allocation97_spill] sm:$0xff] %v14218_v17  ;;  %15916 = vst [vmem:[#allocation98_spill] sm:$0xff] %v14220_v35  ;;  %v14227_v24 = vpack.c.bf16 %v3918_v8, %v3915_v2 }
 0xa6c   :  { %15917 = vst [vmem:[#allocation99_spill] sm:$0xff] %v14223_v31  ;;  %v14229_v57 = vpack.c.bf16 %v4006_v25, %v4003_v55 }
 0xa6d   :  { %15914 = vst [vmem:[#allocation96_spill] sm:$0xff] %v14216_v1  ;;  %10669 = vmatprep.subr.bf16.mxu0 %v14216_v1  ;;  %15918 = vst [vmem:[#allocation100_spill] sm:$0xff] %v14227_v24 }
 0xa6e   :  { %10731 = vmatpush1.bf16.msra.mxu1 %v14218_v17  ;;  %10671 = vmatpush1.bf16.msra.mxu0 %v14220_v35  ;;  %15919 = vst [vmem:[#allocation101_spill] sm:$0xff] %v14229_v57 }
 0xa6f   :  { %10733 = vmatprep.subr.bf16.mxu1 %v14223_v31  ;;  %10673 = vmatprep.subr.bf16.mxu0 %v14227_v24 }
 0xa72   :  { %10735 = vmatpush1.bf16.msra.mxu1 %v14229_v57 }
 0xa73   :  { %10761 = vmatprep.subr.bf16.mxu1 %v14015_v21 }
 0xa75   :  { %4387 = vmatmul.mubr.f32.vlgmr.msra.gmra.mrb[48].mxu1 %v15752_v40 }
 0xa76   :  { %10763 = vmatpush1.bf16.msra.mxu1 %v14017_v16 }
 0xa77   :  { %10765 = vmatprep.subr.bf16.mxu1 %v14019_v32 }
 0xa7a   :  { %10767 = vmatpush1.bf16.msra.mxu1 %v14023_v56 }
 0xa7b   :  { %10769 = vmatprep.subr.bf16.mxu1 %v14026_v9 }
 0xa7e   :  { %10771 = vmatpush1.bf16.msra.mxu1 %v14029_v48 }
 0xa7f   :  { %10773 = vmatprep.subr.bf16.mxu1 %v14032_v52 }
 0xa82   :  { %10775 = vmatpush1.bf16.msra.mxu1 %v14035_v37 }
 0xa83   :  { %10777 = vmatprep.subr.bf16.mxu1 %v14038_v36 }
 0xa86   :  { %10779 = vmatpush1.bf16.msra.mxu1 %v14044_v13 }
 0xa87   :  { %10781 = vmatprep.subr.bf16.mxu1 %v14047_v22 }
 0xa8a   :  { %10783 = vmatpush1.bf16.msra.mxu1 %v14050_v0  ;;  %v3972_v0 = vld [vmem:[#allocation20 + $0x58] sm:$0xff] }
 0xa8b   :  { %10785 = vmatprep.subr.bf16.mxu1 %v14053_v53  ;;  %v3912_v53 = vld [vmem:[#allocation19 + $0x178] sm:$0xff] }
 0xa8e   :  { %10787 = vmatpush1.bf16.msra.mxu1 %v14056_v63  ;;  %v3909_v63 = vld [vmem:[#allocation19 + $0x160] sm:$0xff] }
 0xa8f   :  { %10789 = vmatprep.subr.bf16.mxu1 %v14059_v44 }
 0xa92   :  { %10791 = vmatpush1.bf16.msra.mxu1 %v14062_v6  ;;  %v3921_v6 = vld [vmem:[#allocation19 + $0x1c0] sm:$0xff] }
 0xa93   :  { %10793 = vmatprep.subr.bf16.mxu1 %v14065_v42 }
 0xa96   :  { %10795 = vmatpush1.bf16.msra.mxu1 %v14070_v61 }
 0xa97   :  { %10797 = vmatprep.subr.bf16.mxu1 %v14136_v43  ;;  %v15923_v43 = vld [vmem:[#allocation55_spill] sm:$0xff] }
 0xa9a   :  { %10799 = vmatpush1.bf16.msra.mxu1 %v14140_v38 }
 0xa9b   :  { %10801 = vmatprep.subr.bf16.mxu1 %v14149_v39 }
 0xa9e   :  { %10803 = vmatpush1.bf16.msra.mxu1 %v14153_v10 }
 0xa9f   :  { %10805 = vmatprep.subr.bf16.mxu1 %v14162_v45 }
 0xaa2   :  { %10807 = vmatpush1.bf16.msra.mxu1 %v14166_v58  ;;  %v15921_v58 = vld [vmem:[#allocation53_spill] sm:$0xff] }
 0xaa3   :  { %10809 = vmatprep.subr.bf16.mxu1 %v14176_v27 }
 0xaa6   :  { %10811 = vmatpush1.bf16.msra.mxu1 %v14180_v26 }
 0xaa7   :  { %10813 = vmatprep.subr.bf16.mxu1 %v14190_v20 }
 0xaaa   :  { %10815 = vmatpush1.bf16.msra.mxu1 %v14194_v60 }
 0xaab   :  { %10817 = vmatprep.subr.bf16.mxu1 %v14204_v46 }
 0xaae   :  { %10819 = vmatpush1.bf16.msra.mxu1 %v14208_v15 }
 0xaaf   :  { %10821 = vmatprep.subr.bf16.mxu1 %v14216_v1 }
 0xab2   :  { %10823 = vmatpush1.bf16.msra.mxu1 %v14220_v35 }
 0xab3   :  { %10857 = vmatprep.subr.bf16.mxu1 %v14040_v50  ;;  %v15920_v50 = vld [vmem:[#allocation46_spill] sm:$0xff] }
 0xad2   :  { %v4108_v25 = vpop.permute.xlu1 %4107  ;;  %v4113_v8 = vpop.permute.xlu0 %4112 }
 0xad3   :  { %v4147_v59 = vmul.f32 %v4113_v8, %v15859_v33  ;;  %v4148_v23 = vmul.f32 %v4113_v8, %v13981_v30  ;;  %v4145_v5 = vmul.f32 %v4108_v25, %v15866_v14  ;;  %v4146_v47 = vmul.f32 %v4108_v25, %v14006_v4 }
 0xad5   :  { %v4161_v35 = vadd.f32 %v4147_v59, %v4145_v5  ;;  %v4168_v15 = vadd.f32 %v4148_v23, %v4146_v47  ;;  %v15922_v5 = vld [vmem:[#allocation68_spill] sm:$0xff] }
 0xad6   :  { %v4118_v55 = vpop.permute.xlu1 %4117 }
 0xad7   :  { %v4149_v34 = vmul.f32 %v4118_v55, %v15838_v49  ;;  %v4150_v1 = vmul.f32 %v4118_v55, %v13885_v19 }
 0xad9   :  { %v4162_v26 = vadd.f32 %v4161_v35, %v4149_v34  ;;  %v4169_v27 = vadd.f32 %v4168_v15, %v4150_v1  ;;  %v3867_v1 = vld [vmem:[#allocation19 + $0x10] sm:$0xff]  ;;  %v3870_v34 = vld [vmem:[#allocation19 + $0x28] sm:$0xff] }
 0xada   :  { %v4123_v2 = vpop.permute.xlu1 %4122 }
 0xadb   :  { %v4151_v46 = vmul.f32 %v4123_v2, %v15920_v50  ;;  %v4152_v60 = vmul.f32 %v4123_v2, %v13784_v7 }
 0xadd   :  { %v4163_v10 = vadd.f32 %v4162_v26, %v4151_v46  ;;  %v4170_v25 = vadd.f32 %v4169_v27, %v4152_v60  ;;  %v15924_v26 = vld [vmem:[#allocation48_spill] sm:$0xff]  ;;  %v15925_v60 = vld [vmem:[#allocation86_spill] sm:$0xff] }
 0xade   :  { %v4128_v12 = vpop.permute.xlu1 %4127 }
 0xadf   :  { %v4153_v8 = vmul.f32 %v4128_v12, %v13729_v3  ;;  %v4154_v45 = vmul.f32 %v4128_v12, %v15921_v58 }
 0xae1   :  { %v4164_v59 = vadd.f32 %v4163_v10, %v4153_v8  ;;  %v4171_v23 = vadd.f32 %v4170_v25, %v4154_v45  ;;  %v14286_v45 = vpack.c.bf16 %v3870_v34, %v3867_v1  ;;  %v3927_v25 = vld [vmem:[#allocation19 + $0x1f0] sm:$0xff]  ;;  %v3888_v1 = vld [vmem:[#allocation19 + $0xb8] sm:$0xff] }
 0xae2   :  { %v4133_v20 = vpop.permute.xlu1 %4132  ;;  %v3939_v34 = vld [vmem:[#allocation19 + $0x250] sm:$0xff] }
 0xae3   :  { %v4155_v39 = vmul.f32 %v4133_v20, %v13841_v18  ;;  %v4156_v38 = vmul.f32 %v4133_v20, %v15836_v41  ;;  %v3924_v20 = vld [vmem:[#allocation19 + $0x1d8] sm:$0xff]  ;;  %15926 = vst [vmem:[#allocation46_spill] sm:$0xff] %v14286_v45 }
 0xae4   :  { %v14288_v8 = vpack.c.bf16 %v3924_v20, %v3921_v6  ;;  %v3933_v6 = vld [vmem:[#allocation19 + $0x220] sm:$0xff]  ;;  %v3891_v20 = vld [vmem:[#allocation19 + $0xd0] sm:$0xff] }
 0xae5   :  { %v4165_v61 = vadd.f32 %v4164_v59, %v4155_v39  ;;  %v4172_v35 = vadd.f32 %v4171_v23, %v4156_v38  ;;  %v3873_v39 = vld [vmem:[#allocation19 + $0x40] sm:$0xff]  ;;  %v3876_v38 = vld [vmem:[#allocation19 + $0x58] sm:$0xff]  ;;  %v3879_v59 = vld [vmem:[#allocation19 + $0x70] sm:$0xff] }
 0xae6   :  { %v4138_v55 = vpop.permute.xlu1 %4137  ;;  %15927 = vst [vmem:[#allocation53_spill] sm:$0xff] %v14288_v8  ;;  %v3882_v23 = vld [vmem:[#allocation19 + $0x88] sm:$0xff] }
 0xae7   :  { %v4157_v47 = vmul.f32 %v4138_v55, %v15922_v5  ;;  %v4158_v2 = vmul.f32 %v4138_v55, %v15923_v43  ;;  %v3930_v55 = vld [vmem:[#allocation19 + $0x208] sm:$0xff] }
 0xae9   :  { %v4166_v42 = vadd.f32 %v4165_v61, %v4157_v47  ;;  %v4173_v12 = vadd.f32 %v4172_v35, %v4158_v2  ;;  %v14292_v61 = vpack.c.bf16 %v3876_v38, %v3873_v39  ;;  %v3936_v47 = vld [vmem:[#allocation19 + $0x238] sm:$0xff]  ;;  %v14298_v2 = vpack.c.bf16 %v3882_v23, %v3879_v59  ;;  %v3945_v39 = vld [vmem:[#allocation19 + $0x280] sm:$0xff] }
 0xaea   :  { %v4143_v15 = vpop.permute.xlu1 %4142  ;;  %v14301_v35 = vpack.c.bf16 %v3936_v47, %v3933_v6  ;;  %v3948_v38 = vld [vmem:[#allocation19 + $0x298] sm:$0xff]  ;;  %v3897_v59 = vld [vmem:[#allocation19 + $0x100] sm:$0xff]  ;;  %v3951_v6 = vld [vmem:[#allocation19 + $0x2b0] sm:$0xff] }
 0xaeb   :  { %v4159_v27 = vmul.f32 %v4143_v15, %v15924_v26  ;;  %v4160_v46 = vmul.f32 %v4143_v15, %v15925_v60  ;;  %15928 = vst [vmem:[#allocation68_spill] sm:$0xff] %v14292_v61  ;;  %15930 = vst [vmem:[#allocation48_spill] sm:$0xff] %v14298_v2  ;;  %v3885_v15 = vld [vmem:[#allocation19 + $0xa0] sm:$0xff]  ;;  %v3900_v23 = vld [vmem:[#allocation19 + $0x118] sm:$0xff] }
 0xaec   :  { %15931 = vst [vmem:[#allocation86_spill] sm:$0xff] %v14301_v35  ;;  %v3954_v47 = vld [vmem:[#allocation19 + $0x2c8] sm:$0xff] }
 0xaed   :  { %v14284_v44 = vadd.f32 %v4166_v42, %v4159_v27  ;;  %v4174_v10 = vadd.f32 %v4173_v12, %v4160_v46  ;;  %v14295_v42 = vpack.c.bf16 %v3930_v55, %v3927_v25  ;;  %v3942_v12 = vld [vmem:[#allocation19 + $0x268] sm:$0xff]  ;;  %v14304_v27 = vpack.c.bf16 %v3888_v1, %v3885_v15 }
 0xaee   :  { %v14307_v46 = vpack.c.bf16 %v3942_v12, %v3939_v34  ;;  %v14313_v55 = vpack.c.bf16 %v3948_v38, %v3945_v39  ;;  %v14316_v15 = vpack.c.bf16 %v3900_v23, %v3897_v59  ;;  %v14319_v1 = vpack.c.bf16 %v3954_v47, %v3951_v6  ;;  %v3903_v34 = vld [vmem:[#allocation19 + $0x130] sm:$0xff]  ;;  %v3906_v12 = vld [vmem:[#allocation19 + $0x148] sm:$0xff] }
 0xaef   :  { %4242 = vmatprep.mubr.f32.mxu0 %v4174_v10  ;;  %15929 = vst [vmem:[#allocation55_spill] sm:$0xff] %v14295_v42  ;;  %15932 = vst [vmem:[#allocation102_spill] sm:$0xff] %v14304_v27  ;;  %v14322_v39 = vpack.c.bf16 %v3906_v12, %v3903_v34  ;;  %v14328_v59 = vpack.c.bf16 %v3912_v53, %v3909_v63  ;;  %v3963_v23 = vld [vmem:[#allocation20 + $0x10] sm:$0xff]  ;;  %v3966_v6 = vld [vmem:[#allocation20 + $0x28] sm:$0xff]  ;;  %v15941_v34 = vmov 0.0|0.0  }
 0xaf0   :  { %4243 = vmatmul.mubr.f32.vlgmr.msra.gmra.mrb[72].mxu0 %v14284_v44  ;;  %15933 = vst [vmem:[#allocation103_spill] sm:$0xff] %v14307_v46  ;;  %15935 = vst [vmem:[#allocation105_spill] sm:$0xff] %v14313_v55  ;;  %v14332_v47 = vpack.c.bf16 %v3966_v6, %v3963_v23  ;;  %v3969_v12 = vld [vmem:[#allocation20 + $0x40] sm:$0xff]  ;;  %v3975_v53 = vld [vmem:[#allocation20 + $0x70] sm:$0xff] }
 0xaf1   :  { %10675 = vmatpush3.bf16.msra.mxu0 %v14286_v45  ;;  %4313 = vmatprep.mubr.f32.mxu0 %v4174_v10  ;;  %v3894_v10 = vld [vmem:[#allocation19 + $0xe8] sm:$0xff]  ;;  %15936 = vst [vmem:[#allocation106_spill] sm:$0xff] %v14316_v15  ;;  %15937 = vst [vmem:[#allocation107_spill] sm:$0xff] %v14319_v1  ;;  %v3981_v23 = vld [vmem:[#allocation20 + $0xa0] sm:$0xff] }
 0xaf2   :  { %10677 = vmatprep.subr.bf16.mxu0 %v14288_v8  ;;  %v14310_v25 = vpack.c.bf16 %v3894_v10, %v3891_v20  ;;  %v3957_v20 = vld [vmem:[#allocation19 + $0x2e0] sm:$0xff]  ;;  %v3960_v10 = vld [vmem:[#allocation19 + $0x2f8] sm:$0xff]  ;;  %15938 = vst [vmem:[#allocation108_spill] sm:$0xff] %v14322_v39  ;;  %15940 = vst [vmem:[#allocation110_spill] sm:$0xff] %v14328_v59 }
 0xaf3   :  { %v14325_v38 = vpack.c.bf16 %v3960_v10, %v3957_v20  ;;  %v14337_v20 = vpack.c.bf16 %v3972_v0, %v3969_v12  ;;  %v3978_v63 = vld [vmem:[#allocation20 + $0x88] sm:$0xff]  ;;  %v3984_v6 = vld [vmem:[#allocation20 + $0xb8] sm:$0xff]  ;;  %v3987_v0 = vld [vmem:[#allocation20 + $0xd0] sm:$0xff] }
 0xaf4   :  { %15934 = vst [vmem:[#allocation104_spill] sm:$0xff] %v14310_v25  ;;  %v14343_v10 = vpack.c.bf16 %v3978_v63, %v3975_v53  ;;  %v3990_v12 = vld [vmem:[#allocation20 + $0xe8] sm:$0xff]  ;;  %v3993_v53 = vld [vmem:[#allocation20 + $0x100] sm:$0xff]  ;;  %v3996_v63 = vld [vmem:[#allocation20 + $0x118] sm:$0xff] }
 0xaf5   :  { %10679 = vmatpush3.bf16.msra.mxu0 %v14292_v61  ;;  %15939 = vst [vmem:[#allocation109_spill] sm:$0xff] %v14325_v38  ;;  %v14351_v22 = vpack.c.bf16 %v3990_v12, %v3987_v0  ;;  %v14355_v13 = vpack.c.bf16 %v3996_v63, %v3993_v53  ;;  %v4005_v0 = vld [vmem:[#allocation20 + $0x160] sm:$0xff]  ;;  %v4008_v12 = vld [vmem:[#allocation20 + $0x178] sm:$0xff] }
 0xaf6   :  { %10681 = vmatprep.subr.bf16.mxu0 %v14295_v42  ;;  %v14363_v37 = vpack.c.bf16 %v4008_v12, %v4005_v0  ;;  %v15948_v12 = vld [vmem:[#allocation82_spill] sm:$0xff] }
 0xaf7   :  { %15942 = vst [vmem:[#allocation111_spill] sm:$0xff] %v14351_v22  ;;  %15943 = vst [vmem:[#allocation112_spill] sm:$0xff] %v14355_v13 }
 0xaf8   :  { %15945 = vst [vmem:[#allocation114_spill] sm:$0xff] %v14363_v37 }
 0xaf9   :  { %10683 = vmatpush3.bf16.msra.mxu0 %v14298_v2 }
 0xafa   :  { %10685 = vmatprep.subr.bf16.mxu0 %v14301_v35 }
 0xafd   :  { %10687 = vmatpush3.bf16.msra.mxu0 %v14304_v27 }
 0xafe   :  { %10689 = vmatprep.subr.bf16.mxu0 %v14307_v46 }
 0xb01   :  { %10691 = vmatpush3.bf16.msra.mxu0 %v14310_v25 }
 0xb02   :  { %10693 = vmatprep.subr.bf16.mxu0 %v14313_v55 }
 0xb05   :  { %10695 = vmatpush3.bf16.msra.mxu0 %v14316_v15 }
 0xb06   :  { %10697 = vmatprep.subr.bf16.mxu0 %v14319_v1 }
 0xb09   :  { %10699 = vmatpush3.bf16.msra.mxu0 %v14322_v39 }
 0xb0a   :  { %10701 = vmatprep.subr.bf16.mxu0 %v14325_v38 }
 0xb0d   :  { %10703 = vmatpush3.bf16.msra.mxu0 %v14328_v59 }
 0xb0e   :  { %10736 = vmatprep.subr.bf16.mxu0 %v15941_v34 }
 0xb10   :  { %4314 = vmatmul.mubr.f32.vlgmr.msra.gmra.mrb[74].mxu0 %v14284_v44  ;;  %v14347_v44 = vpack.c.bf16 %v3984_v6, %v3981_v23  ;;  %v3999_v23 = vld [vmem:[#allocation20 + $0x130] sm:$0xff]  ;;  %v4002_v6 = vld [vmem:[#allocation20 + $0x148] sm:$0xff] }
 0xb11   :  { %10738 = vmatpush3.bf16.msra.mxu0 %v14332_v47  ;;  %9340 = vmatprep.mubr.msk.f32.mxu0 %vm12604_vm1, %v15752_v40  ;;  %v14359_v36 = vpack.c.bf16 %v4002_v6, %v3999_v23  ;;  %v12344_v23 = vld [vmem:[%s15427_s14] sm:$0x7]  ;;  %v15946_v6 = vld [vmem:[#allocation80_spill] sm:$0xff] }
 0xb12   :  { %10739 = vmatprep.subr.bf16.mxu0 %v15941_v34  ;;  %v14389_v0 = vrot.slane %v12344_v23, %v15946_v6  ;;  %v15953_v6 = vld [vmem:[#allocation73_spill] sm:$0xff] }
 0xb13   :  { %15944 = vst [vmem:[#allocation113_spill] sm:$0xff] %v14359_v36 }
 0xb14   :  { %15947 = vst [vmem:[#allocation80_spill] sm:$0xff] %v14389_v0 }
 0xb15   :  { %10741 = vmatpush3.bf16.msra.mxu0 %v14337_v20 }
 0xb16   :  { %10742 = vmatprep.subr.bf16.mxu0 %v15941_v34 }
 0xb19   :  { %10744 = vmatpush3.bf16.msra.mxu0 %v14343_v10 }
 0xb1a   :  { %10745 = vmatprep.subr.bf16.mxu0 %v15941_v34 }
 0xb1d   :  { %10747 = vmatpush3.bf16.msra.mxu0 %v14347_v44 }
 0xb1e   :  { %10748 = vmatprep.subr.bf16.mxu0 %v15941_v34 }
 0xb21   :  { %10750 = vmatpush3.bf16.msra.mxu0 %v14351_v22 }
 0xb22   :  { %10751 = vmatprep.subr.bf16.mxu0 %v15941_v34 }
 0xb25   :  { %10753 = vmatpush3.bf16.msra.mxu0 %v14355_v13 }
 0xb26   :  { %10754 = vmatprep.subr.bf16.mxu0 %v15941_v34 }
 0xb29   :  { %10756 = vmatpush3.bf16.msra.mxu0 %v14359_v36 }
 0xb2a   :  { %10757 = vmatprep.subr.bf16.mxu0 %v15941_v34 }
 0xb2d   :  { %10759 = vmatpush3.bf16.msra.mxu0 %v14363_v37 }
 0xb2e   :  { %10825 = vmatprep.subr.bf16.mxu0 %v14227_v24 }
 0xb30   :  { %9341 = vmatmul.mubr.f32.vlgmr.msra.gmra.mrb[76].mxu0 %v15752_v40 }
 0xb31   :  { %10827 = vmatpush3.bf16.msra.mxu0 %v14286_v45 }
 0xb32   :  { %10829 = vmatprep.subr.bf16.mxu0 %v14288_v8 }
 0xb35   :  { %10831 = vmatpush3.bf16.msra.mxu0 %v14292_v61 }
 0xb36   :  { %10833 = vmatprep.subr.bf16.mxu0 %v14295_v42  ;;  %v15952_v42 = vld [vmem:[#allocation71_spill] sm:$0xff] }
 0xb37   :  { %v937_v9 = vadd.f32 %v15953_v6, %v15952_v42  ;;  %v15957_v6 = vld [vmem:[#allocation34_spill] sm:$0xff] }
 0xb39   :  { %10835 = vmatpush3.bf16.msra.mxu0 %v14298_v2 }
 0xb3a   :  { %10837 = vmatprep.subr.bf16.mxu0 %v14301_v35 }
 0xb3d   :  { %10839 = vmatpush3.bf16.msra.mxu0 %v14304_v27 }
 0xb3e   :  { %10841 = vmatprep.subr.bf16.mxu0 %v14307_v46 }
 0xb41   :  { %10843 = vmatpush3.bf16.msra.mxu0 %v14310_v25 }
 0xb42   :  { %10845 = vmatprep.subr.bf16.mxu0 %v14313_v55 }
 0xb45   :  { %10847 = vmatpush3.bf16.msra.mxu0 %v14316_v15  ;;  %v14392_v15 = vrot.slane %v12344_v23, %v15948_v12 }
 0xb46   :  { %10849 = vmatprep.subr.bf16.mxu0 %v14319_v1 }
 0xb47   :  { %15949 = vst [vmem:[#allocation82_spill] sm:$0xff] %v14392_v15 }
 0xb48   :  { %v4388_v53 = vpop.f32.mrb[48].mxu1 }
 0xb49   :  { %10851 = vmatpush3.bf16.msra.mxu0 %v14322_v39  ;;  %v4390_v63 = vpop.f32.mrb[49].mxu1  ;;  %v15950_v39 = vld [vmem:[#allocation41_spill] sm:$0xff] }
 0xb4a   :  { %10853 = vmatprep.subr.bf16.mxu0 %v14325_v38  ;;  %v824_v1 = vadd.f32 %v15950_v39, %v14389_v0  ;;  %v15951_v38 = vld [vmem:[#allocation42_spill] sm:$0xff] }
 0xb4b   :  { %v826_v55 = vadd.f32 %v15951_v38, %v14392_v15 }
 0xb4d   :  { %10855 = vmatpush3.bf16.msra.mxu0 %v14328_v59 }
 0xb4e   :  { %10888 = vmatprep.subr.bf16.mxu0 %v15941_v34 }
 0xbc3   :  { %v4244_v25 = vpop.f32.mrb[72].mxu0 }
 0xbc4   :  { %v4319_v59 = vadd.f32 %v4244_v25, %v824_v1  ;;  %v4246_v46 = vpop.f32.mrb[73].mxu0 }
 0xbc5   :  { %v4320_v27 = vadd.f32 %v4246_v46, %v826_v55  ;;  %v14403_v46 = vld [vmem:[%s15428_s15] ss:$0 sm:$0xff] }
 0xbc6   :  { %v4463_v35 = vadd.f32 %v4388_v53, %v4319_v59  ;;  %15954 = vst [vmem:[#allocation41_spill] sm:$0xff] %v14403_v46  ;;  %v14411_v53 = vld [vmem:[%s15421_s8] ss:$0 sm:$0xff] }
 0xbc7   :  { %v4470_v52 = vadd.f32 %v4390_v63, %v4320_v27  ;;  %15956 = vst [vmem:[#allocation71_spill] sm:$0xff] %v14411_v53 }
 0xbc8   :  { %v7974_v23 = vmul.f32 -1.442695, %v4463_v35 }
 0xbc9   :  { %v7975_v56 = vmul.f32 -1.442695, %v4470_v52 }
 0xbca   :  { %12136 = vpow2.f32 %v7974_v23 }
 0xbcb   :  { %12138 = vpow2.f32 %v7975_v56 }
 0xbd4   :  { %v12137_v39 = vpop.eup %12136 }
 0xbd5   :  { %v4467_v0 = vadd.f32 1.0, %v12137_v39  ;;  %v12139_v38 = vpop.eup %12138 }
 0xbd6   :  { %v4474_v27 = vadd.f32 1.0, %v12139_v38  ;;  %v15959_v38 = vld [vmem:[#allocation81_spill] sm:$0xff] }
 0xbd7   :  { %12140 = vrcp.f32 %v4467_v0 }
 0xbd8   :  { %12142 = vrcp.f32 %v4474_v27 }
 0xbe3   :  { %v8312_v2 = vpop.f32.mrb[74].mxu0 }
 0xbe4   :  { %v8313_v48 = vpop.f32.mrb[75].mxu0 }
 0xbe5   :  { %v8314_v61 = vadd.f32 %v8313_v48, %v8312_v2  ;;  %v12141_v48 = vpop.eup %12140 }
 0xbe6   :  { %v12143_v52 = vpop.eup %12142 }
 0xbe7   :  { %v4321_v12 = vadd.f32 %v8314_v61, %v937_v9  ;;  %v4487_v56 = vsub.f32 1.0, %v12143_v52  ;;  %v4489_v35 = vmul.f32 0.0, %v12143_v52  ;;  %v15963_v52 = vld [vmem:[#allocation32_spill] sm:$0xff] }
 0xc03   :  { %v4459_v25 = vpop.f32.mrb[76].mxu0 }
 0xc04   :  { %v4483_v55 = vadd.f32 %v14403_v46, %v4459_v25  ;;  %v9342_v42 = vpop.f32.mrb[77].mxu0  ;;  %v15960_v25 = vld [vmem:[#allocation39_spill] sm:$0xff] }
 0xc05   :  { %v15961_v42 = vld [vmem:[#allocation37_spill] sm:$0xff] }
 0xc06   :  { %v4484_v9 = vmul.f32 %v12141_v48, %v4483_v55 }
 0xc08   :  { %v4485_v61 = vadd.f32 %v4484_v9, %v4321_v12  ;;  %v15958_v12 = vld [vmem:[#allocation40_spill] sm:$0xff]  ;;  %v15962_v9 = vld [vmem:[#allocation33_spill] sm:$0xff] }
 0xc0a   :  { %12144 = vtanh.f32 %v4485_v61 }
 0xc14   :  { %v12145_v2 = vpop.eup %12144 }
 0xc15   :  { %v4488_v1 = vmul.f32 %v12145_v2, %v4487_v56  ;;  %v15964_v2 = vld [vmem:[#allocation67_spill] sm:$0xff] }
 0xc17   :  { %v14406_v59 = vadd.f32 %v4489_v35, %v4488_v1  ;;  %v15965_v1 = vld [vmem:[#allocation83_spill] sm:$0xff] }
 0xc19   :  { %15955 = vst [vmem:[#allocation42_spill] sm:$0xff] %v14406_v59  ;;  %v4492_v63 = vmul.f32 %v14411_v53, %v14406_v59 }
 0xc1b   :  { %4493 = vadd.xlane.f32.xlu1 %v4492_v63 }
 0xca8   :  { %v4494_v0 = vpop.xlane.xlu1 %4493 }
 0xca9   :  { %v4495_v23 = vadd.f32 %v4494_v0, %v15957_v6  ;;  %v4496_v39 = vadd.f32 %v4494_v0, %v15958_v12  ;;  %v4497_v27 = vadd.f32 %v4494_v0, %v15959_v38  ;;  %v4498_v55 = vadd.f32 %v4494_v0, %v15960_v25 }
 0xcaa   :  { %v4499_v48 = vadd.f32 %v4494_v0, %v15961_v42  ;;  %v4500_v61 = vadd.f32 %v4494_v0, %v15962_v9  ;;  %v4501_v56 = vadd.f32 %v4494_v0, %v15963_v52  ;;  %v4502_v35 = vadd.f32 %v4494_v0, %v15964_v2 }
 0xcab   :  { %v4504_v53 = vadd.f32 %v15965_v1, %v4496_v39  ;;  %v4505_v63 = vadd.f32 %v15965_v1, %v4497_v27  ;;  %v4506_v6 = vadd.f32 %v15965_v1, %v4498_v55  ;;  %v4503_v12 = vadd.f32 %v15965_v1, %v4495_v23 }
 0xcac   :  { %v4507_v38 = vadd.f32 %v15965_v1, %v4499_v48  ;;  %v4508_v25 = vadd.f32 %v15965_v1, %v4500_v61  ;;  %v4509_v42 = vadd.f32 %v15965_v1, %v4501_v56  ;;  %v4510_v9 = vadd.f32 %v15965_v1, %v4502_v35 }
 0xcad   :  { %v4512_v52 = vsel %vm4041_vm2, %v4504_v53, -inf  ;;  %v4513_v0 = vsel %vm4041_vm2, %v4505_v63, -inf  ;;  %v4514_v39 = vsel %vm4041_vm2, %v4506_v6, -inf  ;;  %v4511_v27 = vsel %vm4041_vm2, %v4503_v12, -inf }
 0xcae   :  { %v4517_v55 = vsel %vm4041_vm2, %v4508_v25, -inf  ;;  %v4519_v23 = vsel %vm4041_vm2, %v4509_v42, -inf  ;;  %v4521_v48 = vsel %vm4041_vm2, %v4510_v9, -inf  ;;  %v4515_v61 = vsel %vm4041_vm2, %v4507_v38, -inf }
 0xcaf   :  { %v4518_v2 = vmax.f32 %v4512_v52, %v4517_v55  ;;  %v4520_v56 = vmax.f32 %v4513_v0, %v4519_v23  ;;  %v4522_v46 = vmax.f32 %v4514_v39, %v4521_v48  ;;  %v4516_v35 = vmax.f32 %v4511_v27, %v4515_v61 }
 0xcb1   :  { %v4524_v1 = vmax.f32 %v4520_v56, %v4522_v46  ;;  %v4523_v15 = vmax.f32 %v4516_v35, %v4518_v2 }
 0xcb3   :  { %v4525_v8 = vmax.f32 %v4523_v15, %v4524_v1 }
 0xcb5   :  { %v4526_v32 = vsub.f32 %v4503_v12, %v4525_v8  ;;  %v4527_v45 = vsub.f32 %v4504_v53, %v4525_v8  ;;  %v4528_v16 = vsub.f32 %v4505_v63, %v4525_v8  ;;  %v4529_v59 = vsub.f32 %v4506_v6, %v4525_v8 }
 0xcb6   :  { %v4530_v24 = vsub.f32 %v4507_v38, %v4525_v8  ;;  %v4531_v31 = vsub.f32 %v4508_v25, %v4525_v8  ;;  %v4532_v17 = vsub.f32 %v4509_v42, %v4525_v8  ;;  %v4533_v0 = vsub.f32 %v4510_v9, %v4525_v8 }
 0xcb7   :  { %v4534_v21 = vmul.f32 1.442695, %v4526_v32  ;;  %v4536_v37 = vmul.f32 1.442695, %v4527_v45  ;;  %v4538_v57 = vmul.f32 1.442695, %v4528_v16 }
 0xcb8   :  { %v4540_v36 = vmul.f32 1.442695, %v4529_v59  ;;  %v4542_v52 = vmul.f32 1.442695, %v4530_v24  ;;  %v4544_v46 = vmul.f32 1.442695, %v4531_v31 }
 0xcb9   :  { %12146 = vpow2.f32 %v4534_v21  ;;  %v4546_v15 = vmul.f32 1.442695, %v4532_v17  ;;  %v4548_v53 = vmul.f32 1.442695, %v4533_v0 }
 0xcba   :  { %12148 = vpow2.f32 %v4536_v37 }
 0xcbb   :  { %12150 = vpow2.f32 %v4538_v57 }
 0xcbc   :  { %12152 = vpow2.f32 %v4540_v36 }
 0xcbd   :  { %12154 = vpow2.f32 %v4542_v52 }
 0xcbe   :  { %12156 = vpow2.f32 %v4544_v46 }
 0xcbf   :  { %12158 = vpow2.f32 %v4546_v15 }
 0xcc0   :  { %12160 = vpow2.f32 %v4548_v53 }
 0xcc3   :  { %v12147_v6 = vpop.eup %12146 }
 0xcc4   :  { %v12149_v12 = vpop.eup %12148  ;;  %v4550_v16 = vsel %vm4041_vm2, %v12147_v6, 0.0 }
 0xcc5   :  { %v12151_v32 = vpop.eup %12150  ;;  %v4551_v21 = vsel %vm4041_vm2, %v12149_v12, 0.0 }
 0xcc6   :  { %v12153_v45 = vpop.eup %12152  ;;  %v4552_v37 = vadd.f32 %v4551_v21, %v4550_v16  ;;  %v4553_v24 = vsel %vm4041_vm2, %v12151_v32, 0.0 }
 0xcc7   :  { %v12155_v57 = vpop.eup %12154  ;;  %v4555_v31 = vsel %vm4041_vm2, %v12153_v45, 0.0 }
 0xcc8   :  { %v4554_v36 = vadd.f32 %v4553_v24, %v4552_v37  ;;  %v12157_v17 = vpop.eup %12156  ;;  %v4557_v59 = vsel %vm4041_vm2, %v12155_v57, 0.0 }
 0xcc9   :  { %v12159_v38 = vpop.eup %12158  ;;  %v4559_v42 = vsel %vm4041_vm2, %v12157_v17, 0.0 }
 0xcca   :  { %v4556_v8 = vadd.f32 %v4555_v31, %v4554_v36  ;;  %v12161_v9 = vpop.eup %12160  ;;  %v4561_v63 = vsel %vm4041_vm2, %v12159_v38, 0.0 }
 0xccb   :  { %v4563_v27 = vsel %vm4041_vm2, %v12161_v9, 0.0 }
 0xccc   :  { %v4558_v25 = vadd.f32 %v4557_v59, %v4556_v8 }
 0xcce   :  { %v4560_v2 = vadd.f32 %v4559_v42, %v4558_v25 }
 0xcd0   :  { %v4562_v39 = vadd.f32 %v4561_v63, %v4560_v2 }
 0xcd2   :  { %v4564_v55 = vadd.f32 %v4563_v27, %v4562_v39 }
 0xcd4   :  { %12162 = vrcp.f32 %v4564_v55 }
 0xcde   :  { %v12163_v23 = vpop.eup %12162 }
 0xcdf   :  { %v4566_v48 = vmul.f32 %v12163_v23, %v12147_v6  ;;  %v4567_v61 = vmul.f32 %v12163_v23, %v12149_v12  ;;  %v4568_v56 = vmul.f32 %v12163_v23, %v12151_v32  ;;  %v4569_v35 = vmul.f32 %v12163_v23, %v12153_v45 }
 0xce0   :  { %v4570_v1 = vmul.f32 %v12163_v23, %v12155_v57  ;;  %v4571_v52 = vmul.f32 %v12163_v23, %v12157_v17  ;;  %v4572_v0 = vmul.f32 %v12163_v23, %v12159_v38  ;;  %v4573_v46 = vmul.f32 %v12163_v23, %v12161_v9 }
 0xce1   :  { %4576 = vperm.xlu0 %11957, %v4566_v48  }
 0xce5   :  { %4581 = vperm.xlu0 %11957, %v4567_v61  }
 0xce9   :  { %4586 = vperm.xlu0 %11957, %v4568_v56  }
 0xced   :  { %4591 = vperm.xlu0 %11957, %v4569_v35  }
 0xcf1   :  { %4596 = vperm.xlu0 %11957, %v4570_v1  }
 0xcf5   :  { %4601 = vperm.xlu0 %11957, %v4571_v52  }
 0xcf9   :  { %4606 = vperm.xlu0 %11957, %v4572_v0  }
 0xcfd   :  { %4611 = vperm.xlu0 %11957, %v4573_v46  }
 0xd60   :  { %v4577_v15 = vpop.permute.xlu0 %4576 }
 0xd61   :  { %v4614_v45 = vmul.f32 %v4577_v15, %v15866_v14  ;;  %v4615_v37 = vmul.f32 %v4577_v15, %v14006_v4 }
 0xd64   :  { %v4582_v53 = vpop.permute.xlu0 %4581 }
 0xd65   :  { %v4616_v6 = vmul.f32 %v4582_v53, %v15859_v33  ;;  %v4617_v12 = vmul.f32 %v4582_v53, %v13981_v30 }
 0xd67   :  { %v4630_v36 = vadd.f32 %v4616_v6, %v4614_v45  ;;  %v4637_v31 = vadd.f32 %v4617_v12, %v4615_v37  ;;  %v15966_v6 = vld [vmem:[#allocation43_spill] sm:$0xff]  ;;  %v15967_v12 = vld [vmem:[#allocation58_spill] sm:$0xff]  ;;  %v15969_v45 = vld [vmem:[#allocation89_spill] sm:$0xff] }
 0xd68   :  { %v4587_v16 = vpop.permute.xlu0 %4586  ;;  %v15970_v37 = vld [vmem:[#allocation91_spill] sm:$0xff] }
 0xd69   :  { %v4618_v24 = vmul.f32 %v4587_v16, %v15838_v49  ;;  %v4619_v57 = vmul.f32 %v4587_v16, %v13885_v19 }
 0xd6b   :  { %v4631_v38 = vadd.f32 %v4630_v36, %v4618_v24  ;;  %v4638_v25 = vadd.f32 %v4637_v31, %v4619_v57  ;;  %v15971_v24 = vld [vmem:[#allocation93_spill] sm:$0xff]  ;;  %v15974_v31 = vld [vmem:[#allocation99_spill] sm:$0xff] }
 0xd6c   :  { %v4592_v21 = vpop.permute.xlu0 %4591  ;;  %v15972_v57 = vld [vmem:[#allocation97_spill] sm:$0xff] }
 0xd6d   :  { %v4620_v17 = vmul.f32 %v4592_v21, %v15920_v50  ;;  %v4621_v8 = vmul.f32 %v4592_v21, %v13784_v7  ;;  %v15973_v36 = vld [vmem:[#allocation113_spill] sm:$0xff] }
 0xd6f   :  { %v4632_v2 = vadd.f32 %v4631_v38, %v4620_v17  ;;  %v4639_v63 = vadd.f32 %v4638_v25, %v4621_v8  ;;  %v15975_v17 = vld [vmem:[#allocation101_spill] sm:$0xff]  ;;  %v15976_v8 = vld [vmem:[#allocation114_spill] sm:$0xff]  ;;  %v15978_v38 = vld [vmem:[#allocation100_spill] sm:$0xff] }
 0xd70   :  { %v4597_v32 = vpop.permute.xlu0 %4596  ;;  %v15979_v25 = vld [vmem:[#allocation42_spill] sm:$0xff] }
 0xd71   :  { %v4622_v42 = vmul.f32 %v4597_v32, %v13729_v3  ;;  %v4623_v9 = vmul.f32 %v4597_v32, %v15921_v58  ;;  %v15968_v32 = vld [vmem:[#allocation87_spill] sm:$0xff] }
 0xd73   :  { %v4633_v23 = vadd.f32 %v4632_v2, %v4622_v42  ;;  %v4640_v48 = vadd.f32 %v4639_v63, %v4623_v9  ;;  %v15980_v42 = vld [vmem:[#allocation65_spill] sm:$0xff]  ;;  %v15981_v9 = vld [vmem:[#allocation46_spill] sm:$0xff] }
 0xd74   :  { %v4602_v59 = vpop.permute.xlu0 %4601  ;;  %v15982_v2 = vld [vmem:[#allocation66_spill] sm:$0xff]  ;;  %v15983_v63 = vld [vmem:[#allocation53_spill] sm:$0xff] }
 0xd75   :  { %v4624_v39 = vmul.f32 %v4602_v59, %v13841_v18  ;;  %v4625_v27 = vmul.f32 %v4602_v59, %v15836_v41  ;;  %v15977_v59 = vld [vmem:[#allocation51_spill] sm:$0xff] }
 0xd77   :  { %v4634_v35 = vadd.f32 %v4633_v23, %v4624_v39  ;;  %v4641_v1 = vadd.f32 %v4640_v48, %v4625_v27  ;;  %v15984_v39 = vld [vmem:[#allocation84_spill] sm:$0xff]  ;;  %v15987_v23 = vld [vmem:[#allocation55_spill] sm:$0xff]  ;;  %v15988_v48 = vld [vmem:[#allocation49_spill] sm:$0xff] }
 0xd78   :  { %v4607_v55 = vpop.permute.xlu0 %4606  ;;  %v15985_v27 = vld [vmem:[#allocation68_spill] sm:$0xff] }
 0xd79   :  { %v4626_v61 = vmul.f32 %v4607_v55, %v15922_v5  ;;  %v4627_v56 = vmul.f32 %v4607_v55, %v15923_v43  ;;  %v15986_v55 = vld [vmem:[#allocation50_spill] sm:$0xff] }
 0xd7b   :  { %v4635_v0 = vadd.f32 %v4634_v35, %v4626_v61  ;;  %v4642_v46 = vadd.f32 %v4641_v1, %v4627_v56  ;;  %v15989_v61 = vld [vmem:[#allocation48_spill] sm:$0xff]  ;;  %v15990_v56 = vld [vmem:[#allocation63_spill] sm:$0xff]  ;;  %v15991_v35 = vld [vmem:[#allocation86_spill] sm:$0xff] }
 0xd7c   :  { %v4612_v52 = vpop.permute.xlu0 %4611  ;;  %v15992_v1 = vld [vmem:[#allocation64_spill] sm:$0xff] }
 0xd7d   :  { %v4628_v15 = vmul.f32 %v4612_v52, %v15924_v26  ;;  %v4629_v53 = vmul.f32 %v4612_v52, %v15925_v60  ;;  %v15993_v52 = vld [vmem:[#allocation102_spill] sm:$0xff] }
 0xd7f   :  { %v4636_v16 = vadd.f32 %v4635_v0, %v4628_v15  ;;  %v4643_v21 = vadd.f32 %v4642_v46, %v4629_v53  ;;  %v15994_v0 = vld [vmem:[#allocation52_spill] sm:$0xff]  ;;  %v15995_v46 = vld [vmem:[#allocation103_spill] sm:$0xff]  ;;  %v15996_v15 = vld [vmem:[#allocation61_spill] sm:$0xff] }
 0xd80   :  { %v15997_v53 = vld [vmem:[#allocation104_spill] sm:$0xff] }
 0xd81   :  { %4711 = vmatprep.mubr.f32.mxu1 %v4643_v21  ;;  %4782 = vmatprep.mubr.f32.mxu0 %v4643_v21  ;;  %v15999_v21 = vld [vmem:[#allocation105_spill] sm:$0xff] }
 0xd82   :  { %4712 = vmatmul.mubr.f32.vlgmr.msra.gmra.mrb[2].mxu1 %v4636_v16  ;;  %4783 = vmatmul.mubr.f32.vlgmr.msra.gmra.mrb[78].mxu0 %v4636_v16  ;;  %v15998_v16 = vld [vmem:[#allocation70_spill] sm:$0xff] }
 0xd83   :  { %10859 = vmatpush1.bf16.msra.mxu1 %v14138_v54  ;;  %10890 = vmatpush3.bf16.msra.mxu0 %v14332_v47 }
 0xd84   :  { %10861 = vmatprep.subr.bf16.mxu1 %v14143_v51  ;;  %10891 = vmatprep.subr.bf16.mxu0 %v15941_v34 }
 0xd85   :  { %4855 = vmatprep.mubr.f32.mxu1 %v15752_v40  ;;  %9375 = vmatprep.mubr.msk.f32.mxu0 %vm12604_vm1, %v15752_v40 }
 0xd87   :  { %10863 = vmatpush1.bf16.msra.mxu1 %v14151_v62  ;;  %10893 = vmatpush3.bf16.msra.mxu0 %v14337_v20 }
 0xd88   :  { %10865 = vmatprep.subr.bf16.mxu1 %v14156_v11  ;;  %10894 = vmatprep.subr.bf16.mxu0 %v15941_v34 }
 0xd8b   :  { %10867 = vmatpush1.bf16.msra.mxu1 %v14164_v29  ;;  %10896 = vmatpush3.bf16.msra.mxu0 %v14343_v10 }
 0xd8c   :  { %10869 = vmatprep.subr.bf16.mxu1 %v15966_v6  ;;  %10897 = vmatprep.subr.bf16.mxu0 %v15941_v34 }
 0xd8f   :  { %10871 = vmatpush1.bf16.msra.mxu1 %v15967_v12  ;;  %10899 = vmatpush3.bf16.msra.mxu0 %v14347_v44 }
 0xd90   :  { %10873 = vmatprep.subr.bf16.mxu1 %v15968_v32  ;;  %10900 = vmatprep.subr.bf16.mxu0 %v15941_v34 }
 0xd93   :  { %10875 = vmatpush1.bf16.msra.mxu1 %v15969_v45  ;;  %10902 = vmatpush3.bf16.msra.mxu0 %v14351_v22 }
 0xd94   :  { %10877 = vmatprep.subr.bf16.mxu1 %v15970_v37  ;;  %10903 = vmatprep.subr.bf16.mxu0 %v15941_v34 }
 0xd97   :  { %10879 = vmatpush1.bf16.msra.mxu1 %v15971_v24  ;;  %10905 = vmatpush3.bf16.msra.mxu0 %v14355_v13 }
 0xd98   :  { %10881 = vmatprep.subr.bf16.mxu1 %v14211_v28  ;;  %10906 = vmatprep.subr.bf16.mxu0 %v15941_v34 }
 0xd9b   :  { %10883 = vmatpush1.bf16.msra.mxu1 %v15972_v57  ;;  %10908 = vmatpush3.bf16.msra.mxu0 %v15973_v36 }
 0xd9c   :  { %10885 = vmatprep.subr.bf16.mxu1 %v15974_v31  ;;  %10909 = vmatprep.subr.bf16.mxu0 %v15941_v34 }
 0xd9f   :  { %10887 = vmatpush1.bf16.msra.mxu1 %v15975_v17  ;;  %10911 = vmatpush3.bf16.msra.mxu0 %v15976_v8 }
 0xda0   :  { %10913 = vmatprep.subr.bf16.mxu1 %v15977_v59  ;;  %10977 = vmatprep.subr.bf16.mxu0 %v15978_v38 }
 0xda2   :  { %4856 = vmatmul.mubr.f32.vlgmr.msra.gmra.mrb[2].mxu1 %v15979_v25  ;;  %9376 = vmatmul.mubr.f32.vlgmr.msra.gmra.mrb[80].mxu0 %v15979_v25 }
 0xda3   :  { %10915 = vmatpush1.bf16.msra.mxu1 %v15980_v42  ;;  %10979 = vmatpush3.bf16.msra.mxu0 %v15981_v9 }
 0xda4   :  { %10917 = vmatprep.subr.bf16.mxu1 %v15982_v2  ;;  %10981 = vmatprep.subr.bf16.mxu0 %v15983_v63  ;;  %v16029_v63 = vld [vmem:[#allocation82_spill] sm:$0xff] }
 0xda7   :  { %10919 = vmatpush1.bf16.msra.mxu1 %v15984_v39  ;;  %10983 = vmatpush3.bf16.msra.mxu0 %v15985_v27 }
 0xda8   :  { %10921 = vmatprep.subr.bf16.mxu1 %v15986_v55  ;;  %10985 = vmatprep.subr.bf16.mxu0 %v15987_v23 }
 0xdab   :  { %10923 = vmatpush1.bf16.msra.mxu1 %v15988_v48  ;;  %10987 = vmatpush3.bf16.msra.mxu0 %v15989_v61  ;;  %v16000_v61 = vld [vmem:[#allocation62_spill] sm:$0xff] }
 0xdac   :  { %10925 = vmatprep.subr.bf16.mxu1 %v15990_v56  ;;  %10989 = vmatprep.subr.bf16.mxu0 %v15991_v35  ;;  %v16001_v56 = vld [vmem:[#allocation106_spill] sm:$0xff]  ;;  %v16002_v35 = vld [vmem:[#allocation69_spill] sm:$0xff] }
 0xdaf   :  { %10927 = vmatpush1.bf16.msra.mxu1 %v15992_v1  ;;  %10991 = vmatpush3.bf16.msra.mxu0 %v15993_v52  ;;  %v16003_v1 = vld [vmem:[#allocation107_spill] sm:$0xff]  ;;  %v16004_v52 = vld [vmem:[#allocation30_spill] sm:$0xff] }
 0xdb0   :  { %10929 = vmatprep.subr.bf16.mxu1 %v15994_v0  ;;  %10993 = vmatprep.subr.bf16.mxu0 %v15995_v46  ;;  %v16005_v0 = vld [vmem:[#allocation108_spill] sm:$0xff]  ;;  %v16006_v46 = vld [vmem:[#allocation35_spill] sm:$0xff] }
 0xdb3   :  { %10931 = vmatpush1.bf16.msra.mxu1 %v15996_v15  ;;  %10995 = vmatpush3.bf16.msra.mxu0 %v15997_v53  ;;  %v16007_v15 = vld [vmem:[#allocation109_spill] sm:$0xff]  ;;  %v16008_v53 = vld [vmem:[#allocation36_spill] sm:$0xff] }
 0xdb4   :  { %10933 = vmatprep.subr.bf16.mxu1 %v15998_v16  ;;  %10997 = vmatprep.subr.bf16.mxu0 %v15999_v21  ;;  %v16009_v16 = vld [vmem:[#allocation110_spill] sm:$0xff]  ;;  %v16010_v21 = vld [vmem:[#allocation31_spill] sm:$0xff] }
 0xdb7   :  { %10935 = vmatpush1.bf16.msra.mxu1 %v16000_v61  ;;  %10999 = vmatpush3.bf16.msra.mxu0 %v16001_v56  ;;  %v16011_v56 = vld [vmem:[#allocation38_spill] sm:$0xff] }
 0xdb8   :  { %10937 = vmatprep.subr.bf16.mxu1 %v16002_v35  ;;  %11001 = vmatprep.subr.bf16.mxu0 %v16003_v1  ;;  %v16012_v35 = vld [vmem:[#allocation54_spill] sm:$0xff]  ;;  %v16013_v1 = vld [vmem:[#allocation45_spill] sm:$0xff] }
 0xdb9   :  { %v16021_v61 = vld [vmem:[#allocation90_spill] sm:$0xff] }
 0xdbb   :  { %10939 = vmatpush1.bf16.msra.mxu1 %v16004_v52  ;;  %11003 = vmatpush3.bf16.msra.mxu0 %v16005_v0  ;;  %v16014_v52 = vld [vmem:[#allocation59_spill] sm:$0xff]  ;;  %v16015_v0 = vld [vmem:[#allocation60_spill] sm:$0xff] }
 0xdbc   :  { %10941 = vmatprep.subr.bf16.mxu1 %v16006_v46  ;;  %11005 = vmatprep.subr.bf16.mxu0 %v16007_v15  ;;  %v16016_v46 = vld [vmem:[#allocation44_spill] sm:$0xff] }
 0xdbd   :  { %v16017_v15 = vld [vmem:[#allocation56_spill] sm:$0xff] }
 0xdbf   :  { %10943 = vmatpush1.bf16.msra.mxu1 %v16008_v53  ;;  %11007 = vmatpush3.bf16.msra.mxu0 %v16009_v16  ;;  %v16018_v53 = vld [vmem:[#allocation57_spill] sm:$0xff] }
 0xdc0   :  { %10945 = vmatprep.subr.bf16.mxu1 %v16010_v21  ;;  %11040 = vmatprep.subr.bf16.mxu0 %v15941_v34  ;;  %v16019_v16 = vld [vmem:[#allocation85_spill] sm:$0xff]  ;;  %v16020_v21 = vld [vmem:[#allocation88_spill] sm:$0xff] }
 0xdc3   :  { %10947 = vmatpush1.bf16.msra.mxu1 %v16011_v56  ;;  %v16022_v56 = vld [vmem:[#allocation92_spill] sm:$0xff] }
 0xdc4   :  { %10949 = vmatprep.subr.bf16.mxu1 %v16012_v35  ;;  %v16023_v35 = vld [vmem:[#allocation94_spill] sm:$0xff] }
 0xdc7   :  { %10951 = vmatpush1.bf16.msra.mxu1 %v16013_v1  ;;  %v16024_v1 = vld [vmem:[#allocation96_spill] sm:$0xff] }
 0xdc8   :  { %10953 = vmatprep.subr.bf16.mxu1 %v16014_v52  ;;  %v16025_v52 = vld [vmem:[#allocation98_spill] sm:$0xff] }
 0xdcb   :  { %10955 = vmatpush1.bf16.msra.mxu1 %v16015_v0  ;;  %v16026_v0 = vld [vmem:[#allocation47_spill] sm:$0xff] }
 0xdcc   :  { %10957 = vmatprep.subr.bf16.mxu1 %v16016_v46 }
 0xdcf   :  { %10959 = vmatpush1.bf16.msra.mxu1 %v16017_v15 }
 0xdd0   :  { %10961 = vmatprep.subr.bf16.mxu1 %v16018_v53  ;;  %v16027_v53 = vld [vmem:[#allocation72_spill] sm:$0xff] }
 0xdd3   :  { %10963 = vmatpush1.bf16.msra.mxu1 %v16019_v16 }
 0xdd4   :  { %10965 = vmatprep.subr.bf16.mxu1 %v16020_v21  ;;  %v16028_v21 = vld [vmem:[#allocation80_spill] sm:$0xff] }
 0xdd7   :  { %10967 = vmatpush1.bf16.msra.mxu1 %v16021_v61 }
 0xdd8   :  { %10969 = vmatprep.subr.bf16.mxu1 %v16022_v56 }
 0xddb   :  { %10971 = vmatpush1.bf16.msra.mxu1 %v16023_v35 }
 0xddc   :  { %10973 = vmatprep.subr.bf16.mxu1 %v16024_v1 }
 0xddf   :  { %10975 = vmatpush1.bf16.msra.mxu1 %v16025_v52 }
 0xde0   :  { %11009 = vmatprep.subr.bf16.mxu1 %v16026_v0 }
 0xe55   :  { %v8364_v46 = vpop.f32.mrb[78].mxu0 }
 0xe56   :  { %v8365_v15 = vpop.f32.mrb[79].mxu0 }
 0xe57   :  { %v8366_v48 = vadd.f32 %v8365_v15, %v8364_v46  ;;  %v16030_v46 = vld [vmem:[#allocation41_spill] sm:$0xff] }
 0xe59   :  { %v4790_v23 = vadd.f32 %v8366_v48, %v16027_v53 }
 0xe75   :  { %v4857_v16 = vpop.f32.mrb[2].mxu1  ;;  %v4928_v55 = vpop.f32.mrb[80].mxu0 }
 0xe76   :  { %v11878_v27 = vadd.f32 %v4857_v16, %v16028_v21  ;;  %v4859_v61 = vpop.f32.mrb[3].mxu1  ;;  %v9377_v39 = vpop.f32.mrb[81].mxu0  ;;  %v4946_v15 = vadd.f32 %v16030_v46, %v4928_v55  ;;  %v16034_v46 = vld [vmem:[#allocation40_spill] sm:$0xff]  ;;  %v16038_v21 = vld [vmem:[#allocation33_spill] sm:$0xff] }
 0xe77   :  { %v11879_v35 = vadd.f32 %v4859_v61, %v16029_v63 }
 0xe78   :  { %v7977_v56 = vmul.f32 -1.442695, %v11878_v27 }
 0xe79   :  { %v7978_v1 = vmul.f32 -1.442695, %v11879_v35 }
 0xe7a   :  { %12164 = vpow2.f32 %v7977_v56 }
 0xe7b   :  { %12166 = vpow2.f32 %v7978_v1  ;;  %v16032_v1 = vld [vmem:[#allocation71_spill] sm:$0xff] }
 0xe84   :  { %v12165_v52 = vpop.eup %12164 }
 0xe85   :  { %v4936_v2 = vadd.f32 1.0, %v12165_v52  ;;  %v12167_v0 = vpop.eup %12166 }
 0xe86   :  { %v4943_v9 = vadd.f32 1.0, %v12167_v0  ;;  %v16033_v0 = vld [vmem:[#allocation34_spill] sm:$0xff] }
 0xe87   :  { %12168 = vrcp.f32 %v4936_v2 }
 0xe88   :  { %12170 = vrcp.f32 %v4943_v9  ;;  %v16035_v9 = vld [vmem:[#allocation81_spill] sm:$0xff] }
 0xe91   :  { %v12169_v48 = vpop.eup %12168 }
 0xe92   :  { %v4947_v53 = vmul.f32 %v12169_v48, %v4946_v15  ;;  %v12171_v16 = vpop.eup %12170 }
 0xe93   :  { %v4950_v39 = vsub.f32 1.0, %v12171_v16  ;;  %v4952_v61 = vmul.f32 %v12171_v16, %v15979_v25  ;;  %v14565_v25 = vld [vmem:[#allocation7] ss:$0 sm:$0xff] }
 0xe94   :  { %v4948_v42 = vadd.f32 %v4947_v53, %v4790_v23  ;;  %v16037_v53 = vld [vmem:[#allocation37_spill] sm:$0xff]  ;;  %16041 = vst [vmem:[#allocation83_spill] sm:$0xff] %v14565_v25 }
 0xe96   :  { %12172 = vtanh.f32 %v4948_v42  ;;  %v16036_v42 = vld [vmem:[#allocation39_spill] sm:$0xff] }
 0xea0   :  { %v12173_v27 = vpop.eup %12172 }
 0xea1   :  { %v4951_v56 = vmul.f32 %v12173_v27, %v4950_v39  ;;  %v16039_v39 = vld [vmem:[#allocation32_spill] sm:$0xff] }
 0xea3   :  { %v14553_v35 = vadd.f32 %v4952_v61, %v4951_v56  ;;  %v16040_v61 = vld [vmem:[#allocation67_spill] sm:$0xff] }
 0xea5   :  { %16031 = vst [vmem:[#allocation73_spill] sm:$0xff] %v14553_v35  ;;  %v4955_v2 = vmul.f32 %v16032_v1, %v14553_v35 }
 0xea7   :  { %4956 = vadd.xlane.f32.xlu1 %v4955_v2 }
 0xf34   :  { %v4957_v52 = vpop.xlane.xlu1 %4956 }
 0xf35   :  { %v4958_v55 = vadd.f32 %v4957_v52, %v16033_v0  ;;  %v4959_v15 = vadd.f32 %v4957_v52, %v16034_v46  ;;  %v4960_v23 = vadd.f32 %v4957_v52, %v16035_v9  ;;  %v4961_v48 = vadd.f32 %v4957_v52, %v16036_v42 }
 0xf36   :  { %v4962_v63 = vadd.f32 %v4957_v52, %v16037_v53  ;;  %v4963_v16 = vadd.f32 %v4957_v52, %v16038_v21  ;;  %v4964_v27 = vadd.f32 %v4957_v52, %v16039_v39  ;;  %v4965_v56 = vadd.f32 %v4957_v52, %v16040_v61 }
 0xf37   :  { %v4966_v1 = vadd.f32 %v14565_v25, %v4958_v55  ;;  %v4968_v2 = vadd.f32 %v14565_v25, %v4960_v23  ;;  %v4969_v46 = vadd.f32 %v14565_v25, %v4961_v48  ;;  %v4967_v9 = vadd.f32 %v14565_v25, %v4959_v15 }
 0xf38   :  { %v4970_v42 = vadd.f32 %v14565_v25, %v4962_v63  ;;  %v4971_v53 = vadd.f32 %v14565_v25, %v4963_v16  ;;  %v4972_v21 = vadd.f32 %v14565_v25, %v4964_v27  ;;  %v4973_v39 = vadd.f32 %v14565_v25, %v4965_v56 }
 0xf39   :  { %v4974_v52 = vsel %vm4041_vm2, %v4966_v1, -inf  ;;  %v4976_v61 = vsel %vm4041_vm2, %v4968_v2, -inf  ;;  %v4977_v55 = vsel %vm4041_vm2, %v4969_v46, -inf  ;;  %v4975_v23 = vsel %vm4041_vm2, %v4967_v9, -inf }
 0xf3a   :  { %v4978_v48 = vsel %vm4041_vm2, %v4970_v42, -inf  ;;  %v4982_v15 = vsel %vm4041_vm2, %v4972_v21, -inf  ;;  %v4984_v63 = vsel %vm4041_vm2, %v4973_v39, -inf  ;;  %v4980_v16 = vsel %vm4041_vm2, %v4971_v53, -inf }
 0xf3b   :  { %v4979_v0 = vmax.f32 %v4974_v52, %v4978_v48  ;;  %v4983_v27 = vmax.f32 %v4976_v61, %v4982_v15  ;;  %v4985_v35 = vmax.f32 %v4977_v55, %v4984_v63  ;;  %v4981_v56 = vmax.f32 %v4975_v23, %v4980_v16 }
 0xf3d   :  { %v4987_v25 = vmax.f32 %v4983_v27, %v4985_v35  ;;  %v4986_v38 = vmax.f32 %v4979_v0, %v4981_v56 }
 0xf3f   :  { %v4988_v59 = vmax.f32 %v4986_v38, %v4987_v25 }
 0xf41   :  { %v4989_v8 = vsub.f32 %v4966_v1, %v4988_v59  ;;  %v4990_v17 = vsub.f32 %v4967_v9, %v4988_v59  ;;  %v4991_v31 = vsub.f32 %v4968_v2, %v4988_v59  ;;  %v4992_v36 = vsub.f32 %v4969_v46, %v4988_v59 }
 0xf42   :  { %v4993_v57 = vsub.f32 %v4970_v42, %v4988_v59  ;;  %v4994_v37 = vsub.f32 %v4971_v53, %v4988_v59  ;;  %v4995_v45 = vsub.f32 %v4972_v21, %v4988_v59  ;;  %v4996_v61 = vsub.f32 %v4973_v39, %v4988_v59 }
 0xf43   :  { %v4997_v28 = vmul.f32 1.442695, %v4989_v8  ;;  %v4999_v13 = vmul.f32 1.442695, %v4990_v17  ;;  %v5001_v24 = vmul.f32 1.442695, %v4991_v31 }
 0xf44   :  { %v5003_v22 = vmul.f32 1.442695, %v4992_v36  ;;  %v5005_v52 = vmul.f32 1.442695, %v4993_v57  ;;  %v5007_v35 = vmul.f32 1.442695, %v4994_v37 }
 0xf45   :  { %12174 = vpow2.f32 %v4997_v28  ;;  %v5009_v38 = vmul.f32 1.442695, %v4995_v45  ;;  %v5011_v25 = vmul.f32 1.442695, %v4996_v61 }
 0xf46   :  { %12176 = vpow2.f32 %v4999_v13 }
 0xf47   :  { %12178 = vpow2.f32 %v5001_v24 }
 0xf48   :  { %12180 = vpow2.f32 %v5003_v22 }
 0xf49   :  { %12182 = vpow2.f32 %v5005_v52 }
 0xf4a   :  { %12184 = vpow2.f32 %v5007_v35 }
 0xf4b   :  { %12186 = vpow2.f32 %v5009_v38 }
 0xf4c   :  { %12188 = vpow2.f32 %v5011_v25 }
 0xf4f   :  { %v12175_v0 = vpop.eup %12174 }
 0xf50   :  { %v12177_v46 = vpop.eup %12176  ;;  %v5013_v31 = vsel %vm4041_vm2, %v12175_v0, 0.0 }
 0xf51   :  { %v12179_v17 = vpop.eup %12178  ;;  %v5014_v28 = vsel %vm4041_vm2, %v12177_v46, 0.0 }
 0xf52   :  { %v12181_v36 = vpop.eup %12180  ;;  %v5015_v13 = vadd.f32 %v5014_v28, %v5013_v31  ;;  %v5016_v24 = vsel %vm4041_vm2, %v12179_v17, 0.0 }
 0xf53   :  { %v12183_v57 = vpop.eup %12182  ;;  %v5018_v37 = vsel %vm4041_vm2, %v12181_v36, 0.0 }
 0xf54   :  { %v5017_v22 = vadd.f32 %v5016_v24, %v5015_v13  ;;  %v12185_v45 = vpop.eup %12184  ;;  %v5020_v59 = vsel %vm4041_vm2, %v12183_v57, 0.0 }
 0xf55   :  { %v12187_v21 = vpop.eup %12186  ;;  %v5022_v42 = vsel %vm4041_vm2, %v12185_v45, 0.0 }
 0xf56   :  { %v5019_v8 = vadd.f32 %v5018_v37, %v5017_v22  ;;  %v12189_v53 = vpop.eup %12188  ;;  %v5024_v1 = vsel %vm4041_vm2, %v12187_v21, 0.0 }
 0xf57   :  { %v5026_v55 = vsel %vm4041_vm2, %v12189_v53, 0.0 }
 0xf58   :  { %v5021_v9 = vadd.f32 %v5020_v59, %v5019_v8 }
 0xf5a   :  { %v5023_v39 = vadd.f32 %v5022_v42, %v5021_v9 }
 0xf5c   :  { %v5025_v2 = vadd.f32 %v5024_v1, %v5023_v39 }
 0xf5e   :  { %v5027_v23 = vadd.f32 %v5026_v55, %v5025_v2 }
 0xf60   :  { %12190 = vrcp.f32 %v5027_v23 }
 0xf6a   :  { %v12191_v48 = vpop.eup %12190 }
 0xf6b   :  { %v5030_v15 = vmul.f32 %v12191_v48, %v12177_v46  ;;  %v5029_v63 = vmul.f32 %v12191_v48, %v12175_v0  ;;  %v5035_v16 = vmul.f32 %v12191_v48, %v12187_v21  ;;  %v5031_v27 = vmul.f32 %v12191_v48, %v12179_v17 }
 0xf6c   :  { %v5032_v56 = vmul.f32 %v12191_v48, %v12181_v36  ;;  %v5033_v52 = vmul.f32 %v12191_v48, %v12183_v57  ;;  %v5034_v61 = vmul.f32 %v12191_v48, %v12185_v45  ;;  %v5036_v35 = vmul.f32 %v12191_v48, %v12189_v53 }
 0xf6d   :  { %5044 = vperm.xlu1 %11956, %v5030_v15   ;;  %5039 = vperm.xlu0 %11957, %v5029_v63  }
 0xf71   :  { %5069 = vperm.xlu1 %11956, %v5035_v16   ;;  %5049 = vperm.xlu0 %11957, %v5031_v27  }
 0xf75   :  { %5054 = vperm.xlu0 %11957, %v5032_v56  }
 0xf79   :  { %5059 = vperm.xlu0 %11957, %v5033_v52  }
 0xf7d   :  { %5064 = vperm.xlu0 %11957, %v5034_v61  }
 0xf81   :  { %5074 = vperm.xlu0 %11957, %v5036_v35  }
 0xfec   :  { %v5040_v38 = vpop.permute.xlu0 %5039  ;;  %v5045_v25 = vpop.permute.xlu1 %5044 }
 0xfed   :  { %v5079_v46 = vmul.f32 %v5045_v25, %v15859_v33  ;;  %v5080_v0 = vmul.f32 %v5045_v25, %v13981_v30  ;;  %v5077_v28 = vmul.f32 %v5040_v38, %v15866_v14  ;;  %v5078_v17 = vmul.f32 %v5040_v38, %v14006_v4 }
 0xfef   :  { %v5093_v57 = vadd.f32 %v5079_v46, %v5077_v28  ;;  %v5100_v22 = vadd.f32 %v5080_v0, %v5078_v17  ;;  %v16042_v0 = vld [vmem:[#allocation89_spill] sm:$0xff]  ;;  %v16043_v28 = vld [vmem:[#allocation111_spill] sm:$0xff] }
 0xff0   :  { %v5050_v31 = vpop.permute.xlu0 %5049  ;;  %v5070_v1 = vpop.permute.xlu1 %5069  ;;  %v16044_v17 = vld [vmem:[#allocation91_spill] sm:$0xff] }
 0xff1   :  { %v5081_v36 = vmul.f32 %v5050_v31, %v15838_v49  ;;  %v5082_v24 = vmul.f32 %v5050_v31, %v13885_v19  ;;  %v5089_v63 = vmul.f32 %v5070_v1, %v15922_v5  ;;  %v5090_v16 = vmul.f32 %v5070_v1, %v15923_v43  ;;  %v16059_v1 = vld [vmem:[#allocation53_spill] sm:$0xff] }
 0xff3   :  { %v5094_v59 = vadd.f32 %v5093_v57, %v5081_v36  ;;  %v5101_v21 = vadd.f32 %v5100_v22, %v5082_v24  ;;  %v16046_v36 = vld [vmem:[#allocation112_spill] sm:$0xff]  ;;  %v16047_v24 = vld [vmem:[#allocation95_spill] sm:$0xff]  ;;  %v16048_v57 = vld [vmem:[#allocation97_spill] sm:$0xff] }
 0xff4   :  { %v5055_v13 = vpop.permute.xlu0 %5054  ;;  %v16049_v22 = vld [vmem:[#allocation113_spill] sm:$0xff] }
 0xff5   :  { %v5083_v37 = vmul.f32 %v5055_v13, %v15920_v50  ;;  %v5084_v45 = vmul.f32 %v5055_v13, %v13784_v7  ;;  %v16045_v13 = vld [vmem:[#allocation93_spill] sm:$0xff] }
 0xff7   :  { %v5095_v53 = vadd.f32 %v5094_v59, %v5083_v37  ;;  %v5102_v39 = vadd.f32 %v5101_v21, %v5084_v45  ;;  %v16050_v37 = vld [vmem:[#allocation99_spill] sm:$0xff]  ;;  %v16051_v45 = vld [vmem:[#allocation101_spill] sm:$0xff]  ;;  %v16054_v21 = vld [vmem:[#allocation100_spill] sm:$0xff] }
 0xff8   :  { %v5060_v8 = vpop.permute.xlu0 %5059  ;;  %v16053_v59 = vld [vmem:[#allocation51_spill] sm:$0xff] }
 0xff9   :  { %v5085_v9 = vmul.f32 %v5060_v8, %v13729_v3  ;;  %v5086_v42 = vmul.f32 %v5060_v8, %v15921_v58  ;;  %v16052_v8 = vld [vmem:[#allocation114_spill] sm:$0xff] }
 0xffb   :  { %v5096_v55 = vadd.f32 %v5095_v53, %v5085_v9  ;;  %v5103_v23 = vadd.f32 %v5102_v39, %v5086_v42  ;;  %v16055_v9 = vld [vmem:[#allocation73_spill] sm:$0xff]  ;;  %v16057_v53 = vld [vmem:[#allocation46_spill] sm:$0xff] }
 0xffc   :  { %v5065_v2 = vpop.permute.xlu0 %5064  ;;  %v16056_v42 = vld [vmem:[#allocation65_spill] sm:$0xff]  ;;  %v16058_v39 = vld [vmem:[#allocation66_spill] sm:$0xff] }
 0xffd   :  { %v5087_v48 = vmul.f32 %v5065_v2, %v13841_v18  ;;  %v5088_v15 = vmul.f32 %v5065_v2, %v15836_v41  ;;  %v16060_v2 = vld [vmem:[#allocation84_spill] sm:$0xff] }
 0xfff   :  { %v5097_v27 = vadd.f32 %v5096_v55, %v5087_v48  ;;  %v5104_v56 = vadd.f32 %v5103_v23, %v5088_v15  ;;  %v16061_v55 = vld [vmem:[#allocation68_spill] sm:$0xff]  ;;  %v16062_v23 = vld [vmem:[#allocation50_spill] sm:$0xff]  ;;  %v16063_v48 = vld [vmem:[#allocation55_spill] sm:$0xff] }
0x1000   :  { %v5075_v52 = vpop.permute.xlu0 %5074  ;;  %v16064_v15 = vld [vmem:[#allocation49_spill] sm:$0xff] }
0x1001   :  { %v5098_v61 = vadd.f32 %v5097_v27, %v5089_v63  ;;  %v5105_v35 = vadd.f32 %v5104_v56, %v5090_v16  ;;  %v5091_v38 = vmul.f32 %v5075_v52, %v15924_v26  ;;  %v5092_v25 = vmul.f32 %v5075_v52, %v15925_v60  ;;  %v16065_v63 = vld [vmem:[#allocation48_spill] sm:$0xff]  ;;  %v16066_v16 = vld [vmem:[#allocation63_spill] sm:$0xff]  ;;  %v16067_v27 = vld [vmem:[#allocation86_spill] sm:$0xff] }
0x1002   :  { %v16068_v56 = vld [vmem:[#allocation64_spill] sm:$0xff]  ;;  %v16069_v52 = vld [vmem:[#allocation102_spill] sm:$0xff] }
0x1003   :  { %v5099_v31 = vadd.f32 %v5098_v61, %v5091_v38  ;;  %v5106_v46 = vadd.f32 %v5105_v35, %v5092_v25  ;;  %v16070_v61 = vld [vmem:[#allocation52_spill] sm:$0xff]  ;;  %v16071_v35 = vld [vmem:[#allocation103_spill] sm:$0xff]  ;;  %v16072_v38 = vld [vmem:[#allocation61_spill] sm:$0xff] }
0x1004   :  { %v16073_v25 = vld [vmem:[#allocation104_spill] sm:$0xff] }
0x1005   :  { %5174 = vmatprep.mubr.f32.mxu1 %v5106_v46  ;;  %5245 = vmatprep.mubr.f32.mxu0 %v5106_v46  ;;  %v16075_v46 = vld [vmem:[#allocation105_spill] sm:$0xff] }
0x1006   :  { %5175 = vmatmul.mubr.f32.vlgmr.msra.gmra.mrb[4].mxu1 %v5099_v31  ;;  %5246 = vmatmul.mubr.f32.vlgmr.msra.gmra.mrb[82].mxu0 %v5099_v31  ;;  %v16074_v31 = vld [vmem:[#allocation70_spill] sm:$0xff] }
0x1007   :  { %11011 = vmatpush1.bf16.msra.mxu1 %v14138_v54  ;;  %11042 = vmatpush3.bf16.msra.mxu0 %v14332_v47 }
0x1008   :  { %11013 = vmatprep.subr.bf16.mxu1 %v14143_v51  ;;  %11043 = vmatprep.subr.bf16.mxu0 %v15941_v34 }
0x1009   :  { %5318 = vmatprep.mubr.f32.mxu1 %v15752_v40  ;;  %9410 = vmatprep.mubr.msk.f32.mxu0 %vm12604_vm1, %v15752_v40 }
0x100b   :  { %11015 = vmatpush1.bf16.msra.mxu1 %v14151_v62  ;;  %11045 = vmatpush3.bf16.msra.mxu0 %v14337_v20 }
0x100c   :  { %11017 = vmatprep.subr.bf16.mxu1 %v14156_v11  ;;  %11046 = vmatprep.subr.bf16.mxu0 %v15941_v34 }
0x100f   :  { %11019 = vmatpush1.bf16.msra.mxu1 %v14164_v29  ;;  %11048 = vmatpush3.bf16.msra.mxu0 %v14343_v10 }
0x1010   :  { %11021 = vmatprep.subr.bf16.mxu1 %v15966_v6  ;;  %11049 = vmatprep.subr.bf16.mxu0 %v15941_v34 }
0x1013   :  { %11023 = vmatpush1.bf16.msra.mxu1 %v15967_v12  ;;  %11051 = vmatpush3.bf16.msra.mxu0 %v14347_v44 }
0x1014   :  { %11025 = vmatprep.subr.bf16.mxu1 %v15968_v32  ;;  %11052 = vmatprep.subr.bf16.mxu0 %v15941_v34 }
0x1017   :  { %11027 = vmatpush1.bf16.msra.mxu1 %v16042_v0  ;;  %11054 = vmatpush3.bf16.msra.mxu0 %v16043_v28 }
0x1018   :  { %11029 = vmatprep.subr.bf16.mxu1 %v16044_v17  ;;  %11055 = vmatprep.subr.bf16.mxu0 %v15941_v34 }
0x101b   :  { %11031 = vmatpush1.bf16.msra.mxu1 %v16045_v13  ;;  %11057 = vmatpush3.bf16.msra.mxu0 %v16046_v36 }
0x101c   :  { %11033 = vmatprep.subr.bf16.mxu1 %v16047_v24  ;;  %11058 = vmatprep.subr.bf16.mxu0 %v15941_v34 }
0x101f   :  { %11035 = vmatpush1.bf16.msra.mxu1 %v16048_v57  ;;  %11060 = vmatpush3.bf16.msra.mxu0 %v16049_v22 }
0x1020   :  { %11037 = vmatprep.subr.bf16.mxu1 %v16050_v37  ;;  %11061 = vmatprep.subr.bf16.mxu0 %v15941_v34 }
0x1023   :  { %11039 = vmatpush1.bf16.msra.mxu1 %v16051_v45  ;;  %11063 = vmatpush3.bf16.msra.mxu0 %v16052_v8 }
0x1024   :  { %11065 = vmatprep.subr.bf16.mxu1 %v16053_v59  ;;  %11129 = vmatprep.subr.bf16.mxu0 %v16054_v21 }
0x1026   :  { %5319 = vmatmul.mubr.f32.vlgmr.msra.gmra.mrb[4].mxu1 %v16055_v9  ;;  %9411 = vmatmul.mubr.f32.vlgmr.msra.gmra.mrb[84].mxu0 %v16055_v9 }
0x1027   :  { %11067 = vmatpush1.bf16.msra.mxu1 %v16056_v42  ;;  %11131 = vmatpush3.bf16.msra.mxu0 %v16057_v53  ;;  %v16117_v42 = vld [vmem:[#allocation83_spill] sm:$0xff] }
0x1028   :  { %11069 = vmatprep.subr.bf16.mxu1 %v16058_v39  ;;  %11133 = vmatprep.subr.bf16.mxu0 %v16059_v1  ;;  %v16105_v1 = vld [vmem:[#allocation82_spill] sm:$0xff] }
0x102b   :  { %11071 = vmatpush1.bf16.msra.mxu1 %v16060_v2  ;;  %11135 = vmatpush3.bf16.msra.mxu0 %v16061_v55 }
0x102c   :  { %11073 = vmatprep.subr.bf16.mxu1 %v16062_v23  ;;  %11137 = vmatprep.subr.bf16.mxu0 %v16063_v48 }
0x102f   :  { %11075 = vmatpush1.bf16.msra.mxu1 %v16064_v15  ;;  %11139 = vmatpush3.bf16.msra.mxu0 %v16065_v63  ;;  %v16076_v63 = vld [vmem:[#allocation62_spill] sm:$0xff] }
0x1030   :  { %11077 = vmatprep.subr.bf16.mxu1 %v16066_v16  ;;  %11141 = vmatprep.subr.bf16.mxu0 %v16067_v27  ;;  %v16077_v16 = vld [vmem:[#allocation106_spill] sm:$0xff]  ;;  %v16078_v27 = vld [vmem:[#allocation69_spill] sm:$0xff] }
0x1033   :  { %11079 = vmatpush1.bf16.msra.mxu1 %v16068_v56  ;;  %11143 = vmatpush3.bf16.msra.mxu0 %v16069_v52  ;;  %v16079_v56 = vld [vmem:[#allocation107_spill] sm:$0xff]  ;;  %v16080_v52 = vld [vmem:[#allocation30_spill] sm:$0xff] }
0x1034   :  { %11081 = vmatprep.subr.bf16.mxu1 %v16070_v61  ;;  %11145 = vmatprep.subr.bf16.mxu0 %v16071_v35  ;;  %v16081_v61 = vld [vmem:[#allocation108_spill] sm:$0xff]  ;;  %v16082_v35 = vld [vmem:[#allocation35_spill] sm:$0xff] }
0x1037   :  { %11083 = vmatpush1.bf16.msra.mxu1 %v16072_v38  ;;  %11147 = vmatpush3.bf16.msra.mxu0 %v16073_v25  ;;  %v16083_v38 = vld [vmem:[#allocation109_spill] sm:$0xff]  ;;  %v16084_v25 = vld [vmem:[#allocation36_spill] sm:$0xff] }
0x1038   :  { %11085 = vmatprep.subr.bf16.mxu1 %v16074_v31  ;;  %11149 = vmatprep.subr.bf16.mxu0 %v16075_v46  ;;  %v16085_v31 = vld [vmem:[#allocation110_spill] sm:$0xff]  ;;  %v16086_v46 = vld [vmem:[#allocation31_spill] sm:$0xff] }
0x103b   :  { %11087 = vmatpush1.bf16.msra.mxu1 %v16076_v63  ;;  %11151 = vmatpush3.bf16.msra.mxu0 %v16077_v16  ;;  %v16087_v16 = vld [vmem:[#allocation38_spill] sm:$0xff] }
0x103c   :  { %11089 = vmatprep.subr.bf16.mxu1 %v16078_v27  ;;  %11153 = vmatprep.subr.bf16.mxu0 %v16079_v56  ;;  %v16088_v27 = vld [vmem:[#allocation54_spill] sm:$0xff]  ;;  %v16089_v56 = vld [vmem:[#allocation45_spill] sm:$0xff] }
0x103d   :  { %v16097_v63 = vld [vmem:[#allocation90_spill] sm:$0xff] }
0x103f   :  { %11091 = vmatpush1.bf16.msra.mxu1 %v16080_v52  ;;  %11155 = vmatpush3.bf16.msra.mxu0 %v16081_v61  ;;  %v16090_v52 = vld [vmem:[#allocation59_spill] sm:$0xff]  ;;  %v16091_v61 = vld [vmem:[#allocation60_spill] sm:$0xff] }
0x1040   :  { %11093 = vmatprep.subr.bf16.mxu1 %v16082_v35  ;;  %11157 = vmatprep.subr.bf16.mxu0 %v16083_v38  ;;  %v16092_v35 = vld [vmem:[#allocation44_spill] sm:$0xff] }
0x1041   :  { %v16093_v38 = vld [vmem:[#allocation56_spill] sm:$0xff] }
0x1043   :  { %11095 = vmatpush1.bf16.msra.mxu1 %v16084_v25  ;;  %11159 = vmatpush3.bf16.msra.mxu0 %v16085_v31  ;;  %v16094_v25 = vld [vmem:[#allocation57_spill] sm:$0xff] }
0x1044   :  { %11097 = vmatprep.subr.bf16.mxu1 %v16086_v46  ;;  %11192 = vmatprep.subr.bf16.mxu0 %v15941_v34  ;;  %v16095_v31 = vld [vmem:[#allocation85_spill] sm:$0xff]  ;;  %v16096_v46 = vld [vmem:[#allocation88_spill] sm:$0xff] }
0x1047   :  { %11099 = vmatpush1.bf16.msra.mxu1 %v16087_v16  ;;  %v16098_v16 = vld [vmem:[#allocation92_spill] sm:$0xff] }
0x1048   :  { %11101 = vmatprep.subr.bf16.mxu1 %v16088_v27  ;;  %v16099_v27 = vld [vmem:[#allocation94_spill] sm:$0xff] }
0x104b   :  { %11103 = vmatpush1.bf16.msra.mxu1 %v16089_v56  ;;  %v16100_v56 = vld [vmem:[#allocation96_spill] sm:$0xff] }
0x104c   :  { %11105 = vmatprep.subr.bf16.mxu1 %v16090_v52  ;;  %v16101_v52 = vld [vmem:[#allocation98_spill] sm:$0xff] }
0x104f   :  { %11107 = vmatpush1.bf16.msra.mxu1 %v16091_v61  ;;  %v16102_v61 = vld [vmem:[#allocation47_spill] sm:$0xff] }
0x1050   :  { %11109 = vmatprep.subr.bf16.mxu1 %v16092_v35 }
0x1053   :  { %11111 = vmatpush1.bf16.msra.mxu1 %v16093_v38 }
0x1054   :  { %11113 = vmatprep.subr.bf16.mxu1 %v16094_v25  ;;  %v16103_v25 = vld [vmem:[#allocation75_spill] sm:$0xff] }
0x1057   :  { %11115 = vmatpush1.bf16.msra.mxu1 %v16095_v31 }
0x1058   :  { %11117 = vmatprep.subr.bf16.mxu1 %v16096_v46  ;;  %v16104_v46 = vld [vmem:[#allocation80_spill] sm:$0xff] }
0x105b   :  { %11119 = vmatpush1.bf16.msra.mxu1 %v16097_v63 }
0x105c   :  { %11121 = vmatprep.subr.bf16.mxu1 %v16098_v16 }
0x105f   :  { %11123 = vmatpush1.bf16.msra.mxu1 %v16099_v27 }
0x1060   :  { %11125 = vmatprep.subr.bf16.mxu1 %v16100_v56 }
0x1063   :  { %11127 = vmatpush1.bf16.msra.mxu1 %v16101_v52 }
0x1064   :  { %11161 = vmatprep.subr.bf16.mxu1 %v16102_v61 }
0x10d9   :  { %v8416_v35 = vpop.f32.mrb[82].mxu0 }
0x10da   :  { %v8417_v38 = vpop.f32.mrb[83].mxu0 }
0x10db   :  { %v8418_v15 = vadd.f32 %v8417_v38, %v8416_v35 }
0x10dd   :  { %v5253_v48 = vadd.f32 %v8418_v15, %v16103_v25  ;;  %v14698_v15 = vld [vmem:[%s15428_s15] ss:$0 sm:$0xff] }
0x10de   :  { %16106 = vst [vmem:[#allocation43_spill] sm:$0xff] %v14698_v15 }
0x10f9   :  { %v5320_v31 = vpop.f32.mrb[4].mxu1  ;;  %v5391_v23 = vpop.f32.mrb[84].mxu0 }
0x10fa   :  { %v11880_v55 = vadd.f32 %v5320_v31, %v16104_v46  ;;  %v5322_v63 = vpop.f32.mrb[5].mxu1  ;;  %v9412_v2 = vpop.f32.mrb[85].mxu0  ;;  %v5409_v35 = vadd.f32 %v14698_v15, %v5391_v23  ;;  %v16110_v31 = vld [vmem:[#allocation40_spill] sm:$0xff] }
0x10fb   :  { %v11881_v27 = vadd.f32 %v5322_v63, %v16105_v1  ;;  %v16116_v1 = vld [vmem:[#allocation67_spill] sm:$0xff] }
0x10fc   :  { %v7979_v16 = vmul.f32 -1.442695, %v11880_v55 }
0x10fd   :  { %v7980_v56 = vmul.f32 -1.442695, %v11881_v27 }
0x10fe   :  { %12192 = vpow2.f32 %v7979_v16 }
0x10ff   :  { %12194 = vpow2.f32 %v7980_v56 }
0x1108   :  { %v12193_v52 = vpop.eup %12192 }
0x1109   :  { %v5399_v39 = vadd.f32 1.0, %v12193_v52  ;;  %v12195_v61 = vpop.eup %12194 }
0x110a   :  { %v5406_v53 = vadd.f32 1.0, %v12195_v61  ;;  %v14707_v61 = vld [vmem:[%s15421_s8] ss:$0 sm:$0xff] }
0x110b   :  { %12196 = vrcp.f32 %v5399_v39  ;;  %16108 = vst [vmem:[#allocation87_spill] sm:$0xff] %v14707_v61 }
0x110c   :  { %12198 = vrcp.f32 %v5406_v53 }
0x1115   :  { %v12197_v38 = vpop.eup %12196 }
0x1116   :  { %v5410_v2 = vmul.f32 %v12197_v38, %v5409_v35  ;;  %v12199_v63 = vpop.eup %12198  ;;  %v16111_v38 = vld [vmem:[#allocation81_spill] sm:$0xff] }
0x1117   :  { %v5413_v16 = vsub.f32 1.0, %v12199_v63  ;;  %v5415_v56 = vmul.f32 %v12199_v63, %v16055_v9  ;;  %v16115_v9 = vld [vmem:[#allocation32_spill] sm:$0xff] }
0x1118   :  { %v5411_v55 = vadd.f32 %v5410_v2, %v5253_v48  ;;  %v16109_v48 = vld [vmem:[#allocation34_spill] sm:$0xff] }
0x111a   :  { %12200 = vtanh.f32 %v5411_v55  ;;  %v16112_v55 = vld [vmem:[#allocation39_spill] sm:$0xff] }
0x1124   :  { %v12201_v27 = vpop.eup %12200 }
0x1125   :  { %v5414_v39 = vmul.f32 %v12201_v27, %v5413_v16  ;;  %v16113_v16 = vld [vmem:[#allocation37_spill] sm:$0xff] }
0x1127   :  { %v14702_v52 = vadd.f32 %v5415_v56, %v5414_v39  ;;  %v16114_v56 = vld [vmem:[#allocation33_spill] sm:$0xff] }
0x1129   :  { %16107 = vst [vmem:[#allocation58_spill] sm:$0xff] %v14702_v52  ;;  %v5418_v23 = vmul.f32 %v14707_v61, %v14702_v52 }
0x112b   :  { %5419 = vadd.xlane.f32.xlu1 %v5418_v23 }
0x11b8   :  { %v5420_v53 = vpop.xlane.xlu1 %5419 }
0x11b9   :  { %v5421_v25 = vadd.f32 %v5420_v53, %v16109_v48  ;;  %v5422_v35 = vadd.f32 %v5420_v53, %v16110_v31  ;;  %v5423_v2 = vadd.f32 %v5420_v53, %v16111_v38  ;;  %v5424_v63 = vadd.f32 %v5420_v53, %v16112_v55 }
0x11ba   :  { %v5425_v27 = vadd.f32 %v5420_v53, %v16113_v16  ;;  %v5426_v39 = vadd.f32 %v5420_v53, %v16114_v56  ;;  %v5427_v15 = vadd.f32 %v5420_v53, %v16115_v9  ;;  %v5428_v46 = vadd.f32 %v5420_v53, %v16116_v1 }
0x11bb   :  { %v5430_v61 = vadd.f32 %v16117_v42, %v5422_v35  ;;  %v5431_v23 = vadd.f32 %v16117_v42, %v5423_v2  ;;  %v5432_v48 = vadd.f32 %v16117_v42, %v5424_v63  ;;  %v5429_v31 = vadd.f32 %v16117_v42, %v5421_v25 }
0x11bc   :  { %v5433_v38 = vadd.f32 %v16117_v42, %v5425_v27  ;;  %v5434_v55 = vadd.f32 %v16117_v42, %v5426_v39  ;;  %v5435_v16 = vadd.f32 %v16117_v42, %v5427_v15  ;;  %v5436_v56 = vadd.f32 %v16117_v42, %v5428_v46 }
0x11bd   :  { %v5438_v9 = vsel %vm4041_vm2, %v5430_v61, -inf  ;;  %v5439_v53 = vsel %vm4041_vm2, %v5431_v23, -inf  ;;  %v5440_v35 = vsel %vm4041_vm2, %v5432_v48, -inf  ;;  %v5437_v2 = vsel %vm4041_vm2, %v5429_v31, -inf }
0x11be   :  { %v5443_v63 = vsel %vm4041_vm2, %v5434_v55, -inf  ;;  %v5445_v25 = vsel %vm4041_vm2, %v5435_v16, -inf  ;;  %v5447_v27 = vsel %vm4041_vm2, %v5436_v56, -inf  ;;  %v5441_v39 = vsel %vm4041_vm2, %v5433_v38, -inf }
0x11bf   :  { %v5444_v1 = vmax.f32 %v5438_v9, %v5443_v63  ;;  %v5446_v15 = vmax.f32 %v5439_v53, %v5445_v25  ;;  %v5448_v52 = vmax.f32 %v5440_v35, %v5447_v27  ;;  %v5442_v42 = vmax.f32 %v5437_v2, %v5441_v39 }
0x11c1   :  { %v5450_v46 = vmax.f32 %v5446_v15, %v5448_v52  ;;  %v5449_v21 = vmax.f32 %v5442_v42, %v5444_v1 }
0x11c3   :  { %v5451_v59 = vmax.f32 %v5449_v21, %v5450_v46 }
0x11c5   :  { %v5452_v8 = vsub.f32 %v5429_v31, %v5451_v59  ;;  %v5453_v45 = vsub.f32 %v5430_v61, %v5451_v59  ;;  %v5454_v37 = vsub.f32 %v5431_v23, %v5451_v59  ;;  %v5455_v22 = vsub.f32 %v5432_v48, %v5451_v59 }
0x11c6   :  { %v5456_v57 = vsub.f32 %v5433_v38, %v5451_v59  ;;  %v5457_v17 = vsub.f32 %v5434_v55, %v5451_v59  ;;  %v5458_v0 = vsub.f32 %v5435_v16, %v5451_v59  ;;  %v5459_v53 = vsub.f32 %v5436_v56, %v5451_v59 }
0x11c7   :  { %v5460_v24 = vmul.f32 1.442695, %v5452_v8  ;;  %v5462_v36 = vmul.f32 1.442695, %v5453_v45  ;;  %v5464_v13 = vmul.f32 1.442695, %v5454_v37 }
0x11c8   :  { %v5466_v28 = vmul.f32 1.442695, %v5455_v22  ;;  %v5468_v9 = vmul.f32 1.442695, %v5456_v57  ;;  %v5470_v52 = vmul.f32 1.442695, %v5457_v17 }
0x11c9   :  { %12202 = vpow2.f32 %v5460_v24  ;;  %v5472_v21 = vmul.f32 1.442695, %v5458_v0  ;;  %v5474_v1 = vmul.f32 1.442695, %v5459_v53 }
0x11ca   :  { %12204 = vpow2.f32 %v5462_v36 }
0x11cb   :  { %12206 = vpow2.f32 %v5464_v13 }
0x11cc   :  { %12208 = vpow2.f32 %v5466_v28 }
0x11cd   :  { %12210 = vpow2.f32 %v5468_v9 }
0x11ce   :  { %12212 = vpow2.f32 %v5470_v52 }
0x11cf   :  { %12214 = vpow2.f32 %v5472_v21 }
0x11d0   :  { %12216 = vpow2.f32 %v5474_v1 }
0x11d3   :  { %v12203_v61 = vpop.eup %12202 }
0x11d4   :  { %v12205_v48 = vpop.eup %12204  ;;  %v5476_v37 = vsel %vm4041_vm2, %v12203_v61, 0.0 }
0x11d5   :  { %v12207_v45 = vpop.eup %12206  ;;  %v5477_v24 = vsel %vm4041_vm2, %v12205_v48, 0.0 }
0x11d6   :  { %v12209_v22 = vpop.eup %12208  ;;  %v5478_v36 = vadd.f32 %v5477_v24, %v5476_v37  ;;  %v5479_v13 = vsel %vm4041_vm2, %v12207_v45, 0.0 }
0x11d7   :  { %v12211_v57 = vpop.eup %12210  ;;  %v5481_v17 = vsel %vm4041_vm2, %v12209_v22, 0.0 }
0x11d8   :  { %v5480_v28 = vadd.f32 %v5479_v13, %v5478_v36  ;;  %v12213_v0 = vpop.eup %12212  ;;  %v5483_v59 = vsel %vm4041_vm2, %v12211_v57, 0.0 }
0x11d9   :  { %v12215_v31 = vpop.eup %12214  ;;  %v5485_v55 = vsel %vm4041_vm2, %v12213_v0, 0.0 }
0x11da   :  { %v5482_v8 = vadd.f32 %v5481_v17, %v5480_v28  ;;  %v12217_v16 = vpop.eup %12216  ;;  %v5487_v23 = vsel %vm4041_vm2, %v12215_v31, 0.0 }
0x11db   :  { %v5489_v2 = vsel %vm4041_vm2, %v12217_v16, 0.0 }
0x11dc   :  { %v5484_v38 = vadd.f32 %v5483_v59, %v5482_v8 }
0x11de   :  { %v5486_v56 = vadd.f32 %v5485_v55, %v5484_v38 }
0x11e0   :  { %v5488_v35 = vadd.f32 %v5487_v23, %v5486_v56 }
0x11e2   :  { %v5490_v63 = vadd.f32 %v5489_v2, %v5488_v35 }
0x11e4   :  { %12218 = vrcp.f32 %v5490_v63 }
0x11ee   :  { %v12219_v25 = vpop.eup %12218 }
0x11ef   :  { %v5492_v27 = vmul.f32 %v12219_v25, %v12203_v61  ;;  %v5493_v39 = vmul.f32 %v12219_v25, %v12205_v48  ;;  %v5494_v15 = vmul.f32 %v12219_v25, %v12207_v45  ;;  %v5495_v42 = vmul.f32 %v12219_v25, %v12209_v22 }
0x11f0   :  { %v5496_v46 = vmul.f32 %v12219_v25, %v12211_v57  ;;  %v5497_v9 = vmul.f32 %v12219_v25, %v12213_v0  ;;  %v5498_v53 = vmul.f32 %v12219_v25, %v12215_v31  ;;  %v5499_v52 = vmul.f32 %v12219_v25, %v12217_v16 }
0x11f1   :  { %5502 = vperm.xlu0 %11957, %v5492_v27  }
0x11f5   :  { %5507 = vperm.xlu0 %11957, %v5493_v39  }
0x11f9   :  { %5512 = vperm.xlu0 %11957, %v5494_v15  }
0x11fd   :  { %5517 = vperm.xlu0 %11957, %v5495_v42  }
0x1201   :  { %5522 = vperm.xlu0 %11957, %v5496_v46  }
0x1205   :  { %5527 = vperm.xlu0 %11957, %v5497_v9  }
0x1209   :  { %5532 = vperm.xlu0 %11957, %v5498_v53  }
0x120d   :  { %5537 = vperm.xlu0 %11957, %v5499_v52  }
0x1270   :  { %v5503_v21 = vpop.permute.xlu0 %5502 }
0x1271   :  { %v5540_v22 = vmul.f32 %v5503_v21, %v15866_v14  ;;  %v5541_v36 = vmul.f32 %v5503_v21, %v14006_v4 }
0x1274   :  { %v5508_v1 = vpop.permute.xlu0 %5507 }
0x1275   :  { %v5542_v61 = vmul.f32 %v5508_v1, %v15859_v33  ;;  %v5543_v48 = vmul.f32 %v5508_v1, %v13981_v30 }
0x1277   :  { %v5556_v28 = vadd.f32 %v5542_v61, %v5540_v22  ;;  %v5563_v17 = vadd.f32 %v5543_v48, %v5541_v36  ;;  %v16118_v61 = vld [vmem:[#allocation89_spill] sm:$0xff]  ;;  %v16119_v48 = vld [vmem:[#allocation111_spill] sm:$0xff]  ;;  %v16122_v36 = vld [vmem:[#allocation112_spill] sm:$0xff] }
0x1278   :  { %v5513_v37 = vpop.permute.xlu0 %5512  ;;  %v16121_v22 = vld [vmem:[#allocation93_spill] sm:$0xff] }
0x1279   :  { %v5544_v13 = vmul.f32 %v5513_v37, %v15838_v49  ;;  %v5545_v57 = vmul.f32 %v5513_v37, %v13885_v19 }
0x127b   :  { %v5557_v31 = vadd.f32 %v5556_v28, %v5544_v13  ;;  %v5564_v38 = vadd.f32 %v5563_v17, %v5545_v57  ;;  %v16123_v13 = vld [vmem:[#allocation95_spill] sm:$0xff]  ;;  %v16124_v57 = vld [vmem:[#allocation97_spill] sm:$0xff] }
0x127c   :  { %v5518_v24 = vpop.permute.xlu0 %5517  ;;  %v16125_v28 = vld [vmem:[#allocation113_spill] sm:$0xff]  ;;  %v16126_v17 = vld [vmem:[#allocation99_spill] sm:$0xff] }
0x127d   :  { %v5546_v0 = vmul.f32 %v5518_v24, %v15920_v50  ;;  %v5547_v8 = vmul.f32 %v5518_v24, %v13784_v7 }
0x127f   :  { %v5558_v56 = vadd.f32 %v5557_v31, %v5546_v0  ;;  %v5565_v23 = vadd.f32 %v5564_v38, %v5547_v8  ;;  %v16127_v0 = vld [vmem:[#allocation101_spill] sm:$0xff]  ;;  %v16128_v8 = vld [vmem:[#allocation114_spill] sm:$0xff]  ;;  %v16130_v31 = vld [vmem:[#allocation100_spill] sm:$0xff] }
0x1280   :  { %v5523_v45 = vpop.permute.xlu0 %5522  ;;  %v16131_v38 = vld [vmem:[#allocation58_spill] sm:$0xff] }
0x1281   :  { %v5548_v55 = vmul.f32 %v5523_v45, %v13729_v3  ;;  %v5549_v16 = vmul.f32 %v5523_v45, %v15921_v58  ;;  %v16120_v45 = vld [vmem:[#allocation91_spill] sm:$0xff] }
0x1283   :  { %v5559_v25 = vadd.f32 %v5558_v56, %v5548_v55  ;;  %v5566_v27 = vadd.f32 %v5565_v23, %v5549_v16  ;;  %v16132_v55 = vld [vmem:[#allocation65_spill] sm:$0xff]  ;;  %v16133_v16 = vld [vmem:[#allocation46_spill] sm:$0xff] }
0x1284   :  { %v5528_v59 = vpop.permute.xlu0 %5527  ;;  %v16134_v56 = vld [vmem:[#allocation66_spill] sm:$0xff]  ;;  %v16135_v23 = vld [vmem:[#allocation53_spill] sm:$0xff] }
0x1285   :  { %v5550_v35 = vmul.f32 %v5528_v59, %v13841_v18  ;;  %v5551_v2 = vmul.f32 %v5528_v59, %v15836_v41  ;;  %v16129_v59 = vld [vmem:[#allocation51_spill] sm:$0xff] }
0x1287   :  { %v5560_v42 = vadd.f32 %v5559_v25, %v5550_v35  ;;  %v5567_v46 = vadd.f32 %v5566_v27, %v5551_v2  ;;  %v16136_v35 = vld [vmem:[#allocation84_spill] sm:$0xff]  ;;  %v16139_v25 = vld [vmem:[#allocation55_spill] sm:$0xff]  ;;  %v16140_v27 = vld [vmem:[#allocation49_spill] sm:$0xff] }
0x1288   :  { %v5533_v63 = vpop.permute.xlu0 %5532  ;;  %v16137_v2 = vld [vmem:[#allocation68_spill] sm:$0xff] }
0x1289   :  { %v5552_v39 = vmul.f32 %v5533_v63, %v15922_v5  ;;  %v5553_v15 = vmul.f32 %v5533_v63, %v15923_v43  ;;  %v16138_v63 = vld [vmem:[#allocation50_spill] sm:$0xff] }
0x128b   :  { %v5561_v53 = vadd.f32 %v5560_v42, %v5552_v39  ;;  %v5568_v52 = vadd.f32 %v5567_v46, %v5553_v15  ;;  %v16141_v39 = vld [vmem:[#allocation48_spill] sm:$0xff]  ;;  %v16142_v15 = vld [vmem:[#allocation63_spill] sm:$0xff]  ;;  %v16143_v42 = vld [vmem:[#allocation86_spill] sm:$0xff] }
0x128c   :  { %v5538_v9 = vpop.permute.xlu0 %5537  ;;  %v16144_v46 = vld [vmem:[#allocation64_spill] sm:$0xff] }
0x128d   :  { %v5554_v21 = vmul.f32 %v5538_v9, %v15924_v26  ;;  %v5555_v1 = vmul.f32 %v5538_v9, %v15925_v60  ;;  %v16145_v9 = vld [vmem:[#allocation102_spill] sm:$0xff] }
0x128f   :  { %v5562_v37 = vadd.f32 %v5561_v53, %v5554_v21  ;;  %v5569_v24 = vadd.f32 %v5568_v52, %v5555_v1  ;;  %v16146_v53 = vld [vmem:[#allocation52_spill] sm:$0xff]  ;;  %v16147_v52 = vld [vmem:[#allocation103_spill] sm:$0xff]  ;;  %v16148_v21 = vld [vmem:[#allocation61_spill] sm:$0xff] }
0x1290   :  { %v16149_v1 = vld [vmem:[#allocation104_spill] sm:$0xff] }
0x1291   :  { %5637 = vmatprep.mubr.f32.mxu1 %v5569_v24  ;;  %5708 = vmatprep.mubr.f32.mxu0 %v5569_v24  ;;  %v16151_v24 = vld [vmem:[#allocation105_spill] sm:$0xff] }
0x1292   :  { %5638 = vmatmul.mubr.f32.vlgmr.msra.gmra.mrb[6].mxu1 %v5562_v37  ;;  %5709 = vmatmul.mubr.f32.vlgmr.msra.gmra.mrb[86].mxu0 %v5562_v37  ;;  %v16150_v37 = vld [vmem:[#allocation70_spill] sm:$0xff] }
0x1293   :  { %11163 = vmatpush1.bf16.msra.mxu1 %v14138_v54  ;;  %11194 = vmatpush3.bf16.msra.mxu0 %v14332_v47 }
0x1294   :  { %11165 = vmatprep.subr.bf16.mxu1 %v14143_v51  ;;  %11195 = vmatprep.subr.bf16.mxu0 %v15941_v34 }
0x1295   :  { %5781 = vmatprep.mubr.f32.mxu1 %v15752_v40  ;;  %9445 = vmatprep.mubr.msk.f32.mxu0 %vm12604_vm1, %v15752_v40 }
0x1297   :  { %11167 = vmatpush1.bf16.msra.mxu1 %v14151_v62  ;;  %11197 = vmatpush3.bf16.msra.mxu0 %v14337_v20 }
0x1298   :  { %11169 = vmatprep.subr.bf16.mxu1 %v14156_v11  ;;  %11198 = vmatprep.subr.bf16.mxu0 %v15941_v34 }
0x129b   :  { %11171 = vmatpush1.bf16.msra.mxu1 %v14164_v29  ;;  %11200 = vmatpush3.bf16.msra.mxu0 %v14343_v10 }
0x129c   :  { %11173 = vmatprep.subr.bf16.mxu1 %v15966_v6  ;;  %11201 = vmatprep.subr.bf16.mxu0 %v15941_v34 }
0x129f   :  { %11175 = vmatpush1.bf16.msra.mxu1 %v15967_v12  ;;  %11203 = vmatpush3.bf16.msra.mxu0 %v14347_v44 }
0x12a0   :  { %11177 = vmatprep.subr.bf16.mxu1 %v15968_v32  ;;  %11204 = vmatprep.subr.bf16.mxu0 %v15941_v34 }
0x12a3   :  { %11179 = vmatpush1.bf16.msra.mxu1 %v16118_v61  ;;  %11206 = vmatpush3.bf16.msra.mxu0 %v16119_v48 }
0x12a4   :  { %11181 = vmatprep.subr.bf16.mxu1 %v16120_v45  ;;  %11207 = vmatprep.subr.bf16.mxu0 %v15941_v34 }
0x12a7   :  { %11183 = vmatpush1.bf16.msra.mxu1 %v16121_v22  ;;  %11209 = vmatpush3.bf16.msra.mxu0 %v16122_v36 }
0x12a8   :  { %11185 = vmatprep.subr.bf16.mxu1 %v16123_v13  ;;  %11210 = vmatprep.subr.bf16.mxu0 %v15941_v34 }
0x12ab   :  { %11187 = vmatpush1.bf16.msra.mxu1 %v16124_v57  ;;  %11212 = vmatpush3.bf16.msra.mxu0 %v16125_v28 }
0x12ac   :  { %11189 = vmatprep.subr.bf16.mxu1 %v16126_v17  ;;  %11213 = vmatprep.subr.bf16.mxu0 %v15941_v34 }
0x12af   :  { %11191 = vmatpush1.bf16.msra.mxu1 %v16127_v0  ;;  %11215 = vmatpush3.bf16.msra.mxu0 %v16128_v8 }
0x12b0   :  { %11217 = vmatprep.subr.bf16.mxu1 %v16129_v59  ;;  %11281 = vmatprep.subr.bf16.mxu0 %v16130_v31 }
0x12b2   :  { %5782 = vmatmul.mubr.f32.vlgmr.msra.gmra.mrb[6].mxu1 %v16131_v38  ;;  %9446 = vmatmul.mubr.f32.vlgmr.msra.gmra.mrb[88].mxu0 %v16131_v38 }
0x12b3   :  { %11219 = vmatpush1.bf16.msra.mxu1 %v16132_v55  ;;  %11283 = vmatpush3.bf16.msra.mxu0 %v16133_v16 }
0x12b4   :  { %11221 = vmatprep.subr.bf16.mxu1 %v16134_v56  ;;  %11285 = vmatprep.subr.bf16.mxu0 %v16135_v23  ;;  %v16181_v23 = vld [vmem:[#allocation82_spill] sm:$0xff] }
0x12b7   :  { %11223 = vmatpush1.bf16.msra.mxu1 %v16136_v35  ;;  %11287 = vmatpush3.bf16.msra.mxu0 %v16137_v2 }
0x12b8   :  { %11225 = vmatprep.subr.bf16.mxu1 %v16138_v63  ;;  %11289 = vmatprep.subr.bf16.mxu0 %v16139_v25 }
0x12bb   :  { %11227 = vmatpush1.bf16.msra.mxu1 %v16140_v27  ;;  %11291 = vmatpush3.bf16.msra.mxu0 %v16141_v39  ;;  %v16152_v39 = vld [vmem:[#allocation62_spill] sm:$0xff] }
0x12bc   :  { %11229 = vmatprep.subr.bf16.mxu1 %v16142_v15  ;;  %11293 = vmatprep.subr.bf16.mxu0 %v16143_v42  ;;  %v16153_v15 = vld [vmem:[#allocation106_spill] sm:$0xff]  ;;  %v16154_v42 = vld [vmem:[#allocation69_spill] sm:$0xff] }
0x12bf   :  { %11231 = vmatpush1.bf16.msra.mxu1 %v16144_v46  ;;  %11295 = vmatpush3.bf16.msra.mxu0 %v16145_v9  ;;  %v16155_v46 = vld [vmem:[#allocation107_spill] sm:$0xff]  ;;  %v16156_v9 = vld [vmem:[#allocation30_spill] sm:$0xff] }
0x12c0   :  { %11233 = vmatprep.subr.bf16.mxu1 %v16146_v53  ;;  %11297 = vmatprep.subr.bf16.mxu0 %v16147_v52  ;;  %v16157_v53 = vld [vmem:[#allocation108_spill] sm:$0xff]  ;;  %v16158_v52 = vld [vmem:[#allocation35_spill] sm:$0xff] }
0x12c3   :  { %11235 = vmatpush1.bf16.msra.mxu1 %v16148_v21  ;;  %11299 = vmatpush3.bf16.msra.mxu0 %v16149_v1  ;;  %v16159_v21 = vld [vmem:[#allocation109_spill] sm:$0xff]  ;;  %v16160_v1 = vld [vmem:[#allocation36_spill] sm:$0xff] }
0x12c4   :  { %11237 = vmatprep.subr.bf16.mxu1 %v16150_v37  ;;  %11301 = vmatprep.subr.bf16.mxu0 %v16151_v24  ;;  %v16161_v37 = vld [vmem:[#allocation110_spill] sm:$0xff]  ;;  %v16162_v24 = vld [vmem:[#allocation31_spill] sm:$0xff] }
0x12c7   :  { %11239 = vmatpush1.bf16.msra.mxu1 %v16152_v39  ;;  %11303 = vmatpush3.bf16.msra.mxu0 %v16153_v15  ;;  %v16163_v15 = vld [vmem:[#allocation38_spill] sm:$0xff] }
0x12c8   :  { %11241 = vmatprep.subr.bf16.mxu1 %v16154_v42  ;;  %11305 = vmatprep.subr.bf16.mxu0 %v16155_v46  ;;  %v16164_v42 = vld [vmem:[#allocation54_spill] sm:$0xff]  ;;  %v16165_v46 = vld [vmem:[#allocation45_spill] sm:$0xff] }
0x12c9   :  { %v16173_v39 = vld [vmem:[#allocation90_spill] sm:$0xff] }
0x12cb   :  { %11243 = vmatpush1.bf16.msra.mxu1 %v16156_v9  ;;  %11307 = vmatpush3.bf16.msra.mxu0 %v16157_v53  ;;  %v16166_v9 = vld [vmem:[#allocation59_spill] sm:$0xff]  ;;  %v16167_v53 = vld [vmem:[#allocation60_spill] sm:$0xff] }
0x12cc   :  { %11245 = vmatprep.subr.bf16.mxu1 %v16158_v52  ;;  %11309 = vmatprep.subr.bf16.mxu0 %v16159_v21  ;;  %v16168_v52 = vld [vmem:[#allocation44_spill] sm:$0xff] }
0x12cd   :  { %v16169_v21 = vld [vmem:[#allocation56_spill] sm:$0xff] }
0x12cf   :  { %11247 = vmatpush1.bf16.msra.mxu1 %v16160_v1  ;;  %11311 = vmatpush3.bf16.msra.mxu0 %v16161_v37  ;;  %v16170_v1 = vld [vmem:[#allocation57_spill] sm:$0xff] }
0x12d0   :  { %11249 = vmatprep.subr.bf16.mxu1 %v16162_v24  ;;  %11344 = vmatprep.subr.bf16.mxu0 %v15941_v34  ;;  %v16171_v37 = vld [vmem:[#allocation85_spill] sm:$0xff]  ;;  %v16172_v24 = vld [vmem:[#allocation88_spill] sm:$0xff] }
0x12d3   :  { %11251 = vmatpush1.bf16.msra.mxu1 %v16163_v15  ;;  %v16174_v15 = vld [vmem:[#allocation92_spill] sm:$0xff] }
0x12d4   :  { %11253 = vmatprep.subr.bf16.mxu1 %v16164_v42  ;;  %v16175_v42 = vld [vmem:[#allocation94_spill] sm:$0xff] }
0x12d7   :  { %11255 = vmatpush1.bf16.msra.mxu1 %v16165_v46  ;;  %v16176_v46 = vld [vmem:[#allocation96_spill] sm:$0xff] }
0x12d8   :  { %11257 = vmatprep.subr.bf16.mxu1 %v16166_v9  ;;  %v16177_v9 = vld [vmem:[#allocation98_spill] sm:$0xff] }
0x12db   :  { %11259 = vmatpush1.bf16.msra.mxu1 %v16167_v53  ;;  %v16178_v53 = vld [vmem:[#allocation47_spill] sm:$0xff] }
0x12dc   :  { %11261 = vmatprep.subr.bf16.mxu1 %v16168_v52 }
0x12df   :  { %11263 = vmatpush1.bf16.msra.mxu1 %v16169_v21 }
0x12e0   :  { %11265 = vmatprep.subr.bf16.mxu1 %v16170_v1  ;;  %v16179_v1 = vld [vmem:[#allocation74_spill] sm:$0xff] }
0x12e3   :  { %11267 = vmatpush1.bf16.msra.mxu1 %v16171_v37 }
0x12e4   :  { %11269 = vmatprep.subr.bf16.mxu1 %v16172_v24  ;;  %v16180_v24 = vld [vmem:[#allocation80_spill] sm:$0xff] }
0x12e7   :  { %11271 = vmatpush1.bf16.msra.mxu1 %v16173_v39 }
0x12e8   :  { %11273 = vmatprep.subr.bf16.mxu1 %v16174_v15 }
0x12eb   :  { %11275 = vmatpush1.bf16.msra.mxu1 %v16175_v42 }
0x12ec   :  { %11277 = vmatprep.subr.bf16.mxu1 %v16176_v46 }
0x12ef   :  { %11279 = vmatpush1.bf16.msra.mxu1 %v16177_v9 }
0x12f0   :  { %11313 = vmatprep.subr.bf16.mxu1 %v16178_v53 }
0x1365   :  { %v8468_v52 = vpop.f32.mrb[86].mxu0 }
0x1366   :  { %v8469_v21 = vpop.f32.mrb[87].mxu0 }
0x1367   :  { %v8470_v27 = vadd.f32 %v8469_v21, %v8468_v52  ;;  %v16182_v52 = vld [vmem:[#allocation43_spill] sm:$0xff] }
0x1369   :  { %v5716_v25 = vadd.f32 %v8470_v27, %v16179_v1 }
0x1385   :  { %v5783_v37 = vpop.f32.mrb[6].mxu1  ;;  %v5854_v63 = vpop.f32.mrb[88].mxu0 }
0x1386   :  { %v11882_v2 = vadd.f32 %v5783_v37, %v16180_v24  ;;  %v5785_v39 = vpop.f32.mrb[7].mxu1  ;;  %v9447_v35 = vpop.f32.mrb[89].mxu0  ;;  %v5872_v21 = vadd.f32 %v16182_v52, %v5854_v63  ;;  %v16186_v52 = vld [vmem:[#allocation40_spill] sm:$0xff]  ;;  %v16190_v24 = vld [vmem:[#allocation33_spill] sm:$0xff] }
0x1387   :  { %v11883_v42 = vadd.f32 %v5785_v39, %v16181_v23 }
0x1388   :  { %v7981_v15 = vmul.f32 -1.442695, %v11882_v2 }
0x1389   :  { %v7982_v46 = vmul.f32 -1.442695, %v11883_v42 }
0x138a   :  { %12220 = vpow2.f32 %v7981_v15 }
0x138b   :  { %12222 = vpow2.f32 %v7982_v46  ;;  %v16184_v46 = vld [vmem:[#allocation87_spill] sm:$0xff] }
0x1394   :  { %v12221_v9 = vpop.eup %12220 }
0x1395   :  { %v5862_v56 = vadd.f32 1.0, %v12221_v9  ;;  %v12223_v53 = vpop.eup %12222 }
0x1396   :  { %v5869_v16 = vadd.f32 1.0, %v12223_v53  ;;  %v16185_v53 = vld [vmem:[#allocation34_spill] sm:$0xff] }
0x1397   :  { %12224 = vrcp.f32 %v5862_v56 }
0x1398   :  { %12226 = vrcp.f32 %v5869_v16  ;;  %v16187_v16 = vld [vmem:[#allocation81_spill] sm:$0xff] }
0x13a1   :  { %v12225_v27 = vpop.eup %12224 }
0x13a2   :  { %v5873_v1 = vmul.f32 %v12225_v27, %v5872_v21  ;;  %v12227_v37 = vpop.eup %12226 }
0x13a3   :  { %v5876_v35 = vsub.f32 1.0, %v12227_v37  ;;  %v5878_v39 = vmul.f32 %v12227_v37, %v16131_v38  ;;  %v14861_v38 = vld [vmem:[#allocation7] ss:$0 sm:$0xff] }
0x13a4   :  { %v5874_v55 = vadd.f32 %v5873_v1, %v5716_v25  ;;  %v16189_v1 = vld [vmem:[#allocation37_spill] sm:$0xff]  ;;  %16193 = vst [vmem:[#allocation41_spill] sm:$0xff] %v14861_v38 }
0x13a6   :  { %12228 = vtanh.f32 %v5874_v55  ;;  %v16188_v55 = vld [vmem:[#allocation39_spill] sm:$0xff] }
0x13b0   :  { %v12229_v2 = vpop.eup %12228 }
0x13b1   :  { %v5877_v15 = vmul.f32 %v12229_v2, %v5876_v35  ;;  %v16191_v35 = vld [vmem:[#allocation32_spill] sm:$0xff] }
0x13b3   :  { %v14849_v42 = vadd.f32 %v5878_v39, %v5877_v15  ;;  %v16192_v39 = vld [vmem:[#allocation67_spill] sm:$0xff] }
0x13b5   :  { %16183 = vst [vmem:[#allocation72_spill] sm:$0xff] %v14849_v42  ;;  %v5881_v56 = vmul.f32 %v16184_v46, %v14849_v42 }
0x13b7   :  { %5882 = vadd.xlane.f32.xlu0 %v5881_v56 }
0x1444   :  { %v5883_v9 = vpop.xlane.xlu0 %5882 }
0x1445   :  { %v5884_v63 = vadd.f32 %v5883_v9, %v16185_v53  ;;  %v5885_v21 = vadd.f32 %v5883_v9, %v16186_v52  ;;  %v5886_v25 = vadd.f32 %v5883_v9, %v16187_v16  ;;  %v5887_v27 = vadd.f32 %v5883_v9, %v16188_v55 }
0x1446   :  { %v5888_v23 = vadd.f32 %v5883_v9, %v16189_v1  ;;  %v5889_v37 = vadd.f32 %v5883_v9, %v16190_v24  ;;  %v5890_v2 = vadd.f32 %v5883_v9, %v16191_v35  ;;  %v5891_v15 = vadd.f32 %v5883_v9, %v16192_v39 }
0x1447   :  { %v5892_v46 = vadd.f32 %v14861_v38, %v5884_v63  ;;  %v5893_v56 = vadd.f32 %v14861_v38, %v5885_v21  ;;  %v5894_v52 = vadd.f32 %v14861_v38, %v5886_v25  ;;  %v5895_v16 = vadd.f32 %v14861_v38, %v5887_v27 }
0x1448   :  { %v5897_v55 = vadd.f32 %v14861_v38, %v5889_v37  ;;  %v5898_v1 = vadd.f32 %v14861_v38, %v5890_v2  ;;  %v5899_v24 = vadd.f32 %v14861_v38, %v5891_v15  ;;  %v5896_v35 = vadd.f32 %v14861_v38, %v5888_v23 }
0x1449   :  { %v5901_v9 = vsel %vm4041_vm2, %v5893_v56, -inf  ;;  %v5902_v39 = vsel %vm4041_vm2, %v5894_v52, -inf  ;;  %v5903_v63 = vsel %vm4041_vm2, %v5895_v16, -inf  ;;  %v5900_v21 = vsel %vm4041_vm2, %v5892_v46, -inf }
0x144a   :  { %v5906_v25 = vsel %vm4041_vm2, %v5897_v55, -inf  ;;  %v5908_v27 = vsel %vm4041_vm2, %v5898_v1, -inf  ;;  %v5910_v37 = vsel %vm4041_vm2, %v5899_v24, -inf  ;;  %v5904_v2 = vsel %vm4041_vm2, %v5896_v35, -inf }
0x144b   :  { %v5907_v53 = vmax.f32 %v5901_v9, %v5906_v25  ;;  %v5909_v15 = vmax.f32 %v5902_v39, %v5908_v27  ;;  %v5911_v42 = vmax.f32 %v5903_v63, %v5910_v37  ;;  %v5905_v23 = vmax.f32 %v5900_v21, %v5904_v2 }
0x144d   :  { %v5913_v38 = vmax.f32 %v5909_v15, %v5911_v42  ;;  %v5912_v31 = vmax.f32 %v5905_v23, %v5907_v53 }
0x144f   :  { %v5914_v59 = vmax.f32 %v5912_v31, %v5913_v38 }
0x1451   :  { %v5915_v8 = vsub.f32 %v5892_v46, %v5914_v59  ;;  %v5916_v0 = vsub.f32 %v5893_v56, %v5914_v59  ;;  %v5917_v17 = vsub.f32 %v5894_v52, %v5914_v59  ;;  %v5918_v28 = vsub.f32 %v5895_v16, %v5914_v59 }
0x1452   :  { %v5919_v57 = vsub.f32 %v5896_v35, %v5914_v59  ;;  %v5920_v45 = vsub.f32 %v5897_v55, %v5914_v59  ;;  %v5921_v61 = vsub.f32 %v5898_v1, %v5914_v59  ;;  %v5922_v39 = vsub.f32 %v5899_v24, %v5914_v59 }
0x1453   :  { %v5923_v13 = vmul.f32 1.442695, %v5915_v8  ;;  %v5925_v36 = vmul.f32 1.442695, %v5916_v0  ;;  %v5927_v22 = vmul.f32 1.442695, %v5917_v17 }
0x1454   :  { %v5929_v48 = vmul.f32 1.442695, %v5918_v28  ;;  %v5931_v9 = vmul.f32 1.442695, %v5919_v57  ;;  %v5933_v42 = vmul.f32 1.442695, %v5920_v45 }
0x1455   :  { %12230 = vpow2.f32 %v5923_v13  ;;  %v5935_v31 = vmul.f32 1.442695, %v5921_v61  ;;  %v5937_v38 = vmul.f32 1.442695, %v5922_v39 }
0x1456   :  { %12232 = vpow2.f32 %v5925_v36 }
0x1457   :  { %12234 = vpow2.f32 %v5927_v22 }
0x1458   :  { %12236 = vpow2.f32 %v5929_v48 }
0x1459   :  { %12238 = vpow2.f32 %v5931_v9 }
0x145a   :  { %12240 = vpow2.f32 %v5933_v42 }
0x145b   :  { %12242 = vpow2.f32 %v5935_v31 }
0x145c   :  { %12244 = vpow2.f32 %v5937_v38 }
0x145f   :  { %v12231_v53 = vpop.eup %12230 }
0x1460   :  { %v12233_v52 = vpop.eup %12232  ;;  %v5939_v17 = vsel %vm4041_vm2, %v12231_v53, 0.0 }
0x1461   :  { %v12235_v0 = vpop.eup %12234  ;;  %v5940_v13 = vsel %vm4041_vm2, %v12233_v52, 0.0 }
0x1462   :  { %v12237_v28 = vpop.eup %12236  ;;  %v5941_v36 = vadd.f32 %v5940_v13, %v5939_v17  ;;  %v5942_v22 = vsel %vm4041_vm2, %v12235_v0, 0.0 }
0x1463   :  { %v12239_v57 = vpop.eup %12238  ;;  %v5944_v45 = vsel %vm4041_vm2, %v12237_v28, 0.0 }
0x1464   :  { %v5943_v48 = vadd.f32 %v5942_v22, %v5941_v36  ;;  %v12241_v61 = vpop.eup %12240  ;;  %v5946_v59 = vsel %vm4041_vm2, %v12239_v57, 0.0 }
0x1465   :  { %v12243_v24 = vpop.eup %12242  ;;  %v5948_v55 = vsel %vm4041_vm2, %v12241_v61, 0.0 }
0x1466   :  { %v5945_v8 = vadd.f32 %v5944_v45, %v5943_v48  ;;  %v12245_v1 = vpop.eup %12244  ;;  %v5950_v46 = vsel %vm4041_vm2, %v12243_v24, 0.0 }
0x1467   :  { %v5952_v63 = vsel %vm4041_vm2, %v12245_v1, 0.0 }
0x1468   :  { %v5947_v16 = vadd.f32 %v5946_v59, %v5945_v8 }
0x146a   :  { %v5949_v35 = vadd.f32 %v5948_v55, %v5947_v16 }
0x146c   :  { %v5951_v56 = vadd.f32 %v5950_v46, %v5949_v35 }
0x146e   :  { %v5953_v21 = vadd.f32 %v5952_v63, %v5951_v56 }
0x1470   :  { %12246 = vrcp.f32 %v5953_v21 }
0x147a   :  { %v12247_v25 = vpop.eup %12246 }
0x147b   :  { %v5959_v27 = vmul.f32 %v12247_v25, %v12239_v57  ;;  %v5955_v37 = vmul.f32 %v12247_v25, %v12231_v53  ;;  %v5956_v2 = vmul.f32 %v12247_v25, %v12233_v52  ;;  %v5957_v15 = vmul.f32 %v12247_v25, %v12235_v0 }
0x147c   :  { %v5958_v23 = vmul.f32 %v12247_v25, %v12237_v28  ;;  %v5960_v9 = vmul.f32 %v12247_v25, %v12241_v61  ;;  %v5961_v39 = vmul.f32 %v12247_v25, %v12243_v24  ;;  %v5962_v42 = vmul.f32 %v12247_v25, %v12245_v1 }
0x147d   :  { %5985 = vperm.xlu0 %11957, %v5959_v27   ;;  %5965 = vperm.xlu1 %11956, %v5955_v37  }
0x1481   :  { %5970 = vperm.xlu1 %11956, %v5956_v2  }
0x1485   :  { %5975 = vperm.xlu1 %11956, %v5957_v15  }
0x1489   :  { %5980 = vperm.xlu1 %11956, %v5958_v23  }
0x148d   :  { %5990 = vperm.xlu1 %11956, %v5960_v9  }
0x1491   :  { %5995 = vperm.xlu1 %11956, %v5961_v39  }
0x1495   :  { %6000 = vperm.xlu1 %11956, %v5962_v42  }
0x14fc   :  { %v5966_v31 = vpop.permute.xlu1 %5965  ;;  %v5986_v24 = vpop.permute.xlu0 %5985 }
0x14fd   :  { %v6003_v52 = vmul.f32 %v5966_v31, %v15866_v14  ;;  %v6004_v0 = vmul.f32 %v5966_v31, %v14006_v4  ;;  %v6011_v35 = vmul.f32 %v5986_v24, %v13729_v3  ;;  %v6012_v46 = vmul.f32 %v5986_v24, %v15921_v58  ;;  %v16206_v24 = vld [vmem:[#allocation100_spill] sm:$0xff] }
0x1500   :  { %v5971_v38 = vpop.permute.xlu1 %5970 }
0x1501   :  { %v6005_v17 = vmul.f32 %v5971_v38, %v15859_v33  ;;  %v6006_v53 = vmul.f32 %v5971_v38, %v13981_v30 }
0x1503   :  { %v6019_v22 = vadd.f32 %v6005_v17, %v6003_v52  ;;  %v6026_v57 = vadd.f32 %v6006_v53, %v6004_v0  ;;  %v16195_v52 = vld [vmem:[#allocation111_spill] sm:$0xff] }
0x1504   :  { %v5976_v13 = vpop.permute.xlu1 %5975  ;;  %v16196_v0 = vld [vmem:[#allocation91_spill] sm:$0xff] }
0x1505   :  { %v6007_v28 = vmul.f32 %v5976_v13, %v15838_v49  ;;  %v6008_v36 = vmul.f32 %v5976_v13, %v13885_v19  ;;  %v16194_v13 = vld [vmem:[#allocation89_spill] sm:$0xff] }
0x1507   :  { %v6020_v45 = vadd.f32 %v6019_v22, %v6007_v28  ;;  %v6027_v61 = vadd.f32 %v6026_v57, %v6008_v36  ;;  %v16197_v28 = vld [vmem:[#allocation93_spill] sm:$0xff]  ;;  %v16198_v36 = vld [vmem:[#allocation112_spill] sm:$0xff]  ;;  %v16199_v22 = vld [vmem:[#allocation95_spill] sm:$0xff] }
0x1508   :  { %v5981_v48 = vpop.permute.xlu1 %5980  ;;  %v16200_v57 = vld [vmem:[#allocation97_spill] sm:$0xff] }
0x1509   :  { %v6009_v8 = vmul.f32 %v5981_v48, %v15920_v50  ;;  %v6010_v59 = vmul.f32 %v5981_v48, %v13784_v7  ;;  %v16201_v48 = vld [vmem:[#allocation113_spill] sm:$0xff] }
0x150b   :  { %v6021_v16 = vadd.f32 %v6020_v45, %v6009_v8  ;;  %v6028_v55 = vadd.f32 %v6027_v61, %v6010_v59  ;;  %v16202_v45 = vld [vmem:[#allocation99_spill] sm:$0xff]  ;;  %v16203_v61 = vld [vmem:[#allocation101_spill] sm:$0xff]  ;;  %v16204_v8 = vld [vmem:[#allocation114_spill] sm:$0xff] }
0x150c   :  { %v5991_v1 = vpop.permute.xlu1 %5990  ;;  %v16205_v59 = vld [vmem:[#allocation51_spill] sm:$0xff] }
0x150d   :  { %v6022_v56 = vadd.f32 %v6021_v16, %v6011_v35  ;;  %v6029_v63 = vadd.f32 %v6028_v55, %v6012_v46  ;;  %v6013_v21 = vmul.f32 %v5991_v1, %v13841_v18  ;;  %v6014_v25 = vmul.f32 %v5991_v1, %v15836_v41  ;;  %v16207_v16 = vld [vmem:[#allocation72_spill] sm:$0xff]  ;;  %v16208_v55 = vld [vmem:[#allocation65_spill] sm:$0xff]  ;;  %v16209_v1 = vld [vmem:[#allocation46_spill] sm:$0xff] }
0x150e   :  { %v16210_v35 = vld [vmem:[#allocation66_spill] sm:$0xff]  ;;  %v16211_v46 = vld [vmem:[#allocation53_spill] sm:$0xff] }
0x150f   :  { %v6023_v15 = vadd.f32 %v6022_v56, %v6013_v21  ;;  %v6030_v23 = vadd.f32 %v6029_v63, %v6014_v25  ;;  %v16212_v56 = vld [vmem:[#allocation84_spill] sm:$0xff]  ;;  %v16214_v21 = vld [vmem:[#allocation50_spill] sm:$0xff]  ;;  %v16215_v25 = vld [vmem:[#allocation55_spill] sm:$0xff] }
0x1510   :  { %v5996_v27 = vpop.permute.xlu1 %5995  ;;  %v16213_v63 = vld [vmem:[#allocation68_spill] sm:$0xff] }
0x1511   :  { %v6015_v37 = vmul.f32 %v5996_v27, %v15922_v5  ;;  %v6016_v2 = vmul.f32 %v5996_v27, %v15923_v43  ;;  %v16216_v27 = vld [vmem:[#allocation49_spill] sm:$0xff] }
0x1513   :  { %v6024_v39 = vadd.f32 %v6023_v15, %v6015_v37  ;;  %v6031_v42 = vadd.f32 %v6030_v23, %v6016_v2  ;;  %v16217_v37 = vld [vmem:[#allocation48_spill] sm:$0xff]  ;;  %v16218_v2 = vld [vmem:[#allocation63_spill] sm:$0xff]  ;;  %v16219_v15 = vld [vmem:[#allocation86_spill] sm:$0xff] }
0x1514   :  { %v6001_v9 = vpop.permute.xlu1 %6000  ;;  %v16220_v23 = vld [vmem:[#allocation64_spill] sm:$0xff] }
0x1515   :  { %v6017_v31 = vmul.f32 %v6001_v9, %v15924_v26  ;;  %v6018_v38 = vmul.f32 %v6001_v9, %v15925_v60  ;;  %v16221_v9 = vld [vmem:[#allocation102_spill] sm:$0xff] }
0x1517   :  { %v6025_v17 = vadd.f32 %v6024_v39, %v6017_v31  ;;  %v6032_v53 = vadd.f32 %v6031_v42, %v6018_v38  ;;  %v16222_v39 = vld [vmem:[#allocation52_spill] sm:$0xff]  ;;  %v16223_v42 = vld [vmem:[#allocation103_spill] sm:$0xff]  ;;  %v16224_v31 = vld [vmem:[#allocation61_spill] sm:$0xff] }
0x1518   :  { %v16225_v38 = vld [vmem:[#allocation104_spill] sm:$0xff] }
0x1519   :  { %6100 = vmatprep.mubr.f32.mxu1 %v6032_v53  ;;  %6171 = vmatprep.mubr.f32.mxu0 %v6032_v53  ;;  %v16227_v53 = vld [vmem:[#allocation105_spill] sm:$0xff] }
0x151a   :  { %6101 = vmatmul.mubr.f32.vlgmr.msra.gmra.mrb[8].mxu1 %v6025_v17  ;;  %6172 = vmatmul.mubr.f32.vlgmr.msra.gmra.mrb[90].mxu0 %v6025_v17  ;;  %v16226_v17 = vld [vmem:[#allocation70_spill] sm:$0xff] }
0x151b   :  { %11315 = vmatpush1.bf16.msra.mxu1 %v14138_v54  ;;  %11346 = vmatpush3.bf16.msra.mxu0 %v14332_v47 }
0x151c   :  { %11317 = vmatprep.subr.bf16.mxu1 %v14143_v51  ;;  %11347 = vmatprep.subr.bf16.mxu0 %v15941_v34 }
0x151d   :  { %6244 = vmatprep.mubr.f32.mxu1 %v15752_v40  ;;  %9480 = vmatprep.mubr.msk.f32.mxu0 %vm12604_vm1, %v15752_v40 }
0x151f   :  { %11319 = vmatpush1.bf16.msra.mxu1 %v14151_v62  ;;  %11349 = vmatpush3.bf16.msra.mxu0 %v14337_v20 }
0x1520   :  { %11321 = vmatprep.subr.bf16.mxu1 %v14156_v11  ;;  %11350 = vmatprep.subr.bf16.mxu0 %v15941_v34 }
0x1523   :  { %11323 = vmatpush1.bf16.msra.mxu1 %v14164_v29  ;;  %11352 = vmatpush3.bf16.msra.mxu0 %v14343_v10 }
0x1524   :  { %11325 = vmatprep.subr.bf16.mxu1 %v15966_v6  ;;  %11353 = vmatprep.subr.bf16.mxu0 %v15941_v34 }
0x1527   :  { %11327 = vmatpush1.bf16.msra.mxu1 %v15967_v12  ;;  %11355 = vmatpush3.bf16.msra.mxu0 %v14347_v44 }
0x1528   :  { %11329 = vmatprep.subr.bf16.mxu1 %v15968_v32  ;;  %11356 = vmatprep.subr.bf16.mxu0 %v15941_v34 }
0x152b   :  { %11331 = vmatpush1.bf16.msra.mxu1 %v16194_v13  ;;  %11358 = vmatpush3.bf16.msra.mxu0 %v16195_v52 }
0x152c   :  { %11333 = vmatprep.subr.bf16.mxu1 %v16196_v0  ;;  %11359 = vmatprep.subr.bf16.mxu0 %v15941_v34 }
0x152f   :  { %11335 = vmatpush1.bf16.msra.mxu1 %v16197_v28  ;;  %11361 = vmatpush3.bf16.msra.mxu0 %v16198_v36 }
0x1530   :  { %11337 = vmatprep.subr.bf16.mxu1 %v16199_v22  ;;  %11362 = vmatprep.subr.bf16.mxu0 %v15941_v34 }
0x1533   :  { %11339 = vmatpush1.bf16.msra.mxu1 %v16200_v57  ;;  %11364 = vmatpush3.bf16.msra.mxu0 %v16201_v48 }
0x1534   :  { %11341 = vmatprep.subr.bf16.mxu1 %v16202_v45  ;;  %11365 = vmatprep.subr.bf16.mxu0 %v15941_v34 }
0x1537   :  { %11343 = vmatpush1.bf16.msra.mxu1 %v16203_v61  ;;  %11367 = vmatpush3.bf16.msra.mxu0 %v16204_v8 }
0x1538   :  { %11369 = vmatprep.subr.bf16.mxu1 %v16205_v59  ;;  %11433 = vmatprep.subr.bf16.mxu0 %v16206_v24 }
0x153a   :  { %6245 = vmatmul.mubr.f32.vlgmr.msra.gmra.mrb[8].mxu1 %v16207_v16  ;;  %9481 = vmatmul.mubr.f32.vlgmr.msra.gmra.mrb[92].mxu0 %v16207_v16 }
0x153b   :  { %11371 = vmatpush1.bf16.msra.mxu1 %v16208_v55  ;;  %11435 = vmatpush3.bf16.msra.mxu0 %v16209_v1  ;;  %v16269_v55 = vld [vmem:[#allocation41_spill] sm:$0xff] }
0x153c   :  { %11373 = vmatprep.subr.bf16.mxu1 %v16210_v35  ;;  %11437 = vmatprep.subr.bf16.mxu0 %v16211_v46  ;;  %v16257_v46 = vld [vmem:[#allocation82_spill] sm:$0xff] }
0x153f   :  { %11375 = vmatpush1.bf16.msra.mxu1 %v16212_v56  ;;  %11439 = vmatpush3.bf16.msra.mxu0 %v16213_v63 }
0x1540   :  { %11377 = vmatprep.subr.bf16.mxu1 %v16214_v21  ;;  %11441 = vmatprep.subr.bf16.mxu0 %v16215_v25 }
0x1543   :  { %11379 = vmatpush1.bf16.msra.mxu1 %v16216_v27  ;;  %11443 = vmatpush3.bf16.msra.mxu0 %v16217_v37  ;;  %v16228_v37 = vld [vmem:[#allocation62_spill] sm:$0xff] }
0x1544   :  { %11381 = vmatprep.subr.bf16.mxu1 %v16218_v2  ;;  %11445 = vmatprep.subr.bf16.mxu0 %v16219_v15  ;;  %v16229_v2 = vld [vmem:[#allocation106_spill] sm:$0xff]  ;;  %v16230_v15 = vld [vmem:[#allocation69_spill] sm:$0xff] }
0x1547   :  { %11383 = vmatpush1.bf16.msra.mxu1 %v16220_v23  ;;  %11447 = vmatpush3.bf16.msra.mxu0 %v16221_v9  ;;  %v16231_v23 = vld [vmem:[#allocation107_spill] sm:$0xff]  ;;  %v16232_v9 = vld [vmem:[#allocation30_spill] sm:$0xff] }
0x1548   :  { %11385 = vmatprep.subr.bf16.mxu1 %v16222_v39  ;;  %11449 = vmatprep.subr.bf16.mxu0 %v16223_v42  ;;  %v16233_v39 = vld [vmem:[#allocation108_spill] sm:$0xff]  ;;  %v16234_v42 = vld [vmem:[#allocation35_spill] sm:$0xff] }
0x154b   :  { %11387 = vmatpush1.bf16.msra.mxu1 %v16224_v31  ;;  %11451 = vmatpush3.bf16.msra.mxu0 %v16225_v38  ;;  %v16235_v31 = vld [vmem:[#allocation109_spill] sm:$0xff]  ;;  %v16236_v38 = vld [vmem:[#allocation36_spill] sm:$0xff] }
0x154c   :  { %11389 = vmatprep.subr.bf16.mxu1 %v16226_v17  ;;  %11453 = vmatprep.subr.bf16.mxu0 %v16227_v53  ;;  %v16237_v17 = vld [vmem:[#allocation110_spill] sm:$0xff]  ;;  %v16238_v53 = vld [vmem:[#allocation31_spill] sm:$0xff] }
0x154f   :  { %11391 = vmatpush1.bf16.msra.mxu1 %v16228_v37  ;;  %11455 = vmatpush3.bf16.msra.mxu0 %v16229_v2  ;;  %v16239_v2 = vld [vmem:[#allocation38_spill] sm:$0xff] }
0x1550   :  { %11393 = vmatprep.subr.bf16.mxu1 %v16230_v15  ;;  %11457 = vmatprep.subr.bf16.mxu0 %v16231_v23  ;;  %v16240_v15 = vld [vmem:[#allocation54_spill] sm:$0xff]  ;;  %v16241_v23 = vld [vmem:[#allocation45_spill] sm:$0xff] }
0x1551   :  { %v16249_v37 = vld [vmem:[#allocation90_spill] sm:$0xff] }
0x1553   :  { %11395 = vmatpush1.bf16.msra.mxu1 %v16232_v9  ;;  %11459 = vmatpush3.bf16.msra.mxu0 %v16233_v39  ;;  %v16242_v9 = vld [vmem:[#allocation59_spill] sm:$0xff]  ;;  %v16243_v39 = vld [vmem:[#allocation60_spill] sm:$0xff] }
0x1554   :  { %11397 = vmatprep.subr.bf16.mxu1 %v16234_v42  ;;  %11461 = vmatprep.subr.bf16.mxu0 %v16235_v31  ;;  %v16244_v42 = vld [vmem:[#allocation44_spill] sm:$0xff] }
0x1555   :  { %v16245_v31 = vld [vmem:[#allocation56_spill] sm:$0xff] }
0x1557   :  { %11399 = vmatpush1.bf16.msra.mxu1 %v16236_v38  ;;  %11463 = vmatpush3.bf16.msra.mxu0 %v16237_v17  ;;  %v16246_v38 = vld [vmem:[#allocation57_spill] sm:$0xff] }
0x1558   :  { %11401 = vmatprep.subr.bf16.mxu1 %v16238_v53  ;;  %11496 = vmatprep.subr.bf16.mxu0 %v15941_v34  ;;  %v16247_v17 = vld [vmem:[#allocation85_spill] sm:$0xff]  ;;  %v16248_v53 = vld [vmem:[#allocation88_spill] sm:$0xff] }
0x155b   :  { %11403 = vmatpush1.bf16.msra.mxu1 %v16239_v2  ;;  %v16250_v2 = vld [vmem:[#allocation92_spill] sm:$0xff] }
0x155c   :  { %11405 = vmatprep.subr.bf16.mxu1 %v16240_v15  ;;  %v16251_v15 = vld [vmem:[#allocation94_spill] sm:$0xff] }
0x155f   :  { %11407 = vmatpush1.bf16.msra.mxu1 %v16241_v23  ;;  %v16252_v23 = vld [vmem:[#allocation96_spill] sm:$0xff] }
0x1560   :  { %11409 = vmatprep.subr.bf16.mxu1 %v16242_v9  ;;  %v16253_v9 = vld [vmem:[#allocation98_spill] sm:$0xff] }
0x1563   :  { %11411 = vmatpush1.bf16.msra.mxu1 %v16243_v39  ;;  %v16254_v39 = vld [vmem:[#allocation47_spill] sm:$0xff] }
0x1564   :  { %11413 = vmatprep.subr.bf16.mxu1 %v16244_v42 }
0x1567   :  { %11415 = vmatpush1.bf16.msra.mxu1 %v16245_v31 }
0x1568   :  { %11417 = vmatprep.subr.bf16.mxu1 %v16246_v38  ;;  %v16255_v38 = vld [vmem:[#allocation77_spill] sm:$0xff] }
0x156b   :  { %11419 = vmatpush1.bf16.msra.mxu1 %v16247_v17 }
0x156c   :  { %11421 = vmatprep.subr.bf16.mxu1 %v16248_v53  ;;  %v16256_v53 = vld [vmem:[#allocation80_spill] sm:$0xff] }
0x156f   :  { %11423 = vmatpush1.bf16.msra.mxu1 %v16249_v37 }
0x1570   :  { %11425 = vmatprep.subr.bf16.mxu1 %v16250_v2 }
0x1573   :  { %11427 = vmatpush1.bf16.msra.mxu1 %v16251_v15 }
0x1574   :  { %11429 = vmatprep.subr.bf16.mxu1 %v16252_v23 }
0x1577   :  { %11431 = vmatpush1.bf16.msra.mxu1 %v16253_v9 }
0x1578   :  { %11465 = vmatprep.subr.bf16.mxu1 %v16254_v39 }
0x15ed   :  { %v8520_v42 = vpop.f32.mrb[90].mxu0 }
0x15ee   :  { %v8521_v31 = vpop.f32.mrb[91].mxu0 }
0x15ef   :  { %v8522_v27 = vadd.f32 %v8521_v31, %v8520_v42 }
0x15f1   :  { %v6179_v25 = vadd.f32 %v8522_v27, %v16255_v38  ;;  %v14994_v27 = vld [vmem:[%s15428_s15] ss:$0 sm:$0xff] }
0x15f2   :  { %16258 = vst [vmem:[#allocation71_spill] sm:$0xff] %v14994_v27 }
0x160d   :  { %v6246_v17 = vpop.f32.mrb[8].mxu1  ;;  %v6317_v21 = vpop.f32.mrb[92].mxu0 }
0x160e   :  { %v11884_v63 = vadd.f32 %v6246_v17, %v16256_v53  ;;  %v6248_v37 = vpop.f32.mrb[9].mxu1  ;;  %v9482_v56 = vpop.f32.mrb[93].mxu0  ;;  %v6335_v42 = vadd.f32 %v14994_v27, %v6317_v21  ;;  %v16262_v17 = vld [vmem:[#allocation40_spill] sm:$0xff] }
0x160f   :  { %v11885_v15 = vadd.f32 %v6248_v37, %v16257_v46  ;;  %v16268_v46 = vld [vmem:[#allocation67_spill] sm:$0xff] }
0x1610   :  { %v7983_v2 = vmul.f32 -1.442695, %v11884_v63 }
0x1611   :  { %v7984_v23 = vmul.f32 -1.442695, %v11885_v15 }
0x1612   :  { %12248 = vpow2.f32 %v7983_v2 }
0x1613   :  { %12250 = vpow2.f32 %v7984_v23 }
0x161c   :  { %v12249_v9 = vpop.eup %12248 }
0x161d   :  { %v6325_v35 = vadd.f32 1.0, %v12249_v9  ;;  %v12251_v39 = vpop.eup %12250 }
0x161e   :  { %v6332_v1 = vadd.f32 1.0, %v12251_v39  ;;  %v15003_v39 = vld [vmem:[%s15421_s8] ss:$0 sm:$0xff] }
0x161f   :  { %12252 = vrcp.f32 %v6325_v35  ;;  %16260 = vst [vmem:[#allocation83_spill] sm:$0xff] %v15003_v39 }
0x1620   :  { %12254 = vrcp.f32 %v6332_v1 }
0x1629   :  { %v12253_v31 = vpop.eup %12252 }
0x162a   :  { %v6336_v56 = vmul.f32 %v12253_v31, %v6335_v42  ;;  %v12255_v37 = vpop.eup %12254  ;;  %v16263_v31 = vld [vmem:[#allocation81_spill] sm:$0xff] }
0x162b   :  { %v6339_v2 = vsub.f32 1.0, %v12255_v37  ;;  %v6341_v23 = vmul.f32 %v12255_v37, %v16207_v16  ;;  %v16267_v16 = vld [vmem:[#allocation32_spill] sm:$0xff] }
0x162c   :  { %v6337_v63 = vadd.f32 %v6336_v56, %v6179_v25  ;;  %v16261_v25 = vld [vmem:[#allocation34_spill] sm:$0xff] }
0x162e   :  { %12256 = vtanh.f32 %v6337_v63  ;;  %v16264_v63 = vld [vmem:[#allocation39_spill] sm:$0xff] }
0x1638   :  { %v12257_v15 = vpop.eup %12256 }
0x1639   :  { %v6340_v35 = vmul.f32 %v12257_v15, %v6339_v2  ;;  %v16265_v2 = vld [vmem:[#allocation37_spill] sm:$0xff] }
0x163b   :  { %v14998_v9 = vadd.f32 %v6341_v23, %v6340_v35  ;;  %v16266_v23 = vld [vmem:[#allocation33_spill] sm:$0xff] }
0x163d   :  { %16259 = vst [vmem:[#allocation75_spill] sm:$0xff] %v14998_v9  ;;  %v6344_v21 = vmul.f32 %v15003_v39, %v14998_v9 }
0x163f   :  { %6345 = vadd.xlane.f32.xlu1 %v6344_v21 }
0x16cc   :  { %v6346_v1 = vpop.xlane.xlu1 %6345 }
0x16cd   :  { %v6347_v38 = vadd.f32 %v6346_v1, %v16261_v25  ;;  %v6348_v42 = vadd.f32 %v6346_v1, %v16262_v17  ;;  %v6349_v56 = vadd.f32 %v6346_v1, %v16263_v31  ;;  %v6350_v37 = vadd.f32 %v6346_v1, %v16264_v63 }
0x16ce   :  { %v6351_v15 = vadd.f32 %v6346_v1, %v16265_v2  ;;  %v6352_v35 = vadd.f32 %v6346_v1, %v16266_v23  ;;  %v6353_v27 = vadd.f32 %v6346_v1, %v16267_v16  ;;  %v6354_v53 = vadd.f32 %v6346_v1, %v16268_v46 }
0x16cf   :  { %v6355_v39 = vadd.f32 %v16269_v55, %v6347_v38  ;;  %v6356_v21 = vadd.f32 %v16269_v55, %v6348_v42  ;;  %v6357_v25 = vadd.f32 %v16269_v55, %v6349_v56  ;;  %v6358_v17 = vadd.f32 %v16269_v55, %v6350_v37 }
0x16d0   :  { %v6359_v31 = vadd.f32 %v16269_v55, %v6351_v15  ;;  %v6360_v63 = vadd.f32 %v16269_v55, %v6352_v35  ;;  %v6361_v2 = vadd.f32 %v16269_v55, %v6353_v27  ;;  %v6362_v23 = vadd.f32 %v16269_v55, %v6354_v53 }
0x16d1   :  { %v6363_v16 = vsel %vm4041_vm2, %v6355_v39, -inf  ;;  %v6364_v1 = vsel %vm4041_vm2, %v6356_v21, -inf  ;;  %v6365_v38 = vsel %vm4041_vm2, %v6357_v25, -inf  ;;  %v6366_v42 = vsel %vm4041_vm2, %v6358_v17, -inf }
0x16d2   :  { %v6367_v56 = vsel %vm4041_vm2, %v6359_v31, -inf  ;;  %v6369_v37 = vsel %vm4041_vm2, %v6360_v63, -inf  ;;  %v6371_v15 = vsel %vm4041_vm2, %v6361_v2, -inf  ;;  %v6373_v35 = vsel %vm4041_vm2, %v6362_v23, -inf }
0x16d3   :  { %v6368_v46 = vmax.f32 %v6363_v16, %v6367_v56  ;;  %v6370_v27 = vmax.f32 %v6364_v1, %v6369_v37  ;;  %v6372_v9 = vmax.f32 %v6365_v38, %v6371_v15  ;;  %v6374_v55 = vmax.f32 %v6366_v42, %v6373_v35 }
0x16d5   :  { %v6375_v53 = vmax.f32 %v6368_v46, %v6370_v27  ;;  %v6376_v24 = vmax.f32 %v6372_v9, %v6374_v55 }
0x16d7   :  { %v6377_v59 = vmax.f32 %v6375_v53, %v6376_v24 }
0x16d9   :  { %v6378_v8 = vsub.f32 %v6355_v39, %v6377_v59  ;;  %v6379_v61 = vsub.f32 %v6356_v21, %v6377_v59  ;;  %v6380_v45 = vsub.f32 %v6357_v25, %v6377_v59  ;;  %v6381_v48 = vsub.f32 %v6358_v17, %v6377_v59 }
0x16da   :  { %v6382_v57 = vsub.f32 %v6359_v31, %v6377_v59  ;;  %v6383_v0 = vsub.f32 %v6360_v63, %v6377_v59  ;;  %v6384_v13 = vsub.f32 %v6361_v2, %v6377_v59  ;;  %v6385_v1 = vsub.f32 %v6362_v23, %v6377_v59 }
0x16db   :  { %v6386_v22 = vmul.f32 1.442695, %v6378_v8  ;;  %v6388_v36 = vmul.f32 1.442695, %v6379_v61  ;;  %v6390_v28 = vmul.f32 1.442695, %v6380_v45 }
0x16dc   :  { %v6392_v52 = vmul.f32 1.442695, %v6381_v48  ;;  %v6394_v16 = vmul.f32 1.442695, %v6382_v57  ;;  %v6396_v46 = vmul.f32 1.442695, %v6383_v0 }
0x16dd   :  { %12258 = vpow2.f32 %v6386_v22  ;;  %v6398_v24 = vmul.f32 1.442695, %v6384_v13  ;;  %v6400_v9 = vmul.f32 1.442695, %v6385_v1 }
0x16de   :  { %12260 = vpow2.f32 %v6388_v36 }
0x16df   :  { %12262 = vpow2.f32 %v6390_v28 }
0x16e0   :  { %12264 = vpow2.f32 %v6392_v52 }
0x16e1   :  { %12266 = vpow2.f32 %v6394_v16 }
0x16e2   :  { %12268 = vpow2.f32 %v6396_v46 }
0x16e3   :  { %12270 = vpow2.f32 %v6398_v24 }
0x16e4   :  { %12272 = vpow2.f32 %v6400_v9 }
0x16e7   :  { %v12259_v39 = vpop.eup %12258 }
0x16e8   :  { %v12261_v25 = vpop.eup %12260  ;;  %v6402_v45 = vsel %vm4041_vm2, %v12259_v39, 0.0 }
0x16e9   :  { %v12263_v61 = vpop.eup %12262  ;;  %v6403_v22 = vsel %vm4041_vm2, %v12261_v25, 0.0 }
0x16ea   :  { %v12265_v48 = vpop.eup %12264  ;;  %v6404_v36 = vadd.f32 %v6403_v22, %v6402_v45  ;;  %v6405_v28 = vsel %vm4041_vm2, %v12263_v61, 0.0 }
0x16eb   :  { %v12267_v57 = vpop.eup %12266  ;;  %v6407_v0 = vsel %vm4041_vm2, %v12265_v48, 0.0 }
0x16ec   :  { %v6406_v52 = vadd.f32 %v6405_v28, %v6404_v36  ;;  %v12269_v13 = vpop.eup %12268  ;;  %v6409_v59 = vsel %vm4041_vm2, %v12267_v57, 0.0 }
0x16ed   :  { %v12271_v17 = vpop.eup %12270  ;;  %v6411_v63 = vsel %vm4041_vm2, %v12269_v13, 0.0 }
0x16ee   :  { %v6408_v8 = vadd.f32 %v6407_v0, %v6406_v52  ;;  %v12273_v2 = vpop.eup %12272  ;;  %v6413_v21 = vsel %vm4041_vm2, %v12271_v17, 0.0 }
0x16ef   :  { %v6415_v42 = vsel %vm4041_vm2, %v12273_v2, 0.0 }
0x16f0   :  { %v6410_v31 = vadd.f32 %v6409_v59, %v6408_v8 }
0x16f2   :  { %v6412_v23 = vadd.f32 %v6411_v63, %v6410_v31 }
0x16f4   :  { %v6414_v38 = vadd.f32 %v6413_v21, %v6412_v23 }
0x16f6   :  { %v6416_v56 = vadd.f32 %v6415_v42, %v6414_v38 }
0x16f8   :  { %12274 = vrcp.f32 %v6416_v56 }
0x1702   :  { %v12275_v37 = vpop.eup %12274 }
0x1703   :  { %v6425_v15 = vmul.f32 %v12275_v37, %v12273_v2  ;;  %v6418_v35 = vmul.f32 %v12275_v37, %v12259_v39  ;;  %v6419_v27 = vmul.f32 %v12275_v37, %v12261_v25  ;;  %v6420_v55 = vmul.f32 %v12275_v37, %v12263_v61 }
0x1704   :  { %v6421_v53 = vmul.f32 %v12275_v37, %v12265_v48  ;;  %v6422_v16 = vmul.f32 %v12275_v37, %v12267_v57  ;;  %v6423_v1 = vmul.f32 %v12275_v37, %v12269_v13  ;;  %v6424_v46 = vmul.f32 %v12275_v37, %v12271_v17 }
0x1705   :  { %6463 = vperm.xlu1 %11956, %v6425_v15   ;;  %6428 = vperm.xlu0 %11957, %v6418_v35  }
0x1709   :  { %6433 = vperm.xlu0 %11957, %v6419_v27  }
0x170d   :  { %6438 = vperm.xlu0 %11957, %v6420_v55  }
0x1711   :  { %6443 = vperm.xlu0 %11957, %v6421_v53  }
0x1715   :  { %6448 = vperm.xlu0 %11957, %v6422_v16  }
0x1719   :  { %6453 = vperm.xlu0 %11957, %v6423_v1  }
0x171d   :  { %6458 = vperm.xlu0 %11957, %v6424_v46  }
0x1784   :  { %v6429_v24 = vpop.permute.xlu0 %6428  ;;  %v6464_v15 = vpop.permute.xlu1 %6463 }
0x1785   :  { %v6466_v25 = vmul.f32 %v6429_v24, %v15866_v14  ;;  %v6467_v61 = vmul.f32 %v6429_v24, %v14006_v4  ;;  %v6480_v1 = vmul.f32 %v6464_v15, %v15924_v26  ;;  %v6481_v46 = vmul.f32 %v6464_v15, %v15925_v60  ;;  %v16292_v15 = vld [vmem:[#allocation49_spill] sm:$0xff] }
0x1788   :  { %v6434_v9 = vpop.permute.xlu0 %6433 }
0x1789   :  { %v6468_v39 = vmul.f32 %v6434_v9, %v15859_v33  ;;  %v6469_v36 = vmul.f32 %v6434_v9, %v13981_v30 }
0x178b   :  { %v6482_v52 = vadd.f32 %v6468_v39, %v6466_v25  ;;  %v6489_v0 = vadd.f32 %v6469_v36, %v6467_v61  ;;  %v16270_v39 = vld [vmem:[#allocation89_spill] sm:$0xff]  ;;  %v16271_v36 = vld [vmem:[#allocation111_spill] sm:$0xff] }
0x178c   :  { %v6439_v45 = vpop.permute.xlu0 %6438  ;;  %v16272_v25 = vld [vmem:[#allocation91_spill] sm:$0xff]  ;;  %v16273_v61 = vld [vmem:[#allocation93_spill] sm:$0xff] }
0x178d   :  { %v6470_v48 = vmul.f32 %v6439_v45, %v15838_v49  ;;  %v6471_v28 = vmul.f32 %v6439_v45, %v13885_v19 }
0x178f   :  { %v6483_v59 = vadd.f32 %v6482_v52, %v6470_v48  ;;  %v6490_v17 = vadd.f32 %v6489_v0, %v6471_v28  ;;  %v16274_v48 = vld [vmem:[#allocation112_spill] sm:$0xff]  ;;  %v16275_v28 = vld [vmem:[#allocation95_spill] sm:$0xff]  ;;  %v16277_v52 = vld [vmem:[#allocation113_spill] sm:$0xff] }
0x1790   :  { %v6444_v22 = vpop.permute.xlu0 %6443  ;;  %v16278_v0 = vld [vmem:[#allocation99_spill] sm:$0xff] }
0x1791   :  { %v6472_v13 = vmul.f32 %v6444_v22, %v15920_v50  ;;  %v6473_v8 = vmul.f32 %v6444_v22, %v13784_v7 }
0x1793   :  { %v6484_v23 = vadd.f32 %v6483_v59, %v6472_v13  ;;  %v6491_v21 = vadd.f32 %v6490_v17, %v6473_v8  ;;  %v16279_v13 = vld [vmem:[#allocation101_spill] sm:$0xff]  ;;  %v16280_v8 = vld [vmem:[#allocation114_spill] sm:$0xff]  ;;  %v16281_v59 = vld [vmem:[#allocation51_spill] sm:$0xff] }
0x1794   :  { %v6449_v57 = vpop.permute.xlu0 %6448  ;;  %v16282_v17 = vld [vmem:[#allocation100_spill] sm:$0xff] }
0x1795   :  { %v6474_v31 = vmul.f32 %v6449_v57, %v13729_v3  ;;  %v6475_v63 = vmul.f32 %v6449_v57, %v15921_v58  ;;  %v16276_v57 = vld [vmem:[#allocation97_spill] sm:$0xff] }
0x1797   :  { %v6485_v56 = vadd.f32 %v6484_v23, %v6474_v31  ;;  %v6492_v37 = vadd.f32 %v6491_v21, %v6475_v63  ;;  %v16283_v31 = vld [vmem:[#allocation75_spill] sm:$0xff]  ;;  %v16284_v63 = vld [vmem:[#allocation65_spill] sm:$0xff]  ;;  %v16286_v23 = vld [vmem:[#allocation66_spill] sm:$0xff] }
0x1798   :  { %v6454_v2 = vpop.permute.xlu0 %6453  ;;  %v16287_v21 = vld [vmem:[#allocation53_spill] sm:$0xff] }
0x1799   :  { %v6476_v38 = vmul.f32 %v6454_v2, %v13841_v18  ;;  %v6477_v42 = vmul.f32 %v6454_v2, %v15836_v41  ;;  %v16285_v2 = vld [vmem:[#allocation46_spill] sm:$0xff] }
0x179b   :  { %v6486_v27 = vadd.f32 %v6485_v56, %v6476_v38  ;;  %v6493_v55 = vadd.f32 %v6492_v37, %v6477_v42  ;;  %v16288_v38 = vld [vmem:[#allocation84_spill] sm:$0xff]  ;;  %v16290_v56 = vld [vmem:[#allocation50_spill] sm:$0xff]  ;;  %v16291_v37 = vld [vmem:[#allocation55_spill] sm:$0xff] }
0x179c   :  { %v6459_v35 = vpop.permute.xlu0 %6458  ;;  %v16289_v42 = vld [vmem:[#allocation68_spill] sm:$0xff] }
0x179d   :  { %v6478_v53 = vmul.f32 %v6459_v35, %v15922_v5  ;;  %v6479_v16 = vmul.f32 %v6459_v35, %v15923_v43  ;;  %v16293_v35 = vld [vmem:[#allocation48_spill] sm:$0xff] }
0x179f   :  { %v6487_v24 = vadd.f32 %v6486_v27, %v6478_v53  ;;  %v6494_v9 = vadd.f32 %v6493_v55, %v6479_v16  ;;  %v16294_v27 = vld [vmem:[#allocation63_spill] sm:$0xff]  ;;  %v16295_v55 = vld [vmem:[#allocation86_spill] sm:$0xff]  ;;  %v16296_v53 = vld [vmem:[#allocation64_spill] sm:$0xff] }
0x17a0   :  { %v16297_v16 = vld [vmem:[#allocation102_spill] sm:$0xff] }
0x17a1   :  { %v6488_v45 = vadd.f32 %v6487_v24, %v6480_v1  ;;  %v6495_v22 = vadd.f32 %v6494_v9, %v6481_v46  ;;  %v16298_v1 = vld [vmem:[#allocation52_spill] sm:$0xff]  ;;  %v16299_v46 = vld [vmem:[#allocation103_spill] sm:$0xff]  ;;  %v16300_v24 = vld [vmem:[#allocation61_spill] sm:$0xff] }
0x17a2   :  { %v16301_v9 = vld [vmem:[#allocation104_spill] sm:$0xff] }
0x17a3   :  { %6563 = vmatprep.mubr.f32.mxu1 %v6495_v22  ;;  %6634 = vmatprep.mubr.f32.mxu0 %v6495_v22  ;;  %v16303_v22 = vld [vmem:[#allocation105_spill] sm:$0xff] }
0x17a4   :  { %6564 = vmatmul.mubr.f32.vlgmr.msra.gmra.mrb[10].mxu1 %v6488_v45  ;;  %6635 = vmatmul.mubr.f32.vlgmr.msra.gmra.mrb[94].mxu0 %v6488_v45  ;;  %v16302_v45 = vld [vmem:[#allocation70_spill] sm:$0xff] }
0x17a5   :  { %11467 = vmatpush1.bf16.msra.mxu1 %v14138_v54  ;;  %11498 = vmatpush3.bf16.msra.mxu0 %v14332_v47 }
0x17a6   :  { %11469 = vmatprep.subr.bf16.mxu1 %v14143_v51  ;;  %11499 = vmatprep.subr.bf16.mxu0 %v15941_v34 }
0x17a7   :  { %6707 = vmatprep.mubr.f32.mxu1 %v15752_v40  ;;  %9515 = vmatprep.mubr.msk.f32.mxu0 %vm12604_vm1, %v15752_v40 }
0x17a9   :  { %11471 = vmatpush1.bf16.msra.mxu1 %v14151_v62  ;;  %11501 = vmatpush3.bf16.msra.mxu0 %v14337_v20 }
0x17aa   :  { %11473 = vmatprep.subr.bf16.mxu1 %v14156_v11  ;;  %11502 = vmatprep.subr.bf16.mxu0 %v15941_v34 }
0x17ad   :  { %11475 = vmatpush1.bf16.msra.mxu1 %v14164_v29  ;;  %11504 = vmatpush3.bf16.msra.mxu0 %v14343_v10 }
0x17ae   :  { %11477 = vmatprep.subr.bf16.mxu1 %v15966_v6  ;;  %11505 = vmatprep.subr.bf16.mxu0 %v15941_v34 }
0x17b1   :  { %11479 = vmatpush1.bf16.msra.mxu1 %v15967_v12  ;;  %11507 = vmatpush3.bf16.msra.mxu0 %v14347_v44 }
0x17b2   :  { %11481 = vmatprep.subr.bf16.mxu1 %v15968_v32  ;;  %11508 = vmatprep.subr.bf16.mxu0 %v15941_v34 }
0x17b5   :  { %11483 = vmatpush1.bf16.msra.mxu1 %v16270_v39  ;;  %11510 = vmatpush3.bf16.msra.mxu0 %v16271_v36 }
0x17b6   :  { %11485 = vmatprep.subr.bf16.mxu1 %v16272_v25  ;;  %11511 = vmatprep.subr.bf16.mxu0 %v15941_v34 }
0x17b9   :  { %11487 = vmatpush1.bf16.msra.mxu1 %v16273_v61  ;;  %11513 = vmatpush3.bf16.msra.mxu0 %v16274_v48 }
0x17ba   :  { %11489 = vmatprep.subr.bf16.mxu1 %v16275_v28  ;;  %11514 = vmatprep.subr.bf16.mxu0 %v15941_v34 }
0x17bd   :  { %11491 = vmatpush1.bf16.msra.mxu1 %v16276_v57  ;;  %11516 = vmatpush3.bf16.msra.mxu0 %v16277_v52 }
0x17be   :  { %11493 = vmatprep.subr.bf16.mxu1 %v16278_v0  ;;  %11517 = vmatprep.subr.bf16.mxu0 %v15941_v34 }
0x17c1   :  { %11495 = vmatpush1.bf16.msra.mxu1 %v16279_v13  ;;  %11519 = vmatpush3.bf16.msra.mxu0 %v16280_v8 }
0x17c2   :  { %11521 = vmatprep.subr.bf16.mxu1 %v16281_v59  ;;  %11585 = vmatprep.subr.bf16.mxu0 %v16282_v17 }
0x17c4   :  { %6708 = vmatmul.mubr.f32.vlgmr.msra.gmra.mrb[10].mxu1 %v16283_v31  ;;  %9516 = vmatmul.mubr.f32.vlgmr.msra.gmra.mrb[96].mxu0 %v16283_v31 }
0x17c5   :  { %11523 = vmatpush1.bf16.msra.mxu1 %v16284_v63  ;;  %11587 = vmatpush3.bf16.msra.mxu0 %v16285_v2 }
0x17c6   :  { %11525 = vmatprep.subr.bf16.mxu1 %v16286_v23  ;;  %11589 = vmatprep.subr.bf16.mxu0 %v16287_v21  ;;  %v16333_v21 = vld [vmem:[#allocation82_spill] sm:$0xff] }
0x17c9   :  { %11527 = vmatpush1.bf16.msra.mxu1 %v16288_v38  ;;  %11591 = vmatpush3.bf16.msra.mxu0 %v16289_v42 }
0x17ca   :  { %11529 = vmatprep.subr.bf16.mxu1 %v16290_v56  ;;  %11593 = vmatprep.subr.bf16.mxu0 %v16291_v37 }
0x17cd   :  { %11531 = vmatpush1.bf16.msra.mxu1 %v16292_v15  ;;  %11595 = vmatpush3.bf16.msra.mxu0 %v16293_v35  ;;  %v16304_v35 = vld [vmem:[#allocation62_spill] sm:$0xff] }
0x17ce   :  { %11533 = vmatprep.subr.bf16.mxu1 %v16294_v27  ;;  %11597 = vmatprep.subr.bf16.mxu0 %v16295_v55  ;;  %v16305_v27 = vld [vmem:[#allocation106_spill] sm:$0xff]  ;;  %v16306_v55 = vld [vmem:[#allocation69_spill] sm:$0xff] }
0x17d1   :  { %11535 = vmatpush1.bf16.msra.mxu1 %v16296_v53  ;;  %11599 = vmatpush3.bf16.msra.mxu0 %v16297_v16  ;;  %v16307_v53 = vld [vmem:[#allocation107_spill] sm:$0xff]  ;;  %v16308_v16 = vld [vmem:[#allocation30_spill] sm:$0xff] }
0x17d2   :  { %11537 = vmatprep.subr.bf16.mxu1 %v16298_v1  ;;  %11601 = vmatprep.subr.bf16.mxu0 %v16299_v46  ;;  %v16309_v1 = vld [vmem:[#allocation108_spill] sm:$0xff]  ;;  %v16310_v46 = vld [vmem:[#allocation35_spill] sm:$0xff] }
0x17d5   :  { %11539 = vmatpush1.bf16.msra.mxu1 %v16300_v24  ;;  %11603 = vmatpush3.bf16.msra.mxu0 %v16301_v9  ;;  %v16311_v24 = vld [vmem:[#allocation109_spill] sm:$0xff]  ;;  %v16312_v9 = vld [vmem:[#allocation36_spill] sm:$0xff] }
0x17d6   :  { %11541 = vmatprep.subr.bf16.mxu1 %v16302_v45  ;;  %11605 = vmatprep.subr.bf16.mxu0 %v16303_v22  ;;  %v16313_v45 = vld [vmem:[#allocation110_spill] sm:$0xff]  ;;  %v16314_v22 = vld [vmem:[#allocation31_spill] sm:$0xff] }
0x17d9   :  { %11543 = vmatpush1.bf16.msra.mxu1 %v16304_v35  ;;  %11607 = vmatpush3.bf16.msra.mxu0 %v16305_v27  ;;  %v16315_v27 = vld [vmem:[#allocation38_spill] sm:$0xff] }
0x17da   :  { %11545 = vmatprep.subr.bf16.mxu1 %v16306_v55  ;;  %11609 = vmatprep.subr.bf16.mxu0 %v16307_v53  ;;  %v16316_v55 = vld [vmem:[#allocation54_spill] sm:$0xff]  ;;  %v16317_v53 = vld [vmem:[#allocation45_spill] sm:$0xff] }
0x17db   :  { %v16325_v35 = vld [vmem:[#allocation90_spill] sm:$0xff] }
0x17dd   :  { %11547 = vmatpush1.bf16.msra.mxu1 %v16308_v16  ;;  %11611 = vmatpush3.bf16.msra.mxu0 %v16309_v1  ;;  %v16318_v16 = vld [vmem:[#allocation59_spill] sm:$0xff]  ;;  %v16319_v1 = vld [vmem:[#allocation60_spill] sm:$0xff] }
0x17de   :  { %11549 = vmatprep.subr.bf16.mxu1 %v16310_v46  ;;  %11613 = vmatprep.subr.bf16.mxu0 %v16311_v24  ;;  %v16320_v46 = vld [vmem:[#allocation44_spill] sm:$0xff] }
0x17df   :  { %v16321_v24 = vld [vmem:[#allocation56_spill] sm:$0xff] }
0x17e1   :  { %11551 = vmatpush1.bf16.msra.mxu1 %v16312_v9  ;;  %11615 = vmatpush3.bf16.msra.mxu0 %v16313_v45  ;;  %v16322_v9 = vld [vmem:[#allocation57_spill] sm:$0xff] }
0x17e2   :  { %11553 = vmatprep.subr.bf16.mxu1 %v16314_v22  ;;  %11648 = vmatprep.subr.bf16.mxu0 %v15941_v34  ;;  %v16323_v45 = vld [vmem:[#allocation85_spill] sm:$0xff]  ;;  %v16324_v22 = vld [vmem:[#allocation88_spill] sm:$0xff] }
0x17e5   :  { %11555 = vmatpush1.bf16.msra.mxu1 %v16315_v27  ;;  %v16326_v27 = vld [vmem:[#allocation92_spill] sm:$0xff] }
0x17e6   :  { %11557 = vmatprep.subr.bf16.mxu1 %v16316_v55  ;;  %v16327_v55 = vld [vmem:[#allocation94_spill] sm:$0xff] }
0x17e9   :  { %11559 = vmatpush1.bf16.msra.mxu1 %v16317_v53  ;;  %v16328_v53 = vld [vmem:[#allocation96_spill] sm:$0xff] }
0x17ea   :  { %11561 = vmatprep.subr.bf16.mxu1 %v16318_v16  ;;  %v16329_v16 = vld [vmem:[#allocation98_spill] sm:$0xff] }
0x17ed   :  { %11563 = vmatpush1.bf16.msra.mxu1 %v16319_v1  ;;  %v16330_v1 = vld [vmem:[#allocation47_spill] sm:$0xff] }
0x17ee   :  { %11565 = vmatprep.subr.bf16.mxu1 %v16320_v46 }
0x17f1   :  { %11567 = vmatpush1.bf16.msra.mxu1 %v16321_v24 }
0x17f2   :  { %11569 = vmatprep.subr.bf16.mxu1 %v16322_v9  ;;  %v16331_v9 = vld [vmem:[#allocation76_spill] sm:$0xff] }
0x17f5   :  { %11571 = vmatpush1.bf16.msra.mxu1 %v16323_v45 }
0x17f6   :  { %11573 = vmatprep.subr.bf16.mxu1 %v16324_v22  ;;  %v16332_v22 = vld [vmem:[#allocation80_spill] sm:$0xff] }
0x17f9   :  { %11575 = vmatpush1.bf16.msra.mxu1 %v16325_v35 }
0x17fa   :  { %11577 = vmatprep.subr.bf16.mxu1 %v16326_v27 }
0x17fd   :  { %11579 = vmatpush1.bf16.msra.mxu1 %v16327_v55 }
0x17fe   :  { %11581 = vmatprep.subr.bf16.mxu1 %v16328_v53 }
0x1801   :  { %11583 = vmatpush1.bf16.msra.mxu1 %v16329_v16 }
0x1802   :  { %11617 = vmatprep.subr.bf16.mxu1 %v16330_v1 }
0x1877   :  { %v8572_v46 = vpop.f32.mrb[94].mxu0 }
0x1878   :  { %v8573_v24 = vpop.f32.mrb[95].mxu0 }
0x1879   :  { %v8574_v15 = vadd.f32 %v8573_v24, %v8572_v46  ;;  %v16334_v46 = vld [vmem:[#allocation71_spill] sm:$0xff] }
0x187b   :  { %v6642_v37 = vadd.f32 %v8574_v15, %v16331_v9 }
0x1897   :  { %v6709_v45 = vpop.f32.mrb[10].mxu1  ;;  %v6780_v56 = vpop.f32.mrb[96].mxu0 }
0x1898   :  { %v11886_v42 = vadd.f32 %v6709_v45, %v16332_v22  ;;  %v6711_v35 = vpop.f32.mrb[11].mxu1  ;;  %v9517_v38 = vpop.f32.mrb[97].mxu0  ;;  %v6798_v24 = vadd.f32 %v16334_v46, %v6780_v56  ;;  %v16338_v46 = vld [vmem:[#allocation40_spill] sm:$0xff]  ;;  %v16342_v22 = vld [vmem:[#allocation33_spill] sm:$0xff] }
0x1899   :  { %v11887_v55 = vadd.f32 %v6711_v35, %v16333_v21 }
0x189a   :  { %v7985_v27 = vmul.f32 -1.442695, %v11886_v42 }
0x189b   :  { %v7986_v53 = vmul.f32 -1.442695, %v11887_v55 }
0x189c   :  { %12276 = vpow2.f32 %v7985_v27 }
0x189d   :  { %12278 = vpow2.f32 %v7986_v53  ;;  %v16336_v53 = vld [vmem:[#allocation83_spill] sm:$0xff] }
0x18a6   :  { %v12277_v16 = vpop.eup %12276 }
0x18a7   :  { %v6788_v23 = vadd.f32 1.0, %v12277_v16  ;;  %v12279_v1 = vpop.eup %12278 }
0x18a8   :  { %v6795_v2 = vadd.f32 1.0, %v12279_v1  ;;  %v16337_v1 = vld [vmem:[#allocation34_spill] sm:$0xff] }
0x18a9   :  { %12280 = vrcp.f32 %v6788_v23 }
0x18aa   :  { %12282 = vrcp.f32 %v6795_v2  ;;  %v16339_v2 = vld [vmem:[#allocation81_spill] sm:$0xff] }
0x18b3   :  { %v12281_v15 = vpop.eup %12280 }
0x18b4   :  { %v6799_v9 = vmul.f32 %v12281_v15, %v6798_v24  ;;  %v12283_v45 = vpop.eup %12282 }
0x18b5   :  { %v6802_v38 = vsub.f32 1.0, %v12283_v45  ;;  %v6804_v35 = vmul.f32 %v12283_v45, %v16283_v31  ;;  %v15157_v31 = vld [vmem:[#allocation7] ss:$0 sm:$0xff] }
0x18b6   :  { %v6800_v63 = vadd.f32 %v6799_v9, %v6642_v37  ;;  %v16341_v9 = vld [vmem:[#allocation37_spill] sm:$0xff]  ;;  %16345 = vst [vmem:[#allocation43_spill] sm:$0xff] %v15157_v31 }
0x18b8   :  { %12284 = vtanh.f32 %v6800_v63  ;;  %v16340_v63 = vld [vmem:[#allocation39_spill] sm:$0xff] }
0x18c2   :  { %v12285_v42 = vpop.eup %12284 }
0x18c3   :  { %v6803_v27 = vmul.f32 %v12285_v42, %v6802_v38  ;;  %v16343_v38 = vld [vmem:[#allocation32_spill] sm:$0xff] }
0x18c5   :  { %v15145_v55 = vadd.f32 %v6804_v35, %v6803_v27  ;;  %v16344_v35 = vld [vmem:[#allocation67_spill] sm:$0xff] }
0x18c7   :  { %16335 = vst [vmem:[#allocation74_spill] sm:$0xff] %v15145_v55  ;;  %v6807_v23 = vmul.f32 %v16336_v53, %v15145_v55 }
0x18c9   :  { %6808 = vadd.xlane.f32.xlu0 %v6807_v23 }
0x1956   :  { %v6809_v16 = vpop.xlane.xlu0 %6808 }
0x1957   :  { %v6810_v56 = vadd.f32 %v6809_v16, %v16337_v1  ;;  %v6811_v24 = vadd.f32 %v6809_v16, %v16338_v46  ;;  %v6812_v37 = vadd.f32 %v6809_v16, %v16339_v2  ;;  %v6813_v15 = vadd.f32 %v6809_v16, %v16340_v63 }
0x1958   :  { %v6814_v21 = vadd.f32 %v6809_v16, %v16341_v9  ;;  %v6815_v45 = vadd.f32 %v6809_v16, %v16342_v22  ;;  %v6816_v42 = vadd.f32 %v6809_v16, %v16343_v38  ;;  %v6817_v27 = vadd.f32 %v6809_v16, %v16344_v35 }
0x1959   :  { %v6818_v53 = vadd.f32 %v15157_v31, %v6810_v56  ;;  %v6819_v23 = vadd.f32 %v15157_v31, %v6811_v24  ;;  %v6820_v46 = vadd.f32 %v15157_v31, %v6812_v37  ;;  %v6821_v2 = vadd.f32 %v15157_v31, %v6813_v15 }
0x195a   :  { %v6823_v63 = vadd.f32 %v15157_v31, %v6815_v45  ;;  %v6824_v9 = vadd.f32 %v15157_v31, %v6816_v42  ;;  %v6825_v22 = vadd.f32 %v15157_v31, %v6817_v27  ;;  %v6822_v38 = vadd.f32 %v15157_v31, %v6814_v21 }
0x195b   :  { %v6827_v16 = vsel %vm4041_vm2, %v6819_v23, -inf  ;;  %v6828_v35 = vsel %vm4041_vm2, %v6820_v46, -inf  ;;  %v6829_v56 = vsel %vm4041_vm2, %v6821_v2, -inf  ;;  %v6826_v24 = vsel %vm4041_vm2, %v6818_v53, -inf }
0x195c   :  { %v6832_v37 = vsel %vm4041_vm2, %v6823_v63, -inf  ;;  %v6834_v15 = vsel %vm4041_vm2, %v6824_v9, -inf  ;;  %v6836_v45 = vsel %vm4041_vm2, %v6825_v22, -inf  ;;  %v6830_v42 = vsel %vm4041_vm2, %v6822_v38, -inf }
0x195d   :  { %v6833_v1 = vmax.f32 %v6827_v16, %v6832_v37  ;;  %v6835_v27 = vmax.f32 %v6828_v35, %v6834_v15  ;;  %v6837_v55 = vmax.f32 %v6829_v56, %v6836_v45  ;;  %v6831_v21 = vmax.f32 %v6826_v24, %v6830_v42 }
0x195f   :  { %v6839_v31 = vmax.f32 %v6835_v27, %v6837_v55  ;;  %v6838_v17 = vmax.f32 %v6831_v21, %v6833_v1 }
0x1961   :  { %v6840_v59 = vmax.f32 %v6838_v17, %v6839_v31 }
0x1963   :  { %v6841_v8 = vsub.f32 %v6818_v53, %v6840_v59  ;;  %v6842_v13 = vsub.f32 %v6819_v23, %v6840_v59  ;;  %v6843_v0 = vsub.f32 %v6820_v46, %v6840_v59  ;;  %v6844_v52 = vsub.f32 %v6821_v2, %v6840_v59 }
0x1964   :  { %v6845_v57 = vsub.f32 %v6822_v38, %v6840_v59  ;;  %v6846_v25 = vsub.f32 %v6823_v63, %v6840_v59  ;;  %v6847_v39 = vsub.f32 %v6824_v9, %v6840_v59  ;;  %v6848_v35 = vsub.f32 %v6825_v22, %v6840_v59 }
0x1965   :  { %v6849_v28 = vmul.f32 1.442695, %v6841_v8  ;;  %v6851_v48 = vmul.f32 1.442695, %v6842_v13  ;;  %v6853_v61 = vmul.f32 1.442695, %v6843_v0 }
0x1966   :  { %v6855_v36 = vmul.f32 1.442695, %v6844_v52  ;;  %v6857_v16 = vmul.f32 1.442695, %v6845_v57  ;;  %v6859_v55 = vmul.f32 1.442695, %v6846_v25 }
0x1967   :  { %12286 = vpow2.f32 %v6849_v28  ;;  %v6861_v17 = vmul.f32 1.442695, %v6847_v39  ;;  %v6863_v31 = vmul.f32 1.442695, %v6848_v35 }
0x1968   :  { %12288 = vpow2.f32 %v6851_v48 }
0x1969   :  { %12290 = vpow2.f32 %v6853_v61 }
0x196a   :  { %12292 = vpow2.f32 %v6855_v36 }
0x196b   :  { %12294 = vpow2.f32 %v6857_v16 }
0x196c   :  { %12296 = vpow2.f32 %v6859_v55 }
0x196d   :  { %12298 = vpow2.f32 %v6861_v17 }
0x196e   :  { %12300 = vpow2.f32 %v6863_v31 }
0x1971   :  { %v12287_v1 = vpop.eup %12286 }
0x1972   :  { %v12289_v46 = vpop.eup %12288  ;;  %v6865_v0 = vsel %vm4041_vm2, %v12287_v1, 0.0 }
0x1973   :  { %v12291_v13 = vpop.eup %12290  ;;  %v6866_v28 = vsel %vm4041_vm2, %v12289_v46, 0.0 }
0x1974   :  { %v12293_v52 = vpop.eup %12292  ;;  %v6867_v48 = vadd.f32 %v6866_v28, %v6865_v0  ;;  %v6868_v61 = vsel %vm4041_vm2, %v12291_v13, 0.0 }
0x1975   :  { %v12295_v57 = vpop.eup %12294  ;;  %v6870_v25 = vsel %vm4041_vm2, %v12293_v52, 0.0 }
0x1976   :  { %v6869_v36 = vadd.f32 %v6868_v61, %v6867_v48  ;;  %v12297_v39 = vpop.eup %12296  ;;  %v6872_v59 = vsel %vm4041_vm2, %v12295_v57, 0.0 }
0x1977   :  { %v12299_v22 = vpop.eup %12298  ;;  %v6874_v63 = vsel %vm4041_vm2, %v12297_v39, 0.0 }
0x1978   :  { %v6871_v8 = vadd.f32 %v6870_v25, %v6869_v36  ;;  %v12301_v9 = vpop.eup %12300  ;;  %v6876_v53 = vsel %vm4041_vm2, %v12299_v22, 0.0 }
0x1979   :  { %v6878_v56 = vsel %vm4041_vm2, %v12301_v9, 0.0 }
0x197a   :  { %v6873_v2 = vadd.f32 %v6872_v59, %v6871_v8 }
0x197c   :  { %v6875_v38 = vadd.f32 %v6874_v63, %v6873_v2 }
0x197e   :  { %v6877_v23 = vadd.f32 %v6876_v53, %v6875_v38 }
0x1980   :  { %v6879_v24 = vadd.f32 %v6878_v56, %v6877_v23 }
0x1982   :  { %12302 = vrcp.f32 %v6879_v24 }
0x198c   :  { %v12303_v37 = vpop.eup %12302 }
0x198d   :  { %v6885_v15 = vmul.f32 %v12303_v37, %v12295_v57  ;;  %v6881_v45 = vmul.f32 %v12303_v37, %v12287_v1  ;;  %v6882_v42 = vmul.f32 %v12303_v37, %v12289_v46  ;;  %v6883_v27 = vmul.f32 %v12303_v37, %v12291_v13 }
0x198e   :  { %v6884_v21 = vmul.f32 %v12303_v37, %v12293_v52  ;;  %v6886_v16 = vmul.f32 %v12303_v37, %v12297_v39  ;;  %v6887_v35 = vmul.f32 %v12303_v37, %v12299_v22  ;;  %v6888_v55 = vmul.f32 %v12303_v37, %v12301_v9 }
0x198f   :  { %6911 = vperm.xlu0 %11957, %v6885_v15   ;;  %6891 = vperm.xlu1 %11956, %v6881_v45  }
0x1993   :  { %6896 = vperm.xlu1 %11956, %v6882_v42  }
0x1997   :  { %6901 = vperm.xlu1 %11956, %v6883_v27  }
0x199b   :  { %6906 = vperm.xlu1 %11956, %v6884_v21  }
0x199f   :  { %6916 = vperm.xlu1 %11956, %v6886_v16  }
0x19a3   :  { %6921 = vperm.xlu1 %11956, %v6887_v35  }
0x19a7   :  { %6926 = vperm.xlu1 %11956, %v6888_v55  }
0x1a0e   :  { %v6892_v17 = vpop.permute.xlu1 %6891  ;;  %v6912_v22 = vpop.permute.xlu0 %6911 }
0x1a0f   :  { %v6929_v46 = vmul.f32 %v6892_v17, %v15866_v14  ;;  %v6930_v13 = vmul.f32 %v6892_v17, %v14006_v4  ;;  %v6937_v38 = vmul.f32 %v6912_v22, %v13729_v3  ;;  %v6938_v53 = vmul.f32 %v6912_v22, %v15921_v58  ;;  %v16358_v22 = vld [vmem:[#allocation100_spill] sm:$0xff] }
0x1a12   :  { %v6897_v31 = vpop.permute.xlu1 %6896 }
0x1a13   :  { %v6931_v0 = vmul.f32 %v6897_v31, %v15859_v33  ;;  %v6932_v1 = vmul.f32 %v6897_v31, %v13981_v30 }
0x1a15   :  { %v6945_v61 = vadd.f32 %v6931_v0, %v6929_v46  ;;  %v6952_v57 = vadd.f32 %v6932_v1, %v6930_v13  ;;  %v16347_v46 = vld [vmem:[#allocation111_spill] sm:$0xff] }
0x1a16   :  { %v6902_v28 = vpop.permute.xlu1 %6901  ;;  %v16348_v13 = vld [vmem:[#allocation91_spill] sm:$0xff] }
0x1a17   :  { %v6933_v52 = vmul.f32 %v6902_v28, %v15838_v49  ;;  %v6934_v48 = vmul.f32 %v6902_v28, %v13885_v19  ;;  %v16346_v28 = vld [vmem:[#allocation89_spill] sm:$0xff] }
0x1a19   :  { %v6946_v25 = vadd.f32 %v6945_v61, %v6933_v52  ;;  %v6953_v39 = vadd.f32 %v6952_v57, %v6934_v48  ;;  %v16349_v52 = vld [vmem:[#allocation93_spill] sm:$0xff]  ;;  %v16350_v48 = vld [vmem:[#allocation112_spill] sm:$0xff]  ;;  %v16351_v61 = vld [vmem:[#allocation95_spill] sm:$0xff] }
0x1a1a   :  { %v6907_v36 = vpop.permute.xlu1 %6906  ;;  %v16352_v57 = vld [vmem:[#allocation97_spill] sm:$0xff] }
0x1a1b   :  { %v6935_v8 = vmul.f32 %v6907_v36, %v15920_v50  ;;  %v6936_v59 = vmul.f32 %v6907_v36, %v13784_v7  ;;  %v16353_v36 = vld [vmem:[#allocation113_spill] sm:$0xff] }
0x1a1d   :  { %v6947_v2 = vadd.f32 %v6946_v25, %v6935_v8  ;;  %v6954_v63 = vadd.f32 %v6953_v39, %v6936_v59  ;;  %v16354_v25 = vld [vmem:[#allocation99_spill] sm:$0xff]  ;;  %v16355_v39 = vld [vmem:[#allocation101_spill] sm:$0xff]  ;;  %v16356_v8 = vld [vmem:[#allocation114_spill] sm:$0xff] }
0x1a1e   :  { %v6917_v9 = vpop.permute.xlu1 %6916  ;;  %v16357_v59 = vld [vmem:[#allocation51_spill] sm:$0xff] }
0x1a1f   :  { %v6948_v23 = vadd.f32 %v6947_v2, %v6937_v38  ;;  %v6955_v56 = vadd.f32 %v6954_v63, %v6938_v53  ;;  %v6939_v24 = vmul.f32 %v6917_v9, %v13841_v18  ;;  %v6940_v37 = vmul.f32 %v6917_v9, %v15836_v41  ;;  %v16359_v2 = vld [vmem:[#allocation74_spill] sm:$0xff]  ;;  %v16360_v63 = vld [vmem:[#allocation65_spill] sm:$0xff] }
0x1a20   :  { %v16361_v9 = vld [vmem:[#allocation46_spill] sm:$0xff]  ;;  %v16363_v53 = vld [vmem:[#allocation53_spill] sm:$0xff] }
0x1a21   :  { %v6949_v27 = vadd.f32 %v6948_v23, %v6939_v24  ;;  %v6956_v21 = vadd.f32 %v6955_v56, %v6940_v37  ;;  %v16362_v38 = vld [vmem:[#allocation66_spill] sm:$0xff]  ;;  %v16364_v23 = vld [vmem:[#allocation84_spill] sm:$0xff]  ;;  %v16367_v37 = vld [vmem:[#allocation55_spill] sm:$0xff] }
0x1a22   :  { %v6922_v15 = vpop.permute.xlu1 %6921  ;;  %v16365_v56 = vld [vmem:[#allocation68_spill] sm:$0xff]  ;;  %v16366_v24 = vld [vmem:[#allocation50_spill] sm:$0xff] }
0x1a23   :  { %v6941_v45 = vmul.f32 %v6922_v15, %v15922_v5  ;;  %v6942_v42 = vmul.f32 %v6922_v15, %v15923_v43  ;;  %v16368_v15 = vld [vmem:[#allocation49_spill] sm:$0xff] }
0x1a25   :  { %v6950_v35 = vadd.f32 %v6949_v27, %v6941_v45  ;;  %v6957_v55 = vadd.f32 %v6956_v21, %v6942_v42  ;;  %v16369_v45 = vld [vmem:[#allocation48_spill] sm:$0xff]  ;;  %v16370_v42 = vld [vmem:[#allocation63_spill] sm:$0xff]  ;;  %v16371_v27 = vld [vmem:[#allocation86_spill] sm:$0xff] }
0x1a26   :  { %v6927_v16 = vpop.permute.xlu1 %6926  ;;  %v16372_v21 = vld [vmem:[#allocation64_spill] sm:$0xff] }
0x1a27   :  { %v6943_v17 = vmul.f32 %v6927_v16, %v15924_v26  ;;  %v6944_v31 = vmul.f32 %v6927_v16, %v15925_v60  ;;  %v16373_v16 = vld [vmem:[#allocation102_spill] sm:$0xff] }
0x1a29   :  { %v6951_v0 = vadd.f32 %v6950_v35, %v6943_v17  ;;  %v6958_v1 = vadd.f32 %v6957_v55, %v6944_v31  ;;  %v16374_v35 = vld [vmem:[#allocation52_spill] sm:$0xff]  ;;  %v16375_v55 = vld [vmem:[#allocation103_spill] sm:$0xff]  ;;  %v16376_v17 = vld [vmem:[#allocation61_spill] sm:$0xff] }
0x1a2a   :  { %v16377_v31 = vld [vmem:[#allocation104_spill] sm:$0xff] }
0x1a2b   :  { %7026 = vmatprep.mubr.f32.mxu1 %v6958_v1  ;;  %7097 = vmatprep.mubr.f32.mxu0 %v6958_v1  ;;  %v16379_v1 = vld [vmem:[#allocation105_spill] sm:$0xff] }
0x1a2c   :  { %7027 = vmatmul.mubr.f32.vlgmr.msra.gmra.mrb[12].mxu1 %v6951_v0  ;;  %7098 = vmatmul.mubr.f32.vlgmr.msra.gmra.mrb[98].mxu0 %v6951_v0  ;;  %v16378_v0 = vld [vmem:[#allocation70_spill] sm:$0xff] }
0x1a2d   :  { %11619 = vmatpush1.bf16.msra.mxu1 %v14138_v54  ;;  %11650 = vmatpush3.bf16.msra.mxu0 %v14332_v47 }
0x1a2e   :  { %11621 = vmatprep.subr.bf16.mxu1 %v14143_v51  ;;  %11651 = vmatprep.subr.bf16.mxu0 %v15941_v34 }
0x1a2f   :  { %7170 = vmatprep.mubr.f32.mxu1 %v15752_v40  ;;  %9550 = vmatprep.mubr.msk.f32.mxu0 %vm12604_vm1, %v15752_v40 }
0x1a31   :  { %11623 = vmatpush1.bf16.msra.mxu1 %v14151_v62  ;;  %11653 = vmatpush3.bf16.msra.mxu0 %v14337_v20 }
0x1a32   :  { %11625 = vmatprep.subr.bf16.mxu1 %v14156_v11  ;;  %11654 = vmatprep.subr.bf16.mxu0 %v15941_v34 }
0x1a35   :  { %11627 = vmatpush1.bf16.msra.mxu1 %v14164_v29  ;;  %11656 = vmatpush3.bf16.msra.mxu0 %v14343_v10 }
0x1a36   :  { %11629 = vmatprep.subr.bf16.mxu1 %v15966_v6  ;;  %11657 = vmatprep.subr.bf16.mxu0 %v15941_v34 }
0x1a39   :  { %11631 = vmatpush1.bf16.msra.mxu1 %v15967_v12  ;;  %11659 = vmatpush3.bf16.msra.mxu0 %v14347_v44 }
0x1a3a   :  { %11633 = vmatprep.subr.bf16.mxu1 %v15968_v32  ;;  %11660 = vmatprep.subr.bf16.mxu0 %v15941_v34 }
0x1a3d   :  { %11635 = vmatpush1.bf16.msra.mxu1 %v16346_v28  ;;  %11662 = vmatpush3.bf16.msra.mxu0 %v16347_v46 }
0x1a3e   :  { %11637 = vmatprep.subr.bf16.mxu1 %v16348_v13  ;;  %11663 = vmatprep.subr.bf16.mxu0 %v15941_v34 }
0x1a41   :  { %11639 = vmatpush1.bf16.msra.mxu1 %v16349_v52  ;;  %11665 = vmatpush3.bf16.msra.mxu0 %v16350_v48 }
0x1a42   :  { %11641 = vmatprep.subr.bf16.mxu1 %v16351_v61  ;;  %11666 = vmatprep.subr.bf16.mxu0 %v15941_v34 }
0x1a45   :  { %11643 = vmatpush1.bf16.msra.mxu1 %v16352_v57  ;;  %11668 = vmatpush3.bf16.msra.mxu0 %v16353_v36 }
0x1a46   :  { %11645 = vmatprep.subr.bf16.mxu1 %v16354_v25  ;;  %11669 = vmatprep.subr.bf16.mxu0 %v15941_v34 }
0x1a49   :  { %11647 = vmatpush1.bf16.msra.mxu1 %v16355_v39  ;;  %11671 = vmatpush3.bf16.msra.mxu0 %v16356_v8 }
0x1a4a   :  { %11673 = vmatprep.subr.bf16.mxu1 %v16357_v59  ;;  %11737 = vmatprep.subr.bf16.mxu0 %v16358_v22  ;;  %v16380_v59 = vld [vmem:[#allocation62_spill] sm:$0xff] }
0x1a4b   :  { %v16381_v22 = vld [vmem:[#allocation106_spill] sm:$0xff] }
0x1a4c   :  { %7171 = vmatmul.mubr.f32.vlgmr.msra.gmra.mrb[12].mxu1 %v16359_v2  ;;  %9551 = vmatmul.mubr.f32.vlgmr.msra.gmra.mrb[100].mxu0 %v16359_v2 }
0x1a4d   :  { %11675 = vmatpush1.bf16.msra.mxu1 %v16360_v63  ;;  %11739 = vmatpush3.bf16.msra.mxu0 %v16361_v9  ;;  %v16382_v63 = vld [vmem:[#allocation69_spill] sm:$0xff]  ;;  %v16383_v9 = vld [vmem:[#allocation107_spill] sm:$0xff] }
0x1a4e   :  { %11677 = vmatprep.subr.bf16.mxu1 %v16362_v38  ;;  %11741 = vmatprep.subr.bf16.mxu0 %v16363_v53  ;;  %v16384_v38 = vld [vmem:[#allocation30_spill] sm:$0xff]  ;;  %v16385_v53 = vld [vmem:[#allocation108_spill] sm:$0xff] }
0x1a51   :  { %11679 = vmatpush1.bf16.msra.mxu1 %v16364_v23  ;;  %11743 = vmatpush3.bf16.msra.mxu0 %v16365_v56  ;;  %v16386_v23 = vld [vmem:[#allocation35_spill] sm:$0xff]  ;;  %v16387_v56 = vld [vmem:[#allocation109_spill] sm:$0xff] }
0x1a52   :  { %11681 = vmatprep.subr.bf16.mxu1 %v16366_v24  ;;  %11745 = vmatprep.subr.bf16.mxu0 %v16367_v37  ;;  %v16388_v24 = vld [vmem:[#allocation36_spill] sm:$0xff]  ;;  %v16389_v37 = vld [vmem:[#allocation110_spill] sm:$0xff] }
0x1a55   :  { %11683 = vmatpush1.bf16.msra.mxu1 %v16368_v15  ;;  %11747 = vmatpush3.bf16.msra.mxu0 %v16369_v45  ;;  %v16390_v15 = vld [vmem:[#allocation31_spill] sm:$0xff]  ;;  %v16391_v45 = vld [vmem:[#allocation38_spill] sm:$0xff] }
0x1a56   :  { %11685 = vmatprep.subr.bf16.mxu1 %v16370_v42  ;;  %11749 = vmatprep.subr.bf16.mxu0 %v16371_v27  ;;  %v16392_v42 = vld [vmem:[#allocation54_spill] sm:$0xff]  ;;  %v16393_v27 = vld [vmem:[#allocation45_spill] sm:$0xff] }
0x1a59   :  { %11687 = vmatpush1.bf16.msra.mxu1 %v16372_v21  ;;  %11751 = vmatpush3.bf16.msra.mxu0 %v16373_v16  ;;  %v16394_v21 = vld [vmem:[#allocation59_spill] sm:$0xff]  ;;  %v16395_v16 = vld [vmem:[#allocation60_spill] sm:$0xff] }
0x1a5a   :  { %11689 = vmatprep.subr.bf16.mxu1 %v16374_v35  ;;  %11753 = vmatprep.subr.bf16.mxu0 %v16375_v55  ;;  %v16396_v35 = vld [vmem:[#allocation44_spill] sm:$0xff] }
0x1a5b   :  { %v16397_v55 = vld [vmem:[#allocation56_spill] sm:$0xff] }
0x1a5d   :  { %11691 = vmatpush1.bf16.msra.mxu1 %v16376_v17  ;;  %11755 = vmatpush3.bf16.msra.mxu0 %v16377_v31  ;;  %v16398_v17 = vld [vmem:[#allocation57_spill] sm:$0xff] }
0x1a5e   :  { %11693 = vmatprep.subr.bf16.mxu1 %v16378_v0  ;;  %11757 = vmatprep.subr.bf16.mxu0 %v16379_v1  ;;  %v16399_v31 = vld [vmem:[#allocation85_spill] sm:$0xff]  ;;  %v16400_v0 = vld [vmem:[#allocation88_spill] sm:$0xff]  ;;  %v16401_v1 = vld [vmem:[#allocation90_spill] sm:$0xff] }
0x1a61   :  { %11695 = vmatpush1.bf16.msra.mxu1 %v16380_v59  ;;  %11759 = vmatpush3.bf16.msra.mxu0 %v16381_v22  ;;  %v16402_v59 = vld [vmem:[#allocation92_spill] sm:$0xff]  ;;  %v16403_v22 = vld [vmem:[#allocation94_spill] sm:$0xff] }
0x1a62   :  { %11697 = vmatprep.subr.bf16.mxu1 %v16382_v63  ;;  %11761 = vmatprep.subr.bf16.mxu0 %v16383_v9  ;;  %v16404_v63 = vld [vmem:[#allocation96_spill] sm:$0xff]  ;;  %v16405_v9 = vld [vmem:[#allocation98_spill] sm:$0xff] }
0x1a65   :  { %11699 = vmatpush1.bf16.msra.mxu1 %v16384_v38  ;;  %11763 = vmatpush3.bf16.msra.mxu0 %v16385_v53  ;;  %v16406_v38 = vld [vmem:[#allocation47_spill] sm:$0xff] }
0x1a66   :  { %11701 = vmatprep.subr.bf16.mxu1 %v16386_v23  ;;  %11765 = vmatprep.subr.bf16.mxu0 %v16387_v56 }
0x1a69   :  { %11703 = vmatpush1.bf16.msra.mxu1 %v16388_v24  ;;  %11767 = vmatpush3.bf16.msra.mxu0 %v16389_v37  ;;  %v16407_v24 = vld [vmem:[#allocation79_spill] sm:$0xff] }
0x1a6a   :  { %11705 = vmatprep.subr.bf16.mxu1 %v16390_v15  ;;  %11800 = vmatprep.subr.bf16.mxu0 %v15941_v34 }
0x1a6d   :  { %11707 = vmatpush1.bf16.msra.mxu1 %v16391_v45 }
0x1a6e   :  { %11709 = vmatprep.subr.bf16.mxu1 %v16392_v42  ;;  %v16408_v42 = vld [vmem:[#allocation80_spill] sm:$0xff] }
0x1a71   :  { %11711 = vmatpush1.bf16.msra.mxu1 %v16393_v27 }
0x1a72   :  { %11713 = vmatprep.subr.bf16.mxu1 %v16394_v21 }
0x1a75   :  { %11715 = vmatpush1.bf16.msra.mxu1 %v16395_v16 }
0x1a76   :  { %11717 = vmatprep.subr.bf16.mxu1 %v16396_v35 }
0x1a79   :  { %11719 = vmatpush1.bf16.msra.mxu1 %v16397_v55  ;;  %v16409_v55 = vld [vmem:[#allocation82_spill] sm:$0xff] }
0x1a7a   :  { %11721 = vmatprep.subr.bf16.mxu1 %v16398_v17 }
0x1a7d   :  { %11723 = vmatpush1.bf16.msra.mxu1 %v16399_v31 }
0x1a7e   :  { %11725 = vmatprep.subr.bf16.mxu1 %v16400_v0 }
0x1a81   :  { %11727 = vmatpush1.bf16.msra.mxu1 %v16401_v1 }
0x1a82   :  { %11729 = vmatprep.subr.bf16.mxu1 %v16402_v59 }
0x1a85   :  { %11731 = vmatpush1.bf16.msra.mxu1 %v16403_v22 }
0x1a86   :  { %11733 = vmatprep.subr.bf16.mxu1 %v16404_v63  ;;  %v15290_v63 = vld [vmem:[%s15428_s15] ss:$0 sm:$0xff] }
0x1a87   :  { %16410 = vst [vmem:[#allocation87_spill] sm:$0xff] %v15290_v63 }
0x1a89   :  { %11735 = vmatpush1.bf16.msra.mxu1 %v16405_v9 }
0x1a8a   :  { %11769 = vmatprep.subr.bf16.mxu1 %v16406_v38 }
0x1aff   :  { %v8624_v53 = vpop.f32.mrb[98].mxu0 }
0x1b00   :  { %v8625_v23 = vpop.f32.mrb[99].mxu0 }
0x1b01   :  { %v8626_v56 = vadd.f32 %v8625_v23, %v8624_v53 }
0x1b03   :  { %v7105_v37 = vadd.f32 %v8626_v56, %v16407_v24 }
0x1b1f   :  { %v7172_v15 = vpop.f32.mrb[12].mxu1  ;;  %v7243_v45 = vpop.f32.mrb[100].mxu0 }
0x1b20   :  { %v11888_v27 = vadd.f32 %v7172_v15, %v16408_v42  ;;  %v7174_v21 = vpop.f32.mrb[13].mxu1  ;;  %v9552_v16 = vpop.f32.mrb[101].mxu0  ;;  %v7261_v9 = vadd.f32 %v15290_v63, %v7243_v45 }
0x1b21   :  { %v11889_v17 = vadd.f32 %v7174_v21, %v16409_v55  ;;  %v16420_v55 = vld [vmem:[#allocation43_spill] sm:$0xff] }
0x1b22   :  { %v7987_v35 = vmul.f32 -1.442695, %v11888_v27 }
0x1b23   :  { %v7988_v31 = vmul.f32 -1.442695, %v11889_v17 }
0x1b24   :  { %12304 = vpow2.f32 %v7987_v35  ;;  %v12354_v35 = vld [vmem:[%s15421_s8] ss:$0 sm:$0xff] }
0x1b25   :  { %12306 = vpow2.f32 %v7988_v31  ;;  %v16412_v31 = vld [vmem:[#allocation34_spill] sm:$0xff] }
0x1b2e   :  { %v12305_v0 = vpop.eup %12304 }
0x1b2f   :  { %v7251_v1 = vadd.f32 1.0, %v12305_v0  ;;  %v12307_v59 = vpop.eup %12306 }
0x1b30   :  { %v7258_v22 = vadd.f32 1.0, %v12307_v59  ;;  %v16414_v59 = vld [vmem:[#allocation81_spill] sm:$0xff] }
0x1b31   :  { %12308 = vrcp.f32 %v7251_v1 }
0x1b32   :  { %12310 = vrcp.f32 %v7258_v22 }
0x1b3b   :  { %v12309_v38 = vpop.eup %12308 }
0x1b3c   :  { %v7262_v53 = vmul.f32 %v12309_v38, %v7261_v9  ;;  %v12311_v56 = vpop.eup %12310  ;;  %v16415_v9 = vld [vmem:[#allocation39_spill] sm:$0xff] }
0x1b3d   :  { %v7265_v24 = vsub.f32 1.0, %v12311_v56  ;;  %v7267_v27 = vmul.f32 %v12311_v56, %v16359_v2  ;;  %v16417_v56 = vld [vmem:[#allocation33_spill] sm:$0xff] }
0x1b3e   :  { %v7263_v23 = vadd.f32 %v7262_v53, %v7105_v37  ;;  %v16413_v37 = vld [vmem:[#allocation40_spill] sm:$0xff]  ;;  %v16416_v53 = vld [vmem:[#allocation37_spill] sm:$0xff] }
0x1b40   :  { %12312 = vtanh.f32 %v7263_v23 }
0x1b4a   :  { %v12313_v15 = vpop.eup %12312 }
0x1b4b   :  { %v7266_v21 = vmul.f32 %v12313_v15, %v7265_v24  ;;  %v16418_v15 = vld [vmem:[#allocation32_spill] sm:$0xff] }
0x1b4d   :  { %v15294_v16 = vadd.f32 %v7267_v27, %v7266_v21  ;;  %v16419_v21 = vld [vmem:[#allocation67_spill] sm:$0xff] }
0x1b4f   :  { %16411 = vst [vmem:[#allocation77_spill] sm:$0xff] %v15294_v16  ;;  %v7270_v17 = vmul.f32 %v12354_v35, %v15294_v16 }
0x1b51   :  { %7271 = vadd.xlane.f32.xlu1 %v7270_v17 }
0x1bde   :  { %v7272_v45 = vpop.xlane.xlu1 %7271 }
0x1bdf   :  { %v7273_v0 = vadd.f32 %v7272_v45, %v16412_v31  ;;  %v7274_v1 = vadd.f32 %v7272_v45, %v16413_v37  ;;  %v7275_v22 = vadd.f32 %v7272_v45, %v16414_v59  ;;  %v7276_v38 = vadd.f32 %v7272_v45, %v16415_v9 }
0x1be0   :  { %v7277_v23 = vadd.f32 %v7272_v45, %v16416_v53  ;;  %v7278_v24 = vadd.f32 %v7272_v45, %v16417_v56  ;;  %v7279_v27 = vadd.f32 %v7272_v45, %v16418_v15  ;;  %v7280_v63 = vadd.f32 %v7272_v45, %v16419_v21 }
0x1be1   :  { %v7281_v35 = vadd.f32 %v16420_v55, %v7273_v0  ;;  %v7282_v17 = vadd.f32 %v16420_v55, %v7274_v1  ;;  %v7283_v31 = vadd.f32 %v16420_v55, %v7275_v22  ;;  %v7284_v37 = vadd.f32 %v16420_v55, %v7276_v38 }
0x1be2   :  { %v7285_v59 = vadd.f32 %v16420_v55, %v7277_v23  ;;  %v7286_v9 = vadd.f32 %v16420_v55, %v7278_v24  ;;  %v7287_v53 = vadd.f32 %v16420_v55, %v7279_v27  ;;  %v7288_v56 = vadd.f32 %v16420_v55, %v7280_v63 }
0x1be3   :  { %v7289_v15 = vsel %vm4041_vm2, %v7281_v35, -inf  ;;  %v7290_v45 = vsel %vm4041_vm2, %v7282_v17, -inf  ;;  %v7291_v0 = vsel %vm4041_vm2, %v7283_v31, -inf  ;;  %v7292_v1 = vsel %vm4041_vm2, %v7284_v37, -inf }
0x1be4   :  { %v7293_v22 = vsel %vm4041_vm2, %v7285_v59, -inf  ;;  %v7295_v38 = vsel %vm4041_vm2, %v7286_v9, -inf  ;;  %v7297_v23 = vsel %vm4041_vm2, %v7287_v53, -inf  ;;  %v7299_v24 = vsel %vm4041_vm2, %v7288_v56, -inf }
0x1be5   :  { %v7294_v21 = vmax.f32 %v7289_v15, %v7293_v22  ;;  %v7296_v27 = vmax.f32 %v7290_v45, %v7295_v38  ;;  %v7298_v42 = vmax.f32 %v7291_v0, %v7297_v23  ;;  %v7300_v55 = vmax.f32 %v7292_v1, %v7299_v24 }
0x1be7   :  { %v7301_v63 = vmax.f32 %v7294_v21, %v7296_v27  ;;  %v7302_v2 = vmax.f32 %v7298_v42, %v7300_v55 }
0x1be9   :  { %v7303_v16 = vmax.f32 %v7301_v63, %v7302_v2 }
0x1beb   :  { %v7304_v8 = vsub.f32 %v7281_v35, %v7303_v16  ;;  %v7305_v39 = vsub.f32 %v7282_v17, %v7303_v16  ;;  %v7306_v25 = vsub.f32 %v7283_v31, %v7303_v16  ;;  %v7307_v36 = vsub.f32 %v7284_v37, %v7303_v16 }
0x1bec   :  { %v7308_v57 = vsub.f32 %v7285_v59, %v7303_v16  ;;  %v7309_v13 = vsub.f32 %v7286_v9, %v7303_v16  ;;  %v7310_v28 = vsub.f32 %v7287_v53, %v7303_v16  ;;  %v7311_v45 = vsub.f32 %v7288_v56, %v7303_v16 }
0x1bed   :  { %v7312_v61 = vmul.f32 1.442695, %v7304_v8  ;;  %v7314_v48 = vmul.f32 1.442695, %v7305_v39  ;;  %v7316_v52 = vmul.f32 1.442695, %v7306_v25 }
0x1bee   :  { %v7318_v46 = vmul.f32 1.442695, %v7307_v36  ;;  %v7320_v15 = vmul.f32 1.442695, %v7308_v57  ;;  %v7322_v0 = vmul.f32 1.442695, %v7309_v13 }
0x1bef   :  { %12314 = vpow2.f32 %v7312_v61  ;;  %v7324_v2 = vmul.f32 1.442695, %v7310_v28  ;;  %v7326_v42 = vmul.f32 1.442695, %v7311_v45 }
0x1bf0   :  { %12316 = vpow2.f32 %v7314_v48 }
0x1bf1   :  { %12318 = vpow2.f32 %v7316_v52 }
0x1bf2   :  { %12320 = vpow2.f32 %v7318_v46 }
0x1bf3   :  { %12322 = vpow2.f32 %v7320_v15 }
0x1bf4   :  { %12324 = vpow2.f32 %v7322_v0 }
0x1bf5   :  { %12326 = vpow2.f32 %v7324_v2 }
0x1bf6   :  { %12328 = vpow2.f32 %v7326_v42 }
0x1bf9   :  { %v12315_v35 = vpop.eup %12314 }
0x1bfa   :  { %v12317_v17 = vpop.eup %12316  ;;  %v7328_v25 = vsel %vm4041_vm2, %v12315_v35, 0.0 }
0x1bfb   :  { %v12319_v39 = vpop.eup %12318  ;;  %v7329_v61 = vsel %vm4041_vm2, %v12317_v17, 0.0 }
0x1bfc   :  { %v12321_v36 = vpop.eup %12320  ;;  %v7330_v48 = vadd.f32 %v7329_v61, %v7328_v25  ;;  %v7331_v52 = vsel %vm4041_vm2, %v12319_v39, 0.0 }
0x1bfd   :  { %v12323_v57 = vpop.eup %12322  ;;  %v7333_v13 = vsel %vm4041_vm2, %v12321_v36, 0.0 }
0x1bfe   :  { %v7332_v46 = vadd.f32 %v7331_v52, %v7330_v48  ;;  %v12325_v28 = vpop.eup %12324  ;;  %v7335_v16 = vsel %vm4041_vm2, %v12323_v57, 0.0 }
0x1bff   :  { %v12327_v31 = vpop.eup %12326  ;;  %v7337_v59 = vsel %vm4041_vm2, %v12325_v28, 0.0 }
0x1c00   :  { %v7334_v8 = vadd.f32 %v7333_v13, %v7332_v46  ;;  %v12329_v9 = vpop.eup %12328  ;;  %v7339_v56 = vsel %vm4041_vm2, %v12327_v31, 0.0 }
0x1c01   :  { %v7341_v22 = vsel %vm4041_vm2, %v12329_v9, 0.0 }
0x1c02   :  { %v7336_v37 = vadd.f32 %v7335_v16, %v7334_v8 }
0x1c04   :  { %v7338_v53 = vadd.f32 %v7337_v59, %v7336_v37 }
0x1c06   :  { %v7340_v1 = vadd.f32 %v7339_v56, %v7338_v53 }
0x1c08   :  { %v7342_v38 = vadd.f32 %v7341_v22, %v7340_v1 }
0x1c0a   :  { %12330 = vrcp.f32 %v7342_v38 }
0x1c14   :  { %v12331_v23 = vpop.eup %12330 }
0x1c15   :  { %v7351_v24 = vmul.f32 %v12331_v23, %v12329_v9  ;;  %v7344_v21 = vmul.f32 %v12331_v23, %v12315_v35  ;;  %v7345_v27 = vmul.f32 %v12331_v23, %v12317_v17  ;;  %v7346_v55 = vmul.f32 %v12331_v23, %v12319_v39 }
0x1c16   :  { %v7347_v63 = vmul.f32 %v12331_v23, %v12321_v36  ;;  %v7348_v15 = vmul.f32 %v12331_v23, %v12323_v57  ;;  %v7349_v45 = vmul.f32 %v12331_v23, %v12325_v28  ;;  %v7350_v0 = vmul.f32 %v12331_v23, %v12327_v31 }
0x1c17   :  { %7389 = vperm.xlu1 %11956, %v7351_v24   ;;  %7354 = vperm.xlu0 %11957, %v7344_v21   ;;  %v7746_v21 = vld [vmem:[#allocation22 + $0x28] sm:$0xff] }
0x1c1b   :  { %7359 = vperm.xlu0 %11957, %v7345_v27   ;;  %v16432_v27 = vld [vmem:[#allocation77_spill] sm:$0xff] }
0x1c1f   :  { %7364 = vperm.xlu0 %11957, %v7346_v55   ;;  %v16433_v55 = vld [vmem:[#allocation42_spill] sm:$0xff] }
0x1c23   :  { %7369 = vperm.xlu0 %11957, %v7347_v63   ;;  %v7747_v63 = vld [vmem:[#allocation22 + $0x30] sm:$0xff] }
0x1c27   :  { %7374 = vperm.xlu0 %11957, %v7348_v15   ;;  %v7748_v15 = vld [vmem:[#allocation22 + $0x38] sm:$0xff] }
0x1c2b   :  { %7379 = vperm.xlu0 %11957, %v7349_v45   ;;  %v11836_v45 = vpack.c.bf16 %v7748_v15, %v7747_v63 }
0x1c2f   :  { %7384 = vperm.xlu0 %11957, %v7350_v0   ;;  %v7749_v0 = vld [vmem:[#allocation22 + $0x40] sm:$0xff] }
0x1c96   :  { %v7355_v2 = vpop.permute.xlu0 %7354  ;;  %v7390_v53 = vpop.permute.xlu1 %7389 }
0x1c97   :  { %v7392_v17 = vmul.f32 %v7355_v2, %v15866_v14  ;;  %v7393_v39 = vmul.f32 %v7355_v2, %v14006_v4  ;;  %v7750_v2 = vld [vmem:[#allocation22 + $0x48] sm:$0xff] }
0x1c9a   :  { %v7360_v42 = vpop.permute.xlu0 %7359 }
0x1c9b   :  { %v7394_v35 = vmul.f32 %v7360_v42, %v15859_v33  ;;  %v7395_v48 = vmul.f32 %v7360_v42, %v13981_v30  ;;  %v11840_v42 = vpack.c.bf16 %v7750_v2, %v7749_v0 }
0x1c9d   :  { %v7408_v46 = vadd.f32 %v7394_v35, %v7392_v17  ;;  %v7415_v13 = vadd.f32 %v7395_v48, %v7393_v39  ;;  %v7753_v48 = vld [vmem:[#allocation22 + $0x60] sm:$0xff]  ;;  %v7754_v17 = vld [vmem:[#allocation22 + $0x68] sm:$0xff] }
0x1c9e   :  { %v7365_v25 = vpop.permute.xlu0 %7364  ;;  %v11848_v39 = vpack.c.bf16 %v7754_v17, %v7753_v48 }
0x1c9f   :  { %v7396_v36 = vmul.f32 %v7365_v25, %v15838_v49  ;;  %v7397_v52 = vmul.f32 %v7365_v25, %v13885_v19  ;;  %v7751_v25 = vld [vmem:[#allocation22 + $0x50] sm:$0xff] }
0x1ca1   :  { %v7409_v16 = vadd.f32 %v7408_v46, %v7396_v36  ;;  %v7416_v31 = vadd.f32 %v7415_v13, %v7397_v52  ;;  %v7755_v36 = vld [vmem:[#allocation22 + $0x70] sm:$0xff]  ;;  %v7756_v52 = vld [vmem:[#allocation22 + $0x78] sm:$0xff]  ;;  %v16435_v13 = vld [vmem:[#allocation58_spill] sm:$0xff] }
0x1ca2   :  { %v7370_v61 = vpop.permute.xlu0 %7369  ;;  %v16434_v46 = vld [vmem:[#allocation73_spill] sm:$0xff] }
0x1ca3   :  { %v7398_v28 = vmul.f32 %v7370_v61, %v15920_v50  ;;  %v7399_v8 = vmul.f32 %v7370_v61, %v13784_v7  ;;  %v7752_v61 = vld [vmem:[#allocation22 + $0x58] sm:$0xff] }
0x1ca4   :  { %v11844_v35 = vpack.c.bf16 %v7752_v61, %v7751_v25 }
0x1ca5   :  { %v7410_v37 = vadd.f32 %v7409_v16, %v7398_v28  ;;  %v7417_v4 = vadd.f32 %v7416_v31, %v7399_v8  ;;  %v16436_v28 = vld [vmem:[#allocation72_spill] sm:$0xff]  ;;  %v16437_v8 = vld [vmem:[#allocation75_spill] sm:$0xff]  ;;  %v16438_v16 = vld [vmem:[#allocation74_spill] sm:$0xff] }
0x1ca6   :  { %v7375_v57 = vpop.permute.xlu0 %7374 }
0x1ca7   :  { %v7400_v33 = vmul.f32 %v7375_v57, %v13729_v3  ;;  %v7401_v30 = vmul.f32 %v7375_v57, %v15921_v58  ;;  %v7406_v3 = vmul.f32 %v7390_v53, %v15924_v26  ;;  %v7407_v58 = vmul.f32 %v7390_v53, %v15925_v60  ;;  %v16428_v26 = vld [vmem:[#allocation113_spill] sm:$0xff]  ;;  %v16429_v60 = vld [vmem:[#allocation99_spill] sm:$0xff] }
0x1ca8   :  { %v11852_v57 = vpack.c.bf16 %v7756_v52, %v7755_v36 }
0x1ca9   :  { %v7411_v59 = vadd.f32 %v7410_v37, %v7400_v33  ;;  %v7418_v9 = vadd.f32 %v7417_v4, %v7401_v30 }
0x1caa   :  { %v7380_v14 = vpop.permute.xlu0 %7379 }
0x1cab   :  { %v7402_v49 = vmul.f32 %v7380_v14, %v13841_v18  ;;  %v7403_v19 = vmul.f32 %v7380_v14, %v15836_v41  ;;  %v16422_v41 = vld [vmem:[#allocation111_spill] sm:$0xff]  ;;  %v16439_v14 = vld [vmem:[#allocation78_spill] sm:$0xff] }
0x1cad   :  { %v7412_v50 = vadd.f32 %v7411_v59, %v7402_v49  ;;  %v7419_v1 = vadd.f32 %v7418_v9, %v7403_v19  ;;  %v16440_v19 = vld [vmem:[#allocation80_spill] sm:$0xff] }
0x1cae   :  { %v7385_v56 = vpop.permute.xlu0 %7384 }
0x1caf   :  { %v7404_v7 = vmul.f32 %v7385_v56, %v15922_v5  ;;  %v7405_v22 = vmul.f32 %v7385_v56, %v15923_v43  ;;  %v16423_v43 = vld [vmem:[#allocation91_spill] sm:$0xff]  ;;  %v16427_v5 = vld [vmem:[#allocation97_spill] sm:$0xff] }
0x1cb1   :  { %v7413_v38 = vadd.f32 %v7412_v50, %v7404_v7  ;;  %v7420_v23 = vadd.f32 %v7419_v1, %v7405_v22  ;;  %v16441_v50 = vld [vmem:[#allocation82_spill] sm:$0xff] }
0x1cb3   :  { %v7414_v24 = vadd.f32 %v7413_v38, %v7406_v3  ;;  %v7421_v18 = vadd.f32 %v7420_v23, %v7407_v58  ;;  %v16442_v23 = vld [vmem:[#allocation87_spill] sm:$0xff] }
0x1cb5   :  { %7489 = vmatprep.mubr.f32.mxu1 %v7421_v18  ;;  %7560 = vmatprep.mubr.f32.mxu0 %v7421_v18 }
0x1cb6   :  { %7490 = vmatmul.mubr.f32.vlgmr.msra.gmra.mrb[14].mxu1 %v7414_v24  ;;  %7561 = vmatmul.mubr.f32.vlgmr.msra.gmra.mrb[102].mxu0 %v7414_v24 }
0x1cb7   :  { %11771 = vmatpush1.bf16.msra.mxu1 %v14138_v54  ;;  %11802 = vmatpush3.bf16.msra.mxu0 %v14332_v47  ;;  %v16424_v54 = vld [vmem:[#allocation93_spill] sm:$0xff] }
0x1cb8   :  { %11773 = vmatprep.subr.bf16.mxu1 %v14143_v51  ;;  %11803 = vmatprep.subr.bf16.mxu0 %v15941_v34  ;;  %v16425_v51 = vld [vmem:[#allocation112_spill] sm:$0xff] }
0x1cb9   :  { %7633 = vmatprep.mubr.f32.mxu1 %v15752_v40  ;;  %9585 = vmatprep.mubr.msk.f32.mxu0 %vm12604_vm1, %v15752_v40  ;;  %v16421_v40 = vld [vmem:[#allocation89_spill] sm:$0xff] }
0x1cbb   :  { %11775 = vmatpush1.bf16.msra.mxu1 %v14151_v62  ;;  %11805 = vmatpush3.bf16.msra.mxu0 %v14337_v20  ;;  %v16426_v62 = vld [vmem:[#allocation95_spill] sm:$0xff]  ;;  %v7743_v20 = vld [vmem:[#allocation22 + $0x10] sm:$0xff] }
0x1cbc   :  { %11777 = vmatprep.subr.bf16.mxu1 %v14156_v11  ;;  %11806 = vmatprep.subr.bf16.mxu0 %v15941_v34  ;;  %v7741_v11 = vld [vmem:[#allocation22] sm:$0xff] }
0x1cbf   :  { %11779 = vmatpush1.bf16.msra.mxu1 %v14164_v29  ;;  %11808 = vmatpush3.bf16.msra.mxu0 %v14343_v10  ;;  %v7742_v29 = vld [vmem:[#allocation22 + $0x8] sm:$0xff]  ;;  %v7744_v10 = vld [vmem:[#allocation22 + $0x18] sm:$0xff] }
0x1cc0   :  { %11781 = vmatprep.subr.bf16.mxu1 %v15966_v6  ;;  %11809 = vmatprep.subr.bf16.mxu0 %v15941_v34  ;;  %v11824_v47 = vpack.c.bf16 %v7742_v29, %v7741_v11  ;;  %v16431_v6 = vld [vmem:[#allocation114_spill] sm:$0xff] }
0x1cc3   :  { %11783 = vmatpush1.bf16.msra.mxu1 %v15967_v12  ;;  %11811 = vmatpush3.bf16.msra.mxu0 %v14347_v44  ;;  %v16430_v44 = vld [vmem:[#allocation101_spill] sm:$0xff]  ;;  %v11828_v12 = vpack.c.bf16 %v7744_v10, %v7743_v20 }
0x1cc4   :  { %11785 = vmatprep.subr.bf16.mxu1 %v15968_v32  ;;  %11812 = vmatprep.subr.bf16.mxu0 %v15941_v34  ;;  %v7745_v32 = vld [vmem:[#allocation22 + $0x20] sm:$0xff] }
0x1cc7   :  { %11787 = vmatpush1.bf16.msra.mxu1 %v16421_v40  ;;  %11814 = vmatpush3.bf16.msra.mxu0 %v16422_v41  ;;  %v7991_v41 = vld [vmem:[%s15430_s17] ss:$0 sm:$0xff]  ;;  %s12606_s17 = smov [#allocation23]  }
0x1cc8   :  { %11789 = vmatprep.subr.bf16.mxu1 %v16423_v43  ;;  %11815 = vmatprep.subr.bf16.mxu0 %v15941_v34  ;;  %s7882_s22 = sshll.u32 %s12606_s17, 4  ;;  %s7883_s22 = int_to_ptr.vmem [resolvable:$true] %s7882_s22 }
0x1cc9   :  { %s12553_s9 = scalar_lea.vmem %s7883_s22, 1024  ;;  %p12558_p3 = scmp.lt.s32.totalorder %s7883_s22, %s7883_s22 }
0x1cca   :  { %p12554_p2 = scmp.ne.s32.totalorder %s7883_s22, %s12553_s9  ;;  %p12559_p4 = scmp.lt.s32.totalorder %s12553_s9, %s12553_s9 }
0x1ccb   :  { %11791 = vmatpush1.bf16.msra.mxu1 %v16424_v54  ;;  %11817 = vmatpush3.bf16.msra.mxu0 %v16425_v51 }
0x1ccc   :  { %11793 = vmatprep.subr.bf16.mxu1 %v16426_v62  ;;  %11818 = vmatprep.subr.bf16.mxu0 %v15941_v34  ;;  %p12560_p5 = por %p12559_p4, %p12558_p3 }
0x1cce   :  { %p12561_p6 = pnand %p12560_p5, %p12554_p2 }
0x1ccf   :  { %11795 = vmatpush1.bf16.msra.mxu1 %v16427_v5  ;;  %11820 = vmatpush3.bf16.msra.mxu0 %v16428_v26 }
0x1cd0   :  { %11797 = vmatprep.subr.bf16.mxu1 %v16429_v60  ;;  %11821 = vmatprep.subr.bf16.mxu0 %v15941_v34  ;;  %v11832_v34 = vpack.c.bf16 %v7746_v21, %v7745_v32 }
0x1cd3   :  { %11799 = vmatpush1.bf16.msra.mxu1 %v16430_v44  ;;  %11823 = vmatpush3.bf16.msra.mxu0 %v16431_v6 }
0x1cd4   :  { %11825 = vmatprep.subr.bf16.mxu0 %v11824_v47 }
0x1cd6   :  { %7634 = vmatmul.mubr.f32.vlgmr.msra.gmra.mrb[14].mxu1 %v16432_v27  ;;  %9586 = vmatmul.mubr.f32.vlgmr.msra.gmra.mrb[104].mxu0 %v16432_v27 }
0x1cd7   :  { %11827 = vmatpush3.bf16.msra.mxu0 %v11824_v47  ;;  %9620 = vmatprep.mubr.f32.mxu0 %v16433_v55 }
0x1cd8   :  { %11829 = vmatprep.subr.bf16.mxu0 %v11828_v12 }
0x1cdb   :  { %11831 = vmatpush3.bf16.msra.mxu0 %v11828_v12 }
0x1cdc   :  { %11833 = vmatprep.subr.bf16.mxu0 %v11832_v34 }
0x1cdf   :  { %11835 = vmatpush3.bf16.msra.mxu0 %v11832_v34 }
0x1ce0   :  { %11837 = vmatprep.subr.bf16.mxu0 %v11836_v45 }
0x1ce3   :  { %11839 = vmatpush3.bf16.msra.mxu0 %v11836_v45 }
0x1ce4   :  { %11841 = vmatprep.subr.bf16.mxu0 %v11840_v42 }
0x1ce7   :  { %11843 = vmatpush3.bf16.msra.mxu0 %v11840_v42 }
0x1ce8   :  { %11845 = vmatprep.subr.bf16.mxu0 %v11844_v35 }
0x1ceb   :  { %11847 = vmatpush3.bf16.msra.mxu0 %v11844_v35 }
0x1cec   :  { %11849 = vmatprep.subr.bf16.mxu0 %v11848_v39 }
0x1cef   :  { %11851 = vmatpush3.bf16.msra.mxu0 %v11848_v39 }
0x1cf0   :  { %11853 = vmatprep.subr.bf16.mxu0 %v11852_v57 }
0x1cf3   :  { %11855 = vmatpush3.bf16.msra.mxu0 %v11852_v57 }
0x1cf6   :  { %9621 = vmatmul.mubr.f32.vlgmr.msra.gmra.mrb[106].mxu0 %v16434_v46 }
0x1cf7   :  { %9623 = vmatprep.mubr.f32.mxu0 %v16435_v13 }
0x1cfa   :  { %9624 = vmatmul.mubr.f32.gmra.mrb[108].mxu0 %v16436_v28 }
0x1cfb   :  { %9626 = vmatprep.mubr.f32.mxu0 %v16437_v8 }
0x1cfe   :  { %9627 = vmatmul.mubr.f32.gmra.mrb[110].mxu0 %v16438_v16 }
0x1cff   :  { %9629 = vmatprep.mubr.f32.mxu0 %v16432_v27 }
0x1d89   :  { %v8676_v31 = vpop.f32.mrb[102].mxu0 }
0x1d8a   :  { %v8677_v33 = vpop.f32.mrb[103].mxu0 }
0x1d8b   :  { %v8678_v30 = vadd.f32 %v8677_v33, %v8676_v31 }
0x1d8d   :  { %v7568_v37 = vadd.f32 %v8678_v30, %v16439_v14 }
0x1da9   :  { %v7635_v4 = vpop.f32.mrb[14].mxu1  ;;  %v7706_v49 = vpop.f32.mrb[104].mxu0 }
0x1daa   :  { %v11890_v59 = vadd.f32 %v7635_v4, %v16440_v19  ;;  %v7637_v9 = vpop.f32.mrb[15].mxu1  ;;  %v9587_v53 = vpop.f32.mrb[105].mxu0  ;;  %v7724_v24 = vadd.f32 %v16442_v23, %v7706_v49 }
0x1dab   :  { %v11891_v1 = vadd.f32 %v7637_v9, %v16441_v50 }
0x1dac   :  { %v7989_v56 = vmul.f32 -1.442695, %v11890_v59 }
0x1dad   :  { %v7990_v7 = vmul.f32 -1.442695, %v11891_v1 }
0x1dae   :  { %12332 = vpow2.f32 %v7989_v56 }
0x1daf   :  { %12334 = vpow2.f32 %v7990_v7 }
0x1db8   :  { %v12333_v22 = vpop.eup %12332 }
0x1db9   :  { %v7714_v3 = vadd.f32 1.0, %v12333_v22  ;;  %v12335_v58 = vpop.eup %12334 }
0x1dba   :  { %v7721_v38 = vadd.f32 1.0, %v12335_v58 }
0x1dbb   :  { %12336 = vrcp.f32 %v7714_v3 }
0x1dbc   :  { %12338 = vrcp.f32 %v7721_v38 }
0x1dc5   :  { %v12337_v18 = vpop.eup %12336 }
0x1dc6   :  { %v7725_v40 = vmul.f32 %v12337_v18, %v7724_v24  ;;  %v12339_v47 = vpop.eup %12338 }
0x1dc7   :  { %v7728_v12 = vsub.f32 1.0, %v12339_v47  ;;  %v7730_v55 = vmul.f32 %v12339_v47, %v16432_v27 }
0x1dc8   :  { %v7726_v43 = vadd.f32 %v7725_v40, %v7568_v37 }
0x1dc9   :  { %v9622_v54 = vpop.f32.mrb[106].mxu0 }
0x1dca   :  { %12340 = vtanh.f32 %v7726_v43  ;;  %v7836_v51 = vadd.f32 %v9622_v54, %v7991_v41  ;;  %v7830_v62 = vpop.f32.mrb[107].mxu0 }
0x1dcb   :  { %v7831_v11 = vadd.f32 %v7991_v41, %v7830_v62 }
0x1dcc   :  { %7870 = vst [vmem:[#allocation23 + $0x8] sm:$0xff] %v7836_v51 }
0x1dcd   :  { %7869 = vst [vmem:[#allocation23] sm:$0xff] %v7831_v11  ;;  %v9625_v29 = vpop.f32.mrb[108].mxu0 }
0x1dce   :  { %v7846_v5 = vadd.f32 %v9625_v29, %v7991_v41  ;;  %v7840_v26 = vpop.f32.mrb[109].mxu0 }
0x1dcf   :  { %v7841_v60 = vadd.f32 %v7991_v41, %v7840_v26 }
0x1dd0   :  { %7872 = vst [vmem:[#allocation23 + $0x18] sm:$0xff] %v7846_v5 }
0x1dd1   :  { %7871 = vst [vmem:[#allocation23 + $0x10] sm:$0xff] %v7841_v60  ;;  %v9628_v20 = vpop.f32.mrb[110].mxu0 }
0x1dd2   :  { %v7856_v10 = vadd.f32 %v9628_v20, %v7991_v41  ;;  %v7850_v44 = vpop.f32.mrb[111].mxu0 }
0x1dd3   :  { %v7851_v6 = vadd.f32 %v7991_v41, %v7850_v44 }
0x1dd4   :  { %v12341_v32 = vpop.eup %12340  ;;  %7874 = vst [vmem:[#allocation23 + $0x28] sm:$0xff] %v7856_v10 }
0x1dd5   :  { %7873 = vst [vmem:[#allocation23 + $0x20] sm:$0xff] %v7851_v6  ;;  %v7729_v21 = vmul.f32 %v12341_v32, %v7728_v12 }
0x1dd7   :  { %v7731_v34 = vadd.f32 %v7730_v55, %v7729_v21 }
0x1dd9   :  { %9630 = vmatmul.mubr.f32.gmra.mrb[112].mxu0 %v7731_v34 }
0x1eac   :  { %v9631_v63 = vpop.f32.mrb[112].mxu0 }
0x1ead   :  { %v7866_v15 = vadd.f32 %v9631_v63, %v7991_v41  ;;  %v7860_v45 = vpop.f32.mrb[113].mxu0 }
0x1eae   :  { %v7861_v0 = vadd.f32 %v7991_v41, %v7860_v45 }
0x1eaf   :  { %7876 = vst [vmem:[#allocation23 + $0x38] sm:$0xff] %v7866_v15 }
0x1eb0   :  { %7875 = vst [vmem:[#allocation23 + $0x30] sm:$0xff] %v7861_v0 }
0x1eb1   :  { %12564 = shalt.err (!%p12561_p6)
}
0x1eb2   :  { %s12565_s19 = scalar_lea.hbm %s15431_s18, 1024 }
0x1eb3   :  { %p12566_p7 = scmp.ne.s32.totalorder %s15431_s18, %s12565_s19  ;;  %p12569_p8 = scmp.lt.u32.totalorder %s12565_s19, %s15431_s18 }
0x1eb5   :  { %p12571_p9 = pnand %p12569_p8, %p12566_p7 }
0x1eb7   :  { %12574 = shalt.err (!%p12571_p9)
}
0x1eb8   :  { %7888 = dma.vmem_to_hbm [thread:$0]  %s7883_s22, 1024, %s15431_s18, [#allocation10], %s15690_s10, %s15690_s10, %s15689_s20  }
0x1eb9   :  { %12585 = dma.done.wait [#allocation10], 1024  }
0x1eba   :  { %12586 = vsyncadd [#allocation10], 4294966272 }
0x1ebb   :  { %7892 = vsyncpa [#allocation9], 1 }
0x1ebc   :  { %7893 = vsyncpa [#allocation12], 1 }
0x1ebd   :  { %7894 = vsyncpa [#allocation15], 1 }
0x1ebe   :  { %7895 = vsyncpa [#allocation18], 1 }
0x1ebf   :  { %7896 = vsyncpa [#allocation21], 1 }
0x1ec0   :  { %7897 = vsyncpa [#allocation10], 1 }

</bundles_post_ra>
